<compile_context>
chip_gen: v7x
topology: tpu7x:2x2x1
jax: 0.10.0
libtpu: 0.0.40
codegen_flags: <defaults>
</compile_context>

<pallas_src>
import functools

import jax
import jax.numpy as jnp
from jax.experimental import pallas as pl
from jax.experimental.pallas import tpu as pltpu

SQRT_2_INV = 0.7071067811865476
LN_EPS = 1e-5

BLOCK_PARAM_NAMES = [
    "ln1_w", "ln1_b", "qkv_w", "qkv_b", "proj_w", "proj_b",
    "ln2_w", "ln2_b", "fc1_w", "fc1_b", "fc2_w", "fc2_b",
]


# ---------------------------------------------------------------------------
# In-kernel helpers
# ---------------------------------------------------------------------------
def _layernorm(z, w, b):
    # PyTorch nn.LayerNorm (biased variance, eps=1e-5), normalized over last dim.
    mu = jnp.mean(z, axis=-1, keepdims=True)
    var = jnp.mean((z - mu) ** 2, axis=-1, keepdims=True)
    return (z - mu) * jax.lax.rsqrt(var + LN_EPS) * w + b


# ---------------------------------------------------------------------------
# Kernels
# ---------------------------------------------------------------------------
def embed_seq_kernel(p_ref, w_ref, b_ref, pos_ref, prefix_ref, mod_ref, o_ref):
    # One sequence per grid step.
    #   p_ref:      (1, Np, K)  im2col patches (bf16, pre-cast outside)
    #   w_ref:      (K, D)      patch-proj weight (bf16)
    #   b_ref:      (1, D)      patch-proj bias (f32)
    #   pos_ref:    (Np, D)     positional embedding for patch tokens (f32)
    #   prefix_ref: (1+R, D)    [global_token ; register_token + register_pos] (f32)
    #   mod_ref:    (1, D)      modality token (added to ALL tokens, incl. prefix)
    #   o_ref:      (1, 1+R+Np, D) bf16
    emb = jnp.dot(p_ref[0], w_ref[...], preferred_element_type=jnp.float32)
    emb = emb + b_ref[...] + pos_ref[...] + mod_ref[...]
    pre = prefix_ref[...] + mod_ref[...]
    # Assemble the full sequence in registers, single full-tile store.
    o_ref[0, :, :] = jnp.concatenate([pre, emb], axis=0).astype(o_ref.dtype)


def stack_block_kernel(x_ref,
                       ln1w, ln1b, qkvw, qkvb, projw, projb,
                       ln2w, ln2b, fc1w, fc1b, fc2w, fc2b,
                       o_ref, xs_ref, *, num_heads, batch, seq_len):
    # grid = (num_layers,), "arbitrary".  Layer l's weights arrive as (1, ., .)
    # blocks (pipelined DMA: layer l+1 weights prefetch while layer l computes).
    # The evolving sequence lives flattened (B*N, D) in the f32 scratch xs_ref;
    # the bf16 HBM output is written only at the last layer.
    l = pl.program_id(0)

    @pl.when(l == 0)
    def _():
        xs_ref[...] = x_ref[...].astype(jnp.float32)

    BN, D = x_ref.shape
    H = num_heads
    hd = D // H
    N = seq_len
    scale = float(hd) ** -0.5

    w_qkv = qkvw[0]      # (D, 3D)  bf16
    b_qkv = qkvb[0]      # (1, 3D)  f32
    w_proj = projw[0]    # (D, D)   bf16
    b_proj = projb[0]    # (1, D)   f32
    w1, b1 = fc1w[0], fc1b[0]
    w2, b2 = fc2w[0], fc2b[0]
    g1w, g1b = ln1w[0], ln1b[0]
    g2w, g2b = ln2w[0], ln2b[0]

    x = xs_ref[...]                                           # (BN, D) f32

    # ---- Attention branch: x + Attn(LN1(x)) ----
    h = _layernorm(x, g1w, g1b)
    qkv = jnp.dot(h.astype(jnp.bfloat16), w_qkv,
                  preferred_element_type=jnp.float32) + b_qkv     # (BN, 3D)

    per_seq = []
    for b in range(batch):                    # static unroll (only small (N,N) work)
        qkv_b = qkv[b * N:(b + 1) * N]                        # (N, 3D)
        heads = []
        for hh in range(H):
            q = (qkv_b[:, hh * hd:(hh + 1) * hd] * scale).astype(jnp.bfloat16)
            k = qkv_b[:, D + hh * hd:D + (hh + 1) * hd].astype(jnp.bfloat16)
            v = qkv_b[:, 2 * D + hh * hd:2 * D + (hh + 1) * hd].astype(jnp.bfloat16)
            s = jax.lax.dot_general(q, k, (((1,), (1,)), ((), ())),
                                    preferred_element_type=jnp.float32)   # (N, N)
            s = s - jnp.max(s, axis=-1, keepdims=True)
            e = jnp.exp(s)
            p = e * (1.0 / jnp.sum(e, axis=-1, keepdims=True))   # exact normalization
            heads.append(jnp.dot(p.astype(jnp.bfloat16), v,
                                 preferred_element_type=jnp.float32))     # (N, hd)
        per_seq.append(jnp.concatenate(heads, axis=-1))       # (N, D) head-concat
    head_out = jnp.concatenate(per_seq, axis=0)               # (BN, D)

    # Single K=D output projection over the whole batch (full MXU fill, no
    # per-head serial f32 accumulation chain).
    attn = jnp.dot(head_out.astype(jnp.bfloat16), w_proj,
                   preferred_element_type=jnp.float32) + b_proj
    x = x + attn

    # ---- MLP branch: x + MLP(LN2(x)), whole batch in one shot ----
    h2 = _layernorm(x, g2w, g2b)
    mid = jnp.dot(h2.astype(jnp.bfloat16), w1,
                  preferred_element_type=jnp.float32) + b1
    mid = 0.5 * mid * (1.0 + jax.lax.erf(mid * SQRT_2_INV))   # exact GELU
    y = jnp.dot(mid.astype(jnp.bfloat16), w2,
                preferred_element_type=jnp.float32) + b2
    xs_ref[...] = x + y

    @pl.when(l == pl.num_programs(0) - 1)
    def _():
        o_ref[...] = xs_ref[...].astype(o_ref.dtype)


def head_kernel(x_ref, norm_w, norm_b, hln_w, hln_b, hw, hb, o_ref, *, use_softmax):
    # Whole batch in a single invocation:
    # final LayerNorm -> token mean -> mlp_head (LN + Linear) -> softmax.
    # hw/hb are padded to a lane-dense width; padded bias = -1e30 so padded
    # columns contribute exp(.)=0 to the softmax denominator.
    x = x_ref[...].astype(jnp.float32)                       # (B, N, D)
    xn = _layernorm(x, norm_w[...], norm_b[...])             # self.norm
    pooled = jnp.mean(xn, axis=1)                            # (B, D) token mean
    pooled = _layernorm(pooled, hln_w[...], hln_b[...])      # mlp_head LayerNorm
    logits = jnp.dot(pooled.astype(jnp.bfloat16), hw[...],
                     preferred_element_type=jnp.float32) + hb[...]   # (B, Lp)
    if use_softmax:
        logits = logits - jnp.max(logits, axis=-1, keepdims=True)
        e = jnp.exp(logits)
        logits = e / jnp.sum(e, axis=-1, keepdims=True)      # exact softmax
    o_ref[...] = logits.astype(o_ref.dtype)


# ---------------------------------------------------------------------------
# Pallas wrappers
# ---------------------------------------------------------------------------
def run_embed_seq(patches_bf16, w_bf16, bias, pos, prefix, mod):
    S, Np, K = patches_bf16.shape
    D = w_bf16.shape[1]
    Rp = prefix.shape[0]
    Ntot = Rp + Np
    return pl.pallas_call(
        embed_seq_kernel,
        out_shape=jax.ShapeDtypeStruct((S, Ntot, D), jnp.bfloat16),
        grid=(S,),
        in_specs=[
            pl.BlockSpec((1, Np, K), lambda s: (s, 0, 0)),
            pl.BlockSpec((K, D), lambda s: (0, 0)),
            pl.BlockSpec((1, D), lambda s: (0, 0)),
            pl.BlockSpec((Np, D), lambda s: (0, 0)),
            pl.BlockSpec((Rp, D), lambda s: (0, 0)),
            pl.BlockSpec((1, D), lambda s: (0, 0)),
        ],
        out_specs=pl.BlockSpec((1, Ntot, D), lambda s: (s, 0, 0)),
        compiler_params=pltpu.CompilerParams(dimension_semantics=("parallel",)),
    )(patches_bf16, w_bf16, bias, pos, prefix, mod)


def run_block_stack(x_flat, sp, *, num_heads, batch, seq_len):
    # x_flat: (B*N, D) bf16.  Weights are stacked along a leading layer axis;
    # grid=(L,) pipelines per-layer weight DMA under the per-layer compute.
    BN, D = x_flat.shape
    assert BN == batch * seq_len
    L = sp["ln1_w"].shape[0]
    arrs = [sp[name] for name in BLOCK_PARAM_NAMES]
    in_specs = [pl.BlockSpec((BN, D), lambda l: (0, 0))]
    in_specs += [pl.BlockSpec((1,) + tuple(p.shape[1:]), lambda l: (l, 0, 0))
                 for p in arrs]
    return pl.pallas_call(
        functools.partial(stack_block_kernel, num_heads=num_heads,
                          batch=batch, seq_len=seq_len),
        out_shape=jax.ShapeDtypeStruct((BN, D), jnp.bfloat16),
        grid=(L,),
        in_specs=in_specs,
        out_specs=pl.BlockSpec((BN, D), lambda l: (0, 0)),
        scratch_shapes=[pltpu.VMEM((BN, D), jnp.float32)],
        input_output_aliases={0: 0},
        compiler_params=pltpu.CompilerParams(
            dimension_semantics=("arbitrary",),
            # 48 MiB: below v7x's 64 MiB physical VMEM, ample on v5e/v6e (128 MiB).
            vmem_limit_bytes=48 * 1024 * 1024,
        ),
    )(x_flat, *arrs)


def run_head(x, params, use_softmax):
    B, N, D = x.shape
    Lp = params["head_w_pad"].shape[1]
    return pl.pallas_call(
        functools.partial(head_kernel, use_softmax=use_softmax),
        out_shape=jax.ShapeDtypeStruct((B, Lp), jnp.float32),
    )(x, params["norm_w"], params["norm_b"], params["head_ln_w"],
      params["head_ln_b"], params["head_w_pad"], params["head_b_pad"])


# ---------------------------------------------------------------------------
# Glue: im2col + full forward (multimodal / default branch)
# ---------------------------------------------------------------------------
def im2col(x, p):
    # x: (B, C, H, W) NCHW -> (B, (H/p)*(W/p), C*p*p), flatten order (C, ph, pw)
    B, C, H, W = x.shape
    x = x.reshape(B, C, H // p, p, W // p, p)
    x = jnp.transpose(x, (0, 2, 4, 1, 3, 5))
    return x.reshape(B, (H // p) * (W // p), C * p * p)


def cavmae_forward(params, a, v, *, num_heads, patch, label_dim,
                   pooling=True, use_softmax=True):
    B, Ta, F = a.shape
    _, T, C, H, W = v.shape
    D = params["pos_embed_a"].shape[-1]

    # ---- audio: a.unsqueeze(1).transpose(2,3) -> (B,1,F,Ta) -> patches ----
    a_img = jnp.transpose(a, (0, 2, 1))[:, None, :, :]
    a_patches = im2col(a_img, patch).astype(jnp.bfloat16)             # (B, Na, K)
    # TODO(synk): linear interpolation of pos_embed_a (only on shape mismatch)
    # is skipped; shapes here are built to match exactly.
    prefix_a = jnp.concatenate(
        [params["global_token_a"][0],
         (params["register_token_a"] + params["register_pos_embed_a"])[0]], axis=0)
    a_seq = run_embed_seq(a_patches, params["pe_a_w"], params["pe_a_b"],
                          params["pos_embed_a"][0], prefix_a, params["modality_a"][0])

    # ---- video: per-frame patch embedding ----
    v_frames = v.reshape(B * T, C, H, W)
    v_patches = im2col(v_frames, patch).astype(jnp.bfloat16)          # (B*T, Nv, K)
    prefix_v = jnp.concatenate(
        [params["global_token_v"][0],
         (params["register_token_v"] + params["register_pos_embed_v"])[0]], axis=0)
    v_seq = run_embed_seq(v_patches, params["pe_v_w"], params["pe_v_b"],
                          params["pos_embed_v"][0], prefix_v, params["modality_v"][0])

    Na_tot = a_seq.shape[1]
    Nv_tot = v_seq.shape[1]

    # ---- modality-specific transformer stacks (flattened bf16 sequences) ----
    a_seq = run_block_stack(a_seq.reshape(B * Na_tot, D), params["stack_a"],
                            num_heads=num_heads, batch=B, seq_len=Na_tot)
    v_seq = run_block_stack(v_seq.reshape(B * T * Nv_tot, D), params["stack_v"],
                            num_heads=num_heads, batch=B * T, seq_len=Nv_tot)

    a_seq = a_seq.reshape(B, Na_tot, D)
    if pooling:
        v_seq = (v_seq.reshape(B, T, Nv_tot, D).astype(jnp.float32)
                 .mean(axis=1).astype(jnp.bfloat16))
    else:
        v_seq = v_seq.reshape(B, T * Nv_tot, D)

    # ---- unified stack + head ----
    x = jnp.concatenate([a_seq, v_seq], axis=1)                       # (B, Nu, D) bf16
    Nu = x.shape[1]
    x = run_block_stack(x.reshape(B * Nu, D), params["stack_u"],
                        num_heads=num_heads, batch=B, seq_len=Nu)
    x = x.reshape(B, Nu, D)
    logits = run_head(x, params, use_softmax)
    return logits[:, :label_dim]


# ---------------------------------------------------------------------------
# Deterministic parameter construction (synthetic)
# ---------------------------------------------------------------------------
def _nrm(key, shape, std=0.02):
    return std * jax.random.normal(key, shape, jnp.float32)


def init_block_params(key, D, mlp_ratio=4.0):
    ks = jax.random.split(key, 4)
    Hd = int(D * mlp_ratio)
    return dict(
        ln1_w=jnp.ones((1, D), jnp.float32), ln1_b=jnp.zeros((1, D), jnp.float32),
        qkv_w=_nrm(ks[0], (D, 3 * D)).astype(jnp.bfloat16),
        qkv_b=jnp.zeros((1, 3 * D), jnp.float32),
        proj_w=_nrm(ks[1], (D, D)).astype(jnp.bfloat16),
        proj_b=jnp.zeros((1, D), jnp.float32),
        ln2_w=jnp.ones((1, D), jnp.float32), ln2_b=jnp.zeros((1, D), jnp.float32),
        fc1_w=_nrm(ks[2], (D, Hd)).astype(jnp.bfloat16),
        fc1_b=jnp.zeros((1, Hd), jnp.float32),
        fc2_w=_nrm(ks[3], (Hd, D)).astype(jnp.bfloat16),
        fc2_b=jnp.zeros((1, D), jnp.float32),
    )


def stack_blocks(block_list):
    # Stack per-layer params along a leading layer axis for the layer-grid kernel.
    return {k: jnp.stack([bp[k] for bp in block_list], axis=0)
            for k in BLOCK_PARAM_NAMES}


def init_params(key, *, D, patch, in_chans, Na, Nv, R, label_dim,
                depth_a, depth_v, depth_u, mlp_ratio=4.0):
    n_top = 16
    n_blocks = depth_a + depth_v + depth_u
    keys = jax.random.split(key, n_top + n_blocks)

    params = dict(
        # patch-embed conv weights flattened to (Cin*p*p, D), stored bf16 for MXU
        pe_a_w=_nrm(keys[0], (1 * patch * patch, D)).astype(jnp.bfloat16),
        pe_a_b=jnp.zeros((1, D), jnp.float32),
        pe_v_w=_nrm(keys[1], (in_chans * patch * patch, D)).astype(jnp.bfloat16),
        pe_v_b=jnp.zeros((1, D), jnp.float32),
        pos_embed_a=_nrm(keys[2], (1, Na, D)),
        pos_embed_v=_nrm(keys[3], (1, Nv, D)),
        modality_a=_nrm(keys[4], (1, 1, D)),
        modality_v=_nrm(keys[5], (1, 1, D)),
        global_token_a=_nrm(keys[6], (1, 1, D)),
        global_token_v=_nrm(keys[7], (1, 1, D)),
        register_token_a=_nrm(keys[8], (1, R, D)),
        register_token_v=_nrm(keys[9], (1, R, D)),
        register_pos_embed_a=_nrm(keys[10], (1, R, D)),
        register_pos_embed_v=_nrm(keys[11], (1, R, D)),
        norm_w=jnp.ones((1, D), jnp.float32), norm_b=jnp.zeros((1, D), jnp.float32),
        head_ln_w=jnp.ones((1, D), jnp.float32), head_ln_b=jnp.zeros((1, D), jnp.float32),
    )

    # Classifier padded to a lane-dense multiple of 128 (bf16 weights); padded
    # bias = -1e30 so padded logits vanish under softmax (sliced away outside).
    Lp = ((label_dim + 127) // 128) * 128
    head_w = _nrm(keys[12], (D, label_dim))
    params["head_w_pad"] = (jnp.zeros((D, Lp), jnp.float32)
                            .at[:, :label_dim].set(head_w).astype(jnp.bfloat16))
    params["head_b_pad"] = jnp.full((1, Lp), -1e30, jnp.float32).at[:, :label_dim].set(0.0)

    bkeys = keys[n_top:]
    blocks_a = [init_block_params(bkeys[i], D, mlp_ratio) for i in range(depth_a)]
    blocks_v = [init_block_params(bkeys[depth_a + i], D, mlp_ratio)
                for i in range(depth_v)]
    blocks_u = [init_block_params(bkeys[depth_a + depth_v + i], D, mlp_ratio)
                for i in range(depth_u)]
    params["stack_a"] = stack_blocks(blocks_a)
    params["stack_v"] = stack_blocks(blocks_v)
    params["stack_u"] = stack_blocks(blocks_u)
    return params


# ---------------------------------------------------------------------------
if __name__ == "__main__":
    # Small but structurally faithful configuration.
    B = 2
    D = 32            # embed_dim
    num_heads = 4
    patch = 16
    in_chans = 3
    img_size = 32     # -> Nv = (32/16)^2 = 4 patches per frame
    T_frames = 2
    Ta, F = 64, 32    # audio spectrogram (time, freq) -> NCHW (B,1,32,64) -> Na = 8
    R = 8             # num_registers
    label_dim = 16
    depth_a, depth_v, depth_u = 2, 2, 1
    Na = (F // patch) * (Ta // patch)
    Nv = (img_size // patch) * (img_size // patch)

    key = jax.random.PRNGKey(0)
    kp, ka, kv = jax.random.split(key, 3)
    params = init_params(kp, D=D, patch=patch, in_chans=in_chans, Na=Na, Nv=Nv,
                         R=R, label_dim=label_dim,
                         depth_a=depth_a, depth_v=depth_v, depth_u=depth_u)

    a = jax.random.normal(ka, (B, Ta, F), jnp.float32)
    v = jax.random.normal(kv, (B, T_frames, in_chans, img_size, img_size), jnp.float32)

    fwd = jax.jit(functools.partial(
        cavmae_forward, num_heads=num_heads, patch=patch, label_dim=label_dim,
        pooling=True, use_softmax=True))

    out = jax.block_until_ready(fwd(params, a, v))
    assert out.shape == (B, label_dim)
    assert bool(jnp.all(jnp.isfinite(out)))
    # softmax rows sum to 1 (exact normalization in the head)
    assert bool(jnp.allclose(jnp.sum(out, axis=-1), 1.0, atol=1e-3))
    print("KERNEL_OK")
</pallas_src>

<mosaic_0001>
module attributes {stable_mosaic.version = 11 : i64} {
  func.func @embed_seq_kernel(%arg0: i32, %arg1: memref<1x4x768xbf16, #tpu.memory_space<vmem>>, %arg2: memref<768x32xbf16, #tpu.memory_space<vmem>>, %arg3: memref<1x32xf32, #tpu.memory_space<vmem>>, %arg4: memref<4x32xf32, #tpu.memory_space<vmem>>, %arg5: memref<9x32xf32, #tpu.memory_space<vmem>>, %arg6: memref<1x32xf32, #tpu.memory_space<vmem>>, %arg7: memref<1x13x32xbf16, #tpu.memory_space<vmem>>) attributes {dimension_semantics = [#tpu.dimension_semantics<parallel>], iteration_bounds = array<i64: 4>, scalar_prefetch = 0 : i64, scratch_operands = 0 : i64, tpu.core_type = #tpu.core_type<tc>, window_params = [{transform_indices = @transform_0, window_bounds = array<i64: 1, 4, 768>}, {pipeline_mode = #tpu.pipeline_mode<synchronous>, transform_indices = @transform_1, window_bounds = array<i64: 768, 32>}, {pipeline_mode = #tpu.pipeline_mode<synchronous>, transform_indices = @transform_2, window_bounds = array<i64: 1, 32>}, {pipeline_mode = #tpu.pipeline_mode<synchronous>, transform_indices = @transform_3, window_bounds = array<i64: 4, 32>}, {pipeline_mode = #tpu.pipeline_mode<synchronous>, transform_indices = @transform_4, window_bounds = array<i64: 9, 32>}, {pipeline_mode = #tpu.pipeline_mode<synchronous>, transform_indices = @transform_5, window_bounds = array<i64: 1, 32>}, {transform_indices = @transform_6, window_bounds = array<i64: 1, 13, 32>}]} {
    %c0 = arith.constant 0 : index
    %c0_0 = arith.constant 0 : index
    %c0_1 = arith.constant 0 : index
    %0 = vector.load %arg1[%c0, %c0_0, %c0_1] : memref<1x4x768xbf16, #tpu.memory_space<vmem>>, vector<1x4x768xbf16>
    %1 = vector.shape_cast %0 : vector<1x4x768xbf16> to vector<4x768xbf16>
    %c0_2 = arith.constant 0 : index
    %c0_3 = arith.constant 0 : index
    %2 = vector.load %arg2[%c0_2, %c0_3] : memref<768x32xbf16, #tpu.memory_space<vmem>>, vector<768x32xbf16>
    %cst = arith.constant dense<0.000000e+00> : vector<4x32xf32>
    %3 = tpu.matmul %1, %2, %cst {dimension_numbers = #tpu.dot_dimension_numbers<[1], [0], [0], [1], [0, 0, 1, 1], [], []>} : vector<4x768xbf16>, vector<768x32xbf16>, vector<4x32xf32> -> vector<4x32xf32>
    %c0_4 = arith.constant 0 : index
    %c0_5 = arith.constant 0 : index
    %4 = vector.load %arg3[%c0_4, %c0_5] : memref<1x32xf32, #tpu.memory_space<vmem>>, vector<1x32xf32>
    %5 = vector.broadcast %4 : vector<1x32xf32> to vector<4x32xf32>
    %6 = arith.addf %3, %5 : vector<4x32xf32>
    %c0_6 = arith.constant 0 : index
    %c0_7 = arith.constant 0 : index
    %7 = vector.load %arg4[%c0_6, %c0_7] : memref<4x32xf32, #tpu.memory_space<vmem>>, vector<4x32xf32>
    %8 = arith.addf %6, %7 : vector<4x32xf32>
    %c0_8 = arith.constant 0 : index
    %c0_9 = arith.constant 0 : index
    %9 = vector.load %arg6[%c0_8, %c0_9] : memref<1x32xf32, #tpu.memory_space<vmem>>, vector<1x32xf32>
    %10 = vector.broadcast %9 : vector<1x32xf32> to vector<4x32xf32>
    %11 = arith.addf %8, %10 : vector<4x32xf32>
    %c0_10 = arith.constant 0 : index
    %c0_11 = arith.constant 0 : index
    %12 = vector.load %arg5[%c0_10, %c0_11] : memref<9x32xf32, #tpu.memory_space<vmem>>, vector<9x32xf32>
    %c0_12 = arith.constant 0 : index
    %c0_13 = arith.constant 0 : index
    %13 = vector.load %arg6[%c0_12, %c0_13] : memref<1x32xf32, #tpu.memory_space<vmem>>, vector<1x32xf32>
    %14 = vector.broadcast %13 : vector<1x32xf32> to vector<9x32xf32>
    %15 = arith.addf %12, %14 : vector<9x32xf32>
    %16 = tpu.concatenate %15, %11 in 0 : vector<9x32xf32>, vector<4x32xf32> -> vector<13x32xf32>
    %17 = arith.truncf %16 : vector<13x32xf32> to vector<13x32xbf16>
    %c0_14 = arith.constant 0 : index
    %c0_15 = arith.constant 0 : index
    %c0_16 = arith.constant 0 : index
    %18 = vector.load %arg7[%c0_14, %c0_15, %c0_16] : memref<1x13x32xbf16, #tpu.memory_space<vmem>>, vector<1x13x32xbf16>
    %19 = vector.shape_cast %18 : vector<1x13x32xbf16> to vector<13x32xbf16>
    %20 = vector.shape_cast %17 : vector<13x32xbf16> to vector<1x13x32xbf16>
    tpu.vector_store %arg7[%c0_14, %c0_15, %c0_16], %20 {strides = array<i32>} : memref<1x13x32xbf16, #tpu.memory_space<vmem>>, vector<1x13x32xbf16>,
    return
  }
  func.func @transform_0(%arg0: i32) -> (i32, i32, i32) {
    %c0_i32 = arith.constant 0 : i32
    %c0_i32_0 = arith.constant 0 : i32
    %c0_i32_1 = arith.constant 0 : i32
    return %arg0, %c0_i32, %c0_i32_0 : i32, i32, i32
  }
  func.func @transform_1(%arg0: i32) -> (i32, i32) {
    %c0_i32 = arith.constant 0 : i32
    %c0_i32_0 = arith.constant 0 : i32
    %c0_i32_1 = arith.constant 0 : i32
    return %c0_i32, %c0_i32_0 : i32, i32
  }
  func.func @transform_2(%arg0: i32) -> (i32, i32) {
    %c0_i32 = arith.constant 0 : i32
    %c0_i32_0 = arith.constant 0 : i32
    %c0_i32_1 = arith.constant 0 : i32
    return %c0_i32, %c0_i32_0 : i32, i32
  }
  func.func @transform_3(%arg0: i32) -> (i32, i32) {
    %c0_i32 = arith.constant 0 : i32
    %c0_i32_0 = arith.constant 0 : i32
    %c0_i32_1 = arith.constant 0 : i32
    return %c0_i32, %c0_i32_0 : i32, i32
  }
  func.func @transform_4(%arg0: i32) -> (i32, i32) {
    %c0_i32 = arith.constant 0 : i32
    %c0_i32_0 = arith.constant 0 : i32
    %c0_i32_1 = arith.constant 0 : i32
    return %c0_i32, %c0_i32_0 : i32, i32
  }
  func.func @transform_5(%arg0: i32) -> (i32, i32) {
    %c0_i32 = arith.constant 0 : i32
    %c0_i32_0 = arith.constant 0 : i32
    %c0_i32_1 = arith.constant 0 : i32
    return %c0_i32, %c0_i32_0 : i32, i32
  }
  func.func @transform_6(%arg0: i32) -> (i32, i32, i32) {
    %c0_i32 = arith.constant 0 : i32
    %c0_i32_0 = arith.constant 0 : i32
    %c0_i32_1 = arith.constant 0 : i32
    return %arg0, %c0_i32, %c0_i32_0 : i32, i32, i32
  }
}

module attributes {stable_mosaic.version = 11 : i64} {
  func.func @stack_block_kernel(%arg0: i32, %arg1: memref<52x32xbf16, #tpu.memory_space<vmem>>, %arg2: memref<1x1x32xf32, #tpu.memory_space<vmem>>, %arg3: memref<1x1x32xf32, #tpu.memory_space<vmem>>, %arg4: memref<1x32x96xbf16, #tpu.memory_space<vmem>>, %arg5: memref<1x1x96xf32, #tpu.memory_space<vmem>>, %arg6: memref<1x32x32xbf16, #tpu.memory_space<vmem>>, %arg7: memref<1x1x32xf32, #tpu.memory_space<vmem>>, %arg8: memref<1x1x32xf32, #tpu.memory_space<vmem>>, %arg9: memref<1x1x32xf32, #tpu.memory_space<vmem>>, %arg10: memref<1x32x128xbf16, #tpu.memory_space<vmem>>, %arg11: memref<1x1x128xf32, #tpu.memory_space<vmem>>, %arg12: memref<1x128x32xbf16, #tpu.memory_space<vmem>>, %arg13: memref<1x1x32xf32, #tpu.memory_space<vmem>>, %arg14: memref<52x32xbf16, #tpu.memory_space<vmem>>, %arg15: memref<52x32xf32, #tpu.memory_space<vmem>>) attributes {dimension_semantics = [#tpu.dimension_semantics<arbitrary>], iteration_bounds = array<i64: 2>, scalar_prefetch = 0 : i64, scratch_operands = 1 : i64, tpu.core_type = #tpu.core_type<tc>, window_params = [{pipeline_mode = #tpu.pipeline_mode<synchronous>, transform_indices = @transform_0, window_bounds = array<i64: 52, 32>}, {transform_indices = @transform_1, window_bounds = array<i64: 1, 1, 32>}, {transform_indices = @transform_2, window_bounds = array<i64: 1, 1, 32>}, {transform_indices = @transform_3, window_bounds = array<i64: 1, 32, 96>}, {transform_indices = @transform_4, window_bounds = array<i64: 1, 1, 96>}, {transform_indices = @transform_5, window_bounds = array<i64: 1, 32, 32>}, {transform_indices = @transform_6, window_bounds = array<i64: 1, 1, 32>}, {transform_indices = @transform_7, window_bounds = array<i64: 1, 1, 32>}, {transform_indices = @transform_8, window_bounds = array<i64: 1, 1, 32>}, {transform_indices = @transform_9, window_bounds = array<i64: 1, 32, 128>}, {transform_indices = @transform_10, window_bounds = array<i64: 1, 1, 128>}, {transform_indices = @transform_11, window_bounds = array<i64: 1, 128, 32>}, {transform_indices = @transform_12, window_bounds = array<i64: 1, 1, 32>}, {pipeline_mode = #tpu.pipeline_mode<synchronous>, transform_indices = @transform_13, window_bounds = array<i64: 52, 32>}]} {
    %c0_i32 = arith.constant 0 : i32
    %0 = arith.cmpi eq, %arg0, %c0_i32 : i32
    %1 = arith.extui %0 : i1 to i32
    %c0_i32_0 = arith.constant 0 : i32
    %2 = arith.cmpi ne, %1, %c0_i32_0 : i32
    scf.if %2 {
      %c0_153 = arith.constant 0 : index
      %c0_154 = arith.constant 0 : index
      %463 = vector.load %arg1[%c0_153, %c0_154] : memref<52x32xbf16, #tpu.memory_space<vmem>>, vector<52x32xbf16>
      %464 = arith.extf %463 : vector<52x32xbf16> to vector<52x32xf32>
      %c0_155 = arith.constant 0 : index
      %c0_156 = arith.constant 0 : index
      %465 = vector.load %arg15[%c0_155, %c0_156] : memref<52x32xf32, #tpu.memory_space<vmem>>, vector<52x32xf32>
      tpu.vector_store %arg15[%c0_155, %c0_156], %464 {strides = array<i32>} : memref<52x32xf32, #tpu.memory_space<vmem>>, vector<52x32xf32>,
    } else {
    }
    %c0 = arith.constant 0 : index
    %c0_1 = arith.constant 0 : index
    %c0_2 = arith.constant 0 : index
    %3 = vector.load %arg4[%c0, %c0_1, %c0_2] : memref<1x32x96xbf16, #tpu.memory_space<vmem>>, vector<1x32x96xbf16>
    %4 = vector.shape_cast %3 : vector<1x32x96xbf16> to vector<32x96xbf16>
    %c0_3 = arith.constant 0 : index
    %c0_4 = arith.constant 0 : index
    %c0_5 = arith.constant 0 : index
    %5 = vector.load %arg5[%c0_3, %c0_4, %c0_5] : memref<1x1x96xf32, #tpu.memory_space<vmem>>, vector<1x1x96xf32>
    %6 = vector.shape_cast %5 : vector<1x1x96xf32> to vector<1x96xf32>
    %c0_6 = arith.constant 0 : index
    %c0_7 = arith.constant 0 : index
    %c0_8 = arith.constant 0 : index
    %7 = vector.load %arg6[%c0_6, %c0_7, %c0_8] : memref<1x32x32xbf16, #tpu.memory_space<vmem>>, vector<1x32x32xbf16>
    %8 = vector.shape_cast %7 : vector<1x32x32xbf16> to vector<32x32xbf16>
    %c0_9 = arith.constant 0 : index
    %c0_10 = arith.constant 0 : index
    %c0_11 = arith.constant 0 : index
    %9 = vector.load %arg7[%c0_9, %c0_10, %c0_11] : memref<1x1x32xf32, #tpu.memory_space<vmem>>, vector<1x1x32xf32>
    %10 = vector.shape_cast %9 : vector<1x1x32xf32> to vector<1x32xf32>
    %c0_12 = arith.constant 0 : index
    %c0_13 = arith.constant 0 : index
    %c0_14 = arith.constant 0 : index
    %11 = vector.load %arg10[%c0_12, %c0_13, %c0_14] : memref<1x32x128xbf16, #tpu.memory_space<vmem>>, vector<1x32x128xbf16>
    %12 = vector.shape_cast %11 : vector<1x32x128xbf16> to vector<32x128xbf16>
    %c0_15 = arith.constant 0 : index
    %c0_16 = arith.constant 0 : index
    %c0_17 = arith.constant 0 : index
    %13 = vector.load %arg11[%c0_15, %c0_16, %c0_17] : memref<1x1x128xf32, #tpu.memory_space<vmem>>, vector<1x1x128xf32>
    %14 = vector.shape_cast %13 : vector<1x1x128xf32> to vector<1x128xf32>
    %c0_18 = arith.constant 0 : index
    %c0_19 = arith.constant 0 : index
    %c0_20 = arith.constant 0 : index
    %15 = vector.load %arg12[%c0_18, %c0_19, %c0_20] : memref<1x128x32xbf16, #tpu.memory_space<vmem>>, vector<1x128x32xbf16>
    %16 = vector.shape_cast %15 : vector<1x128x32xbf16> to vector<128x32xbf16>
    %c0_21 = arith.constant 0 : index
    %c0_22 = arith.constant 0 : index
    %c0_23 = arith.constant 0 : index
    %17 = vector.load %arg13[%c0_21, %c0_22, %c0_23] : memref<1x1x32xf32, #tpu.memory_space<vmem>>, vector<1x1x32xf32>
    %18 = vector.shape_cast %17 : vector<1x1x32xf32> to vector<1x32xf32>
    %c0_24 = arith.constant 0 : index
    %c0_25 = arith.constant 0 : index
    %c0_26 = arith.constant 0 : index
    %19 = vector.load %arg2[%c0_24, %c0_25, %c0_26] : memref<1x1x32xf32, #tpu.memory_space<vmem>>, vector<1x1x32xf32>
    %20 = vector.shape_cast %19 : vector<1x1x32xf32> to vector<1x32xf32>
    %c0_27 = arith.constant 0 : index
    %c0_28 = arith.constant 0 : index
    %c0_29 = arith.constant 0 : index
    %21 = vector.load %arg3[%c0_27, %c0_28, %c0_29] : memref<1x1x32xf32, #tpu.memory_space<vmem>>, vector<1x1x32xf32>
    %22 = vector.shape_cast %21 : vector<1x1x32xf32> to vector<1x32xf32>
    %c0_30 = arith.constant 0 : index
    %c0_31 = arith.constant 0 : index
    %c0_32 = arith.constant 0 : index
    %23 = vector.load %arg8[%c0_30, %c0_31, %c0_32] : memref<1x1x32xf32, #tpu.memory_space<vmem>>, vector<1x1x32xf32>
    %24 = vector.shape_cast %23 : vector<1x1x32xf32> to vector<1x32xf32>
    %c0_33 = arith.constant 0 : index
    %c0_34 = arith.constant 0 : index
    %c0_35 = arith.constant 0 : index
    %25 = vector.load %arg9[%c0_33, %c0_34, %c0_35] : memref<1x1x32xf32, #tpu.memory_space<vmem>>, vector<1x1x32xf32>
    %26 = vector.shape_cast %25 : vector<1x1x32xf32> to vector<1x32xf32>
    %c0_36 = arith.constant 0 : index
    %c0_37 = arith.constant 0 : index
    %27 = vector.load %arg15[%c0_36, %c0_37] : memref<52x32xf32, #tpu.memory_space<vmem>>, vector<52x32xf32>
    %cst = arith.constant dense<0.000000e+00> : vector<52xf32>
    %28 = vector.multi_reduction <add>, %27, %cst [1] : vector<52x32xf32> to vector<52xf32>
    %29 = vector.shape_cast %28 : vector<52xf32> to vector<52x1xf32>
    %cst_38 = arith.constant 3.200000e+01 : f32
    %30 = vector.broadcast %cst_38 : f32 to vector<52x1xf32>
    %31 = arith.divf %29, %30 : vector<52x1xf32>
    %32 = vector.broadcast %31 : vector<52x1xf32> to vector<52x32xf32>
    %33 = arith.subf %27, %32 : vector<52x32xf32>
    %34 = arith.mulf %33, %33 : vector<52x32xf32>
    %cst_39 = arith.constant dense<0.000000e+00> : vector<52xf32>
    %35 = vector.multi_reduction <add>, %34, %cst_39 [1] : vector<52x32xf32> to vector<52xf32>
    %36 = vector.shape_cast %35 : vector<52xf32> to vector<52x1xf32>
    %cst_40 = arith.constant 3.200000e+01 : f32
    %37 = vector.broadcast %cst_40 : f32 to vector<52x1xf32>
    %38 = arith.divf %36, %37 : vector<52x1xf32>
    %39 = vector.broadcast %31 : vector<52x1xf32> to vector<52x32xf32>
    %40 = arith.subf %27, %39 : vector<52x32xf32>
    %cst_41 = arith.constant 9.99999974E-6 : f32
    %41 = vector.broadcast %cst_41 : f32 to vector<52x1xf32>
    %42 = arith.addf %38, %41 : vector<52x1xf32>
    %43 = math.rsqrt %42 : vector<52x1xf32>
    %44 = vector.broadcast %43 : vector<52x1xf32> to vector<52x32xf32>
    %45 = arith.mulf %40, %44 : vector<52x32xf32>
    %46 = vector.broadcast %20 : vector<1x32xf32> to vector<52x32xf32>
    %47 = arith.mulf %45, %46 : vector<52x32xf32>
    %48 = vector.broadcast %22 : vector<1x32xf32> to vector<52x32xf32>
    %49 = arith.addf %47, %48 : vector<52x32xf32>
    %50 = arith.truncf %49 : vector<52x32xf32> to vector<52x32xbf16>
    %cst_42 = arith.constant dense<0.000000e+00> : vector<52x96xf32>
    %51 = tpu.matmul %50, %4, %cst_42 {dimension_numbers = #tpu.dot_dimension_numbers<[1], [0], [0], [1], [0, 0, 1, 1], [], []>} : vector<52x32xbf16>, vector<32x96xbf16>, vector<52x96xf32> -> vector<52x96xf32>
    %52 = vector.broadcast %6 : vector<1x96xf32> to vector<52x96xf32>
    %53 = arith.addf %51, %52 : vector<52x96xf32>
    %54 = vector.extract_strided_slice %53 {offsets = [0, 0], sizes = [13, 96], strides = [1, 1]} : vector<52x96xf32> to vector<13x96xf32>
    %55 = vector.extract_strided_slice %54 {offsets = [0, 0], sizes = [13, 8], strides = [1, 1]} : vector<13x96xf32> to vector<13x8xf32>
    %cst_43 = arith.constant 0.353553385 : f32
    %56 = vector.broadcast %cst_43 : f32 to vector<13x8xf32>
    %57 = arith.mulf %55, %56 : vector<13x8xf32>
    %58 = arith.truncf %57 : vector<13x8xf32> to vector<13x8xbf16>
    %59 = vector.extract_strided_slice %54 {offsets = [0, 32], sizes = [13, 8], strides = [1, 1]} : vector<13x96xf32> to vector<13x8xf32>
    %60 = arith.truncf %59 : vector<13x8xf32> to vector<13x8xbf16>
    %61 = vector.extract_strided_slice %54 {offsets = [0, 64], sizes = [13, 8], strides = [1, 1]} : vector<13x96xf32> to vector<13x8xf32>
    %62 = arith.truncf %61 : vector<13x8xf32> to vector<13x8xbf16>
    %cst_44 = arith.constant dense<0.000000e+00> : vector<13x13xf32>
    %63 = tpu.matmul %58, %60, %cst_44 {dimension_numbers = #tpu.dot_dimension_numbers<[1], [1], [0], [0], [0, 0, 1, 0], [], []>} : vector<13x8xbf16>, vector<13x8xbf16>, vector<13x13xf32> -> vector<13x13xf32>
    %cst_45 = arith.constant dense<0xFF800000> : vector<13xf32>
    %64 = vector.multi_reduction <maximumf>, %63, %cst_45 [1] : vector<13x13xf32> to vector<13xf32>
    %65 = vector.shape_cast %64 : vector<13xf32> to vector<13x1xf32>
    %66 = vector.broadcast %65 : vector<13x1xf32> to vector<13x13xf32>
    %67 = arith.subf %63, %66 : vector<13x13xf32>
    %68 = math.exp %67 : vector<13x13xf32>
    %cst_46 = arith.constant dense<0.000000e+00> : vector<13xf32>
    %69 = vector.multi_reduction <add>, %68, %cst_46 [1] : vector<13x13xf32> to vector<13xf32>
    %70 = vector.shape_cast %69 : vector<13xf32> to vector<13x1xf32>
    %cst_47 = arith.constant 1.000000e+00 : f32
    %71 = vector.broadcast %cst_47 : f32 to vector<13x1xf32>
    %72 = arith.divf %71, %70 : vector<13x1xf32>
    %73 = vector.broadcast %72 : vector<13x1xf32> to vector<13x13xf32>
    %74 = arith.mulf %68, %73 : vector<13x13xf32>
    %75 = arith.truncf %74 : vector<13x13xf32> to vector<13x13xbf16>
    %cst_48 = arith.constant dense<0.000000e+00> : vector<13x8xf32>
    %76 = tpu.matmul %75, %62, %cst_48 {dimension_numbers = #tpu.dot_dimension_numbers<[1], [0], [0], [1], [0, 0, 1, 1], [], []>} : vector<13x13xbf16>, vector<13x8xbf16>, vector<13x8xf32> -> vector<13x8xf32>
    %77 = vector.extract_strided_slice %54 {offsets = [0, 8], sizes = [13, 8], strides = [1, 1]} : vector<13x96xf32> to vector<13x8xf32>
    %cst_49 = arith.constant 0.353553385 : f32
    %78 = vector.broadcast %cst_49 : f32 to vector<13x8xf32>
    %79 = arith.mulf %77, %78 : vector<13x8xf32>
    %80 = arith.truncf %79 : vector<13x8xf32> to vector<13x8xbf16>
    %81 = vector.extract_strided_slice %54 {offsets = [0, 40], sizes = [13, 8], strides = [1, 1]} : vector<13x96xf32> to vector<13x8xf32>
    %82 = arith.truncf %81 : vector<13x8xf32> to vector<13x8xbf16>
    %83 = vector.extract_strided_slice %54 {offsets = [0, 72], sizes = [13, 8], strides = [1, 1]} : vector<13x96xf32> to vector<13x8xf32>
    %84 = arith.truncf %83 : vector<13x8xf32> to vector<13x8xbf16>
    %cst_50 = arith.constant dense<0.000000e+00> : vector<13x13xf32>
    %85 = tpu.matmul %80, %82, %cst_50 {dimension_numbers = #tpu.dot_dimension_numbers<[1], [1], [0], [0], [0, 0, 1, 0], [], []>} : vector<13x8xbf16>, vector<13x8xbf16>, vector<13x13xf32> -> vector<13x13xf32>
    %cst_51 = arith.constant dense<0xFF800000> : vector<13xf32>
    %86 = vector.multi_reduction <maximumf>, %85, %cst_51 [1] : vector<13x13xf32> to vector<13xf32>
    %87 = vector.shape_cast %86 : vector<13xf32> to vector<13x1xf32>
    %88 = vector.broadcast %87 : vector<13x1xf32> to vector<13x13xf32>
    %89 = arith.subf %85, %88 : vector<13x13xf32>
    %90 = math.exp %89 : vector<13x13xf32>
    %cst_52 = arith.constant dense<0.000000e+00> : vector<13xf32>
    %91 = vector.multi_reduction <add>, %90, %cst_52 [1] : vector<13x13xf32> to vector<13xf32>
    %92 = vector.shape_cast %91 : vector<13xf32> to vector<13x1xf32>
    %cst_53 = arith.constant 1.000000e+00 : f32
    %93 = vector.broadcast %cst_53 : f32 to vector<13x1xf32>
    %94 = arith.divf %93, %92 : vector<13x1xf32>
    %95 = vector.broadcast %94 : vector<13x1xf32> to vector<13x13xf32>
    %96 = arith.mulf %90, %95 : vector<13x13xf32>
    %97 = arith.truncf %96 : vector<13x13xf32> to vector<13x13xbf16>
    %cst_54 = arith.constant dense<0.000000e+00> : vector<13x8xf32>
    %98 = tpu.matmul %97, %84, %cst_54 {dimension_numbers = #tpu.dot_dimension_numbers<[1], [0], [0], [1], [0, 0, 1, 1], [], []>} : vector<13x13xbf16>, vector<13x8xbf16>, vector<13x8xf32> -> vector<13x8xf32>
    %99 = vector.extract_strided_slice %54 {offsets = [0, 16], sizes = [13, 8], strides = [1, 1]} : vector<13x96xf32> to vector<13x8xf32>
    %cst_55 = arith.constant 0.353553385 : f32
    %100 = vector.broadcast %cst_55 : f32 to vector<13x8xf32>
    %101 = arith.mulf %99, %100 : vector<13x8xf32>
    %102 = arith.truncf %101 : vector<13x8xf32> to vector<13x8xbf16>
    %103 = vector.extract_strided_slice %54 {offsets = [0, 48], sizes = [13, 8], strides = [1, 1]} : vector<13x96xf32> to vector<13x8xf32>
    %104 = arith.truncf %103 : vector<13x8xf32> to vector<13x8xbf16>
    %105 = vector.extract_strided_slice %54 {offsets = [0, 80], sizes = [13, 8], strides = [1, 1]} : vector<13x96xf32> to vector<13x8xf32>
    %106 = arith.truncf %105 : vector<13x8xf32> to vector<13x8xbf16>
    %cst_56 = arith.constant dense<0.000000e+00> : vector<13x13xf32>
    %107 = tpu.matmul %102, %104, %cst_56 {dimension_numbers = #tpu.dot_dimension_numbers<[1], [1], [0], [0], [0, 0, 1, 0], [], []>} : vector<13x8xbf16>, vector<13x8xbf16>, vector<13x13xf32> -> vector<13x13xf32>
    %cst_57 = arith.constant dense<0xFF800000> : vector<13xf32>
    %108 = vector.multi_reduction <maximumf>, %107, %cst_57 [1] : vector<13x13xf32> to vector<13xf32>
    %109 = vector.shape_cast %108 : vector<13xf32> to vector<13x1xf32>
    %110 = vector.broadcast %109 : vector<13x1xf32> to vector<13x13xf32>
    %111 = arith.subf %107, %110 : vector<13x13xf32>
    %112 = math.exp %111 : vector<13x13xf32>
    %cst_58 = arith.constant dense<0.000000e+00> : vector<13xf32>
    %113 = vector.multi_reduction <add>, %112, %cst_58 [1] : vector<13x13xf32> to vector<13xf32>
    %114 = vector.shape_cast %113 : vector<13xf32> to vector<13x1xf32>
    %cst_59 = arith.constant 1.000000e+00 : f32
    %115 = vector.broadcast %cst_59 : f32 to vector<13x1xf32>
    %116 = arith.divf %115, %114 : vector<13x1xf32>
    %117 = vector.broadcast %116 : vector<13x1xf32> to vector<13x13xf32>
    %118 = arith.mulf %112, %117 : vector<13x13xf32>
    %119 = arith.truncf %118 : vector<13x13xf32> to vector<13x13xbf16>
    %cst_60 = arith.constant dense<0.000000e+00> : vector<13x8xf32>
    %120 = tpu.matmul %119, %106, %cst_60 {dimension_numbers = #tpu.dot_dimension_numbers<[1], [0], [0], [1], [0, 0, 1, 1], [], []>} : vector<13x13xbf16>, vector<13x8xbf16>, vector<13x8xf32> -> vector<13x8xf32>
    %121 = vector.extract_strided_slice %54 {offsets = [0, 24], sizes = [13, 8], strides = [1, 1]} : vector<13x96xf32> to vector<13x8xf32>
    %cst_61 = arith.constant 0.353553385 : f32
    %122 = vector.broadcast %cst_61 : f32 to vector<13x8xf32>
    %123 = arith.mulf %121, %122 : vector<13x8xf32>
    %124 = arith.truncf %123 : vector<13x8xf32> to vector<13x8xbf16>
    %125 = vector.extract_strided_slice %54 {offsets = [0, 56], sizes = [13, 8], strides = [1, 1]} : vector<13x96xf32> to vector<13x8xf32>
    %126 = arith.truncf %125 : vector<13x8xf32> to vector<13x8xbf16>
    %127 = vector.extract_strided_slice %54 {offsets = [0, 88], sizes = [13, 8], strides = [1, 1]} : vector<13x96xf32> to vector<13x8xf32>
    %128 = arith.truncf %127 : vector<13x8xf32> to vector<13x8xbf16>
    %cst_62 = arith.constant dense<0.000000e+00> : vector<13x13xf32>
    %129 = tpu.matmul %124, %126, %cst_62 {dimension_numbers = #tpu.dot_dimension_numbers<[1], [1], [0], [0], [0, 0, 1, 0], [], []>} : vector<13x8xbf16>, vector<13x8xbf16>, vector<13x13xf32> -> vector<13x13xf32>
    %cst_63 = arith.constant dense<0xFF800000> : vector<13xf32>
    %130 = vector.multi_reduction <maximumf>, %129, %cst_63 [1] : vector<13x13xf32> to vector<13xf32>
    %131 = vector.shape_cast %130 : vector<13xf32> to vector<13x1xf32>
    %132 = vector.broadcast %131 : vector<13x1xf32> to vector<13x13xf32>
    %133 = arith.subf %129, %132 : vector<13x13xf32>
    %134 = math.exp %133 : vector<13x13xf32>
    %cst_64 = arith.constant dense<0.000000e+00> : vector<13xf32>
    %135 = vector.multi_reduction <add>, %134, %cst_64 [1] : vector<13x13xf32> to vector<13xf32>
    %136 = vector.shape_cast %135 : vector<13xf32> to vector<13x1xf32>
    %cst_65 = arith.constant 1.000000e+00 : f32
    %137 = vector.broadcast %cst_65 : f32 to vector<13x1xf32>
    %138 = arith.divf %137, %136 : vector<13x1xf32>
    %139 = vector.broadcast %138 : vector<13x1xf32> to vector<13x13xf32>
    %140 = arith.mulf %134, %139 : vector<13x13xf32>
    %141 = arith.truncf %140 : vector<13x13xf32> to vector<13x13xbf16>
    %cst_66 = arith.constant dense<0.000000e+00> : vector<13x8xf32>
    %142 = tpu.matmul %141, %128, %cst_66 {dimension_numbers = #tpu.dot_dimension_numbers<[1], [0], [0], [1], [0, 0, 1, 1], [], []>} : vector<13x13xbf16>, vector<13x8xbf16>, vector<13x8xf32> -> vector<13x8xf32>
    %143 = tpu.concatenate %76, %98, %120, %142 in 1 : vector<13x8xf32>, vector<13x8xf32>, vector<13x8xf32>, vector<13x8xf32> -> vector<13x32xf32>
    %144 = vector.extract_strided_slice %53 {offsets = [13, 0], sizes = [13, 96], strides = [1, 1]} : vector<52x96xf32> to vector<13x96xf32>
    %145 = vector.extract_strided_slice %144 {offsets = [0, 0], sizes = [13, 8], strides = [1, 1]} : vector<13x96xf32> to vector<13x8xf32>
    %cst_67 = arith.constant 0.353553385 : f32
    %146 = vector.broadcast %cst_67 : f32 to vector<13x8xf32>
    %147 = arith.mulf %145, %146 : vector<13x8xf32>
    %148 = arith.truncf %147 : vector<13x8xf32> to vector<13x8xbf16>
    %149 = vector.extract_strided_slice %144 {offsets = [0, 32], sizes = [13, 8], strides = [1, 1]} : vector<13x96xf32> to vector<13x8xf32>
    %150 = arith.truncf %149 : vector<13x8xf32> to vector<13x8xbf16>
    %151 = vector.extract_strided_slice %144 {offsets = [0, 64], sizes = [13, 8], strides = [1, 1]} : vector<13x96xf32> to vector<13x8xf32>
    %152 = arith.truncf %151 : vector<13x8xf32> to vector<13x8xbf16>
    %cst_68 = arith.constant dense<0.000000e+00> : vector<13x13xf32>
    %153 = tpu.matmul %148, %150, %cst_68 {dimension_numbers = #tpu.dot_dimension_numbers<[1], [1], [0], [0], [0, 0, 1, 0], [], []>} : vector<13x8xbf16>, vector<13x8xbf16>, vector<13x13xf32> -> vector<13x13xf32>
    %cst_69 = arith.constant dense<0xFF800000> : vector<13xf32>
    %154 = vector.multi_reduction <maximumf>, %153, %cst_69 [1] : vector<13x13xf32> to vector<13xf32>
    %155 = vector.shape_cast %154 : vector<13xf32> to vector<13x1xf32>
    %156 = vector.broadcast %155 : vector<13x1xf32> to vector<13x13xf32>
    %157 = arith.subf %153, %156 : vector<13x13xf32>
    %158 = math.exp %157 : vector<13x13xf32>
    %cst_70 = arith.constant dense<0.000000e+00> : vector<13xf32>
    %159 = vector.multi_reduction <add>, %158, %cst_70 [1] : vector<13x13xf32> to vector<13xf32>
    %160 = vector.shape_cast %159 : vector<13xf32> to vector<13x1xf32>
    %cst_71 = arith.constant 1.000000e+00 : f32
    %161 = vector.broadcast %cst_71 : f32 to vector<13x1xf32>
    %162 = arith.divf %161, %160 : vector<13x1xf32>
    %163 = vector.broadcast %162 : vector<13x1xf32> to vector<13x13xf32>
    %164 = arith.mulf %158, %163 : vector<13x13xf32>
    %165 = arith.truncf %164 : vector<13x13xf32> to vector<13x13xbf16>
    %cst_72 = arith.constant dense<0.000000e+00> : vector<13x8xf32>
    %166 = tpu.matmul %165, %152, %cst_72 {dimension_numbers = #tpu.dot_dimension_numbers<[1], [0], [0], [1], [0, 0, 1, 1], [], []>} : vector<13x13xbf16>, vector<13x8xbf16>, vector<13x8xf32> -> vector<13x8xf32>
    %167 = vector.extract_strided_slice %144 {offsets = [0, 8], sizes = [13, 8], strides = [1, 1]} : vector<13x96xf32> to vector<13x8xf32>
    %cst_73 = arith.constant 0.353553385 : f32
    %168 = vector.broadcast %cst_73 : f32 to vector<13x8xf32>
    %169 = arith.mulf %167, %168 : vector<13x8xf32>
    %170 = arith.truncf %169 : vector<13x8xf32> to vector<13x8xbf16>
    %171 = vector.extract_strided_slice %144 {offsets = [0, 40], sizes = [13, 8], strides = [1, 1]} : vector<13x96xf32> to vector<13x8xf32>
    %172 = arith.truncf %171 : vector<13x8xf32> to vector<13x8xbf16>
    %173 = vector.extract_strided_slice %144 {offsets = [0, 72], sizes = [13, 8], strides = [1, 1]} : vector<13x96xf32> to vector<13x8xf32>
    %174 = arith.truncf %173 : vector<13x8xf32> to vector<13x8xbf16>
    %cst_74 = arith.constant dense<0.000000e+00> : vector<13x13xf32>
    %175 = tpu.matmul %170, %172, %cst_74 {dimension_numbers = #tpu.dot_dimension_numbers<[1], [1], [0], [0], [0, 0, 1, 0], [], []>} : vector<13x8xbf16>, vector<13x8xbf16>, vector<13x13xf32> -> vector<13x13xf32>
    %cst_75 = arith.constant dense<0xFF800000> : vector<13xf32>
    %176 = vector.multi_reduction <maximumf>, %175, %cst_75 [1] : vector<13x13xf32> to vector<13xf32>
    %177 = vector.shape_cast %176 : vector<13xf32> to vector<13x1xf32>
    %178 = vector.broadcast %177 : vector<13x1xf32> to vector<13x13xf32>
    %179 = arith.subf %175, %178 : vector<13x13xf32>
    %180 = math.exp %179 : vector<13x13xf32>
    %cst_76 = arith.constant dense<0.000000e+00> : vector<13xf32>
    %181 = vector.multi_reduction <add>, %180, %cst_76 [1] : vector<13x13xf32> to vector<13xf32>
    %182 = vector.shape_cast %181 : vector<13xf32> to vector<13x1xf32>
    %cst_77 = arith.constant 1.000000e+00 : f32
    %183 = vector.broadcast %cst_77 : f32 to vector<13x1xf32>
    %184 = arith.divf %183, %182 : vector<13x1xf32>
    %185 = vector.broadcast %184 : vector<13x1xf32> to vector<13x13xf32>
    %186 = arith.mulf %180, %185 : vector<13x13xf32>
    %187 = arith.truncf %186 : vector<13x13xf32> to vector<13x13xbf16>
    %cst_78 = arith.constant dense<0.000000e+00> : vector<13x8xf32>
    %188 = tpu.matmul %187, %174, %cst_78 {dimension_numbers = #tpu.dot_dimension_numbers<[1], [0], [0], [1], [0, 0, 1, 1], [], []>} : vector<13x13xbf16>, vector<13x8xbf16>, vector<13x8xf32> -> vector<13x8xf32>
    %189 = vector.extract_strided_slice %144 {offsets = [0, 16], sizes = [13, 8], strides = [1, 1]} : vector<13x96xf32> to vector<13x8xf32>
    %cst_79 = arith.constant 0.353553385 : f32
    %190 = vector.broadcast %cst_79 : f32 to vector<13x8xf32>
    %191 = arith.mulf %189, %190 : vector<13x8xf32>
    %192 = arith.truncf %191 : vector<13x8xf32> to vector<13x8xbf16>
    %193 = vector.extract_strided_slice %144 {offsets = [0, 48], sizes = [13, 8], strides = [1, 1]} : vector<13x96xf32> to vector<13x8xf32>
    %194 = arith.truncf %193 : vector<13x8xf32> to vector<13x8xbf16>
    %195 = vector.extract_strided_slice %144 {offsets = [0, 80], sizes = [13, 8], strides = [1, 1]} : vector<13x96xf32> to vector<13x8xf32>
    %196 = arith.truncf %195 : vector<13x8xf32> to vector<13x8xbf16>
    %cst_80 = arith.constant dense<0.000000e+00> : vector<13x13xf32>
    %197 = tpu.matmul %192, %194, %cst_80 {dimension_numbers = #tpu.dot_dimension_numbers<[1], [1], [0], [0], [0, 0, 1, 0], [], []>} : vector<13x8xbf16>, vector<13x8xbf16>, vector<13x13xf32> -> vector<13x13xf32>
    %cst_81 = arith.constant dense<0xFF800000> : vector<13xf32>
    %198 = vector.multi_reduction <maximumf>, %197, %cst_81 [1] : vector<13x13xf32> to vector<13xf32>
    %199 = vector.shape_cast %198 : vector<13xf32> to vector<13x1xf32>
    %200 = vector.broadcast %199 : vector<13x1xf32> to vector<13x13xf32>
    %201 = arith.subf %197, %200 : vector<13x13xf32>
    %202 = math.exp %201 : vector<13x13xf32>
    %cst_82 = arith.constant dense<0.000000e+00> : vector<13xf32>
    %203 = vector.multi_reduction <add>, %202, %cst_82 [1] : vector<13x13xf32> to vector<13xf32>
    %204 = vector.shape_cast %203 : vector<13xf32> to vector<13x1xf32>
    %cst_83 = arith.constant 1.000000e+00 : f32
    %205 = vector.broadcast %cst_83 : f32 to vector<13x1xf32>
    %206 = arith.divf %205, %204 : vector<13x1xf32>
    %207 = vector.broadcast %206 : vector<13x1xf32> to vector<13x13xf32>
    %208 = arith.mulf %202, %207 : vector<13x13xf32>
    %209 = arith.truncf %208 : vector<13x13xf32> to vector<13x13xbf16>
    %cst_84 = arith.constant dense<0.000000e+00> : vector<13x8xf32>
    %210 = tpu.matmul %209, %196, %cst_84 {dimension_numbers = #tpu.dot_dimension_numbers<[1], [0], [0], [1], [0, 0, 1, 1], [], []>} : vector<13x13xbf16>, vector<13x8xbf16>, vector<13x8xf32> -> vector<13x8xf32>
    %211 = vector.extract_strided_slice %144 {offsets = [0, 24], sizes = [13, 8], strides = [1, 1]} : vector<13x96xf32> to vector<13x8xf32>
    %cst_85 = arith.constant 0.353553385 : f32
    %212 = vector.broadcast %cst_85 : f32 to vector<13x8xf32>
    %213 = arith.mulf %211, %212 : vector<13x8xf32>
    %214 = arith.truncf %213 : vector<13x8xf32> to vector<13x8xbf16>
    %215 = vector.extract_strided_slice %144 {offsets = [0, 56], sizes = [13, 8], strides = [1, 1]} : vector<13x96xf32> to vector<13x8xf32>
    %216 = arith.truncf %215 : vector<13x8xf32> to vector<13x8xbf16>
    %217 = vector.extract_strided_slice %144 {offsets = [0, 88], sizes = [13, 8], strides = [1, 1]} : vector<13x96xf32> to vector<13x8xf32>
    %218 = arith.truncf %217 : vector<13x8xf32> to vector<13x8xbf16>
    %cst_86 = arith.constant dense<0.000000e+00> : vector<13x13xf32>
    %219 = tpu.matmul %214, %216, %cst_86 {dimension_numbers = #tpu.dot_dimension_numbers<[1], [1], [0], [0], [0, 0, 1, 0], [], []>} : vector<13x8xbf16>, vector<13x8xbf16>, vector<13x13xf32> -> vector<13x13xf32>
    %cst_87 = arith.constant dense<0xFF800000> : vector<13xf32>
    %220 = vector.multi_reduction <maximumf>, %219, %cst_87 [1] : vector<13x13xf32> to vector<13xf32>
    %221 = vector.shape_cast %220 : vector<13xf32> to vector<13x1xf32>
    %222 = vector.broadcast %221 : vector<13x1xf32> to vector<13x13xf32>
    %223 = arith.subf %219, %222 : vector<13x13xf32>
    %224 = math.exp %223 : vector<13x13xf32>
    %cst_88 = arith.constant dense<0.000000e+00> : vector<13xf32>
    %225 = vector.multi_reduction <add>, %224, %cst_88 [1] : vector<13x13xf32> to vector<13xf32>
    %226 = vector.shape_cast %225 : vector<13xf32> to vector<13x1xf32>
    %cst_89 = arith.constant 1.000000e+00 : f32
    %227 = vector.broadcast %cst_89 : f32 to vector<13x1xf32>
    %228 = arith.divf %227, %226 : vector<13x1xf32>
    %229 = vector.broadcast %228 : vector<13x1xf32> to vector<13x13xf32>
    %230 = arith.mulf %224, %229 : vector<13x13xf32>
    %231 = arith.truncf %230 : vector<13x13xf32> to vector<13x13xbf16>
    %cst_90 = arith.constant dense<0.000000e+00> : vector<13x8xf32>
    %232 = tpu.matmul %231, %218, %cst_90 {dimension_numbers = #tpu.dot_dimension_numbers<[1], [0], [0], [1], [0, 0, 1, 1], [], []>} : vector<13x13xbf16>, vector<13x8xbf16>, vector<13x8xf32> -> vector<13x8xf32>
    %233 = tpu.concatenate %166, %188, %210, %232 in 1 : vector<13x8xf32>, vector<13x8xf32>, vector<13x8xf32>, vector<13x8xf32> -> vector<13x32xf32>
    %234 = vector.extract_strided_slice %53 {offsets = [26, 0], sizes = [13, 96], strides = [1, 1]} : vector<52x96xf32> to vector<13x96xf32>
    %235 = vector.extract_strided_slice %234 {offsets = [0, 0], sizes = [13, 8], strides = [1, 1]} : vector<13x96xf32> to vector<13x8xf32>
    %cst_91 = arith.constant 0.353553385 : f32
    %236 = vector.broadcast %cst_91 : f32 to vector<13x8xf32>
    %237 = arith.mulf %235, %236 : vector<13x8xf32>
    %238 = arith.truncf %237 : vector<13x8xf32> to vector<13x8xbf16>
    %239 = vector.extract_strided_slice %234 {offsets = [0, 32], sizes = [13, 8], strides = [1, 1]} : vector<13x96xf32> to vector<13x8xf32>
    %240 = arith.truncf %239 : vector<13x8xf32> to vector<13x8xbf16>
    %241 = vector.extract_strided_slice %234 {offsets = [0, 64], sizes = [13, 8], strides = [1, 1]} : vector<13x96xf32> to vector<13x8xf32>
    %242 = arith.truncf %241 : vector<13x8xf32> to vector<13x8xbf16>
    %cst_92 = arith.constant dense<0.000000e+00> : vector<13x13xf32>
    %243 = tpu.matmul %238, %240, %cst_92 {dimension_numbers = #tpu.dot_dimension_numbers<[1], [1], [0], [0], [0, 0, 1, 0], [], []>} : vector<13x8xbf16>, vector<13x8xbf16>, vector<13x13xf32> -> vector<13x13xf32>
    %cst_93 = arith.constant dense<0xFF800000> : vector<13xf32>
    %244 = vector.multi_reduction <maximumf>, %243, %cst_93 [1] : vector<13x13xf32> to vector<13xf32>
    %245 = vector.shape_cast %244 : vector<13xf32> to vector<13x1xf32>
    %246 = vector.broadcast %245 : vector<13x1xf32> to vector<13x13xf32>
    %247 = arith.subf %243, %246 : vector<13x13xf32>
    %248 = math.exp %247 : vector<13x13xf32>
    %cst_94 = arith.constant dense<0.000000e+00> : vector<13xf32>
    %249 = vector.multi_reduction <add>, %248, %cst_94 [1] : vector<13x13xf32> to vector<13xf32>
    %250 = vector.shape_cast %249 : vector<13xf32> to vector<13x1xf32>
    %cst_95 = arith.constant 1.000000e+00 : f32
    %251 = vector.broadcast %cst_95 : f32 to vector<13x1xf32>
    %252 = arith.divf %251, %250 : vector<13x1xf32>
    %253 = vector.broadcast %252 : vector<13x1xf32> to vector<13x13xf32>
    %254 = arith.mulf %248, %253 : vector<13x13xf32>
    %255 = arith.truncf %254 : vector<13x13xf32> to vector<13x13xbf16>
    %cst_96 = arith.constant dense<0.000000e+00> : vector<13x8xf32>
    %256 = tpu.matmul %255, %242, %cst_96 {dimension_numbers = #tpu.dot_dimension_numbers<[1], [0], [0], [1], [0, 0, 1, 1], [], []>} : vector<13x13xbf16>, vector<13x8xbf16>, vector<13x8xf32> -> vector<13x8xf32>
    %257 = vector.extract_strided_slice %234 {offsets = [0, 8], sizes = [13, 8], strides = [1, 1]} : vector<13x96xf32> to vector<13x8xf32>
    %cst_97 = arith.constant 0.353553385 : f32
    %258 = vector.broadcast %cst_97 : f32 to vector<13x8xf32>
    %259 = arith.mulf %257, %258 : vector<13x8xf32>
    %260 = arith.truncf %259 : vector<13x8xf32> to vector<13x8xbf16>
    %261 = vector.extract_strided_slice %234 {offsets = [0, 40], sizes = [13, 8], strides = [1, 1]} : vector<13x96xf32> to vector<13x8xf32>
    %262 = arith.truncf %261 : vector<13x8xf32> to vector<13x8xbf16>
    %263 = vector.extract_strided_slice %234 {offsets = [0, 72], sizes = [13, 8], strides = [1, 1]} : vector<13x96xf32> to vector<13x8xf32>
    %264 = arith.truncf %263 : vector<13x8xf32> to vector<13x8xbf16>
    %cst_98 = arith.constant dense<0.000000e+00> : vector<13x13xf32>
    %265 = tpu.matmul %260, %262, %cst_98 {dimension_numbers = #tpu.dot_dimension_numbers<[1], [1], [0], [0], [0, 0, 1, 0], [], []>} : vector<13x8xbf16>, vector<13x8xbf16>, vector<13x13xf32> -> vector<13x13xf32>
    %cst_99 = arith.constant dense<0xFF800000> : vector<13xf32>
    %266 = vector.multi_reduction <maximumf>, %265, %cst_99 [1] : vector<13x13xf32> to vector<13xf32>
    %267 = vector.shape_cast %266 : vector<13xf32> to vector<13x1xf32>
    %268 = vector.broadcast %267 : vector<13x1xf32> to vector<13x13xf32>
    %269 = arith.subf %265, %268 : vector<13x13xf32>
    %270 = math.exp %269 : vector<13x13xf32>
    %cst_100 = arith.constant dense<0.000000e+00> : vector<13xf32>
    %271 = vector.multi_reduction <add>, %270, %cst_100 [1] : vector<13x13xf32> to vector<13xf32>
    %272 = vector.shape_cast %271 : vector<13xf32> to vector<13x1xf32>
    %cst_101 = arith.constant 1.000000e+00 : f32
    %273 = vector.broadcast %cst_101 : f32 to vector<13x1xf32>
    %274 = arith.divf %273, %272 : vector<13x1xf32>
    %275 = vector.broadcast %274 : vector<13x1xf32> to vector<13x13xf32>
    %276 = arith.mulf %270, %275 : vector<13x13xf32>
    %277 = arith.truncf %276 : vector<13x13xf32> to vector<13x13xbf16>
    %cst_102 = arith.constant dense<0.000000e+00> : vector<13x8xf32>
    %278 = tpu.matmul %277, %264, %cst_102 {dimension_numbers = #tpu.dot_dimension_numbers<[1], [0], [0], [1], [0, 0, 1, 1], [], []>} : vector<13x13xbf16>, vector<13x8xbf16>, vector<13x8xf32> -> vector<13x8xf32>
    %279 = vector.extract_strided_slice %234 {offsets = [0, 16], sizes = [13, 8], strides = [1, 1]} : vector<13x96xf32> to vector<13x8xf32>
    %cst_103 = arith.constant 0.353553385 : f32
    %280 = vector.broadcast %cst_103 : f32 to vector<13x8xf32>
    %281 = arith.mulf %279, %280 : vector<13x8xf32>
    %282 = arith.truncf %281 : vector<13x8xf32> to vector<13x8xbf16>
    %283 = vector.extract_strided_slice %234 {offsets = [0, 48], sizes = [13, 8], strides = [1, 1]} : vector<13x96xf32> to vector<13x8xf32>
    %284 = arith.truncf %283 : vector<13x8xf32> to vector<13x8xbf16>
    %285 = vector.extract_strided_slice %234 {offsets = [0, 80], sizes = [13, 8], strides = [1, 1]} : vector<13x96xf32> to vector<13x8xf32>
    %286 = arith.truncf %285 : vector<13x8xf32> to vector<13x8xbf16>
    %cst_104 = arith.constant dense<0.000000e+00> : vector<13x13xf32>
    %287 = tpu.matmul %282, %284, %cst_104 {dimension_numbers = #tpu.dot_dimension_numbers<[1], [1], [0], [0], [0, 0, 1, 0], [], []>} : vector<13x8xbf16>, vector<13x8xbf16>, vector<13x13xf32> -> vector<13x13xf32>
    %cst_105 = arith.constant dense<0xFF800000> : vector<13xf32>
    %288 = vector.multi_reduction <maximumf>, %287, %cst_105 [1] : vector<13x13xf32> to vector<13xf32>
    %289 = vector.shape_cast %288 : vector<13xf32> to vector<13x1xf32>
    %290 = vector.broadcast %289 : vector<13x1xf32> to vector<13x13xf32>
    %291 = arith.subf %287, %290 : vector<13x13xf32>
    %292 = math.exp %291 : vector<13x13xf32>
    %cst_106 = arith.constant dense<0.000000e+00> : vector<13xf32>
    %293 = vector.multi_reduction <add>, %292, %cst_106 [1] : vector<13x13xf32> to vector<13xf32>
    %294 = vector.shape_cast %293 : vector<13xf32> to vector<13x1xf32>
    %cst_107 = arith.constant 1.000000e+00 : f32
    %295 = vector.broadcast %cst_107 : f32 to vector<13x1xf32>
    %296 = arith.divf %295, %294 : vector<13x1xf32>
    %297 = vector.broadcast %296 : vector<13x1xf32> to vector<13x13xf32>
    %298 = arith.mulf %292, %297 : vector<13x13xf32>
    %299 = arith.truncf %298 : vector<13x13xf32> to vector<13x13xbf16>
    %cst_108 = arith.constant dense<0.000000e+00> : vector<13x8xf32>
    %300 = tpu.matmul %299, %286, %cst_108 {dimension_numbers = #tpu.dot_dimension_numbers<[1], [0], [0], [1], [0, 0, 1, 1], [], []>} : vector<13x13xbf16>, vector<13x8xbf16>, vector<13x8xf32> -> vector<13x8xf32>
    %301 = vector.extract_strided_slice %234 {offsets = [0, 24], sizes = [13, 8], strides = [1, 1]} : vector<13x96xf32> to vector<13x8xf32>
    %cst_109 = arith.constant 0.353553385 : f32
    %302 = vector.broadcast %cst_109 : f32 to vector<13x8xf32>
    %303 = arith.mulf %301, %302 : vector<13x8xf32>
    %304 = arith.truncf %303 : vector<13x8xf32> to vector<13x8xbf16>
    %305 = vector.extract_strided_slice %234 {offsets = [0, 56], sizes = [13, 8], strides = [1, 1]} : vector<13x96xf32> to vector<13x8xf32>
    %306 = arith.truncf %305 : vector<13x8xf32> to vector<13x8xbf16>
    %307 = vector.extract_strided_slice %234 {offsets = [0, 88], sizes = [13, 8], strides = [1, 1]} : vector<13x96xf32> to vector<13x8xf32>
    %308 = arith.truncf %307 : vector<13x8xf32> to vector<13x8xbf16>
    %cst_110 = arith.constant dense<0.000000e+00> : vector<13x13xf32>
    %309 = tpu.matmul %304, %306, %cst_110 {dimension_numbers = #tpu.dot_dimension_numbers<[1], [1], [0], [0], [0, 0, 1, 0], [], []>} : vector<13x8xbf16>, vector<13x8xbf16>, vector<13x13xf32> -> vector<13x13xf32>
    %cst_111 = arith.constant dense<0xFF800000> : vector<13xf32>
    %310 = vector.multi_reduction <maximumf>, %309, %cst_111 [1] : vector<13x13xf32> to vector<13xf32>
    %311 = vector.shape_cast %310 : vector<13xf32> to vector<13x1xf32>
    %312 = vector.broadcast %311 : vector<13x1xf32> to vector<13x13xf32>
    %313 = arith.subf %309, %312 : vector<13x13xf32>
    %314 = math.exp %313 : vector<13x13xf32>
    %cst_112 = arith.constant dense<0.000000e+00> : vector<13xf32>
    %315 = vector.multi_reduction <add>, %314, %cst_112 [1] : vector<13x13xf32> to vector<13xf32>
    %316 = vector.shape_cast %315 : vector<13xf32> to vector<13x1xf32>
    %cst_113 = arith.constant 1.000000e+00 : f32
    %317 = vector.broadcast %cst_113 : f32 to vector<13x1xf32>
    %318 = arith.divf %317, %316 : vector<13x1xf32>
    %319 = vector.broadcast %318 : vector<13x1xf32> to vector<13x13xf32>
    %320 = arith.mulf %314, %319 : vector<13x13xf32>
    %321 = arith.truncf %320 : vector<13x13xf32> to vector<13x13xbf16>
    %cst_114 = arith.constant dense<0.000000e+00> : vector<13x8xf32>
    %322 = tpu.matmul %321, %308, %cst_114 {dimension_numbers = #tpu.dot_dimension_numbers<[1], [0], [0], [1], [0, 0, 1, 1], [], []>} : vector<13x13xbf16>, vector<13x8xbf16>, vector<13x8xf32> -> vector<13x8xf32>
    %323 = tpu.concatenate %256, %278, %300, %322 in 1 : vector<13x8xf32>, vector<13x8xf32>, vector<13x8xf32>, vector<13x8xf32> -> vector<13x32xf32>
    %324 = vector.extract_strided_slice %53 {offsets = [39, 0], sizes = [13, 96], strides = [1, 1]} : vector<52x96xf32> to vector<13x96xf32>
    %325 = vector.extract_strided_slice %324 {offsets = [0, 0], sizes = [13, 8], strides = [1, 1]} : vector<13x96xf32> to vector<13x8xf32>
    %cst_115 = arith.constant 0.353553385 : f32
    %326 = vector.broadcast %cst_115 : f32 to vector<13x8xf32>
    %327 = arith.mulf %325, %326 : vector<13x8xf32>
    %328 = arith.truncf %327 : vector<13x8xf32> to vector<13x8xbf16>
    %329 = vector.extract_strided_slice %324 {offsets = [0, 32], sizes = [13, 8], strides = [1, 1]} : vector<13x96xf32> to vector<13x8xf32>
    %330 = arith.truncf %329 : vector<13x8xf32> to vector<13x8xbf16>
    %331 = vector.extract_strided_slice %324 {offsets = [0, 64], sizes = [13, 8], strides = [1, 1]} : vector<13x96xf32> to vector<13x8xf32>
    %332 = arith.truncf %331 : vector<13x8xf32> to vector<13x8xbf16>
    %cst_116 = arith.constant dense<0.000000e+00> : vector<13x13xf32>
    %333 = tpu.matmul %328, %330, %cst_116 {dimension_numbers = #tpu.dot_dimension_numbers<[1], [1], [0], [0], [0, 0, 1, 0], [], []>} : vector<13x8xbf16>, vector<13x8xbf16>, vector<13x13xf32> -> vector<13x13xf32>
    %cst_117 = arith.constant dense<0xFF800000> : vector<13xf32>
    %334 = vector.multi_reduction <maximumf>, %333, %cst_117 [1] : vector<13x13xf32> to vector<13xf32>
    %335 = vector.shape_cast %334 : vector<13xf32> to vector<13x1xf32>
    %336 = vector.broadcast %335 : vector<13x1xf32> to vector<13x13xf32>
    %337 = arith.subf %333, %336 : vector<13x13xf32>
    %338 = math.exp %337 : vector<13x13xf32>
    %cst_118 = arith.constant dense<0.000000e+00> : vector<13xf32>
    %339 = vector.multi_reduction <add>, %338, %cst_118 [1] : vector<13x13xf32> to vector<13xf32>
    %340 = vector.shape_cast %339 : vector<13xf32> to vector<13x1xf32>
    %cst_119 = arith.constant 1.000000e+00 : f32
    %341 = vector.broadcast %cst_119 : f32 to vector<13x1xf32>
    %342 = arith.divf %341, %340 : vector<13x1xf32>
    %343 = vector.broadcast %342 : vector<13x1xf32> to vector<13x13xf32>
    %344 = arith.mulf %338, %343 : vector<13x13xf32>
    %345 = arith.truncf %344 : vector<13x13xf32> to vector<13x13xbf16>
    %cst_120 = arith.constant dense<0.000000e+00> : vector<13x8xf32>
    %346 = tpu.matmul %345, %332, %cst_120 {dimension_numbers = #tpu.dot_dimension_numbers<[1], [0], [0], [1], [0, 0, 1, 1], [], []>} : vector<13x13xbf16>, vector<13x8xbf16>, vector<13x8xf32> -> vector<13x8xf32>
    %347 = vector.extract_strided_slice %324 {offsets = [0, 8], sizes = [13, 8], strides = [1, 1]} : vector<13x96xf32> to vector<13x8xf32>
    %cst_121 = arith.constant 0.353553385 : f32
    %348 = vector.broadcast %cst_121 : f32 to vector<13x8xf32>
    %349 = arith.mulf %347, %348 : vector<13x8xf32>
    %350 = arith.truncf %349 : vector<13x8xf32> to vector<13x8xbf16>
    %351 = vector.extract_strided_slice %324 {offsets = [0, 40], sizes = [13, 8], strides = [1, 1]} : vector<13x96xf32> to vector<13x8xf32>
    %352 = arith.truncf %351 : vector<13x8xf32> to vector<13x8xbf16>
    %353 = vector.extract_strided_slice %324 {offsets = [0, 72], sizes = [13, 8], strides = [1, 1]} : vector<13x96xf32> to vector<13x8xf32>
    %354 = arith.truncf %353 : vector<13x8xf32> to vector<13x8xbf16>
    %cst_122 = arith.constant dense<0.000000e+00> : vector<13x13xf32>
    %355 = tpu.matmul %350, %352, %cst_122 {dimension_numbers = #tpu.dot_dimension_numbers<[1], [1], [0], [0], [0, 0, 1, 0], [], []>} : vector<13x8xbf16>, vector<13x8xbf16>, vector<13x13xf32> -> vector<13x13xf32>
    %cst_123 = arith.constant dense<0xFF800000> : vector<13xf32>
    %356 = vector.multi_reduction <maximumf>, %355, %cst_123 [1] : vector<13x13xf32> to vector<13xf32>
    %357 = vector.shape_cast %356 : vector<13xf32> to vector<13x1xf32>
    %358 = vector.broadcast %357 : vector<13x1xf32> to vector<13x13xf32>
    %359 = arith.subf %355, %358 : vector<13x13xf32>
    %360 = math.exp %359 : vector<13x13xf32>
    %cst_124 = arith.constant dense<0.000000e+00> : vector<13xf32>
    %361 = vector.multi_reduction <add>, %360, %cst_124 [1] : vector<13x13xf32> to vector<13xf32>
    %362 = vector.shape_cast %361 : vector<13xf32> to vector<13x1xf32>
    %cst_125 = arith.constant 1.000000e+00 : f32
    %363 = vector.broadcast %cst_125 : f32 to vector<13x1xf32>
    %364 = arith.divf %363, %362 : vector<13x1xf32>
    %365 = vector.broadcast %364 : vector<13x1xf32> to vector<13x13xf32>
    %366 = arith.mulf %360, %365 : vector<13x13xf32>
    %367 = arith.truncf %366 : vector<13x13xf32> to vector<13x13xbf16>
    %cst_126 = arith.constant dense<0.000000e+00> : vector<13x8xf32>
    %368 = tpu.matmul %367, %354, %cst_126 {dimension_numbers = #tpu.dot_dimension_numbers<[1], [0], [0], [1], [0, 0, 1, 1], [], []>} : vector<13x13xbf16>, vector<13x8xbf16>, vector<13x8xf32> -> vector<13x8xf32>
    %369 = vector.extract_strided_slice %324 {offsets = [0, 16], sizes = [13, 8], strides = [1, 1]} : vector<13x96xf32> to vector<13x8xf32>
    %cst_127 = arith.constant 0.353553385 : f32
    %370 = vector.broadcast %cst_127 : f32 to vector<13x8xf32>
    %371 = arith.mulf %369, %370 : vector<13x8xf32>
    %372 = arith.truncf %371 : vector<13x8xf32> to vector<13x8xbf16>
    %373 = vector.extract_strided_slice %324 {offsets = [0, 48], sizes = [13, 8], strides = [1, 1]} : vector<13x96xf32> to vector<13x8xf32>
    %374 = arith.truncf %373 : vector<13x8xf32> to vector<13x8xbf16>
    %375 = vector.extract_strided_slice %324 {offsets = [0, 80], sizes = [13, 8], strides = [1, 1]} : vector<13x96xf32> to vector<13x8xf32>
    %376 = arith.truncf %375 : vector<13x8xf32> to vector<13x8xbf16>
    %cst_128 = arith.constant dense<0.000000e+00> : vector<13x13xf32>
    %377 = tpu.matmul %372, %374, %cst_128 {dimension_numbers = #tpu.dot_dimension_numbers<[1], [1], [0], [0], [0, 0, 1, 0], [], []>} : vector<13x8xbf16>, vector<13x8xbf16>, vector<13x13xf32> -> vector<13x13xf32>
    %cst_129 = arith.constant dense<0xFF800000> : vector<13xf32>
    %378 = vector.multi_reduction <maximumf>, %377, %cst_129 [1] : vector<13x13xf32> to vector<13xf32>
    %379 = vector.shape_cast %378 : vector<13xf32> to vector<13x1xf32>
    %380 = vector.broadcast %379 : vector<13x1xf32> to vector<13x13xf32>
    %381 = arith.subf %377, %380 : vector<13x13xf32>
    %382 = math.exp %381 : vector<13x13xf32>
    %cst_130 = arith.constant dense<0.000000e+00> : vector<13xf32>
    %383 = vector.multi_reduction <add>, %382, %cst_130 [1] : vector<13x13xf32> to vector<13xf32>
    %384 = vector.shape_cast %383 : vector<13xf32> to vector<13x1xf32>
    %cst_131 = arith.constant 1.000000e+00 : f32
    %385 = vector.broadcast %cst_131 : f32 to vector<13x1xf32>
    %386 = arith.divf %385, %384 : vector<13x1xf32>
    %387 = vector.broadcast %386 : vector<13x1xf32> to vector<13x13xf32>
    %388 = arith.mulf %382, %387 : vector<13x13xf32>
    %389 = arith.truncf %388 : vector<13x13xf32> to vector<13x13xbf16>
    %cst_132 = arith.constant dense<0.000000e+00> : vector<13x8xf32>
    %390 = tpu.matmul %389, %376, %cst_132 {dimension_numbers = #tpu.dot_dimension_numbers<[1], [0], [0], [1], [0, 0, 1, 1], [], []>} : vector<13x13xbf16>, vector<13x8xbf16>, vector<13x8xf32> -> vector<13x8xf32>
    %391 = vector.extract_strided_slice %324 {offsets = [0, 24], sizes = [13, 8], strides = [1, 1]} : vector<13x96xf32> to vector<13x8xf32>
    %cst_133 = arith.constant 0.353553385 : f32
    %392 = vector.broadcast %cst_133 : f32 to vector<13x8xf32>
    %393 = arith.mulf %391, %392 : vector<13x8xf32>
    %394 = arith.truncf %393 : vector<13x8xf32> to vector<13x8xbf16>
    %395 = vector.extract_strided_slice %324 {offsets = [0, 56], sizes = [13, 8], strides = [1, 1]} : vector<13x96xf32> to vector<13x8xf32>
    %396 = arith.truncf %395 : vector<13x8xf32> to vector<13x8xbf16>
    %397 = vector.extract_strided_slice %324 {offsets = [0, 88], sizes = [13, 8], strides = [1, 1]} : vector<13x96xf32> to vector<13x8xf32>
    %398 = arith.truncf %397 : vector<13x8xf32> to vector<13x8xbf16>
    %cst_134 = arith.constant dense<0.000000e+00> : vector<13x13xf32>
    %399 = tpu.matmul %394, %396, %cst_134 {dimension_numbers = #tpu.dot_dimension_numbers<[1], [1], [0], [0], [0, 0, 1, 0], [], []>} : vector<13x8xbf16>, vector<13x8xbf16>, vector<13x13xf32> -> vector<13x13xf32>
    %cst_135 = arith.constant dense<0xFF800000> : vector<13xf32>
    %400 = vector.multi_reduction <maximumf>, %399, %cst_135 [1] : vector<13x13xf32> to vector<13xf32>
    %401 = vector.shape_cast %400 : vector<13xf32> to vector<13x1xf32>
    %402 = vector.broadcast %401 : vector<13x1xf32> to vector<13x13xf32>
    %403 = arith.subf %399, %402 : vector<13x13xf32>
    %404 = math.exp %403 : vector<13x13xf32>
    %cst_136 = arith.constant dense<0.000000e+00> : vector<13xf32>
    %405 = vector.multi_reduction <add>, %404, %cst_136 [1] : vector<13x13xf32> to vector<13xf32>
    %406 = vector.shape_cast %405 : vector<13xf32> to vector<13x1xf32>
    %cst_137 = arith.constant 1.000000e+00 : f32
    %407 = vector.broadcast %cst_137 : f32 to vector<13x1xf32>
    %408 = arith.divf %407, %406 : vector<13x1xf32>
    %409 = vector.broadcast %408 : vector<13x1xf32> to vector<13x13xf32>
    %410 = arith.mulf %404, %409 : vector<13x13xf32>
    %411 = arith.truncf %410 : vector<13x13xf32> to vector<13x13xbf16>
    %cst_138 = arith.constant dense<0.000000e+00> : vector<13x8xf32>
    %412 = tpu.matmul %411, %398, %cst_138 {dimension_numbers = #tpu.dot_dimension_numbers<[1], [0], [0], [1], [0, 0, 1, 1], [], []>} : vector<13x13xbf16>, vector<13x8xbf16>, vector<13x8xf32> -> vector<13x8xf32>
    %413 = tpu.concatenate %346, %368, %390, %412 in 1 : vector<13x8xf32>, vector<13x8xf32>, vector<13x8xf32>, vector<13x8xf32> -> vector<13x32xf32>
    %414 = tpu.concatenate %143, %233, %323, %413 in 0 : vector<13x32xf32>, vector<13x32xf32>, vector<13x32xf32>, vector<13x32xf32> -> vector<52x32xf32>
    %415 = arith.truncf %414 : vector<52x32xf32> to vector<52x32xbf16>
    %cst_139 = arith.constant dense<0.000000e+00> : vector<52x32xf32>
    %416 = tpu.matmul %415, %8, %cst_139 {dimension_numbers = #tpu.dot_dimension_numbers<[1], [0], [0], [1], [0, 0, 1, 1], [], []>} : vector<52x32xbf16>, vector<32x32xbf16>, vector<52x32xf32> -> vector<52x32xf32>
    %417 = vector.broadcast %10 : vector<1x32xf32> to vector<52x32xf32>
    %418 = arith.addf %416, %417 : vector<52x32xf32>
    %419 = arith.addf %27, %418 : vector<52x32xf32>
    %cst_140 = arith.constant dense<0.000000e+00> : vector<52xf32>
    %420 = vector.multi_reduction <add>, %419, %cst_140 [1] : vector<52x32xf32> to vector<52xf32>
    %421 = vector.shape_cast %420 : vector<52xf32> to vector<52x1xf32>
    %cst_141 = arith.constant 3.200000e+01 : f32
    %422 = vector.broadcast %cst_141 : f32 to vector<52x1xf32>
    %423 = arith.divf %421, %422 : vector<52x1xf32>
    %424 = vector.broadcast %423 : vector<52x1xf32> to vector<52x32xf32>
    %425 = arith.subf %419, %424 : vector<52x32xf32>
    %426 = arith.mulf %425, %425 : vector<52x32xf32>
    %cst_142 = arith.constant dense<0.000000e+00> : vector<52xf32>
    %427 = vector.multi_reduction <add>, %426, %cst_142 [1] : vector<52x32xf32> to vector<52xf32>
    %428 = vector.shape_cast %427 : vector<52xf32> to vector<52x1xf32>
    %cst_143 = arith.constant 3.200000e+01 : f32
    %429 = vector.broadcast %cst_143 : f32 to vector<52x1xf32>
    %430 = arith.divf %428, %429 : vector<52x1xf32>
    %431 = vector.broadcast %423 : vector<52x1xf32> to vector<52x32xf32>
    %432 = arith.subf %419, %431 : vector<52x32xf32>
    %cst_144 = arith.constant 9.99999974E-6 : f32
    %433 = vector.broadcast %cst_144 : f32 to vector<52x1xf32>
    %434 = arith.addf %430, %433 : vector<52x1xf32>
    %435 = math.rsqrt %434 : vector<52x1xf32>
    %436 = vector.broadcast %435 : vector<52x1xf32> to vector<52x32xf32>
    %437 = arith.mulf %432, %436 : vector<52x32xf32>
    %438 = vector.broadcast %24 : vector<1x32xf32> to vector<52x32xf32>
    %439 = arith.mulf %437, %438 : vector<52x32xf32>
    %440 = vector.broadcast %26 : vector<1x32xf32> to vector<52x32xf32>
    %441 = arith.addf %439, %440 : vector<52x32xf32>
    %442 = arith.truncf %441 : vector<52x32xf32> to vector<52x32xbf16>
    %cst_145 = arith.constant dense<0.000000e+00> : vector<52x128xf32>
    %443 = tpu.matmul %442, %12, %cst_145 {dimension_numbers = #tpu.dot_dimension_numbers<[1], [0], [0], [1], [0, 0, 1, 1], [], []>} : vector<52x32xbf16>, vector<32x128xbf16>, vector<52x128xf32> -> vector<52x128xf32>
    %444 = vector.broadcast %14 : vector<1x128xf32> to vector<52x128xf32>
    %445 = arith.addf %443, %444 : vector<52x128xf32>
    %cst_146 = arith.constant 5.000000e-01 : f32
    %446 = vector.broadcast %cst_146 : f32 to vector<52x128xf32>
    %447 = arith.mulf %446, %445 : vector<52x128xf32>
    %cst_147 = arith.constant 0.707106769 : f32
    %448 = vector.broadcast %cst_147 : f32 to vector<52x128xf32>
    %449 = arith.mulf %445, %448 : vector<52x128xf32>
    %450 = math.erf %449 : vector<52x128xf32>
    %cst_148 = arith.constant 1.000000e+00 : f32
    %451 = vector.broadcast %cst_148 : f32 to vector<52x128xf32>
    %452 = arith.addf %451, %450 : vector<52x128xf32>
    %453 = arith.mulf %447, %452 : vector<52x128xf32>
    %454 = arith.truncf %453 : vector<52x128xf32> to vector<52x128xbf16>
    %cst_149 = arith.constant dense<0.000000e+00> : vector<52x32xf32>
    %455 = tpu.matmul %454, %16, %cst_149 {dimension_numbers = #tpu.dot_dimension_numbers<[1], [0], [0], [1], [0, 0, 1, 1], [], []>} : vector<52x128xbf16>, vector<128x32xbf16>, vector<52x32xf32> -> vector<52x32xf32>
    %456 = vector.broadcast %18 : vector<1x32xf32> to vector<52x32xf32>
    %457 = arith.addf %455, %456 : vector<52x32xf32>
    %458 = arith.addf %419, %457 : vector<52x32xf32>
    %c0_150 = arith.constant 0 : index
    %c0_151 = arith.constant 0 : index
    %459 = vector.load %arg15[%c0_150, %c0_151] : memref<52x32xf32, #tpu.memory_space<vmem>>, vector<52x32xf32>
    tpu.vector_store %arg15[%c0_150, %c0_151], %458 {strides = array<i32>} : memref<52x32xf32, #tpu.memory_space<vmem>>, vector<52x32xf32>,
    %c1_i32 = arith.constant 1 : i32
    %460 = arith.cmpi eq, %arg0, %c1_i32 : i32
    %461 = arith.extui %460 : i1 to i32
    %c0_i32_152 = arith.constant 0 : i32
    %462 = arith.cmpi ne, %461, %c0_i32_152 : i32
    scf.if %462 {
      %c0_153 = arith.constant 0 : index
      %c0_154 = arith.constant 0 : index
      %463 = vector.load %arg15[%c0_153, %c0_154] : memref<52x32xf32, #tpu.memory_space<vmem>>, vector<52x32xf32>
      %464 = arith.truncf %463 : vector<52x32xf32> to vector<52x32xbf16>
      %c0_155 = arith.constant 0 : index
      %c0_156 = arith.constant 0 : index
      %465 = vector.load %arg14[%c0_155, %c0_156] : memref<52x32xbf16, #tpu.memory_space<vmem>>, vector<52x32xbf16>
      tpu.vector_store %arg14[%c0_155, %c0_156], %464 {strides = array<i32>} : memref<52x32xbf16, #tpu.memory_space<vmem>>, vector<52x32xbf16>,
    } else {
    }
    return
  }
  func.func @transform_0(%arg0: i32) -> (i32, i32) {
    %c0_i32 = arith.constant 0 : i32
    %c0_i32_0 = arith.constant 0 : i32
    %c0_i32_1 = arith.constant 0 : i32
    return %c0_i32, %c0_i32_0 : i32, i32
  }
  func.func @transform_1(%arg0: i32) -> (i32, i32, i32) {
    %c0_i32 = arith.constant 0 : i32
    %c0_i32_0 = arith.constant 0 : i32
    %c0_i32_1 = arith.constant 0 : i32
    return %arg0, %c0_i32, %c0_i32_0 : i32, i32, i32
  }
  func.func @transform_2(%arg0: i32) -> (i32, i32, i32) {
    %c0_i32 = arith.constant 0 : i32
    %c0_i32_0 = arith.constant 0 : i32
    %c0_i32_1 = arith.constant 0 : i32
    return %arg0, %c0_i32, %c0_i32_0 : i32, i32, i32
  }
  func.func @transform_3(%arg0: i32) -> (i32, i32, i32) {
    %c0_i32 = arith.constant 0 : i32
    %c0_i32_0 = arith.constant 0 : i32
    %c0_i32_1 = arith.constant 0 : i32
    return %arg0, %c0_i32, %c0_i32_0 : i32, i32, i32
  }
  func.func @transform_4(%arg0: i32) -> (i32, i32, i32) {
    %c0_i32 = arith.constant 0 : i32
    %c0_i32_0 = arith.constant 0 : i32
    %c0_i32_1 = arith.constant 0 : i32
    return %arg0, %c0_i32, %c0_i32_0 : i32, i32, i32
  }
  func.func @transform_5(%arg0: i32) -> (i32, i32, i32) {
    %c0_i32 = arith.constant 0 : i32
    %c0_i32_0 = arith.constant 0 : i32
    %c0_i32_1 = arith.constant 0 : i32
    return %arg0, %c0_i32, %c0_i32_0 : i32, i32, i32
  }
  func.func @transform_6(%arg0: i32) -> (i32, i32, i32) {
    %c0_i32 = arith.constant 0 : i32
    %c0_i32_0 = arith.constant 0 : i32
    %c0_i32_1 = arith.constant 0 : i32
    return %arg0, %c0_i32, %c0_i32_0 : i32, i32, i32
  }
  func.func @transform_7(%arg0: i32) -> (i32, i32, i32) {
    %c0_i32 = arith.constant 0 : i32
    %c0_i32_0 = arith.constant 0 : i32
    %c0_i32_1 = arith.constant 0 : i32
    return %arg0, %c0_i32, %c0_i32_0 : i32, i32, i32
  }
  func.func @transform_8(%arg0: i32) -> (i32, i32, i32) {
    %c0_i32 = arith.constant 0 : i32
    %c0_i32_0 = arith.constant 0 : i32
    %c0_i32_1 = arith.constant 0 : i32
    return %arg0, %c0_i32, %c0_i32_0 : i32, i32, i32
  }
  func.func @transform_9(%arg0: i32) -> (i32, i32, i32) {
    %c0_i32 = arith.constant 0 : i32
    %c0_i32_0 = arith.constant 0 : i32
    %c0_i32_1 = arith.constant 0 : i32
    return %arg0, %c0_i32, %c0_i32_0 : i32, i32, i32
  }
  func.func @transform_10(%arg0: i32) -> (i32, i32, i32) {
    %c0_i32 = arith.constant 0 : i32
    %c0_i32_0 = arith.constant 0 : i32
    %c0_i32_1 = arith.constant 0 : i32
    return %arg0, %c0_i32, %c0_i32_0 : i32, i32, i32
  }
  func.func @transform_11(%arg0: i32) -> (i32, i32, i32) {
    %c0_i32 = arith.constant 0 : i32
    %c0_i32_0 = arith.constant 0 : i32
    %c0_i32_1 = arith.constant 0 : i32
    return %arg0, %c0_i32, %c0_i32_0 : i32, i32, i32
  }
  func.func @transform_12(%arg0: i32) -> (i32, i32, i32) {
    %c0_i32 = arith.constant 0 : i32
    %c0_i32_0 = arith.constant 0 : i32
    %c0_i32_1 = arith.constant 0 : i32
    return %arg0, %c0_i32, %c0_i32_0 : i32, i32, i32
  }
  func.func @transform_13(%arg0: i32) -> (i32, i32) {
    %c0_i32 = arith.constant 0 : i32
    %c0_i32_0 = arith.constant 0 : i32
    %c0_i32_1 = arith.constant 0 : i32
    return %c0_i32, %c0_i32_0 : i32, i32
  }
}

module attributes {stable_mosaic.version = 11 : i64} {
  func.func @embed_seq_kernel(%arg0: i32, %arg1: memref<1x8x256xbf16, #tpu.memory_space<vmem>>, %arg2: memref<256x32xbf16, #tpu.memory_space<vmem>>, %arg3: memref<1x32xf32, #tpu.memory_space<vmem>>, %arg4: memref<8x32xf32, #tpu.memory_space<vmem>>, %arg5: memref<9x32xf32, #tpu.memory_space<vmem>>, %arg6: memref<1x32xf32, #tpu.memory_space<vmem>>, %arg7: memref<1x17x32xbf16, #tpu.memory_space<vmem>>) attributes {dimension_semantics = [#tpu.dimension_semantics<parallel>], iteration_bounds = array<i64: 2>, scalar_prefetch = 0 : i64, scratch_operands = 0 : i64, tpu.core_type = #tpu.core_type<tc>, window_params = [{transform_indices = @transform_0, window_bounds = array<i64: 1, 8, 256>}, {pipeline_mode = #tpu.pipeline_mode<synchronous>, transform_indices = @transform_1, window_bounds = array<i64: 256, 32>}, {pipeline_mode = #tpu.pipeline_mode<synchronous>, transform_indices = @transform_2, window_bounds = array<i64: 1, 32>}, {pipeline_mode = #tpu.pipeline_mode<synchronous>, transform_indices = @transform_3, window_bounds = array<i64: 8, 32>}, {pipeline_mode = #tpu.pipeline_mode<synchronous>, transform_indices = @transform_4, window_bounds = array<i64: 9, 32>}, {pipeline_mode = #tpu.pipeline_mode<synchronous>, transform_indices = @transform_5, window_bounds = array<i64: 1, 32>}, {transform_indices = @transform_6, window_bounds = array<i64: 1, 17, 32>}]} {
    %c0 = arith.constant 0 : index
    %c0_0 = arith.constant 0 : index
    %c0_1 = arith.constant 0 : index
    %0 = vector.load %arg1[%c0, %c0_0, %c0_1] : memref<1x8x256xbf16, #tpu.memory_space<vmem>>, vector<1x8x256xbf16>
    %1 = vector.shape_cast %0 : vector<1x8x256xbf16> to vector<8x256xbf16>
    %c0_2 = arith.constant 0 : index
    %c0_3 = arith.constant 0 : index
    %2 = vector.load %arg2[%c0_2, %c0_3] : memref<256x32xbf16, #tpu.memory_space<vmem>>, vector<256x32xbf16>
    %cst = arith.constant dense<0.000000e+00> : vector<8x32xf32>
    %3 = tpu.matmul %1, %2, %cst {dimension_numbers = #tpu.dot_dimension_numbers<[1], [0], [0], [1], [0, 0, 1, 1], [], []>} : vector<8x256xbf16>, vector<256x32xbf16>, vector<8x32xf32> -> vector<8x32xf32>
    %c0_4 = arith.constant 0 : index
    %c0_5 = arith.constant 0 : index
    %4 = vector.load %arg3[%c0_4, %c0_5] : memref<1x32xf32, #tpu.memory_space<vmem>>, vector<1x32xf32>
    %5 = vector.broadcast %4 : vector<1x32xf32> to vector<8x32xf32>
    %6 = arith.addf %3, %5 : vector<8x32xf32>
    %c0_6 = arith.constant 0 : index
    %c0_7 = arith.constant 0 : index
    %7 = vector.load %arg4[%c0_6, %c0_7] : memref<8x32xf32, #tpu.memory_space<vmem>>, vector<8x32xf32>
    %8 = arith.addf %6, %7 : vector<8x32xf32>
    %c0_8 = arith.constant 0 : index
    %c0_9 = arith.constant 0 : index
    %9 = vector.load %arg6[%c0_8, %c0_9] : memref<1x32xf32, #tpu.memory_space<vmem>>, vector<1x32xf32>
    %10 = vector.broadcast %9 : vector<1x32xf32> to vector<8x32xf32>
    %11 = arith.addf %8, %10 : vector<8x32xf32>
    %c0_10 = arith.constant 0 : index
    %c0_11 = arith.constant 0 : index
    %12 = vector.load %arg5[%c0_10, %c0_11] : memref<9x32xf32, #tpu.memory_space<vmem>>, vector<9x32xf32>
    %c0_12 = arith.constant 0 : index
    %c0_13 = arith.constant 0 : index
    %13 = vector.load %arg6[%c0_12, %c0_13] : memref<1x32xf32, #tpu.memory_space<vmem>>, vector<1x32xf32>
    %14 = vector.broadcast %13 : vector<1x32xf32> to vector<9x32xf32>
    %15 = arith.addf %12, %14 : vector<9x32xf32>
    %16 = tpu.concatenate %15, %11 in 0 : vector<9x32xf32>, vector<8x32xf32> -> vector<17x32xf32>
    %17 = arith.truncf %16 : vector<17x32xf32> to vector<17x32xbf16>
    %c0_14 = arith.constant 0 : index
    %c0_15 = arith.constant 0 : index
    %c0_16 = arith.constant 0 : index
    %18 = vector.load %arg7[%c0_14, %c0_15, %c0_16] : memref<1x17x32xbf16, #tpu.memory_space<vmem>>, vector<1x17x32xbf16>
    %19 = vector.shape_cast %18 : vector<1x17x32xbf16> to vector<17x32xbf16>
    %20 = vector.shape_cast %17 : vector<17x32xbf16> to vector<1x17x32xbf16>
    tpu.vector_store %arg7[%c0_14, %c0_15, %c0_16], %20 {strides = array<i32>} : memref<1x17x32xbf16, #tpu.memory_space<vmem>>, vector<1x17x32xbf16>,
    return
  }
  func.func @transform_0(%arg0: i32) -> (i32, i32, i32) {
    %c0_i32 = arith.constant 0 : i32
    %c0_i32_0 = arith.constant 0 : i32
    %c0_i32_1 = arith.constant 0 : i32
    return %arg0, %c0_i32, %c0_i32_0 : i32, i32, i32
  }
  func.func @transform_1(%arg0: i32) -> (i32, i32) {
    %c0_i32 = arith.constant 0 : i32
    %c0_i32_0 = arith.constant 0 : i32
    %c0_i32_1 = arith.constant 0 : i32
    return %c0_i32, %c0_i32_0 : i32, i32
  }
  func.func @transform_2(%arg0: i32) -> (i32, i32) {
    %c0_i32 = arith.constant 0 : i32
    %c0_i32_0 = arith.constant 0 : i32
    %c0_i32_1 = arith.constant 0 : i32
    return %c0_i32, %c0_i32_0 : i32, i32
  }
  func.func @transform_3(%arg0: i32) -> (i32, i32) {
    %c0_i32 = arith.constant 0 : i32
    %c0_i32_0 = arith.constant 0 : i32
    %c0_i32_1 = arith.constant 0 : i32
    return %c0_i32, %c0_i32_0 : i32, i32
  }
  func.func @transform_4(%arg0: i32) -> (i32, i32) {
    %c0_i32 = arith.constant 0 : i32
    %c0_i32_0 = arith.constant 0 : i32
    %c0_i32_1 = arith.constant 0 : i32
    return %c0_i32, %c0_i32_0 : i32, i32
  }
  func.func @transform_5(%arg0: i32) -> (i32, i32) {
    %c0_i32 = arith.constant 0 : i32
    %c0_i32_0 = arith.constant 0 : i32
    %c0_i32_1 = arith.constant 0 : i32
    return %c0_i32, %c0_i32_0 : i32, i32
  }
  func.func @transform_6(%arg0: i32) -> (i32, i32, i32) {
    %c0_i32 = arith.constant 0 : i32
    %c0_i32_0 = arith.constant 0 : i32
    %c0_i32_1 = arith.constant 0 : i32
    return %arg0, %c0_i32, %c0_i32_0 : i32, i32, i32
  }
}

module attributes {stable_mosaic.version = 11 : i64} {
  func.func @stack_block_kernel(%arg0: i32, %arg1: memref<34x32xbf16, #tpu.memory_space<vmem>>, %arg2: memref<1x1x32xf32, #tpu.memory_space<vmem>>, %arg3: memref<1x1x32xf32, #tpu.memory_space<vmem>>, %arg4: memref<1x32x96xbf16, #tpu.memory_space<vmem>>, %arg5: memref<1x1x96xf32, #tpu.memory_space<vmem>>, %arg6: memref<1x32x32xbf16, #tpu.memory_space<vmem>>, %arg7: memref<1x1x32xf32, #tpu.memory_space<vmem>>, %arg8: memref<1x1x32xf32, #tpu.memory_space<vmem>>, %arg9: memref<1x1x32xf32, #tpu.memory_space<vmem>>, %arg10: memref<1x32x128xbf16, #tpu.memory_space<vmem>>, %arg11: memref<1x1x128xf32, #tpu.memory_space<vmem>>, %arg12: memref<1x128x32xbf16, #tpu.memory_space<vmem>>, %arg13: memref<1x1x32xf32, #tpu.memory_space<vmem>>, %arg14: memref<34x32xbf16, #tpu.memory_space<vmem>>, %arg15: memref<34x32xf32, #tpu.memory_space<vmem>>) attributes {dimension_semantics = [#tpu.dimension_semantics<arbitrary>], iteration_bounds = array<i64: 2>, scalar_prefetch = 0 : i64, scratch_operands = 1 : i64, tpu.core_type = #tpu.core_type<tc>, window_params = [{pipeline_mode = #tpu.pipeline_mode<synchronous>, transform_indices = @transform_0, window_bounds = array<i64: 34, 32>}, {transform_indices = @transform_1, window_bounds = array<i64: 1, 1, 32>}, {transform_indices = @transform_2, window_bounds = array<i64: 1, 1, 32>}, {transform_indices = @transform_3, window_bounds = array<i64: 1, 32, 96>}, {transform_indices = @transform_4, window_bounds = array<i64: 1, 1, 96>}, {transform_indices = @transform_5, window_bounds = array<i64: 1, 32, 32>}, {transform_indices = @transform_6, window_bounds = array<i64: 1, 1, 32>}, {transform_indices = @transform_7, window_bounds = array<i64: 1, 1, 32>}, {transform_indices = @transform_8, window_bounds = array<i64: 1, 1, 32>}, {transform_indices = @transform_9, window_bounds = array<i64: 1, 32, 128>}, {transform_indices = @transform_10, window_bounds = array<i64: 1, 1, 128>}, {transform_indices = @transform_11, window_bounds = array<i64: 1, 128, 32>}, {transform_indices = @transform_12, window_bounds = array<i64: 1, 1, 32>}, {pipeline_mode = #tpu.pipeline_mode<synchronous>, transform_indices = @transform_13, window_bounds = array<i64: 34, 32>}]} {
    %c0_i32 = arith.constant 0 : i32
    %0 = arith.cmpi eq, %arg0, %c0_i32 : i32
    %1 = arith.extui %0 : i1 to i32
    %c0_i32_0 = arith.constant 0 : i32
    %2 = arith.cmpi ne, %1, %c0_i32_0 : i32
    scf.if %2 {
      %c0_105 = arith.constant 0 : index
      %c0_106 = arith.constant 0 : index
      %283 = vector.load %arg1[%c0_105, %c0_106] : memref<34x32xbf16, #tpu.memory_space<vmem>>, vector<34x32xbf16>
      %284 = arith.extf %283 : vector<34x32xbf16> to vector<34x32xf32>
      %c0_107 = arith.constant 0 : index
      %c0_108 = arith.constant 0 : index
      %285 = vector.load %arg15[%c0_107, %c0_108] : memref<34x32xf32, #tpu.memory_space<vmem>>, vector<34x32xf32>
      tpu.vector_store %arg15[%c0_107, %c0_108], %284 {strides = array<i32>} : memref<34x32xf32, #tpu.memory_space<vmem>>, vector<34x32xf32>,
    } else {
    }
    %c0 = arith.constant 0 : index
    %c0_1 = arith.constant 0 : index
    %c0_2 = arith.constant 0 : index
    %3 = vector.load %arg4[%c0, %c0_1, %c0_2] : memref<1x32x96xbf16, #tpu.memory_space<vmem>>, vector<1x32x96xbf16>
    %4 = vector.shape_cast %3 : vector<1x32x96xbf16> to vector<32x96xbf16>
    %c0_3 = arith.constant 0 : index
    %c0_4 = arith.constant 0 : index
    %c0_5 = arith.constant 0 : index
    %5 = vector.load %arg5[%c0_3, %c0_4, %c0_5] : memref<1x1x96xf32, #tpu.memory_space<vmem>>, vector<1x1x96xf32>
    %6 = vector.shape_cast %5 : vector<1x1x96xf32> to vector<1x96xf32>
    %c0_6 = arith.constant 0 : index
    %c0_7 = arith.constant 0 : index
    %c0_8 = arith.constant 0 : index
    %7 = vector.load %arg6[%c0_6, %c0_7, %c0_8] : memref<1x32x32xbf16, #tpu.memory_space<vmem>>, vector<1x32x32xbf16>
    %8 = vector.shape_cast %7 : vector<1x32x32xbf16> to vector<32x32xbf16>
    %c0_9 = arith.constant 0 : index
    %c0_10 = arith.constant 0 : index
    %c0_11 = arith.constant 0 : index
    %9 = vector.load %arg7[%c0_9, %c0_10, %c0_11] : memref<1x1x32xf32, #tpu.memory_space<vmem>>, vector<1x1x32xf32>
    %10 = vector.shape_cast %9 : vector<1x1x32xf32> to vector<1x32xf32>
    %c0_12 = arith.constant 0 : index
    %c0_13 = arith.constant 0 : index
    %c0_14 = arith.constant 0 : index
    %11 = vector.load %arg10[%c0_12, %c0_13, %c0_14] : memref<1x32x128xbf16, #tpu.memory_space<vmem>>, vector<1x32x128xbf16>
    %12 = vector.shape_cast %11 : vector<1x32x128xbf16> to vector<32x128xbf16>
    %c0_15 = arith.constant 0 : index
    %c0_16 = arith.constant 0 : index
    %c0_17 = arith.constant 0 : index
    %13 = vector.load %arg11[%c0_15, %c0_16, %c0_17] : memref<1x1x128xf32, #tpu.memory_space<vmem>>, vector<1x1x128xf32>
    %14 = vector.shape_cast %13 : vector<1x1x128xf32> to vector<1x128xf32>
    %c0_18 = arith.constant 0 : index
    %c0_19 = arith.constant 0 : index
    %c0_20 = arith.constant 0 : index
    %15 = vector.load %arg12[%c0_18, %c0_19, %c0_20] : memref<1x128x32xbf16, #tpu.memory_space<vmem>>, vector<1x128x32xbf16>
    %16 = vector.shape_cast %15 : vector<1x128x32xbf16> to vector<128x32xbf16>
    %c0_21 = arith.constant 0 : index
    %c0_22 = arith.constant 0 : index
    %c0_23 = arith.constant 0 : index
    %17 = vector.load %arg13[%c0_21, %c0_22, %c0_23] : memref<1x1x32xf32, #tpu.memory_space<vmem>>, vector<1x1x32xf32>
    %18 = vector.shape_cast %17 : vector<1x1x32xf32> to vector<1x32xf32>
    %c0_24 = arith.constant 0 : index
    %c0_25 = arith.constant 0 : index
    %c0_26 = arith.constant 0 : index
    %19 = vector.load %arg2[%c0_24, %c0_25, %c0_26] : memref<1x1x32xf32, #tpu.memory_space<vmem>>, vector<1x1x32xf32>
    %20 = vector.shape_cast %19 : vector<1x1x32xf32> to vector<1x32xf32>
    %c0_27 = arith.constant 0 : index
    %c0_28 = arith.constant 0 : index
    %c0_29 = arith.constant 0 : index
    %21 = vector.load %arg3[%c0_27, %c0_28, %c0_29] : memref<1x1x32xf32, #tpu.memory_space<vmem>>, vector<1x1x32xf32>
    %22 = vector.shape_cast %21 : vector<1x1x32xf32> to vector<1x32xf32>
    %c0_30 = arith.constant 0 : index
    %c0_31 = arith.constant 0 : index
    %c0_32 = arith.constant 0 : index
    %23 = vector.load %arg8[%c0_30, %c0_31, %c0_32] : memref<1x1x32xf32, #tpu.memory_space<vmem>>, vector<1x1x32xf32>
    %24 = vector.shape_cast %23 : vector<1x1x32xf32> to vector<1x32xf32>
    %c0_33 = arith.constant 0 : index
    %c0_34 = arith.constant 0 : index
    %c0_35 = arith.constant 0 : index
    %25 = vector.load %arg9[%c0_33, %c0_34, %c0_35] : memref<1x1x32xf32, #tpu.memory_space<vmem>>, vector<1x1x32xf32>
    %26 = vector.shape_cast %25 : vector<1x1x32xf32> to vector<1x32xf32>
    %c0_36 = arith.constant 0 : index
    %c0_37 = arith.constant 0 : index
    %27 = vector.load %arg15[%c0_36, %c0_37] : memref<34x32xf32, #tpu.memory_space<vmem>>, vector<34x32xf32>
    %cst = arith.constant dense<0.000000e+00> : vector<34xf32>
    %28 = vector.multi_reduction <add>, %27, %cst [1] : vector<34x32xf32> to vector<34xf32>
    %29 = vector.shape_cast %28 : vector<34xf32> to vector<34x1xf32>
    %cst_38 = arith.constant 3.200000e+01 : f32
    %30 = vector.broadcast %cst_38 : f32 to vector<34x1xf32>
    %31 = arith.divf %29, %30 : vector<34x1xf32>
    %32 = vector.broadcast %31 : vector<34x1xf32> to vector<34x32xf32>
    %33 = arith.subf %27, %32 : vector<34x32xf32>
    %34 = arith.mulf %33, %33 : vector<34x32xf32>
    %cst_39 = arith.constant dense<0.000000e+00> : vector<34xf32>
    %35 = vector.multi_reduction <add>, %34, %cst_39 [1] : vector<34x32xf32> to vector<34xf32>
    %36 = vector.shape_cast %35 : vector<34xf32> to vector<34x1xf32>
    %cst_40 = arith.constant 3.200000e+01 : f32
    %37 = vector.broadcast %cst_40 : f32 to vector<34x1xf32>
    %38 = arith.divf %36, %37 : vector<34x1xf32>
    %39 = vector.broadcast %31 : vector<34x1xf32> to vector<34x32xf32>
    %40 = arith.subf %27, %39 : vector<34x32xf32>
    %cst_41 = arith.constant 9.99999974E-6 : f32
    %41 = vector.broadcast %cst_41 : f32 to vector<34x1xf32>
    %42 = arith.addf %38, %41 : vector<34x1xf32>
    %43 = math.rsqrt %42 : vector<34x1xf32>
    %44 = vector.broadcast %43 : vector<34x1xf32> to vector<34x32xf32>
    %45 = arith.mulf %40, %44 : vector<34x32xf32>
    %46 = vector.broadcast %20 : vector<1x32xf32> to vector<34x32xf32>
    %47 = arith.mulf %45, %46 : vector<34x32xf32>
    %48 = vector.broadcast %22 : vector<1x32xf32> to vector<34x32xf32>
    %49 = arith.addf %47, %48 : vector<34x32xf32>
    %50 = arith.truncf %49 : vector<34x32xf32> to vector<34x32xbf16>
    %cst_42 = arith.constant dense<0.000000e+00> : vector<34x96xf32>
    %51 = tpu.matmul %50, %4, %cst_42 {dimension_numbers = #tpu.dot_dimension_numbers<[1], [0], [0], [1], [0, 0, 1, 1], [], []>} : vector<34x32xbf16>, vector<32x96xbf16>, vector<34x96xf32> -> vector<34x96xf32>
    %52 = vector.broadcast %6 : vector<1x96xf32> to vector<34x96xf32>
    %53 = arith.addf %51, %52 : vector<34x96xf32>
    %54 = vector.extract_strided_slice %53 {offsets = [0, 0], sizes = [17, 96], strides = [1, 1]} : vector<34x96xf32> to vector<17x96xf32>
    %55 = vector.extract_strided_slice %54 {offsets = [0, 0], sizes = [17, 8], strides = [1, 1]} : vector<17x96xf32> to vector<17x8xf32>
    %cst_43 = arith.constant 0.353553385 : f32
    %56 = vector.broadcast %cst_43 : f32 to vector<17x8xf32>
    %57 = arith.mulf %55, %56 : vector<17x8xf32>
    %58 = arith.truncf %57 : vector<17x8xf32> to vector<17x8xbf16>
    %59 = vector.extract_strided_slice %54 {offsets = [0, 32], sizes = [17, 8], strides = [1, 1]} : vector<17x96xf32> to vector<17x8xf32>
    %60 = arith.truncf %59 : vector<17x8xf32> to vector<17x8xbf16>
    %61 = vector.extract_strided_slice %54 {offsets = [0, 64], sizes = [17, 8], strides = [1, 1]} : vector<17x96xf32> to vector<17x8xf32>
    %62 = arith.truncf %61 : vector<17x8xf32> to vector<17x8xbf16>
    %cst_44 = arith.constant dense<0.000000e+00> : vector<17x17xf32>
    %63 = tpu.matmul %58, %60, %cst_44 {dimension_numbers = #tpu.dot_dimension_numbers<[1], [1], [0], [0], [0, 0, 1, 0], [], []>} : vector<17x8xbf16>, vector<17x8xbf16>, vector<17x17xf32> -> vector<17x17xf32>
    %cst_45 = arith.constant dense<0xFF800000> : vector<17xf32>
    %64 = vector.multi_reduction <maximumf>, %63, %cst_45 [1] : vector<17x17xf32> to vector<17xf32>
    %65 = vector.shape_cast %64 : vector<17xf32> to vector<17x1xf32>
    %66 = vector.broadcast %65 : vector<17x1xf32> to vector<17x17xf32>
    %67 = arith.subf %63, %66 : vector<17x17xf32>
    %68 = math.exp %67 : vector<17x17xf32>
    %cst_46 = arith.constant dense<0.000000e+00> : vector<17xf32>
    %69 = vector.multi_reduction <add>, %68, %cst_46 [1] : vector<17x17xf32> to vector<17xf32>
    %70 = vector.shape_cast %69 : vector<17xf32> to vector<17x1xf32>
    %cst_47 = arith.constant 1.000000e+00 : f32
    %71 = vector.broadcast %cst_47 : f32 to vector<17x1xf32>
    %72 = arith.divf %71, %70 : vector<17x1xf32>
    %73 = vector.broadcast %72 : vector<17x1xf32> to vector<17x17xf32>
    %74 = arith.mulf %68, %73 : vector<17x17xf32>
    %75 = arith.truncf %74 : vector<17x17xf32> to vector<17x17xbf16>
    %cst_48 = arith.constant dense<0.000000e+00> : vector<17x8xf32>
    %76 = tpu.matmul %75, %62, %cst_48 {dimension_numbers = #tpu.dot_dimension_numbers<[1], [0], [0], [1], [0, 0, 1, 1], [], []>} : vector<17x17xbf16>, vector<17x8xbf16>, vector<17x8xf32> -> vector<17x8xf32>
    %77 = vector.extract_strided_slice %54 {offsets = [0, 8], sizes = [17, 8], strides = [1, 1]} : vector<17x96xf32> to vector<17x8xf32>
    %cst_49 = arith.constant 0.353553385 : f32
    %78 = vector.broadcast %cst_49 : f32 to vector<17x8xf32>
    %79 = arith.mulf %77, %78 : vector<17x8xf32>
    %80 = arith.truncf %79 : vector<17x8xf32> to vector<17x8xbf16>
    %81 = vector.extract_strided_slice %54 {offsets = [0, 40], sizes = [17, 8], strides = [1, 1]} : vector<17x96xf32> to vector<17x8xf32>
    %82 = arith.truncf %81 : vector<17x8xf32> to vector<17x8xbf16>
    %83 = vector.extract_strided_slice %54 {offsets = [0, 72], sizes = [17, 8], strides = [1, 1]} : vector<17x96xf32> to vector<17x8xf32>
    %84 = arith.truncf %83 : vector<17x8xf32> to vector<17x8xbf16>
    %cst_50 = arith.constant dense<0.000000e+00> : vector<17x17xf32>
    %85 = tpu.matmul %80, %82, %cst_50 {dimension_numbers = #tpu.dot_dimension_numbers<[1], [1], [0], [0], [0, 0, 1, 0], [], []>} : vector<17x8xbf16>, vector<17x8xbf16>, vector<17x17xf32> -> vector<17x17xf32>
    %cst_51 = arith.constant dense<0xFF800000> : vector<17xf32>
    %86 = vector.multi_reduction <maximumf>, %85, %cst_51 [1] : vector<17x17xf32> to vector<17xf32>
    %87 = vector.shape_cast %86 : vector<17xf32> to vector<17x1xf32>
    %88 = vector.broadcast %87 : vector<17x1xf32> to vector<17x17xf32>
    %89 = arith.subf %85, %88 : vector<17x17xf32>
    %90 = math.exp %89 : vector<17x17xf32>
    %cst_52 = arith.constant dense<0.000000e+00> : vector<17xf32>
    %91 = vector.multi_reduction <add>, %90, %cst_52 [1] : vector<17x17xf32> to vector<17xf32>
    %92 = vector.shape_cast %91 : vector<17xf32> to vector<17x1xf32>
    %cst_53 = arith.constant 1.000000e+00 : f32
    %93 = vector.broadcast %cst_53 : f32 to vector<17x1xf32>
    %94 = arith.divf %93, %92 : vector<17x1xf32>
    %95 = vector.broadcast %94 : vector<17x1xf32> to vector<17x17xf32>
    %96 = arith.mulf %90, %95 : vector<17x17xf32>
    %97 = arith.truncf %96 : vector<17x17xf32> to vector<17x17xbf16>
    %cst_54 = arith.constant dense<0.000000e+00> : vector<17x8xf32>
    %98 = tpu.matmul %97, %84, %cst_54 {dimension_numbers = #tpu.dot_dimension_numbers<[1], [0], [0], [1], [0, 0, 1, 1], [], []>} : vector<17x17xbf16>, vector<17x8xbf16>, vector<17x8xf32> -> vector<17x8xf32>
    %99 = vector.extract_strided_slice %54 {offsets = [0, 16], sizes = [17, 8], strides = [1, 1]} : vector<17x96xf32> to vector<17x8xf32>
    %cst_55 = arith.constant 0.353553385 : f32
    %100 = vector.broadcast %cst_55 : f32 to vector<17x8xf32>
    %101 = arith.mulf %99, %100 : vector<17x8xf32>
    %102 = arith.truncf %101 : vector<17x8xf32> to vector<17x8xbf16>
    %103 = vector.extract_strided_slice %54 {offsets = [0, 48], sizes = [17, 8], strides = [1, 1]} : vector<17x96xf32> to vector<17x8xf32>
    %104 = arith.truncf %103 : vector<17x8xf32> to vector<17x8xbf16>
    %105 = vector.extract_strided_slice %54 {offsets = [0, 80], sizes = [17, 8], strides = [1, 1]} : vector<17x96xf32> to vector<17x8xf32>
    %106 = arith.truncf %105 : vector<17x8xf32> to vector<17x8xbf16>
    %cst_56 = arith.constant dense<0.000000e+00> : vector<17x17xf32>
    %107 = tpu.matmul %102, %104, %cst_56 {dimension_numbers = #tpu.dot_dimension_numbers<[1], [1], [0], [0], [0, 0, 1, 0], [], []>} : vector<17x8xbf16>, vector<17x8xbf16>, vector<17x17xf32> -> vector<17x17xf32>
    %cst_57 = arith.constant dense<0xFF800000> : vector<17xf32>
    %108 = vector.multi_reduction <maximumf>, %107, %cst_57 [1] : vector<17x17xf32> to vector<17xf32>
    %109 = vector.shape_cast %108 : vector<17xf32> to vector<17x1xf32>
    %110 = vector.broadcast %109 : vector<17x1xf32> to vector<17x17xf32>
    %111 = arith.subf %107, %110 : vector<17x17xf32>
    %112 = math.exp %111 : vector<17x17xf32>
    %cst_58 = arith.constant dense<0.000000e+00> : vector<17xf32>
    %113 = vector.multi_reduction <add>, %112, %cst_58 [1] : vector<17x17xf32> to vector<17xf32>
    %114 = vector.shape_cast %113 : vector<17xf32> to vector<17x1xf32>
    %cst_59 = arith.constant 1.000000e+00 : f32
    %115 = vector.broadcast %cst_59 : f32 to vector<17x1xf32>
    %116 = arith.divf %115, %114 : vector<17x1xf32>
    %117 = vector.broadcast %116 : vector<17x1xf32> to vector<17x17xf32>
    %118 = arith.mulf %112, %117 : vector<17x17xf32>
    %119 = arith.truncf %118 : vector<17x17xf32> to vector<17x17xbf16>
    %cst_60 = arith.constant dense<0.000000e+00> : vector<17x8xf32>
    %120 = tpu.matmul %119, %106, %cst_60 {dimension_numbers = #tpu.dot_dimension_numbers<[1], [0], [0], [1], [0, 0, 1, 1], [], []>} : vector<17x17xbf16>, vector<17x8xbf16>, vector<17x8xf32> -> vector<17x8xf32>
    %121 = vector.extract_strided_slice %54 {offsets = [0, 24], sizes = [17, 8], strides = [1, 1]} : vector<17x96xf32> to vector<17x8xf32>
    %cst_61 = arith.constant 0.353553385 : f32
    %122 = vector.broadcast %cst_61 : f32 to vector<17x8xf32>
    %123 = arith.mulf %121, %122 : vector<17x8xf32>
    %124 = arith.truncf %123 : vector<17x8xf32> to vector<17x8xbf16>
    %125 = vector.extract_strided_slice %54 {offsets = [0, 56], sizes = [17, 8], strides = [1, 1]} : vector<17x96xf32> to vector<17x8xf32>
    %126 = arith.truncf %125 : vector<17x8xf32> to vector<17x8xbf16>
    %127 = vector.extract_strided_slice %54 {offsets = [0, 88], sizes = [17, 8], strides = [1, 1]} : vector<17x96xf32> to vector<17x8xf32>
    %128 = arith.truncf %127 : vector<17x8xf32> to vector<17x8xbf16>
    %cst_62 = arith.constant dense<0.000000e+00> : vector<17x17xf32>
    %129 = tpu.matmul %124, %126, %cst_62 {dimension_numbers = #tpu.dot_dimension_numbers<[1], [1], [0], [0], [0, 0, 1, 0], [], []>} : vector<17x8xbf16>, vector<17x8xbf16>, vector<17x17xf32> -> vector<17x17xf32>
    %cst_63 = arith.constant dense<0xFF800000> : vector<17xf32>
    %130 = vector.multi_reduction <maximumf>, %129, %cst_63 [1] : vector<17x17xf32> to vector<17xf32>
    %131 = vector.shape_cast %130 : vector<17xf32> to vector<17x1xf32>
    %132 = vector.broadcast %131 : vector<17x1xf32> to vector<17x17xf32>
    %133 = arith.subf %129, %132 : vector<17x17xf32>
    %134 = math.exp %133 : vector<17x17xf32>
    %cst_64 = arith.constant dense<0.000000e+00> : vector<17xf32>
    %135 = vector.multi_reduction <add>, %134, %cst_64 [1] : vector<17x17xf32> to vector<17xf32>
    %136 = vector.shape_cast %135 : vector<17xf32> to vector<17x1xf32>
    %cst_65 = arith.constant 1.000000e+00 : f32
    %137 = vector.broadcast %cst_65 : f32 to vector<17x1xf32>
    %138 = arith.divf %137, %136 : vector<17x1xf32>
    %139 = vector.broadcast %138 : vector<17x1xf32> to vector<17x17xf32>
    %140 = arith.mulf %134, %139 : vector<17x17xf32>
    %141 = arith.truncf %140 : vector<17x17xf32> to vector<17x17xbf16>
    %cst_66 = arith.constant dense<0.000000e+00> : vector<17x8xf32>
    %142 = tpu.matmul %141, %128, %cst_66 {dimension_numbers = #tpu.dot_dimension_numbers<[1], [0], [0], [1], [0, 0, 1, 1], [], []>} : vector<17x17xbf16>, vector<17x8xbf16>, vector<17x8xf32> -> vector<17x8xf32>
    %143 = tpu.concatenate %76, %98, %120, %142 in 1 : vector<17x8xf32>, vector<17x8xf32>, vector<17x8xf32>, vector<17x8xf32> -> vector<17x32xf32>
    %144 = vector.extract_strided_slice %53 {offsets = [17, 0], sizes = [17, 96], strides = [1, 1]} : vector<34x96xf32> to vector<17x96xf32>
    %145 = vector.extract_strided_slice %144 {offsets = [0, 0], sizes = [17, 8], strides = [1, 1]} : vector<17x96xf32> to vector<17x8xf32>
    %cst_67 = arith.constant 0.353553385 : f32
    %146 = vector.broadcast %cst_67 : f32 to vector<17x8xf32>
    %147 = arith.mulf %145, %146 : vector<17x8xf32>
    %148 = arith.truncf %147 : vector<17x8xf32> to vector<17x8xbf16>
    %149 = vector.extract_strided_slice %144 {offsets = [0, 32], sizes = [17, 8], strides = [1, 1]} : vector<17x96xf32> to vector<17x8xf32>
    %150 = arith.truncf %149 : vector<17x8xf32> to vector<17x8xbf16>
    %151 = vector.extract_strided_slice %144 {offsets = [0, 64], sizes = [17, 8], strides = [1, 1]} : vector<17x96xf32> to vector<17x8xf32>
    %152 = arith.truncf %151 : vector<17x8xf32> to vector<17x8xbf16>
    %cst_68 = arith.constant dense<0.000000e+00> : vector<17x17xf32>
    %153 = tpu.matmul %148, %150, %cst_68 {dimension_numbers = #tpu.dot_dimension_numbers<[1], [1], [0], [0], [0, 0, 1, 0], [], []>} : vector<17x8xbf16>, vector<17x8xbf16>, vector<17x17xf32> -> vector<17x17xf32>
    %cst_69 = arith.constant dense<0xFF800000> : vector<17xf32>
    %154 = vector.multi_reduction <maximumf>, %153, %cst_69 [1] : vector<17x17xf32> to vector<17xf32>
    %155 = vector.shape_cast %154 : vector<17xf32> to vector<17x1xf32>
    %156 = vector.broadcast %155 : vector<17x1xf32> to vector<17x17xf32>
    %157 = arith.subf %153, %156 : vector<17x17xf32>
    %158 = math.exp %157 : vector<17x17xf32>
    %cst_70 = arith.constant dense<0.000000e+00> : vector<17xf32>
    %159 = vector.multi_reduction <add>, %158, %cst_70 [1] : vector<17x17xf32> to vector<17xf32>
    %160 = vector.shape_cast %159 : vector<17xf32> to vector<17x1xf32>
    %cst_71 = arith.constant 1.000000e+00 : f32
    %161 = vector.broadcast %cst_71 : f32 to vector<17x1xf32>
    %162 = arith.divf %161, %160 : vector<17x1xf32>
    %163 = vector.broadcast %162 : vector<17x1xf32> to vector<17x17xf32>
    %164 = arith.mulf %158, %163 : vector<17x17xf32>
    %165 = arith.truncf %164 : vector<17x17xf32> to vector<17x17xbf16>
    %cst_72 = arith.constant dense<0.000000e+00> : vector<17x8xf32>
    %166 = tpu.matmul %165, %152, %cst_72 {dimension_numbers = #tpu.dot_dimension_numbers<[1], [0], [0], [1], [0, 0, 1, 1], [], []>} : vector<17x17xbf16>, vector<17x8xbf16>, vector<17x8xf32> -> vector<17x8xf32>
    %167 = vector.extract_strided_slice %144 {offsets = [0, 8], sizes = [17, 8], strides = [1, 1]} : vector<17x96xf32> to vector<17x8xf32>
    %cst_73 = arith.constant 0.353553385 : f32
    %168 = vector.broadcast %cst_73 : f32 to vector<17x8xf32>
    %169 = arith.mulf %167, %168 : vector<17x8xf32>
    %170 = arith.truncf %169 : vector<17x8xf32> to vector<17x8xbf16>
    %171 = vector.extract_strided_slice %144 {offsets = [0, 40], sizes = [17, 8], strides = [1, 1]} : vector<17x96xf32> to vector<17x8xf32>
    %172 = arith.truncf %171 : vector<17x8xf32> to vector<17x8xbf16>
    %173 = vector.extract_strided_slice %144 {offsets = [0, 72], sizes = [17, 8], strides = [1, 1]} : vector<17x96xf32> to vector<17x8xf32>
    %174 = arith.truncf %173 : vector<17x8xf32> to vector<17x8xbf16>
    %cst_74 = arith.constant dense<0.000000e+00> : vector<17x17xf32>
    %175 = tpu.matmul %170, %172, %cst_74 {dimension_numbers = #tpu.dot_dimension_numbers<[1], [1], [0], [0], [0, 0, 1, 0], [], []>} : vector<17x8xbf16>, vector<17x8xbf16>, vector<17x17xf32> -> vector<17x17xf32>
    %cst_75 = arith.constant dense<0xFF800000> : vector<17xf32>
    %176 = vector.multi_reduction <maximumf>, %175, %cst_75 [1] : vector<17x17xf32> to vector<17xf32>
    %177 = vector.shape_cast %176 : vector<17xf32> to vector<17x1xf32>
    %178 = vector.broadcast %177 : vector<17x1xf32> to vector<17x17xf32>
    %179 = arith.subf %175, %178 : vector<17x17xf32>
    %180 = math.exp %179 : vector<17x17xf32>
    %cst_76 = arith.constant dense<0.000000e+00> : vector<17xf32>
    %181 = vector.multi_reduction <add>, %180, %cst_76 [1] : vector<17x17xf32> to vector<17xf32>
    %182 = vector.shape_cast %181 : vector<17xf32> to vector<17x1xf32>
    %cst_77 = arith.constant 1.000000e+00 : f32
    %183 = vector.broadcast %cst_77 : f32 to vector<17x1xf32>
    %184 = arith.divf %183, %182 : vector<17x1xf32>
    %185 = vector.broadcast %184 : vector<17x1xf32> to vector<17x17xf32>
    %186 = arith.mulf %180, %185 : vector<17x17xf32>
    %187 = arith.truncf %186 : vector<17x17xf32> to vector<17x17xbf16>
    %cst_78 = arith.constant dense<0.000000e+00> : vector<17x8xf32>
    %188 = tpu.matmul %187, %174, %cst_78 {dimension_numbers = #tpu.dot_dimension_numbers<[1], [0], [0], [1], [0, 0, 1, 1], [], []>} : vector<17x17xbf16>, vector<17x8xbf16>, vector<17x8xf32> -> vector<17x8xf32>
    %189 = vector.extract_strided_slice %144 {offsets = [0, 16], sizes = [17, 8], strides = [1, 1]} : vector<17x96xf32> to vector<17x8xf32>
    %cst_79 = arith.constant 0.353553385 : f32
    %190 = vector.broadcast %cst_79 : f32 to vector<17x8xf32>
    %191 = arith.mulf %189, %190 : vector<17x8xf32>
    %192 = arith.truncf %191 : vector<17x8xf32> to vector<17x8xbf16>
    %193 = vector.extract_strided_slice %144 {offsets = [0, 48], sizes = [17, 8], strides = [1, 1]} : vector<17x96xf32> to vector<17x8xf32>
    %194 = arith.truncf %193 : vector<17x8xf32> to vector<17x8xbf16>
    %195 = vector.extract_strided_slice %144 {offsets = [0, 80], sizes = [17, 8], strides = [1, 1]} : vector<17x96xf32> to vector<17x8xf32>
    %196 = arith.truncf %195 : vector<17x8xf32> to vector<17x8xbf16>
    %cst_80 = arith.constant dense<0.000000e+00> : vector<17x17xf32>
    %197 = tpu.matmul %192, %194, %cst_80 {dimension_numbers = #tpu.dot_dimension_numbers<[1], [1], [0], [0], [0, 0, 1, 0], [], []>} : vector<17x8xbf16>, vector<17x8xbf16>, vector<17x17xf32> -> vector<17x17xf32>
    %cst_81 = arith.constant dense<0xFF800000> : vector<17xf32>
    %198 = vector.multi_reduction <maximumf>, %197, %cst_81 [1] : vector<17x17xf32> to vector<17xf32>
    %199 = vector.shape_cast %198 : vector<17xf32> to vector<17x1xf32>
    %200 = vector.broadcast %199 : vector<17x1xf32> to vector<17x17xf32>
    %201 = arith.subf %197, %200 : vector<17x17xf32>
    %202 = math.exp %201 : vector<17x17xf32>
    %cst_82 = arith.constant dense<0.000000e+00> : vector<17xf32>
    %203 = vector.multi_reduction <add>, %202, %cst_82 [1] : vector<17x17xf32> to vector<17xf32>
    %204 = vector.shape_cast %203 : vector<17xf32> to vector<17x1xf32>
    %cst_83 = arith.constant 1.000000e+00 : f32
    %205 = vector.broadcast %cst_83 : f32 to vector<17x1xf32>
    %206 = arith.divf %205, %204 : vector<17x1xf32>
    %207 = vector.broadcast %206 : vector<17x1xf32> to vector<17x17xf32>
    %208 = arith.mulf %202, %207 : vector<17x17xf32>
    %209 = arith.truncf %208 : vector<17x17xf32> to vector<17x17xbf16>
    %cst_84 = arith.constant dense<0.000000e+00> : vector<17x8xf32>
    %210 = tpu.matmul %209, %196, %cst_84 {dimension_numbers = #tpu.dot_dimension_numbers<[1], [0], [0], [1], [0, 0, 1, 1], [], []>} : vector<17x17xbf16>, vector<17x8xbf16>, vector<17x8xf32> -> vector<17x8xf32>
    %211 = vector.extract_strided_slice %144 {offsets = [0, 24], sizes = [17, 8], strides = [1, 1]} : vector<17x96xf32> to vector<17x8xf32>
    %cst_85 = arith.constant 0.353553385 : f32
    %212 = vector.broadcast %cst_85 : f32 to vector<17x8xf32>
    %213 = arith.mulf %211, %212 : vector<17x8xf32>
    %214 = arith.truncf %213 : vector<17x8xf32> to vector<17x8xbf16>
    %215 = vector.extract_strided_slice %144 {offsets = [0, 56], sizes = [17, 8], strides = [1, 1]} : vector<17x96xf32> to vector<17x8xf32>
    %216 = arith.truncf %215 : vector<17x8xf32> to vector<17x8xbf16>
    %217 = vector.extract_strided_slice %144 {offsets = [0, 88], sizes = [17, 8], strides = [1, 1]} : vector<17x96xf32> to vector<17x8xf32>
    %218 = arith.truncf %217 : vector<17x8xf32> to vector<17x8xbf16>
    %cst_86 = arith.constant dense<0.000000e+00> : vector<17x17xf32>
    %219 = tpu.matmul %214, %216, %cst_86 {dimension_numbers = #tpu.dot_dimension_numbers<[1], [1], [0], [0], [0, 0, 1, 0], [], []>} : vector<17x8xbf16>, vector<17x8xbf16>, vector<17x17xf32> -> vector<17x17xf32>
    %cst_87 = arith.constant dense<0xFF800000> : vector<17xf32>
    %220 = vector.multi_reduction <maximumf>, %219, %cst_87 [1] : vector<17x17xf32> to vector<17xf32>
    %221 = vector.shape_cast %220 : vector<17xf32> to vector<17x1xf32>
    %222 = vector.broadcast %221 : vector<17x1xf32> to vector<17x17xf32>
    %223 = arith.subf %219, %222 : vector<17x17xf32>
    %224 = math.exp %223 : vector<17x17xf32>
    %cst_88 = arith.constant dense<0.000000e+00> : vector<17xf32>
    %225 = vector.multi_reduction <add>, %224, %cst_88 [1] : vector<17x17xf32> to vector<17xf32>
    %226 = vector.shape_cast %225 : vector<17xf32> to vector<17x1xf32>
    %cst_89 = arith.constant 1.000000e+00 : f32
    %227 = vector.broadcast %cst_89 : f32 to vector<17x1xf32>
    %228 = arith.divf %227, %226 : vector<17x1xf32>
    %229 = vector.broadcast %228 : vector<17x1xf32> to vector<17x17xf32>
    %230 = arith.mulf %224, %229 : vector<17x17xf32>
    %231 = arith.truncf %230 : vector<17x17xf32> to vector<17x17xbf16>
    %cst_90 = arith.constant dense<0.000000e+00> : vector<17x8xf32>
    %232 = tpu.matmul %231, %218, %cst_90 {dimension_numbers = #tpu.dot_dimension_numbers<[1], [0], [0], [1], [0, 0, 1, 1], [], []>} : vector<17x17xbf16>, vector<17x8xbf16>, vector<17x8xf32> -> vector<17x8xf32>
    %233 = tpu.concatenate %166, %188, %210, %232 in 1 : vector<17x8xf32>, vector<17x8xf32>, vector<17x8xf32>, vector<17x8xf32> -> vector<17x32xf32>
    %234 = tpu.concatenate %143, %233 in 0 : vector<17x32xf32>, vector<17x32xf32> -> vector<34x32xf32>
    %235 = arith.truncf %234 : vector<34x32xf32> to vector<34x32xbf16>
    %cst_91 = arith.constant dense<0.000000e+00> : vector<34x32xf32>
    %236 = tpu.matmul %235, %8, %cst_91 {dimension_numbers = #tpu.dot_dimension_numbers<[1], [0], [0], [1], [0, 0, 1, 1], [], []>} : vector<34x32xbf16>, vector<32x32xbf16>, vector<34x32xf32> -> vector<34x32xf32>
    %237 = vector.broadcast %10 : vector<1x32xf32> to vector<34x32xf32>
    %238 = arith.addf %236, %237 : vector<34x32xf32>
    %239 = arith.addf %27, %238 : vector<34x32xf32>
    %cst_92 = arith.constant dense<0.000000e+00> : vector<34xf32>
    %240 = vector.multi_reduction <add>, %239, %cst_92 [1] : vector<34x32xf32> to vector<34xf32>
    %241 = vector.shape_cast %240 : vector<34xf32> to vector<34x1xf32>
    %cst_93 = arith.constant 3.200000e+01 : f32
    %242 = vector.broadcast %cst_93 : f32 to vector<34x1xf32>
    %243 = arith.divf %241, %242 : vector<34x1xf32>
    %244 = vector.broadcast %243 : vector<34x1xf32> to vector<34x32xf32>
    %245 = arith.subf %239, %244 : vector<34x32xf32>
    %246 = arith.mulf %245, %245 : vector<34x32xf32>
    %cst_94 = arith.constant dense<0.000000e+00> : vector<34xf32>
    %247 = vector.multi_reduction <add>, %246, %cst_94 [1] : vector<34x32xf32> to vector<34xf32>
    %248 = vector.shape_cast %247 : vector<34xf32> to vector<34x1xf32>
    %cst_95 = arith.constant 3.200000e+01 : f32
    %249 = vector.broadcast %cst_95 : f32 to vector<34x1xf32>
    %250 = arith.divf %248, %249 : vector<34x1xf32>
    %251 = vector.broadcast %243 : vector<34x1xf32> to vector<34x32xf32>
    %252 = arith.subf %239, %251 : vector<34x32xf32>
    %cst_96 = arith.constant 9.99999974E-6 : f32
    %253 = vector.broadcast %cst_96 : f32 to vector<34x1xf32>
    %254 = arith.addf %250, %253 : vector<34x1xf32>
    %255 = math.rsqrt %254 : vector<34x1xf32>
    %256 = vector.broadcast %255 : vector<34x1xf32> to vector<34x32xf32>
    %257 = arith.mulf %252, %256 : vector<34x32xf32>
    %258 = vector.broadcast %24 : vector<1x32xf32> to vector<34x32xf32>
    %259 = arith.mulf %257, %258 : vector<34x32xf32>
    %260 = vector.broadcast %26 : vector<1x32xf32> to vector<34x32xf32>
    %261 = arith.addf %259, %260 : vector<34x32xf32>
    %262 = arith.truncf %261 : vector<34x32xf32> to vector<34x32xbf16>
    %cst_97 = arith.constant dense<0.000000e+00> : vector<34x128xf32>
    %263 = tpu.matmul %262, %12, %cst_97 {dimension_numbers = #tpu.dot_dimension_numbers<[1], [0], [0], [1], [0, 0, 1, 1], [], []>} : vector<34x32xbf16>, vector<32x128xbf16>, vector<34x128xf32> -> vector<34x128xf32>
    %264 = vector.broadcast %14 : vector<1x128xf32> to vector<34x128xf32>
    %265 = arith.addf %263, %264 : vector<34x128xf32>
    %cst_98 = arith.constant 5.000000e-01 : f32
    %266 = vector.broadcast %cst_98 : f32 to vector<34x128xf32>
    %267 = arith.mulf %266, %265 : vector<34x128xf32>
    %cst_99 = arith.constant 0.707106769 : f32
    %268 = vector.broadcast %cst_99 : f32 to vector<34x128xf32>
    %269 = arith.mulf %265, %268 : vector<34x128xf32>
    %270 = math.erf %269 : vector<34x128xf32>
    %cst_100 = arith.constant 1.000000e+00 : f32
    %271 = vector.broadcast %cst_100 : f32 to vector<34x128xf32>
    %272 = arith.addf %271, %270 : vector<34x128xf32>
    %273 = arith.mulf %267, %272 : vector<34x128xf32>
    %274 = arith.truncf %273 : vector<34x128xf32> to vector<34x128xbf16>
    %cst_101 = arith.constant dense<0.000000e+00> : vector<34x32xf32>
    %275 = tpu.matmul %274, %16, %cst_101 {dimension_numbers = #tpu.dot_dimension_numbers<[1], [0], [0], [1], [0, 0, 1, 1], [], []>} : vector<34x128xbf16>, vector<128x32xbf16>, vector<34x32xf32> -> vector<34x32xf32>
    %276 = vector.broadcast %18 : vector<1x32xf32> to vector<34x32xf32>
    %277 = arith.addf %275, %276 : vector<34x32xf32>
    %278 = arith.addf %239, %277 : vector<34x32xf32>
    %c0_102 = arith.constant 0 : index
    %c0_103 = arith.constant 0 : index
    %279 = vector.load %arg15[%c0_102, %c0_103] : memref<34x32xf32, #tpu.memory_space<vmem>>, vector<34x32xf32>
    tpu.vector_store %arg15[%c0_102, %c0_103], %278 {strides = array<i32>} : memref<34x32xf32, #tpu.memory_space<vmem>>, vector<34x32xf32>,
    %c1_i32 = arith.constant 1 : i32
    %280 = arith.cmpi eq, %arg0, %c1_i32 : i32
    %281 = arith.extui %280 : i1 to i32
    %c0_i32_104 = arith.constant 0 : i32
    %282 = arith.cmpi ne, %281, %c0_i32_104 : i32
    scf.if %282 {
      %c0_105 = arith.constant 0 : index
      %c0_106 = arith.constant 0 : index
      %283 = vector.load %arg15[%c0_105, %c0_106] : memref<34x32xf32, #tpu.memory_space<vmem>>, vector<34x32xf32>
      %284 = arith.truncf %283 : vector<34x32xf32> to vector<34x32xbf16>
      %c0_107 = arith.constant 0 : index
      %c0_108 = arith.constant 0 : index
      %285 = vector.load %arg14[%c0_107, %c0_108] : memref<34x32xbf16, #tpu.memory_space<vmem>>, vector<34x32xbf16>
      tpu.vector_store %arg14[%c0_107, %c0_108], %284 {strides = array<i32>} : memref<34x32xbf16, #tpu.memory_space<vmem>>, vector<34x32xbf16>,
    } else {
    }
    return
  }
  func.func @transform_0(%arg0: i32) -> (i32, i32) {
    %c0_i32 = arith.constant 0 : i32
    %c0_i32_0 = arith.constant 0 : i32
    %c0_i32_1 = arith.constant 0 : i32
    return %c0_i32, %c0_i32_0 : i32, i32
  }
  func.func @transform_1(%arg0: i32) -> (i32, i32, i32) {
    %c0_i32 = arith.constant 0 : i32
    %c0_i32_0 = arith.constant 0 : i32
    %c0_i32_1 = arith.constant 0 : i32
    return %arg0, %c0_i32, %c0_i32_0 : i32, i32, i32
  }
  func.func @transform_2(%arg0: i32) -> (i32, i32, i32) {
    %c0_i32 = arith.constant 0 : i32
    %c0_i32_0 = arith.constant 0 : i32
    %c0_i32_1 = arith.constant 0 : i32
    return %arg0, %c0_i32, %c0_i32_0 : i32, i32, i32
  }
  func.func @transform_3(%arg0: i32) -> (i32, i32, i32) {
    %c0_i32 = arith.constant 0 : i32
    %c0_i32_0 = arith.constant 0 : i32
    %c0_i32_1 = arith.constant 0 : i32
    return %arg0, %c0_i32, %c0_i32_0 : i32, i32, i32
  }
  func.func @transform_4(%arg0: i32) -> (i32, i32, i32) {
    %c0_i32 = arith.constant 0 : i32
    %c0_i32_0 = arith.constant 0 : i32
    %c0_i32_1 = arith.constant 0 : i32
    return %arg0, %c0_i32, %c0_i32_0 : i32, i32, i32
  }
  func.func @transform_5(%arg0: i32) -> (i32, i32, i32) {
    %c0_i32 = arith.constant 0 : i32
    %c0_i32_0 = arith.constant 0 : i32
    %c0_i32_1 = arith.constant 0 : i32
    return %arg0, %c0_i32, %c0_i32_0 : i32, i32, i32
  }
  func.func @transform_6(%arg0: i32) -> (i32, i32, i32) {
    %c0_i32 = arith.constant 0 : i32
    %c0_i32_0 = arith.constant 0 : i32
    %c0_i32_1 = arith.constant 0 : i32
    return %arg0, %c0_i32, %c0_i32_0 : i32, i32, i32
  }
  func.func @transform_7(%arg0: i32) -> (i32, i32, i32) {
    %c0_i32 = arith.constant 0 : i32
    %c0_i32_0 = arith.constant 0 : i32
    %c0_i32_1 = arith.constant 0 : i32
    return %arg0, %c0_i32, %c0_i32_0 : i32, i32, i32
  }
  func.func @transform_8(%arg0: i32) -> (i32, i32, i32) {
    %c0_i32 = arith.constant 0 : i32
    %c0_i32_0 = arith.constant 0 : i32
    %c0_i32_1 = arith.constant 0 : i32
    return %arg0, %c0_i32, %c0_i32_0 : i32, i32, i32
  }
  func.func @transform_9(%arg0: i32) -> (i32, i32, i32) {
    %c0_i32 = arith.constant 0 : i32
    %c0_i32_0 = arith.constant 0 : i32
    %c0_i32_1 = arith.constant 0 : i32
    return %arg0, %c0_i32, %c0_i32_0 : i32, i32, i32
  }
  func.func @transform_10(%arg0: i32) -> (i32, i32, i32) {
    %c0_i32 = arith.constant 0 : i32
    %c0_i32_0 = arith.constant 0 : i32
    %c0_i32_1 = arith.constant 0 : i32
    return %arg0, %c0_i32, %c0_i32_0 : i32, i32, i32
  }
  func.func @transform_11(%arg0: i32) -> (i32, i32, i32) {
    %c0_i32 = arith.constant 0 : i32
    %c0_i32_0 = arith.constant 0 : i32
    %c0_i32_1 = arith.constant 0 : i32
    return %arg0, %c0_i32, %c0_i32_0 : i32, i32, i32
  }
  func.func @transform_12(%arg0: i32) -> (i32, i32, i32) {
    %c0_i32 = arith.constant 0 : i32
    %c0_i32_0 = arith.constant 0 : i32
    %c0_i32_1 = arith.constant 0 : i32
    return %arg0, %c0_i32, %c0_i32_0 : i32, i32, i32
  }
  func.func @transform_13(%arg0: i32) -> (i32, i32) {
    %c0_i32 = arith.constant 0 : i32
    %c0_i32_0 = arith.constant 0 : i32
    %c0_i32_1 = arith.constant 0 : i32
    return %c0_i32, %c0_i32_0 : i32, i32
  }
}

module attributes {stable_mosaic.version = 11 : i64} {
  func.func @stack_block_kernel(%arg0: i32, %arg1: memref<60x32xbf16, #tpu.memory_space<vmem>>, %arg2: memref<1x1x32xf32, #tpu.memory_space<vmem>>, %arg3: memref<1x1x32xf32, #tpu.memory_space<vmem>>, %arg4: memref<1x32x96xbf16, #tpu.memory_space<vmem>>, %arg5: memref<1x1x96xf32, #tpu.memory_space<vmem>>, %arg6: memref<1x32x32xbf16, #tpu.memory_space<vmem>>, %arg7: memref<1x1x32xf32, #tpu.memory_space<vmem>>, %arg8: memref<1x1x32xf32, #tpu.memory_space<vmem>>, %arg9: memref<1x1x32xf32, #tpu.memory_space<vmem>>, %arg10: memref<1x32x128xbf16, #tpu.memory_space<vmem>>, %arg11: memref<1x1x128xf32, #tpu.memory_space<vmem>>, %arg12: memref<1x128x32xbf16, #tpu.memory_space<vmem>>, %arg13: memref<1x1x32xf32, #tpu.memory_space<vmem>>, %arg14: memref<60x32xbf16, #tpu.memory_space<vmem>>, %arg15: memref<60x32xf32, #tpu.memory_space<vmem>>) attributes {dimension_semantics = [#tpu.dimension_semantics<arbitrary>], iteration_bounds = array<i64: 1>, scalar_prefetch = 0 : i64, scratch_operands = 1 : i64, tpu.core_type = #tpu.core_type<tc>, window_params = [{pipeline_mode = #tpu.pipeline_mode<synchronous>, transform_indices = @transform_0, window_bounds = array<i64: 60, 32>}, {transform_indices = @transform_1, window_bounds = array<i64: 1, 1, 32>}, {transform_indices = @transform_2, window_bounds = array<i64: 1, 1, 32>}, {transform_indices = @transform_3, window_bounds = array<i64: 1, 32, 96>}, {transform_indices = @transform_4, window_bounds = array<i64: 1, 1, 96>}, {transform_indices = @transform_5, window_bounds = array<i64: 1, 32, 32>}, {transform_indices = @transform_6, window_bounds = array<i64: 1, 1, 32>}, {transform_indices = @transform_7, window_bounds = array<i64: 1, 1, 32>}, {transform_indices = @transform_8, window_bounds = array<i64: 1, 1, 32>}, {transform_indices = @transform_9, window_bounds = array<i64: 1, 32, 128>}, {transform_indices = @transform_10, window_bounds = array<i64: 1, 1, 128>}, {transform_indices = @transform_11, window_bounds = array<i64: 1, 128, 32>}, {transform_indices = @transform_12, window_bounds = array<i64: 1, 1, 32>}, {pipeline_mode = #tpu.pipeline_mode<synchronous>, transform_indices = @transform_13, window_bounds = array<i64: 60, 32>}]} {
    %c0_i32 = arith.constant 0 : i32
    %0 = arith.cmpi eq, %arg0, %c0_i32 : i32
    %1 = arith.extui %0 : i1 to i32
    %c0_i32_0 = arith.constant 0 : i32
    %2 = arith.cmpi ne, %1, %c0_i32_0 : i32
    scf.if %2 {
      %c0_106 = arith.constant 0 : index
      %c0_107 = arith.constant 0 : index
      %283 = vector.load %arg1[%c0_106, %c0_107] : memref<60x32xbf16, #tpu.memory_space<vmem>>, vector<60x32xbf16>
      %284 = arith.extf %283 : vector<60x32xbf16> to vector<60x32xf32>
      %c0_108 = arith.constant 0 : index
      %c0_109 = arith.constant 0 : index
      %285 = vector.load %arg15[%c0_108, %c0_109] : memref<60x32xf32, #tpu.memory_space<vmem>>, vector<60x32xf32>
      tpu.vector_store %arg15[%c0_108, %c0_109], %284 {strides = array<i32>} : memref<60x32xf32, #tpu.memory_space<vmem>>, vector<60x32xf32>,
    } else {
    }
    %c0 = arith.constant 0 : index
    %c0_1 = arith.constant 0 : index
    %c0_2 = arith.constant 0 : index
    %3 = vector.load %arg4[%c0, %c0_1, %c0_2] : memref<1x32x96xbf16, #tpu.memory_space<vmem>>, vector<1x32x96xbf16>
    %4 = vector.shape_cast %3 : vector<1x32x96xbf16> to vector<32x96xbf16>
    %c0_3 = arith.constant 0 : index
    %c0_4 = arith.constant 0 : index
    %c0_5 = arith.constant 0 : index
    %5 = vector.load %arg5[%c0_3, %c0_4, %c0_5] : memref<1x1x96xf32, #tpu.memory_space<vmem>>, vector<1x1x96xf32>
    %6 = vector.shape_cast %5 : vector<1x1x96xf32> to vector<1x96xf32>
    %c0_6 = arith.constant 0 : index
    %c0_7 = arith.constant 0 : index
    %c0_8 = arith.constant 0 : index
    %7 = vector.load %arg6[%c0_6, %c0_7, %c0_8] : memref<1x32x32xbf16, #tpu.memory_space<vmem>>, vector<1x32x32xbf16>
    %8 = vector.shape_cast %7 : vector<1x32x32xbf16> to vector<32x32xbf16>
    %c0_9 = arith.constant 0 : index
    %c0_10 = arith.constant 0 : index
    %c0_11 = arith.constant 0 : index
    %9 = vector.load %arg7[%c0_9, %c0_10, %c0_11] : memref<1x1x32xf32, #tpu.memory_space<vmem>>, vector<1x1x32xf32>
    %10 = vector.shape_cast %9 : vector<1x1x32xf32> to vector<1x32xf32>
    %c0_12 = arith.constant 0 : index
    %c0_13 = arith.constant 0 : index
    %c0_14 = arith.constant 0 : index
    %11 = vector.load %arg10[%c0_12, %c0_13, %c0_14] : memref<1x32x128xbf16, #tpu.memory_space<vmem>>, vector<1x32x128xbf16>
    %12 = vector.shape_cast %11 : vector<1x32x128xbf16> to vector<32x128xbf16>
    %c0_15 = arith.constant 0 : index
    %c0_16 = arith.constant 0 : index
    %c0_17 = arith.constant 0 : index
    %13 = vector.load %arg11[%c0_15, %c0_16, %c0_17] : memref<1x1x128xf32, #tpu.memory_space<vmem>>, vector<1x1x128xf32>
    %14 = vector.shape_cast %13 : vector<1x1x128xf32> to vector<1x128xf32>
    %c0_18 = arith.constant 0 : index
    %c0_19 = arith.constant 0 : index
    %c0_20 = arith.constant 0 : index
    %15 = vector.load %arg12[%c0_18, %c0_19, %c0_20] : memref<1x128x32xbf16, #tpu.memory_space<vmem>>, vector<1x128x32xbf16>
    %16 = vector.shape_cast %15 : vector<1x128x32xbf16> to vector<128x32xbf16>
    %c0_21 = arith.constant 0 : index
    %c0_22 = arith.constant 0 : index
    %c0_23 = arith.constant 0 : index
    %17 = vector.load %arg13[%c0_21, %c0_22, %c0_23] : memref<1x1x32xf32, #tpu.memory_space<vmem>>, vector<1x1x32xf32>
    %18 = vector.shape_cast %17 : vector<1x1x32xf32> to vector<1x32xf32>
    %c0_24 = arith.constant 0 : index
    %c0_25 = arith.constant 0 : index
    %c0_26 = arith.constant 0 : index
    %19 = vector.load %arg2[%c0_24, %c0_25, %c0_26] : memref<1x1x32xf32, #tpu.memory_space<vmem>>, vector<1x1x32xf32>
    %20 = vector.shape_cast %19 : vector<1x1x32xf32> to vector<1x32xf32>
    %c0_27 = arith.constant 0 : index
    %c0_28 = arith.constant 0 : index
    %c0_29 = arith.constant 0 : index
    %21 = vector.load %arg3[%c0_27, %c0_28, %c0_29] : memref<1x1x32xf32, #tpu.memory_space<vmem>>, vector<1x1x32xf32>
    %22 = vector.shape_cast %21 : vector<1x1x32xf32> to vector<1x32xf32>
    %c0_30 = arith.constant 0 : index
    %c0_31 = arith.constant 0 : index
    %c0_32 = arith.constant 0 : index
    %23 = vector.load %arg8[%c0_30, %c0_31, %c0_32] : memref<1x1x32xf32, #tpu.memory_space<vmem>>, vector<1x1x32xf32>
    %24 = vector.shape_cast %23 : vector<1x1x32xf32> to vector<1x32xf32>
    %c0_33 = arith.constant 0 : index
    %c0_34 = arith.constant 0 : index
    %c0_35 = arith.constant 0 : index
    %25 = vector.load %arg9[%c0_33, %c0_34, %c0_35] : memref<1x1x32xf32, #tpu.memory_space<vmem>>, vector<1x1x32xf32>
    %26 = vector.shape_cast %25 : vector<1x1x32xf32> to vector<1x32xf32>
    %c0_36 = arith.constant 0 : index
    %c0_37 = arith.constant 0 : index
    %27 = vector.load %arg15[%c0_36, %c0_37] : memref<60x32xf32, #tpu.memory_space<vmem>>, vector<60x32xf32>
    %cst = arith.constant dense<0.000000e+00> : vector<60xf32>
    %28 = vector.multi_reduction <add>, %27, %cst [1] : vector<60x32xf32> to vector<60xf32>
    %29 = vector.shape_cast %28 : vector<60xf32> to vector<60x1xf32>
    %cst_38 = arith.constant 3.200000e+01 : f32
    %30 = vector.broadcast %cst_38 : f32 to vector<60x1xf32>
    %31 = arith.divf %29, %30 : vector<60x1xf32>
    %32 = vector.broadcast %31 : vector<60x1xf32> to vector<60x32xf32>
    %33 = arith.subf %27, %32 : vector<60x32xf32>
    %34 = arith.mulf %33, %33 : vector<60x32xf32>
    %cst_39 = arith.constant dense<0.000000e+00> : vector<60xf32>
    %35 = vector.multi_reduction <add>, %34, %cst_39 [1] : vector<60x32xf32> to vector<60xf32>
    %36 = vector.shape_cast %35 : vector<60xf32> to vector<60x1xf32>
    %cst_40 = arith.constant 3.200000e+01 : f32
    %37 = vector.broadcast %cst_40 : f32 to vector<60x1xf32>
    %38 = arith.divf %36, %37 : vector<60x1xf32>
    %39 = vector.broadcast %31 : vector<60x1xf32> to vector<60x32xf32>
    %40 = arith.subf %27, %39 : vector<60x32xf32>
    %cst_41 = arith.constant 9.99999974E-6 : f32
    %41 = vector.broadcast %cst_41 : f32 to vector<60x1xf32>
    %42 = arith.addf %38, %41 : vector<60x1xf32>
    %43 = math.rsqrt %42 : vector<60x1xf32>
    %44 = vector.broadcast %43 : vector<60x1xf32> to vector<60x32xf32>
    %45 = arith.mulf %40, %44 : vector<60x32xf32>
    %46 = vector.broadcast %20 : vector<1x32xf32> to vector<60x32xf32>
    %47 = arith.mulf %45, %46 : vector<60x32xf32>
    %48 = vector.broadcast %22 : vector<1x32xf32> to vector<60x32xf32>
    %49 = arith.addf %47, %48 : vector<60x32xf32>
    %50 = arith.truncf %49 : vector<60x32xf32> to vector<60x32xbf16>
    %cst_42 = arith.constant dense<0.000000e+00> : vector<60x96xf32>
    %51 = tpu.matmul %50, %4, %cst_42 {dimension_numbers = #tpu.dot_dimension_numbers<[1], [0], [0], [1], [0, 0, 1, 1], [], []>} : vector<60x32xbf16>, vector<32x96xbf16>, vector<60x96xf32> -> vector<60x96xf32>
    %52 = vector.broadcast %6 : vector<1x96xf32> to vector<60x96xf32>
    %53 = arith.addf %51, %52 : vector<60x96xf32>
    %54 = vector.extract_strided_slice %53 {offsets = [0, 0], sizes = [30, 96], strides = [1, 1]} : vector<60x96xf32> to vector<30x96xf32>
    %55 = vector.extract_strided_slice %54 {offsets = [0, 0], sizes = [30, 8], strides = [1, 1]} : vector<30x96xf32> to vector<30x8xf32>
    %cst_43 = arith.constant 0.353553385 : f32
    %56 = vector.broadcast %cst_43 : f32 to vector<30x8xf32>
    %57 = arith.mulf %55, %56 : vector<30x8xf32>
    %58 = arith.truncf %57 : vector<30x8xf32> to vector<30x8xbf16>
    %59 = vector.extract_strided_slice %54 {offsets = [0, 32], sizes = [30, 8], strides = [1, 1]} : vector<30x96xf32> to vector<30x8xf32>
    %60 = arith.truncf %59 : vector<30x8xf32> to vector<30x8xbf16>
    %61 = vector.extract_strided_slice %54 {offsets = [0, 64], sizes = [30, 8], strides = [1, 1]} : vector<30x96xf32> to vector<30x8xf32>
    %62 = arith.truncf %61 : vector<30x8xf32> to vector<30x8xbf16>
    %cst_44 = arith.constant dense<0.000000e+00> : vector<30x30xf32>
    %63 = tpu.matmul %58, %60, %cst_44 {dimension_numbers = #tpu.dot_dimension_numbers<[1], [1], [0], [0], [0, 0, 1, 0], [], []>} : vector<30x8xbf16>, vector<30x8xbf16>, vector<30x30xf32> -> vector<30x30xf32>
    %cst_45 = arith.constant dense<0xFF800000> : vector<30xf32>
    %64 = vector.multi_reduction <maximumf>, %63, %cst_45 [1] : vector<30x30xf32> to vector<30xf32>
    %65 = vector.shape_cast %64 : vector<30xf32> to vector<30x1xf32>
    %66 = vector.broadcast %65 : vector<30x1xf32> to vector<30x30xf32>
    %67 = arith.subf %63, %66 : vector<30x30xf32>
    %68 = math.exp %67 : vector<30x30xf32>
    %cst_46 = arith.constant dense<0.000000e+00> : vector<30xf32>
    %69 = vector.multi_reduction <add>, %68, %cst_46 [1] : vector<30x30xf32> to vector<30xf32>
    %70 = vector.shape_cast %69 : vector<30xf32> to vector<30x1xf32>
    %cst_47 = arith.constant 1.000000e+00 : f32
    %71 = vector.broadcast %cst_47 : f32 to vector<30x1xf32>
    %72 = arith.divf %71, %70 : vector<30x1xf32>
    %73 = vector.broadcast %72 : vector<30x1xf32> to vector<30x30xf32>
    %74 = arith.mulf %68, %73 : vector<30x30xf32>
    %75 = arith.truncf %74 : vector<30x30xf32> to vector<30x30xbf16>
    %cst_48 = arith.constant dense<0.000000e+00> : vector<30x8xf32>
    %76 = tpu.matmul %75, %62, %cst_48 {dimension_numbers = #tpu.dot_dimension_numbers<[1], [0], [0], [1], [0, 0, 1, 1], [], []>} : vector<30x30xbf16>, vector<30x8xbf16>, vector<30x8xf32> -> vector<30x8xf32>
    %77 = vector.extract_strided_slice %54 {offsets = [0, 8], sizes = [30, 8], strides = [1, 1]} : vector<30x96xf32> to vector<30x8xf32>
    %cst_49 = arith.constant 0.353553385 : f32
    %78 = vector.broadcast %cst_49 : f32 to vector<30x8xf32>
    %79 = arith.mulf %77, %78 : vector<30x8xf32>
    %80 = arith.truncf %79 : vector<30x8xf32> to vector<30x8xbf16>
    %81 = vector.extract_strided_slice %54 {offsets = [0, 40], sizes = [30, 8], strides = [1, 1]} : vector<30x96xf32> to vector<30x8xf32>
    %82 = arith.truncf %81 : vector<30x8xf32> to vector<30x8xbf16>
    %83 = vector.extract_strided_slice %54 {offsets = [0, 72], sizes = [30, 8], strides = [1, 1]} : vector<30x96xf32> to vector<30x8xf32>
    %84 = arith.truncf %83 : vector<30x8xf32> to vector<30x8xbf16>
    %cst_50 = arith.constant dense<0.000000e+00> : vector<30x30xf32>
    %85 = tpu.matmul %80, %82, %cst_50 {dimension_numbers = #tpu.dot_dimension_numbers<[1], [1], [0], [0], [0, 0, 1, 0], [], []>} : vector<30x8xbf16>, vector<30x8xbf16>, vector<30x30xf32> -> vector<30x30xf32>
    %cst_51 = arith.constant dense<0xFF800000> : vector<30xf32>
    %86 = vector.multi_reduction <maximumf>, %85, %cst_51 [1] : vector<30x30xf32> to vector<30xf32>
    %87 = vector.shape_cast %86 : vector<30xf32> to vector<30x1xf32>
    %88 = vector.broadcast %87 : vector<30x1xf32> to vector<30x30xf32>
    %89 = arith.subf %85, %88 : vector<30x30xf32>
    %90 = math.exp %89 : vector<30x30xf32>
    %cst_52 = arith.constant dense<0.000000e+00> : vector<30xf32>
    %91 = vector.multi_reduction <add>, %90, %cst_52 [1] : vector<30x30xf32> to vector<30xf32>
    %92 = vector.shape_cast %91 : vector<30xf32> to vector<30x1xf32>
    %cst_53 = arith.constant 1.000000e+00 : f32
    %93 = vector.broadcast %cst_53 : f32 to vector<30x1xf32>
    %94 = arith.divf %93, %92 : vector<30x1xf32>
    %95 = vector.broadcast %94 : vector<30x1xf32> to vector<30x30xf32>
    %96 = arith.mulf %90, %95 : vector<30x30xf32>
    %97 = arith.truncf %96 : vector<30x30xf32> to vector<30x30xbf16>
    %cst_54 = arith.constant dense<0.000000e+00> : vector<30x8xf32>
    %98 = tpu.matmul %97, %84, %cst_54 {dimension_numbers = #tpu.dot_dimension_numbers<[1], [0], [0], [1], [0, 0, 1, 1], [], []>} : vector<30x30xbf16>, vector<30x8xbf16>, vector<30x8xf32> -> vector<30x8xf32>
    %99 = vector.extract_strided_slice %54 {offsets = [0, 16], sizes = [30, 8], strides = [1, 1]} : vector<30x96xf32> to vector<30x8xf32>
    %cst_55 = arith.constant 0.353553385 : f32
    %100 = vector.broadcast %cst_55 : f32 to vector<30x8xf32>
    %101 = arith.mulf %99, %100 : vector<30x8xf32>
    %102 = arith.truncf %101 : vector<30x8xf32> to vector<30x8xbf16>
    %103 = vector.extract_strided_slice %54 {offsets = [0, 48], sizes = [30, 8], strides = [1, 1]} : vector<30x96xf32> to vector<30x8xf32>
    %104 = arith.truncf %103 : vector<30x8xf32> to vector<30x8xbf16>
    %105 = vector.extract_strided_slice %54 {offsets = [0, 80], sizes = [30, 8], strides = [1, 1]} : vector<30x96xf32> to vector<30x8xf32>
    %106 = arith.truncf %105 : vector<30x8xf32> to vector<30x8xbf16>
    %cst_56 = arith.constant dense<0.000000e+00> : vector<30x30xf32>
    %107 = tpu.matmul %102, %104, %cst_56 {dimension_numbers = #tpu.dot_dimension_numbers<[1], [1], [0], [0], [0, 0, 1, 0], [], []>} : vector<30x8xbf16>, vector<30x8xbf16>, vector<30x30xf32> -> vector<30x30xf32>
    %cst_57 = arith.constant dense<0xFF800000> : vector<30xf32>
    %108 = vector.multi_reduction <maximumf>, %107, %cst_57 [1] : vector<30x30xf32> to vector<30xf32>
    %109 = vector.shape_cast %108 : vector<30xf32> to vector<30x1xf32>
    %110 = vector.broadcast %109 : vector<30x1xf32> to vector<30x30xf32>
    %111 = arith.subf %107, %110 : vector<30x30xf32>
    %112 = math.exp %111 : vector<30x30xf32>
    %cst_58 = arith.constant dense<0.000000e+00> : vector<30xf32>
    %113 = vector.multi_reduction <add>, %112, %cst_58 [1] : vector<30x30xf32> to vector<30xf32>
    %114 = vector.shape_cast %113 : vector<30xf32> to vector<30x1xf32>
    %cst_59 = arith.constant 1.000000e+00 : f32
    %115 = vector.broadcast %cst_59 : f32 to vector<30x1xf32>
    %116 = arith.divf %115, %114 : vector<30x1xf32>
    %117 = vector.broadcast %116 : vector<30x1xf32> to vector<30x30xf32>
    %118 = arith.mulf %112, %117 : vector<30x30xf32>
    %119 = arith.truncf %118 : vector<30x30xf32> to vector<30x30xbf16>
    %cst_60 = arith.constant dense<0.000000e+00> : vector<30x8xf32>
    %120 = tpu.matmul %119, %106, %cst_60 {dimension_numbers = #tpu.dot_dimension_numbers<[1], [0], [0], [1], [0, 0, 1, 1], [], []>} : vector<30x30xbf16>, vector<30x8xbf16>, vector<30x8xf32> -> vector<30x8xf32>
    %121 = vector.extract_strided_slice %54 {offsets = [0, 24], sizes = [30, 8], strides = [1, 1]} : vector<30x96xf32> to vector<30x8xf32>
    %cst_61 = arith.constant 0.353553385 : f32
    %122 = vector.broadcast %cst_61 : f32 to vector<30x8xf32>
    %123 = arith.mulf %121, %122 : vector<30x8xf32>
    %124 = arith.truncf %123 : vector<30x8xf32> to vector<30x8xbf16>
    %125 = vector.extract_strided_slice %54 {offsets = [0, 56], sizes = [30, 8], strides = [1, 1]} : vector<30x96xf32> to vector<30x8xf32>
    %126 = arith.truncf %125 : vector<30x8xf32> to vector<30x8xbf16>
    %127 = vector.extract_strided_slice %54 {offsets = [0, 88], sizes = [30, 8], strides = [1, 1]} : vector<30x96xf32> to vector<30x8xf32>
    %128 = arith.truncf %127 : vector<30x8xf32> to vector<30x8xbf16>
    %cst_62 = arith.constant dense<0.000000e+00> : vector<30x30xf32>
    %129 = tpu.matmul %124, %126, %cst_62 {dimension_numbers = #tpu.dot_dimension_numbers<[1], [1], [0], [0], [0, 0, 1, 0], [], []>} : vector<30x8xbf16>, vector<30x8xbf16>, vector<30x30xf32> -> vector<30x30xf32>
    %cst_63 = arith.constant dense<0xFF800000> : vector<30xf32>
    %130 = vector.multi_reduction <maximumf>, %129, %cst_63 [1] : vector<30x30xf32> to vector<30xf32>
    %131 = vector.shape_cast %130 : vector<30xf32> to vector<30x1xf32>
    %132 = vector.broadcast %131 : vector<30x1xf32> to vector<30x30xf32>
    %133 = arith.subf %129, %132 : vector<30x30xf32>
    %134 = math.exp %133 : vector<30x30xf32>
    %cst_64 = arith.constant dense<0.000000e+00> : vector<30xf32>
    %135 = vector.multi_reduction <add>, %134, %cst_64 [1] : vector<30x30xf32> to vector<30xf32>
    %136 = vector.shape_cast %135 : vector<30xf32> to vector<30x1xf32>
    %cst_65 = arith.constant 1.000000e+00 : f32
    %137 = vector.broadcast %cst_65 : f32 to vector<30x1xf32>
    %138 = arith.divf %137, %136 : vector<30x1xf32>
    %139 = vector.broadcast %138 : vector<30x1xf32> to vector<30x30xf32>
    %140 = arith.mulf %134, %139 : vector<30x30xf32>
    %141 = arith.truncf %140 : vector<30x30xf32> to vector<30x30xbf16>
    %cst_66 = arith.constant dense<0.000000e+00> : vector<30x8xf32>
    %142 = tpu.matmul %141, %128, %cst_66 {dimension_numbers = #tpu.dot_dimension_numbers<[1], [0], [0], [1], [0, 0, 1, 1], [], []>} : vector<30x30xbf16>, vector<30x8xbf16>, vector<30x8xf32> -> vector<30x8xf32>
    %143 = tpu.concatenate %76, %98, %120, %142 in 1 : vector<30x8xf32>, vector<30x8xf32>, vector<30x8xf32>, vector<30x8xf32> -> vector<30x32xf32>
    %144 = vector.extract_strided_slice %53 {offsets = [30, 0], sizes = [30, 96], strides = [1, 1]} : vector<60x96xf32> to vector<30x96xf32>
    %145 = vector.extract_strided_slice %144 {offsets = [0, 0], sizes = [30, 8], strides = [1, 1]} : vector<30x96xf32> to vector<30x8xf32>
    %cst_67 = arith.constant 0.353553385 : f32
    %146 = vector.broadcast %cst_67 : f32 to vector<30x8xf32>
    %147 = arith.mulf %145, %146 : vector<30x8xf32>
    %148 = arith.truncf %147 : vector<30x8xf32> to vector<30x8xbf16>
    %149 = vector.extract_strided_slice %144 {offsets = [0, 32], sizes = [30, 8], strides = [1, 1]} : vector<30x96xf32> to vector<30x8xf32>
    %150 = arith.truncf %149 : vector<30x8xf32> to vector<30x8xbf16>
    %151 = vector.extract_strided_slice %144 {offsets = [0, 64], sizes = [30, 8], strides = [1, 1]} : vector<30x96xf32> to vector<30x8xf32>
    %152 = arith.truncf %151 : vector<30x8xf32> to vector<30x8xbf16>
    %cst_68 = arith.constant dense<0.000000e+00> : vector<30x30xf32>
    %153 = tpu.matmul %148, %150, %cst_68 {dimension_numbers = #tpu.dot_dimension_numbers<[1], [1], [0], [0], [0, 0, 1, 0], [], []>} : vector<30x8xbf16>, vector<30x8xbf16>, vector<30x30xf32> -> vector<30x30xf32>
    %cst_69 = arith.constant dense<0xFF800000> : vector<30xf32>
    %154 = vector.multi_reduction <maximumf>, %153, %cst_69 [1] : vector<30x30xf32> to vector<30xf32>
    %155 = vector.shape_cast %154 : vector<30xf32> to vector<30x1xf32>
    %156 = vector.broadcast %155 : vector<30x1xf32> to vector<30x30xf32>
    %157 = arith.subf %153, %156 : vector<30x30xf32>
    %158 = math.exp %157 : vector<30x30xf32>
    %cst_70 = arith.constant dense<0.000000e+00> : vector<30xf32>
    %159 = vector.multi_reduction <add>, %158, %cst_70 [1] : vector<30x30xf32> to vector<30xf32>
    %160 = vector.shape_cast %159 : vector<30xf32> to vector<30x1xf32>
    %cst_71 = arith.constant 1.000000e+00 : f32
    %161 = vector.broadcast %cst_71 : f32 to vector<30x1xf32>
    %162 = arith.divf %161, %160 : vector<30x1xf32>
    %163 = vector.broadcast %162 : vector<30x1xf32> to vector<30x30xf32>
    %164 = arith.mulf %158, %163 : vector<30x30xf32>
    %165 = arith.truncf %164 : vector<30x30xf32> to vector<30x30xbf16>
    %cst_72 = arith.constant dense<0.000000e+00> : vector<30x8xf32>
    %166 = tpu.matmul %165, %152, %cst_72 {dimension_numbers = #tpu.dot_dimension_numbers<[1], [0], [0], [1], [0, 0, 1, 1], [], []>} : vector<30x30xbf16>, vector<30x8xbf16>, vector<30x8xf32> -> vector<30x8xf32>
    %167 = vector.extract_strided_slice %144 {offsets = [0, 8], sizes = [30, 8], strides = [1, 1]} : vector<30x96xf32> to vector<30x8xf32>
    %cst_73 = arith.constant 0.353553385 : f32
    %168 = vector.broadcast %cst_73 : f32 to vector<30x8xf32>
    %169 = arith.mulf %167, %168 : vector<30x8xf32>
    %170 = arith.truncf %169 : vector<30x8xf32> to vector<30x8xbf16>
    %171 = vector.extract_strided_slice %144 {offsets = [0, 40], sizes = [30, 8], strides = [1, 1]} : vector<30x96xf32> to vector<30x8xf32>
    %172 = arith.truncf %171 : vector<30x8xf32> to vector<30x8xbf16>
    %173 = vector.extract_strided_slice %144 {offsets = [0, 72], sizes = [30, 8], strides = [1, 1]} : vector<30x96xf32> to vector<30x8xf32>
    %174 = arith.truncf %173 : vector<30x8xf32> to vector<30x8xbf16>
    %cst_74 = arith.constant dense<0.000000e+00> : vector<30x30xf32>
    %175 = tpu.matmul %170, %172, %cst_74 {dimension_numbers = #tpu.dot_dimension_numbers<[1], [1], [0], [0], [0, 0, 1, 0], [], []>} : vector<30x8xbf16>, vector<30x8xbf16>, vector<30x30xf32> -> vector<30x30xf32>
    %cst_75 = arith.constant dense<0xFF800000> : vector<30xf32>
    %176 = vector.multi_reduction <maximumf>, %175, %cst_75 [1] : vector<30x30xf32> to vector<30xf32>
    %177 = vector.shape_cast %176 : vector<30xf32> to vector<30x1xf32>
    %178 = vector.broadcast %177 : vector<30x1xf32> to vector<30x30xf32>
    %179 = arith.subf %175, %178 : vector<30x30xf32>
    %180 = math.exp %179 : vector<30x30xf32>
    %cst_76 = arith.constant dense<0.000000e+00> : vector<30xf32>
    %181 = vector.multi_reduction <add>, %180, %cst_76 [1] : vector<30x30xf32> to vector<30xf32>
    %182 = vector.shape_cast %181 : vector<30xf32> to vector<30x1xf32>
    %cst_77 = arith.constant 1.000000e+00 : f32
    %183 = vector.broadcast %cst_77 : f32 to vector<30x1xf32>
    %184 = arith.divf %183, %182 : vector<30x1xf32>
    %185 = vector.broadcast %184 : vector<30x1xf32> to vector<30x30xf32>
    %186 = arith.mulf %180, %185 : vector<30x30xf32>
    %187 = arith.truncf %186 : vector<30x30xf32> to vector<30x30xbf16>
    %cst_78 = arith.constant dense<0.000000e+00> : vector<30x8xf32>
    %188 = tpu.matmul %187, %174, %cst_78 {dimension_numbers = #tpu.dot_dimension_numbers<[1], [0], [0], [1], [0, 0, 1, 1], [], []>} : vector<30x30xbf16>, vector<30x8xbf16>, vector<30x8xf32> -> vector<30x8xf32>
    %189 = vector.extract_strided_slice %144 {offsets = [0, 16], sizes = [30, 8], strides = [1, 1]} : vector<30x96xf32> to vector<30x8xf32>
    %cst_79 = arith.constant 0.353553385 : f32
    %190 = vector.broadcast %cst_79 : f32 to vector<30x8xf32>
    %191 = arith.mulf %189, %190 : vector<30x8xf32>
    %192 = arith.truncf %191 : vector<30x8xf32> to vector<30x8xbf16>
    %193 = vector.extract_strided_slice %144 {offsets = [0, 48], sizes = [30, 8], strides = [1, 1]} : vector<30x96xf32> to vector<30x8xf32>
    %194 = arith.truncf %193 : vector<30x8xf32> to vector<30x8xbf16>
    %195 = vector.extract_strided_slice %144 {offsets = [0, 80], sizes = [30, 8], strides = [1, 1]} : vector<30x96xf32> to vector<30x8xf32>
    %196 = arith.truncf %195 : vector<30x8xf32> to vector<30x8xbf16>
    %cst_80 = arith.constant dense<0.000000e+00> : vector<30x30xf32>
    %197 = tpu.matmul %192, %194, %cst_80 {dimension_numbers = #tpu.dot_dimension_numbers<[1], [1], [0], [0], [0, 0, 1, 0], [], []>} : vector<30x8xbf16>, vector<30x8xbf16>, vector<30x30xf32> -> vector<30x30xf32>
    %cst_81 = arith.constant dense<0xFF800000> : vector<30xf32>
    %198 = vector.multi_reduction <maximumf>, %197, %cst_81 [1] : vector<30x30xf32> to vector<30xf32>
    %199 = vector.shape_cast %198 : vector<30xf32> to vector<30x1xf32>
    %200 = vector.broadcast %199 : vector<30x1xf32> to vector<30x30xf32>
    %201 = arith.subf %197, %200 : vector<30x30xf32>
    %202 = math.exp %201 : vector<30x30xf32>
    %cst_82 = arith.constant dense<0.000000e+00> : vector<30xf32>
    %203 = vector.multi_reduction <add>, %202, %cst_82 [1] : vector<30x30xf32> to vector<30xf32>
    %204 = vector.shape_cast %203 : vector<30xf32> to vector<30x1xf32>
    %cst_83 = arith.constant 1.000000e+00 : f32
    %205 = vector.broadcast %cst_83 : f32 to vector<30x1xf32>
    %206 = arith.divf %205, %204 : vector<30x1xf32>
    %207 = vector.broadcast %206 : vector<30x1xf32> to vector<30x30xf32>
    %208 = arith.mulf %202, %207 : vector<30x30xf32>
    %209 = arith.truncf %208 : vector<30x30xf32> to vector<30x30xbf16>
    %cst_84 = arith.constant dense<0.000000e+00> : vector<30x8xf32>
    %210 = tpu.matmul %209, %196, %cst_84 {dimension_numbers = #tpu.dot_dimension_numbers<[1], [0], [0], [1], [0, 0, 1, 1], [], []>} : vector<30x30xbf16>, vector<30x8xbf16>, vector<30x8xf32> -> vector<30x8xf32>
    %211 = vector.extract_strided_slice %144 {offsets = [0, 24], sizes = [30, 8], strides = [1, 1]} : vector<30x96xf32> to vector<30x8xf32>
    %cst_85 = arith.constant 0.353553385 : f32
    %212 = vector.broadcast %cst_85 : f32 to vector<30x8xf32>
    %213 = arith.mulf %211, %212 : vector<30x8xf32>
    %214 = arith.truncf %213 : vector<30x8xf32> to vector<30x8xbf16>
    %215 = vector.extract_strided_slice %144 {offsets = [0, 56], sizes = [30, 8], strides = [1, 1]} : vector<30x96xf32> to vector<30x8xf32>
    %216 = arith.truncf %215 : vector<30x8xf32> to vector<30x8xbf16>
    %217 = vector.extract_strided_slice %144 {offsets = [0, 88], sizes = [30, 8], strides = [1, 1]} : vector<30x96xf32> to vector<30x8xf32>
    %218 = arith.truncf %217 : vector<30x8xf32> to vector<30x8xbf16>
    %cst_86 = arith.constant dense<0.000000e+00> : vector<30x30xf32>
    %219 = tpu.matmul %214, %216, %cst_86 {dimension_numbers = #tpu.dot_dimension_numbers<[1], [1], [0], [0], [0, 0, 1, 0], [], []>} : vector<30x8xbf16>, vector<30x8xbf16>, vector<30x30xf32> -> vector<30x30xf32>
    %cst_87 = arith.constant dense<0xFF800000> : vector<30xf32>
    %220 = vector.multi_reduction <maximumf>, %219, %cst_87 [1] : vector<30x30xf32> to vector<30xf32>
    %221 = vector.shape_cast %220 : vector<30xf32> to vector<30x1xf32>
    %222 = vector.broadcast %221 : vector<30x1xf32> to vector<30x30xf32>
    %223 = arith.subf %219, %222 : vector<30x30xf32>
    %224 = math.exp %223 : vector<30x30xf32>
    %cst_88 = arith.constant dense<0.000000e+00> : vector<30xf32>
    %225 = vector.multi_reduction <add>, %224, %cst_88 [1] : vector<30x30xf32> to vector<30xf32>
    %226 = vector.shape_cast %225 : vector<30xf32> to vector<30x1xf32>
    %cst_89 = arith.constant 1.000000e+00 : f32
    %227 = vector.broadcast %cst_89 : f32 to vector<30x1xf32>
    %228 = arith.divf %227, %226 : vector<30x1xf32>
    %229 = vector.broadcast %228 : vector<30x1xf32> to vector<30x30xf32>
    %230 = arith.mulf %224, %229 : vector<30x30xf32>
    %231 = arith.truncf %230 : vector<30x30xf32> to vector<30x30xbf16>
    %cst_90 = arith.constant dense<0.000000e+00> : vector<30x8xf32>
    %232 = tpu.matmul %231, %218, %cst_90 {dimension_numbers = #tpu.dot_dimension_numbers<[1], [0], [0], [1], [0, 0, 1, 1], [], []>} : vector<30x30xbf16>, vector<30x8xbf16>, vector<30x8xf32> -> vector<30x8xf32>
    %233 = tpu.concatenate %166, %188, %210, %232 in 1 : vector<30x8xf32>, vector<30x8xf32>, vector<30x8xf32>, vector<30x8xf32> -> vector<30x32xf32>
    %234 = tpu.concatenate %143, %233 in 0 : vector<30x32xf32>, vector<30x32xf32> -> vector<60x32xf32>
    %235 = arith.truncf %234 : vector<60x32xf32> to vector<60x32xbf16>
    %cst_91 = arith.constant dense<0.000000e+00> : vector<60x32xf32>
    %236 = tpu.matmul %235, %8, %cst_91 {dimension_numbers = #tpu.dot_dimension_numbers<[1], [0], [0], [1], [0, 0, 1, 1], [], []>} : vector<60x32xbf16>, vector<32x32xbf16>, vector<60x32xf32> -> vector<60x32xf32>
    %237 = vector.broadcast %10 : vector<1x32xf32> to vector<60x32xf32>
    %238 = arith.addf %236, %237 : vector<60x32xf32>
    %239 = arith.addf %27, %238 : vector<60x32xf32>
    %cst_92 = arith.constant dense<0.000000e+00> : vector<60xf32>
    %240 = vector.multi_reduction <add>, %239, %cst_92 [1] : vector<60x32xf32> to vector<60xf32>
    %241 = vector.shape_cast %240 : vector<60xf32> to vector<60x1xf32>
    %cst_93 = arith.constant 3.200000e+01 : f32
    %242 = vector.broadcast %cst_93 : f32 to vector<60x1xf32>
    %243 = arith.divf %241, %242 : vector<60x1xf32>
    %244 = vector.broadcast %243 : vector<60x1xf32> to vector<60x32xf32>
    %245 = arith.subf %239, %244 : vector<60x32xf32>
    %246 = arith.mulf %245, %245 : vector<60x32xf32>
    %cst_94 = arith.constant dense<0.000000e+00> : vector<60xf32>
    %247 = vector.multi_reduction <add>, %246, %cst_94 [1] : vector<60x32xf32> to vector<60xf32>
    %248 = vector.shape_cast %247 : vector<60xf32> to vector<60x1xf32>
    %cst_95 = arith.constant 3.200000e+01 : f32
    %249 = vector.broadcast %cst_95 : f32 to vector<60x1xf32>
    %250 = arith.divf %248, %249 : vector<60x1xf32>
    %251 = vector.broadcast %243 : vector<60x1xf32> to vector<60x32xf32>
    %252 = arith.subf %239, %251 : vector<60x32xf32>
    %cst_96 = arith.constant 9.99999974E-6 : f32
    %253 = vector.broadcast %cst_96 : f32 to vector<60x1xf32>
    %254 = arith.addf %250, %253 : vector<60x1xf32>
    %255 = math.rsqrt %254 : vector<60x1xf32>
    %256 = vector.broadcast %255 : vector<60x1xf32> to vector<60x32xf32>
    %257 = arith.mulf %252, %256 : vector<60x32xf32>
    %258 = vector.broadcast %24 : vector<1x32xf32> to vector<60x32xf32>
    %259 = arith.mulf %257, %258 : vector<60x32xf32>
    %260 = vector.broadcast %26 : vector<1x32xf32> to vector<60x32xf32>
    %261 = arith.addf %259, %260 : vector<60x32xf32>
    %262 = arith.truncf %261 : vector<60x32xf32> to vector<60x32xbf16>
    %cst_97 = arith.constant dense<0.000000e+00> : vector<60x128xf32>
    %263 = tpu.matmul %262, %12, %cst_97 {dimension_numbers = #tpu.dot_dimension_numbers<[1], [0], [0], [1], [0, 0, 1, 1], [], []>} : vector<60x32xbf16>, vector<32x128xbf16>, vector<60x128xf32> -> vector<60x128xf32>
    %264 = vector.broadcast %14 : vector<1x128xf32> to vector<60x128xf32>
    %265 = arith.addf %263, %264 : vector<60x128xf32>
    %cst_98 = arith.constant 5.000000e-01 : f32
    %266 = vector.broadcast %cst_98 : f32 to vector<60x128xf32>
    %267 = arith.mulf %266, %265 : vector<60x128xf32>
    %cst_99 = arith.constant 0.707106769 : f32
    %268 = vector.broadcast %cst_99 : f32 to vector<60x128xf32>
    %269 = arith.mulf %265, %268 : vector<60x128xf32>
    %270 = math.erf %269 : vector<60x128xf32>
    %cst_100 = arith.constant 1.000000e+00 : f32
    %271 = vector.broadcast %cst_100 : f32 to vector<60x128xf32>
    %272 = arith.addf %271, %270 : vector<60x128xf32>
    %273 = arith.mulf %267, %272 : vector<60x128xf32>
    %274 = arith.truncf %273 : vector<60x128xf32> to vector<60x128xbf16>
    %cst_101 = arith.constant dense<0.000000e+00> : vector<60x32xf32>
    %275 = tpu.matmul %274, %16, %cst_101 {dimension_numbers = #tpu.dot_dimension_numbers<[1], [0], [0], [1], [0, 0, 1, 1], [], []>} : vector<60x128xbf16>, vector<128x32xbf16>, vector<60x32xf32> -> vector<60x32xf32>
    %276 = vector.broadcast %18 : vector<1x32xf32> to vector<60x32xf32>
    %277 = arith.addf %275, %276 : vector<60x32xf32>
    %278 = arith.addf %239, %277 : vector<60x32xf32>
    %c0_102 = arith.constant 0 : index
    %c0_103 = arith.constant 0 : index
    %279 = vector.load %arg15[%c0_102, %c0_103] : memref<60x32xf32, #tpu.memory_space<vmem>>, vector<60x32xf32>
    tpu.vector_store %arg15[%c0_102, %c0_103], %278 {strides = array<i32>} : memref<60x32xf32, #tpu.memory_space<vmem>>, vector<60x32xf32>,
    %c0_i32_104 = arith.constant 0 : i32
    %280 = arith.cmpi eq, %arg0, %c0_i32_104 : i32
    %281 = arith.extui %280 : i1 to i32
    %c0_i32_105 = arith.constant 0 : i32
    %282 = arith.cmpi ne, %281, %c0_i32_105 : i32
    scf.if %282 {
      %c0_106 = arith.constant 0 : index
      %c0_107 = arith.constant 0 : index
      %283 = vector.load %arg15[%c0_106, %c0_107] : memref<60x32xf32, #tpu.memory_space<vmem>>, vector<60x32xf32>
      %284 = arith.truncf %283 : vector<60x32xf32> to vector<60x32xbf16>
      %c0_108 = arith.constant 0 : index
      %c0_109 = arith.constant 0 : index
      %285 = vector.load %arg14[%c0_108, %c0_109] : memref<60x32xbf16, #tpu.memory_space<vmem>>, vector<60x32xbf16>
      tpu.vector_store %arg14[%c0_108, %c0_109], %284 {strides = array<i32>} : memref<60x32xbf16, #tpu.memory_space<vmem>>, vector<60x32xbf16>,
    } else {
    }
    return
  }
  func.func @transform_0(%arg0: i32) -> (i32, i32) {
    %c0_i32 = arith.constant 0 : i32
    %c0_i32_0 = arith.constant 0 : i32
    %c0_i32_1 = arith.constant 0 : i32
    return %c0_i32, %c0_i32_0 : i32, i32
  }
  func.func @transform_1(%arg0: i32) -> (i32, i32, i32) {
    %c0_i32 = arith.constant 0 : i32
    %c0_i32_0 = arith.constant 0 : i32
    %c0_i32_1 = arith.constant 0 : i32
    return %arg0, %c0_i32, %c0_i32_0 : i32, i32, i32
  }
  func.func @transform_2(%arg0: i32) -> (i32, i32, i32) {
    %c0_i32 = arith.constant 0 : i32
    %c0_i32_0 = arith.constant 0 : i32
    %c0_i32_1 = arith.constant 0 : i32
    return %arg0, %c0_i32, %c0_i32_0 : i32, i32, i32
  }
  func.func @transform_3(%arg0: i32) -> (i32, i32, i32) {
    %c0_i32 = arith.constant 0 : i32
    %c0_i32_0 = arith.constant 0 : i32
    %c0_i32_1 = arith.constant 0 : i32
    return %arg0, %c0_i32, %c0_i32_0 : i32, i32, i32
  }
  func.func @transform_4(%arg0: i32) -> (i32, i32, i32) {
    %c0_i32 = arith.constant 0 : i32
    %c0_i32_0 = arith.constant 0 : i32
    %c0_i32_1 = arith.constant 0 : i32
    return %arg0, %c0_i32, %c0_i32_0 : i32, i32, i32
  }
  func.func @transform_5(%arg0: i32) -> (i32, i32, i32) {
    %c0_i32 = arith.constant 0 : i32
    %c0_i32_0 = arith.constant 0 : i32
    %c0_i32_1 = arith.constant 0 : i32
    return %arg0, %c0_i32, %c0_i32_0 : i32, i32, i32
  }
  func.func @transform_6(%arg0: i32) -> (i32, i32, i32) {
    %c0_i32 = arith.constant 0 : i32
    %c0_i32_0 = arith.constant 0 : i32
    %c0_i32_1 = arith.constant 0 : i32
    return %arg0, %c0_i32, %c0_i32_0 : i32, i32, i32
  }
  func.func @transform_7(%arg0: i32) -> (i32, i32, i32) {
    %c0_i32 = arith.constant 0 : i32
    %c0_i32_0 = arith.constant 0 : i32
    %c0_i32_1 = arith.constant 0 : i32
    return %arg0, %c0_i32, %c0_i32_0 : i32, i32, i32
  }
  func.func @transform_8(%arg0: i32) -> (i32, i32, i32) {
    %c0_i32 = arith.constant 0 : i32
    %c0_i32_0 = arith.constant 0 : i32
    %c0_i32_1 = arith.constant 0 : i32
    return %arg0, %c0_i32, %c0_i32_0 : i32, i32, i32
  }
  func.func @transform_9(%arg0: i32) -> (i32, i32, i32) {
    %c0_i32 = arith.constant 0 : i32
    %c0_i32_0 = arith.constant 0 : i32
    %c0_i32_1 = arith.constant 0 : i32
    return %arg0, %c0_i32, %c0_i32_0 : i32, i32, i32
  }
  func.func @transform_10(%arg0: i32) -> (i32, i32, i32) {
    %c0_i32 = arith.constant 0 : i32
    %c0_i32_0 = arith.constant 0 : i32
    %c0_i32_1 = arith.constant 0 : i32
    return %arg0, %c0_i32, %c0_i32_0 : i32, i32, i32
  }
  func.func @transform_11(%arg0: i32) -> (i32, i32, i32) {
    %c0_i32 = arith.constant 0 : i32
    %c0_i32_0 = arith.constant 0 : i32
    %c0_i32_1 = arith.constant 0 : i32
    return %arg0, %c0_i32, %c0_i32_0 : i32, i32, i32
  }
  func.func @transform_12(%arg0: i32) -> (i32, i32, i32) {
    %c0_i32 = arith.constant 0 : i32
    %c0_i32_0 = arith.constant 0 : i32
    %c0_i32_1 = arith.constant 0 : i32
    return %arg0, %c0_i32, %c0_i32_0 : i32, i32, i32
  }
  func.func @transform_13(%arg0: i32) -> (i32, i32) {
    %c0_i32 = arith.constant 0 : i32
    %c0_i32_0 = arith.constant 0 : i32
    %c0_i32_1 = arith.constant 0 : i32
    return %c0_i32, %c0_i32_0 : i32, i32
  }
}

module attributes {stable_mosaic.version = 11 : i64} {
  func.func @head_kernel(%arg0: memref<2x30x32xbf16, #tpu.memory_space<vmem>>, %arg1: memref<1x32xf32, #tpu.memory_space<vmem>>, %arg2: memref<1x32xf32, #tpu.memory_space<vmem>>, %arg3: memref<1x32xf32, #tpu.memory_space<vmem>>, %arg4: memref<1x32xf32, #tpu.memory_space<vmem>>, %arg5: memref<32x128xbf16, #tpu.memory_space<vmem>>, %arg6: memref<1x128xf32, #tpu.memory_space<vmem>>, %arg7: memref<2x128xf32, #tpu.memory_space<vmem>>) attributes {dimension_semantics = [], scalar_prefetch = 0 : i64, scratch_operands = 0 : i64, tpu.core_type = #tpu.core_type<tc>} {
    %c0 = arith.constant 0 : index
    %c0_0 = arith.constant 0 : index
    %c0_1 = arith.constant 0 : index
    %0 = vector.load %arg0[%c0, %c0_0, %c0_1] : memref<2x30x32xbf16, #tpu.memory_space<vmem>>, vector<2x30x32xbf16>
    %1 = arith.extf %0 : vector<2x30x32xbf16> to vector<2x30x32xf32>
    %c0_2 = arith.constant 0 : index
    %c0_3 = arith.constant 0 : index
    %2 = vector.load %arg1[%c0_2, %c0_3] : memref<1x32xf32, #tpu.memory_space<vmem>>, vector<1x32xf32>
    %c0_4 = arith.constant 0 : index
    %c0_5 = arith.constant 0 : index
    %3 = vector.load %arg2[%c0_4, %c0_5] : memref<1x32xf32, #tpu.memory_space<vmem>>, vector<1x32xf32>
    %cst = arith.constant dense<0.000000e+00> : vector<2x30xf32>
    %4 = vector.multi_reduction <add>, %1, %cst [2] : vector<2x30x32xf32> to vector<2x30xf32>
    %5 = vector.shape_cast %4 : vector<2x30xf32> to vector<2x30x1xf32>
    %cst_6 = arith.constant 3.200000e+01 : f32
    %6 = vector.broadcast %cst_6 : f32 to vector<2x30x1xf32>
    %7 = arith.divf %5, %6 : vector<2x30x1xf32>
    %8 = vector.broadcast %7 : vector<2x30x1xf32> to vector<2x30x32xf32>
    %9 = arith.subf %1, %8 : vector<2x30x32xf32>
    %10 = arith.mulf %9, %9 : vector<2x30x32xf32>
    %cst_7 = arith.constant dense<0.000000e+00> : vector<2x30xf32>
    %11 = vector.multi_reduction <add>, %10, %cst_7 [2] : vector<2x30x32xf32> to vector<2x30xf32>
    %12 = vector.shape_cast %11 : vector<2x30xf32> to vector<2x30x1xf32>
    %cst_8 = arith.constant 3.200000e+01 : f32
    %13 = vector.broadcast %cst_8 : f32 to vector<2x30x1xf32>
    %14 = arith.divf %12, %13 : vector<2x30x1xf32>
    %15 = vector.broadcast %7 : vector<2x30x1xf32> to vector<2x30x32xf32>
    %16 = arith.subf %1, %15 : vector<2x30x32xf32>
    %cst_9 = arith.constant 9.99999974E-6 : f32
    %17 = vector.broadcast %cst_9 : f32 to vector<2x30x1xf32>
    %18 = arith.addf %14, %17 : vector<2x30x1xf32>
    %19 = math.rsqrt %18 : vector<2x30x1xf32>
    %20 = vector.broadcast %19 : vector<2x30x1xf32> to vector<2x30x32xf32>
    %21 = arith.mulf %16, %20 : vector<2x30x32xf32>
    %22 = vector.shape_cast %2 : vector<1x32xf32> to vector<1x1x32xf32>
    %23 = vector.broadcast %22 : vector<1x1x32xf32> to vector<2x30x32xf32>
    %24 = arith.mulf %21, %23 : vector<2x30x32xf32>
    %25 = vector.shape_cast %3 : vector<1x32xf32> to vector<1x1x32xf32>
    %26 = vector.broadcast %25 : vector<1x1x32xf32> to vector<2x30x32xf32>
    %27 = arith.addf %24, %26 : vector<2x30x32xf32>
    %cst_10 = arith.constant dense<0.000000e+00> : vector<2x32xf32>
    %28 = vector.multi_reduction <add>, %27, %cst_10 [1] : vector<2x30x32xf32> to vector<2x32xf32>
    %cst_11 = arith.constant 3.000000e+01 : f32
    %29 = vector.broadcast %cst_11 : f32 to vector<2x32xf32>
    %30 = arith.divf %28, %29 : vector<2x32xf32>
    %c0_12 = arith.constant 0 : index
    %c0_13 = arith.constant 0 : index
    %31 = vector.load %arg3[%c0_12, %c0_13] : memref<1x32xf32, #tpu.memory_space<vmem>>, vector<1x32xf32>
    %c0_14 = arith.constant 0 : index
    %c0_15 = arith.constant 0 : index
    %32 = vector.load %arg4[%c0_14, %c0_15] : memref<1x32xf32, #tpu.memory_space<vmem>>, vector<1x32xf32>
    %cst_16 = arith.constant dense<0.000000e+00> : vector<2xf32>
    %33 = vector.multi_reduction <add>, %30, %cst_16 [1] : vector<2x32xf32> to vector<2xf32>
    %34 = vector.shape_cast %33 : vector<2xf32> to vector<2x1xf32>
    %cst_17 = arith.constant 3.200000e+01 : f32
    %35 = vector.broadcast %cst_17 : f32 to vector<2x1xf32>
    %36 = arith.divf %34, %35 : vector<2x1xf32>
    %37 = vector.broadcast %36 : vector<2x1xf32> to vector<2x32xf32>
    %38 = arith.subf %30, %37 : vector<2x32xf32>
    %39 = arith.mulf %38, %38 : vector<2x32xf32>
    %cst_18 = arith.constant dense<0.000000e+00> : vector<2xf32>
    %40 = vector.multi_reduction <add>, %39, %cst_18 [1] : vector<2x32xf32> to vector<2xf32>
    %41 = vector.shape_cast %40 : vector<2xf32> to vector<2x1xf32>
    %cst_19 = arith.constant 3.200000e+01 : f32
    %42 = vector.broadcast %cst_19 : f32 to vector<2x1xf32>
    %43 = arith.divf %41, %42 : vector<2x1xf32>
    %44 = vector.broadcast %36 : vector<2x1xf32> to vector<2x32xf32>
    %45 = arith.subf %30, %44 : vector<2x32xf32>
    %cst_20 = arith.constant 9.99999974E-6 : f32
    %46 = vector.broadcast %cst_20 : f32 to vector<2x1xf32>
    %47 = arith.addf %43, %46 : vector<2x1xf32>
    %48 = math.rsqrt %47 : vector<2x1xf32>
    %49 = vector.broadcast %48 : vector<2x1xf32> to vector<2x32xf32>
    %50 = arith.mulf %45, %49 : vector<2x32xf32>
    %51 = vector.broadcast %31 : vector<1x32xf32> to vector<2x32xf32>
    %52 = arith.mulf %50, %51 : vector<2x32xf32>
    %53 = vector.broadcast %32 : vector<1x32xf32> to vector<2x32xf32>
    %54 = arith.addf %52, %53 : vector<2x32xf32>
    %55 = arith.truncf %54 : vector<2x32xf32> to vector<2x32xbf16>
    %c0_21 = arith.constant 0 : index
    %c0_22 = arith.constant 0 : index
    %56 = vector.load %arg5[%c0_21, %c0_22] : memref<32x128xbf16, #tpu.memory_space<vmem>>, vector<32x128xbf16>
    %cst_23 = arith.constant dense<0.000000e+00> : vector<2x128xf32>
    %57 = tpu.matmul %55, %56, %cst_23 {dimension_numbers = #tpu.dot_dimension_numbers<[1], [0], [0], [1], [0, 0, 1, 1], [], []>} : vector<2x32xbf16>, vector<32x128xbf16>, vector<2x128xf32> -> vector<2x128xf32>
    %c0_24 = arith.constant 0 : index
    %c0_25 = arith.constant 0 : index
    %58 = vector.load %arg6[%c0_24, %c0_25] : memref<1x128xf32, #tpu.memory_space<vmem>>, vector<1x128xf32>
    %59 = vector.broadcast %58 : vector<1x128xf32> to vector<2x128xf32>
    %60 = arith.addf %57, %59 : vector<2x128xf32>
    %cst_26 = arith.constant dense<0xFF800000> : vector<2xf32>
    %61 = vector.multi_reduction <maximumf>, %60, %cst_26 [1] : vector<2x128xf32> to vector<2xf32>
    %62 = vector.shape_cast %61 : vector<2xf32> to vector<2x1xf32>
    %63 = vector.broadcast %62 : vector<2x1xf32> to vector<2x128xf32>
    %64 = arith.subf %60, %63 : vector<2x128xf32>
    %65 = math.exp %64 : vector<2x128xf32>
    %cst_27 = arith.constant dense<0.000000e+00> : vector<2xf32>
    %66 = vector.multi_reduction <add>, %65, %cst_27 [1] : vector<2x128xf32> to vector<2xf32>
    %67 = vector.shape_cast %66 : vector<2xf32> to vector<2x1xf32>
    %68 = vector.broadcast %67 : vector<2x1xf32> to vector<2x128xf32>
    %69 = arith.divf %65, %68 : vector<2x128xf32>
    %c0_28 = arith.constant 0 : index
    %c0_29 = arith.constant 0 : index
    %70 = vector.load %arg7[%c0_28, %c0_29] : memref<2x128xf32, #tpu.memory_space<vmem>>, vector<2x128xf32>
    tpu.vector_store %arg7[%c0_28, %c0_29], %69 {strides = array<i32>} : memref<2x128xf32, #tpu.memory_space<vmem>>, vector<2x128xf32>,
    return
  }
}

</mosaic_0001>

<bundles_post_ra>
// kernel: cavmae_forward.7
= control target key start
LH: loop header
LB: loop body
LE: loop exit
PB: predicated region body
PF: predicated region fallthrough
CT: control target
= control target key end

     0   :  { %s1124_s21 = smov 0   ;;  %s1317_s0 = inlined_call_operand.vmem [shape: bf16[4,4,768], index: 0, kind: input, shape index: {}]   ;;  %s1318_s1 = inlined_call_operand.vmem [shape: bf16[768,32], index: 1, kind: input, shape index: {}]   ;;  %s1319_s2 = inlined_call_operand.vmem [shape: f32[1,32], index: 2, kind: input, shape index: {}]   ;;  %s1320_s3 = inlined_call_operand.vmem [shape: f32[4,32], index: 3, kind: input, shape index: {}]   ;;  %s1321_s4 = inlined_call_operand.vmem [shape: f32[9,32], index: 4, kind: input, shape index: {}]   ;;  %s1322_s5 = inlined_call_operand.vmem [shape: f32[1,32], index: 5, kind: input, shape index: {}]   ;;  %s1323_s6 = inlined_call_operand.vmem [shape: bf16[4,13,32], index: 6, kind: output, shape index: {}]  }
   0x1 LB: > { %s889_s22 = sadd.s32 4294967295, %s1086_s21   ;;  %p893_p0 = scmp.ge.s32.totalorder %s1086_s21, 1  ;;  %s1086_s21 = sphi %s1124_s21, %s16_s21  }
   0x2   : > { %p212_p1 = scmp.lt.s32.totalorder %s1086_s21, 5 }
   0x4   : > { %p213_p2 = pnand %p893_p0, %p212_p1 }
   0x5   : > { %v1031_v0 = vld [vmem:[%s1318_s1 + $0x40] sm:$0xff] (!%p213_p2)   ;;  %v1035_v4 = vld [vmem:[%s1318_s1 + $0x48] sm:$0xff] (!%p213_p2)   ;;  %v1039_v8 = vld [vmem:[%s1318_s1 + $0x50] sm:$0xff] (!%p213_p2)   ;;  %p242_p3 = scmp.lt.s32.totalorder (!%p213_p2), %s889_s22, 3  ;;  %v364_v28 = vlaneseq (!%p213_p2)  ;;  %v1088_v35 = vmov (!%p213_p2), 1983009808  }
   0x6   : > { %216 = sbr.rel (%p213_p2) target bundleno = 298 (0x12a), region = 44  ;;  %v1032_v1 = vld [vmem:[%s1318_s1] sm:$0xff] (!%p213_p2)   ;;  %955 = vmatprep.subr.bf16.mxu0 (!%p213_p2), %v1031_v0  ;;  %v1036_v5 = vld [vmem:[%s1318_s1 + $0x8] sm:$0xff] (!%p213_p2)   ;;  %v1040_v9 = vld [vmem:[%s1318_s1 + $0x10] sm:$0xff] (!%p213_p2)   ;;  %v362_v36 = vunpack.c.l.s4 (!%p213_p2), %v1088_v35  ;;  %vm826_vm0 = vcmask (!%p213_p2), 257024   ;;  %vm816_vm1 = vcmask (!%p213_p2), 1040384  }
   0x7   : > { %v1033_v2 = vld [vmem:[%s1318_s1 + $0xc0] sm:$0xff] (!%p213_p2)   ;;  %956 = vmatpush3.bf16.msra.mxu0 (!%p213_p2), %v1032_v1  ;;  %v1037_v6 = vld [vmem:[%s1318_s1 + $0xc8] sm:$0xff] (!%p213_p2)   ;;  %v1041_v10 = vld [vmem:[%s1318_s1 + $0xd0] sm:$0xff] (!%p213_p2)   ;;  %v365_v33 = vshrl.u32 (!%p213_p2), %v364_v28, 7  ;;  %vm828_vm2 = vcmask (!%p213_p2), 256000  }
   0x8   : > { %v1034_v3 = vld [vmem:[%s1318_s1 + $0x80] sm:$0xff] (!%p213_p2)   ;;  %977 = vmatprep.subr.bf16.mxu1 (!%p213_p2), %v1033_v2  ;;  %957 = vmatprep.subr.bf16.mxu0 (!%p213_p2), %v1035_v4  ;;  %v1038_v7 = vld [vmem:[%s1318_s1 + $0x88] sm:$0xff] (!%p213_p2)   ;;  %v1042_v11 = vld [vmem:[%s1318_s1 + $0x90] sm:$0xff] (!%p213_p2)   ;;  %v363_v38 = vunpack.c.0.s8 (!%p213_p2), %v362_v36  ;;  %vm829_vm3 = vsmask.f32 (!%p213_p2), 2304 }
   0x9   : > { %978 = vmatpush3.bf16.msra.mxu1 (!%p213_p2), %v1034_v3  ;;  %v1043_v12 = vld [vmem:[%s1318_s1 + $0x58] sm:$0xff] (!%p213_p2)   ;;  %v1047_v16 = vld [vmem:[%s1318_s1 + $0x60] sm:$0xff] (!%p213_p2)   ;;  %v1051_v20 = vld [vmem:[%s1318_s1 + $0x68] sm:$0xff] (!%p213_p2)  }
   0xa   : > { %979 = vmatprep.subr.bf16.mxu1 (!%p213_p2), %v1037_v6  ;;  %v1044_v13 = vld [vmem:[%s1318_s1 + $0x18] sm:$0xff] (!%p213_p2)   ;;  %v1048_v17 = vld [vmem:[%s1318_s1 + $0x20] sm:$0xff] (!%p213_p2)   ;;  %v1052_v21 = vld [vmem:[%s1318_s1 + $0x28] sm:$0xff] (!%p213_p2)   ;;  %v366_v40 = vsub.s32 (!%p213_p2), %v363_v38, %v365_v33 }
   0xb   : > { %958 = vmatpush3.bf16.msra.mxu0 (!%p213_p2), %v1036_v5  ;;  %v1045_v14 = vld [vmem:[%s1318_s1 + $0xd8] sm:$0xff] (!%p213_p2)   ;;  %v1049_v18 = vld [vmem:[%s1318_s1 + $0xe0] sm:$0xff] (!%p213_p2)   ;;  %v1053_v22 = vld [vmem:[%s1318_s1 + $0xe8] sm:$0xff] (!%p213_p2)  }
   0xc   : > { %959 = vmatprep.subr.bf16.mxu0 (!%p213_p2), %v1039_v8  ;;  %v1046_v15 = vld [vmem:[%s1318_s1 + $0x98] sm:$0xff] (!%p213_p2)   ;;  %v1050_v19 = vld [vmem:[%s1318_s1 + $0xa0] sm:$0xff] (!%p213_p2)   ;;  %v1054_v23 = vld [vmem:[%s1318_s1 + $0xa8] sm:$0xff] (!%p213_p2)  }
   0xd   : > { %980 = vmatpush3.bf16.msra.mxu1 %v1038_v7  ;;  %s1325_s22 = smov (!%p242_p3, %s889_s22), 3  ;;  %v1055_v24 = vld [vmem:[%s1318_s1 + $0x70] sm:$0xff]   ;;  %v1059_v29 = vld [vmem:[%s1318_s1 + $0x78] sm:$0xff]   ;;  %v1063_v37 = vld [vmem:[%s1318_s1 + $0x140] sm:$0xff]  }
   0xe   : > { %981 = vmatprep.subr.bf16.mxu1 %v1041_v10  ;;  %s1021_s29 = smul.u32 12, %s1325_s22  ;;  %v1056_v25 = vld [vmem:[%s1318_s1 + $0x30] sm:$0xff]   ;;  %v1060_v30 = vld [vmem:[%s1318_s1 + $0x38] sm:$0xff]   ;;  %v1065_v45 = vld [vmem:[%s1318_s1 + $0x100] sm:$0xff]   ;;  %s952_s15 = sshll.u32 %s1325_s22, 3 }
   0xf   : > { %960 = vmatpush3.bf16.msra.mxu0 %v1040_v9  ;;  %v1057_v26 = vld [vmem:[%s1318_s1 + $0xf0] sm:$0xff]   ;;  %v1061_v31 = vld [vmem:[%s1318_s1 + $0xf8] sm:$0xff]   ;;  %v1066_v46 = vld [vmem:[%s1318_s1 + $0x148] sm:$0xff]   ;;  %s1300_s19 = scalar_lea.vmem %s1323_s6, %s952_s15 }
  0x10   : > { %961 = vmatprep.subr.bf16.mxu0 %v1043_v12  ;;  %v1058_v27 = vld [vmem:[%s1318_s1 + $0xb0] sm:$0xff]   ;;  %s1229_s16 = scalar_lea.vmem %s1317_s0, %s1021_s29  ;;  %v1062_v34 = vld [vmem:[%s1318_s1 + $0xb8] sm:$0xff]   ;;  %v1067_v47 = vld [vmem:[%s1318_s1 + $0x108] sm:$0xff]  }
  0x11   : > { %982 = vmatpush3.bf16.msra.mxu1 %v1042_v11  ;;  %v253_v32 = vld [vmem:[%s1229_s16] sm:$0xff]  ;;  %v1068_v48 = vld [vmem:[%s1318_s1 + $0x150] sm:$0xff]   ;;  %v1070_v50 = vld [vmem:[%s1318_s1 + $0x158] sm:$0xff]  }
  0x12   : > { %983 = vmatprep.subr.bf16.mxu1 %v1045_v14  ;;  %v360_v39 = vcombine.high %v253_v32, %v253_v32  ;;  %v367_v41 = vrot.slane %v253_v32, %v366_v40  ;;  %v1069_v49 = vld [vmem:[%s1318_s1 + $0x110] sm:$0xff]   ;;  %v898_v51 = vld.sshfl [vmem:[%s1229_s16 + $0x8] sm:$0x33 pattern:$0x76325410]  ;;  %v1071_v53 = vld [vmem:[%s1318_s1 + $0x118] sm:$0xff]  }
  0x13   : > { %962 = vmatpush3.bf16.msra.mxu0 %v1044_v13  ;;  %v384_v52 = vcombine.high %v898_v51, %v898_v51  ;;  %v1072_v54 = vld [vmem:[%s1318_s1 + $0x160] sm:$0xff]   ;;  %v1074_v56 = vld [vmem:[%s1318_s1 + $0x168] sm:$0xff]   ;;  %v1076_v58 = vld [vmem:[%s1318_s1 + $0x170] sm:$0xff]  }
  0x14   : > { %963 = vmatprep.subr.bf16.mxu0 %v1047_v16  ;;  %v374_v42 = vrot.slane %v360_v39, %v366_v40  ;;  %v375_v43 = vcombine.high %v367_v41, %v367_v41  ;;  %v1073_v55 = vld [vmem:[%s1318_s1 + $0x120] sm:$0xff]   ;;  %v1075_v57 = vld [vmem:[%s1318_s1 + $0x128] sm:$0xff]   ;;  %v1077_v59 = vld [vmem:[%s1318_s1 + $0x130] sm:$0xff]  }
  0x15   : > { %984 = vmatpush3.bf16.msra.mxu1 %v1046_v15  ;;  %v1078_v60 = vld [vmem:[%s1318_s1 + $0x178] sm:$0xff]   ;;  %v947_v62 = vld [vmem:[%s1322_s5] ss:$0 sm:$0xff]  ;;  %vm830_vm4 = vmand %vm828_vm2, %vm829_vm3 }
  0x16   : > { %985 = vmatprep.subr.bf16.mxu1 %v1049_v18  ;;  %v376_v44 = vcombine.high %v374_v42, %v374_v42  ;;  %711 = vmatprep.mubr.bf16.mxu0 %v375_v43  ;;  %v1079_v61 = vld [vmem:[%s1318_s1 + $0x138] sm:$0xff]   ;;  %v809_v63 = vld [vmem:[%s1321_s4] sm:$0xff] }
  0x17   : > { %964 = vmatpush3.bf16.msra.mxu0 %v1048_v17  ;;  %v811_v0 = vadd.f32 %v947_v62, %v809_v63  ;;  %v897_v4 = vld [vmem:[%s1319_s2] ss:$0 sm:$0xff] }
  0x18   : > { %965 = vmatprep.subr.bf16.mxu0 %v1051_v20  ;;  %751 = vmatprep.mubr.bf16.mxu1 %v376_v44 }
  0x19   : > { %986 = vmatpush3.bf16.msra.mxu1 %v1050_v19  ;;  %v953_v1 = vpack.c.bf16 %v811_v0, %v811_v0  ;;  %v799_v19 = vld [vmem:[%s1320_s3] sm:$0xf] }
  0x1a   : > { %987 = vmatprep.subr.bf16.mxu1 %v1053_v22  ;;  %v810_v22 = vld [vmem:[%s1321_s4 + $0x8] sm:$0x1] }
  0x1b   : > { %966 = vmatpush3.bf16.msra.mxu0 %v1052_v21  ;;  %827 = vst.msk [vmem:[%s1300_s19] sm:$0xf] %vm826_vm0, %v953_v1 }
  0x1c   : > { %967 = vmatprep.subr.bf16.mxu0 %v1055_v24 }
  0x1d   : > { %988 = vmatpush3.bf16.msra.mxu1 %v1054_v23 }
  0x1e   : > { %989 = vmatprep.subr.bf16.mxu1 %v1057_v26 }
  0x1f   : > { %968 = vmatpush3.bf16.msra.mxu0 %v1056_v25  ;;  %v812_v25 = vadd.f32 %v947_v62, %v810_v22 }
  0x20   : > { %969 = vmatprep.subr.bf16.mxu0 %v1059_v29 }
  0x21   : > { %990 = vmatpush3.bf16.msra.mxu1 %v1058_v27  ;;  %v831_v27 = vld [vmem:[%s1300_s19 + $0x4] sm:$0x7] }
  0x22   : > { %991 = vmatprep.subr.bf16.mxu1 %v1061_v31 }
  0x23   : > { %970 = vmatpush3.bf16.msra.mxu0 %v1060_v30 }
  0x24   : > { %999 = vmatprep.subr.bf16.mxu0 %v1063_v37 }
  0x25   : > { %992 = vmatpush3.bf16.msra.mxu1 %v1062_v34 }
  0x26   : > { %712 = vmatmul.mubr.bf16.vlgmr.msra.gmra.mrb[0].mxu0 %v367_v41 }
  0x27   : > { %1000 = vmatpush3.bf16.msra.mxu0 %v1065_v45  ;;  %791 = vmatprep.mubr.bf16.mxu0 %v384_v52 }
  0x28   : > { %752 = vmatmul.mubr.bf16.vlgmr.msra.gmra.mrb[0].mxu1 %v374_v42  ;;  %1001 = vmatprep.subr.bf16.mxu0 %v1066_v46 }
  0x2b   : > { %1002 = vmatpush3.bf16.msra.mxu0 %v1067_v47 }
  0x2c   : > { %1003 = vmatprep.subr.bf16.mxu0 %v1068_v48 }
  0x2f   : > { %1004 = vmatpush3.bf16.msra.mxu0 %v1069_v49 }
  0x30   : > { %1005 = vmatprep.subr.bf16.mxu0 %v1070_v50 }
  0x33   : > { %1006 = vmatpush3.bf16.msra.mxu0 %v1071_v53 }
  0x34   : > { %1007 = vmatprep.subr.bf16.mxu0 %v1072_v54 }
  0x37   : > { %1008 = vmatpush3.bf16.msra.mxu0 %v1073_v55 }
  0x38   : > { %1009 = vmatprep.subr.bf16.mxu0 %v1074_v56 }
  0x3b   : > { %1010 = vmatpush3.bf16.msra.mxu0 %v1075_v57 }
  0x3c   : > { %1011 = vmatprep.subr.bf16.mxu0 %v1076_v58 }
  0x3f   : > { %1012 = vmatpush3.bf16.msra.mxu0 %v1077_v59 }
  0x40   : > { %1013 = vmatprep.subr.bf16.mxu0 %v1078_v60 }
  0x43   : > { %1014 = vmatpush3.bf16.msra.mxu0 %v1079_v61 }
  0x46   : > { %792 = vmatmul.mubr.bf16.vlgmr.msra.gmra.mrb[4].mxu0 %v898_v51 }
  0xf9   : > { %v971_v2 = vpop.f32.mrb[0].mxu0 }
  0xfa   : > { %v972_v5 = vpop.f32.mrb[1].mxu0 }
  0xfb   : > { %v993_v3 = vpop.f32.mrb[0].mxu1  ;;  %v973_v7 = vadd.f32 %v972_v5, %v971_v2  ;;  %v974_v8 = vpop.f32.mrb[2].mxu0 }
  0xfc   : > { %v994_v6 = vpop.f32.mrb[1].mxu1  ;;  %v975_v11 = vpop.f32.mrb[3].mxu0 }
  0xfd   : > { %v995_v9 = vadd.f32 %v994_v6, %v993_v3  ;;  %v996_v10 = vpop.f32.mrb[2].mxu1  ;;  %v714_v13 = vadd.f32 %v973_v7, %v897_v4 }
  0xfe   : > { %v997_v12 = vpop.f32.mrb[3].mxu1 }
  0xff   : > { %v754_v14 = vadd.f32 %v995_v9, %v714_v13 }
 0x119   : > { %v1015_v15 = vpop.f32.mrb[4].mxu0 }
 0x11a   : > { %v1016_v16 = vpop.f32.mrb[5].mxu0 }
 0x11b   : > { %v1017_v17 = vadd.f32 %v1016_v16, %v1015_v15  ;;  %v1018_v18 = vpop.f32.mrb[6].mxu0 }
 0x11c   : > { %v1019_v20 = vpop.f32.mrb[7].mxu0 }
 0x11d   : > { %v794_v21 = vadd.f32 %v1017_v17, %v754_v14 }
 0x11f   : > { %v800_v23 = vadd.f32 %v799_v19, %v794_v21 }
 0x121   : > { %v808_v24 = vadd.f32 %v947_v62, %v800_v23 }
 0x123   : > { %v814_v26 = vrot.slane %v808_v24, 7 }
 0x125   : > { %v817_v28 = vsel %vm816_vm1, %v812_v25, %v814_v26 }
 0x126   : > { %v954_v29 = vpack.c.bf16 %v817_v28, %v817_v28 }
 0x128   : > { %v832_v30 = vsel %vm830_vm4, %v954_v29, %v831_v27 }
 0x129   : > { %833 = vst [vmem:[%s1300_s19 + $0x4] sm:$0x7] %v832_v30 }
 0x12a PF: > { %s16_s21 = sadd.s32 1, %s1086_s21  }
 0x12b   : > { %p13_p4 = scmp.ge.s32.totalorder %s16_s21, 6  }
 0x12d   :  { %15 = sbr.rel (!%p13_p4) target bundleno = 1 (0x1), region = 74 }

// kernel: cavmae_forward.6
= control target key start
LH: loop header
LB: loop body
LE: loop exit
PB: predicated region body
PF: predicated region fallthrough
CT: control target
= control target key end

     0   :  { %s661_s21 = smov 0   ;;  %s747_s0 = inlined_call_operand.vmem [shape: bf16[2,8,256], index: 0, kind: input, shape index: {}]   ;;  %s748_s1 = inlined_call_operand.vmem [shape: bf16[256,32], index: 1, kind: input, shape index: {}]   ;;  %s749_s2 = inlined_call_operand.vmem [shape: f32[1,32], index: 2, kind: input, shape index: {}]   ;;  %s750_s3 = inlined_call_operand.vmem [shape: f32[8,32], index: 3, kind: input, shape index: {}]   ;;  %s751_s4 = inlined_call_operand.vmem [shape: f32[9,32], index: 4, kind: input, shape index: {}]   ;;  %s752_s5 = inlined_call_operand.vmem [shape: f32[1,32], index: 5, kind: input, shape index: {}]   ;;  %s753_s6 = inlined_call_operand.vmem [shape: bf16[2,17,32], index: 6, kind: output, shape index: {}]  }
   0x1 LB: > { %s532_s22 = sadd.s32 4294967295, %s624_s21   ;;  %p536_p0 = scmp.ge.s32.totalorder %s624_s21, 1  ;;  %s624_s21 = sphi %s661_s21, %s16_s21  }
   0x2   : > { %p212_p1 = scmp.lt.s32.totalorder %s624_s21, 3 }
   0x4   : > { %p213_p2 = pnand %p536_p0, %p212_p1 }
   0x5   : > { %v600_v0 = vld [vmem:[%s748_s1 + $0x40] sm:$0xff] (!%p213_p2)   ;;  %v602_v2 = vld [vmem:[%s748_s1 + $0x48] sm:$0xff] (!%p213_p2)   ;;  %p242_p3 = scmp.lt.s32.totalorder (!%p213_p2), %s532_s22, 1  ;;  %v604_v4 = vld [vmem:[%s748_s1 + $0x50] sm:$0xff] (!%p213_p2)   ;;  %vm468_vm0 = vcmask (!%p213_p2), 257024   ;;  %vm471_vm1 = vcmask (!%p213_p2), 253952  }
   0x6   : > { %216 = sbr.rel (%p213_p2) target bundleno = 265 (0x109), region = 44  ;;  %v601_v1 = vld [vmem:[%s748_s1] sm:$0xff] (!%p213_p2)   ;;  %569 = vmatprep.subr.bf16.mxu0 (!%p213_p2), %v600_v0  ;;  %v603_v3 = vld [vmem:[%s748_s1 + $0x8] sm:$0xff] (!%p213_p2)   ;;  %v605_v5 = vld [vmem:[%s748_s1 + $0x10] sm:$0xff] (!%p213_p2)   ;;  %vm472_vm2 = vsmask.f32 (!%p213_p2), 256 }
   0x7   : > { %570 = vmatpush3.bf16.msra.mxu0 (!%p213_p2), %v601_v1  ;;  %v606_v6 = vld [vmem:[%s748_s1 + $0x58] sm:$0xff] (!%p213_p2)   ;;  %v608_v8 = vld [vmem:[%s748_s1 + $0x60] sm:$0xff] (!%p213_p2)   ;;  %v610_v10 = vld [vmem:[%s748_s1 + $0x68] sm:$0xff] (!%p213_p2)   ;;  %vm453_vm3 = vcmask (!%p213_p2), 1040384  }
   0x8   : > { %571 = vmatprep.subr.bf16.mxu0 (!%p213_p2), %v602_v2  ;;  %v607_v7 = vld [vmem:[%s748_s1 + $0x18] sm:$0xff] (!%p213_p2)   ;;  %v609_v9 = vld [vmem:[%s748_s1 + $0x20] sm:$0xff] (!%p213_p2)   ;;  %v611_v13 = vld [vmem:[%s748_s1 + $0x28] sm:$0xff] (!%p213_p2)  }
   0x9   : > { %v612_v14 = vld [vmem:[%s748_s1 + $0x70] sm:$0xff] (!%p213_p2)   ;;  %v614_v16 = vld [vmem:[%s748_s1 + $0x78] sm:$0xff] (!%p213_p2)   ;;  %v559_v19 = vld [vmem:[%s752_s5] ss:$0 sm:$0xff] (!%p213_p2) }
   0xa   : > { %v613_v15 = vld [vmem:[%s748_s1 + $0x30] sm:$0xff] (!%p213_p2)   ;;  %v615_v17 = vld [vmem:[%s748_s1 + $0x38] sm:$0xff] (!%p213_p2)   ;;  %v446_v20 = vld [vmem:[%s751_s4] sm:$0xff] (!%p213_p2) }
   0xb   : > { %572 = vmatpush3.bf16.msra.mxu0 (!%p213_p2), %v603_v3  ;;  %v448_v21 = vadd.f32 (!%p213_p2), %v559_v19, %v446_v20  ;;  %v540_v24 = vld [vmem:[%s749_s2] ss:$0 sm:$0xff] (!%p213_p2)  ;;  %v447_v31 = vld [vmem:[%s751_s4 + $0x8] sm:$0x1] (!%p213_p2)  ;;  %vm473_vm4 = vmand (!%p213_p2), %vm471_vm1, %vm472_vm2 }
   0xc   : > { %573 = vmatprep.subr.bf16.mxu0 (!%p213_p2), %v604_v4  ;;  %v436_v28 = vld [vmem:[%s750_s3] sm:$0xff] (!%p213_p2)  ;;  %v449_v34 = vadd.f32 (!%p213_p2), %v559_v19, %v447_v31 }
   0xd   : > { %s755_s22 = smov (!%p242_p3, %s532_s22), 1  ;;  %v566_v22 = vpack.c.bf16 %v448_v21, %v448_v21 }
   0xe   : > { %s565_s13 = sshll.u32 %s755_s22, 3  ;;  %s591_s17 = smul.u32 12, %s755_s22 }
   0xf   : > { %574 = vmatpush3.bf16.msra.mxu0 %v605_v5  ;;  %s246_s20 = scalar_lea.vmem %s747_s0, %s565_s13 }
  0x10   : > { %575 = vmatprep.subr.bf16.mxu0 %v606_v6  ;;  %v253_v11 = vld [vmem:[%s246_s20] sm:$0xff]  ;;  %s251_s20 = scalar_lea.vmem %s753_s6, %s591_s17 }
  0x11   : > { %v542_v12 = vcombine.high %v253_v11, %v253_v11  ;;  %v541_v18 = vcombine.low %v253_v11, %v253_v11  ;;  %469 = vst.msk [vmem:[%s251_s20] sm:$0xf] %vm468_vm0, %v566_v22  ;;  %v474_v36 = vld [vmem:[%s251_s20 + $0x8] sm:$0x1] }
  0x13   : > { %576 = vmatpush3.bf16.msra.mxu0 %v607_v7  ;;  %428 = vmatprep.mubr.bf16.mxu0 %v542_v12 }
  0x14   : > { %577 = vmatprep.subr.bf16.mxu0 %v608_v8 }
  0x17   : > { %578 = vmatpush3.bf16.msra.mxu0 %v609_v9 }
  0x18   : > { %579 = vmatprep.subr.bf16.mxu0 %v610_v10 }
  0x1b   : > { %580 = vmatpush3.bf16.msra.mxu0 %v611_v13 }
  0x1c   : > { %581 = vmatprep.subr.bf16.mxu0 %v612_v14 }
  0x1f   : > { %582 = vmatpush3.bf16.msra.mxu0 %v613_v15 }
  0x20   : > { %583 = vmatprep.subr.bf16.mxu0 %v614_v16 }
  0x23   : > { %584 = vmatpush3.bf16.msra.mxu0 %v615_v17 }
  0x26   : > { %429 = vmatmul.mubr.bf16.vlgmr.msra.gmra.mrb[0].mxu0 %v541_v18 }
  0xf9   : > { %v585_v23 = vpop.f32.mrb[0].mxu0 }
  0xfa   : > { %v586_v25 = vpop.f32.mrb[1].mxu0 }
  0xfb   : > { %v587_v26 = vadd.f32 %v586_v25, %v585_v23  ;;  %v588_v27 = vpop.f32.mrb[2].mxu0 }
  0xfc   : > { %v589_v29 = vpop.f32.mrb[3].mxu0 }
  0xfd   : > { %v431_v30 = vadd.f32 %v587_v26, %v540_v24 }
  0xff   : > { %v437_v32 = vadd.f32 %v436_v28, %v431_v30 }
 0x101   : > { %v445_v33 = vadd.f32 %v559_v19, %v437_v32 }
 0x103   : > { %v451_v35 = vrot.slane %v445_v33, 7 }
 0x105   : > { %v454_v37 = vsel %vm453_vm3, %v449_v34, %v451_v35  ;;  %v568_v38 = vpack.c.bf16 %v451_v35, %v451_v35 }
 0x106   : > { %v567_v39 = vpack.c.bf16 %v454_v37, %v454_v37 }
 0x107   : > { %v475_v40 = vsel %vm473_vm4, %v568_v38, %v474_v36 }
 0x108   : > { %470 = vst.msk [vmem:[%s251_s20 + $0x4] sm:$0xf] %vm468_vm0, %v567_v39  ;;  %476 = vst [vmem:[%s251_s20 + $0x8] sm:$0x1] %v475_v40 }
 0x109 PF: > { %s16_s21 = sadd.s32 1, %s624_s21  }
 0x10a   : > { %p13_p4 = scmp.ge.s32.totalorder %s16_s21, 4  }
 0x10c   :  { %15 = sbr.rel (!%p13_p4) target bundleno = 1 (0x1), region = 74 }

// kernel: cavmae_forward.9
= control target key start
LH: loop header
LB: loop body
LE: loop exit
PB: predicated region body
PF: predicated region fallthrough
CT: control target
= control target key end

     0   :  { %s4637_s25 = smov 0   ;;  %s5660_s0 = inlined_call_operand.vmem [shape: bf16[52,32], index: 0, kind: input, shape index: {}, may-alias: {0,13}]   ;;  %s5661_s1 = inlined_call_operand.vmem [shape: f32[2,1,32], index: 1, kind: input, shape index: {}]   ;;  %s5662_s2 = inlined_call_operand.vmem [shape: f32[2,1,32], index: 2, kind: input, shape index: {}]   ;;  %s5663_s3 = inlined_call_operand.vmem [shape: bf16[2,32,96], index: 3, kind: input, shape index: {}]   ;;  %s5664_s4 = inlined_call_operand.vmem [shape: f32[2,1,96], index: 4, kind: input, shape index: {}]   ;;  %s5665_s5 = inlined_call_operand.vmem [shape: bf16[2,32,32], index: 5, kind: input, shape index: {}]   ;;  %s5666_s6 = inlined_call_operand.vmem [shape: f32[2,1,32], index: 6, kind: input, shape index: {}]   ;;  %s5667_s7 = inlined_call_operand.vmem [shape: f32[2,1,32], index: 7, kind: input, shape index: {}]   ;;  %s5668_s8 = inlined_call_operand.vmem [shape: f32[2,1,32], index: 8, kind: input, shape index: {}]   ;;  %s5669_s9 = inlined_call_operand.vmem [shape: bf16[2,32,128], index: 9, kind: input, shape index: {}]   ;;  %s5670_s10 = inlined_call_operand.vmem [shape: f32[2,1,128], index: 10, kind: input, shape index: {}]   ;;  %s5671_s11 = inlined_call_operand.vmem [shape: bf16[2,128,32], index: 11, kind: input, shape index: {}]   ;;  %s5672_s12 = inlined_call_operand.vmem [shape: f32[2,1,32], index: 12, kind: input, shape index: {}]   ;;  %s5673_s13 = inlined_call_operand.vmem [shape: bf16[52,32], index: 13, kind: output, shape index: {}, may-alias: {0,13}]  }
   0x1   :  { %5677 = sst [smem:[#allocation5_spill]] %s5663_s3 }
   0x2   :  { %5678 = sst [smem:[#allocation6_spill]] %s5665_s5 }
   0x3   :  { %5679 = sst [smem:[#allocation7_spill]] %s5673_s13 }
   0x4 LB: > { %5680 = sst [smem:[#allocation3_spill]] %s4548_s25  ;;  %s4643_s26 = sadd.s32 4294967295, %s4548_s25   ;;  %s4548_s25 = sphi %s4637_s25, %s23_s25  }
   0x5   : > { %p3809_p0 = scmp.ge.s32.totalorder %s4548_s25, 1  ;;  %p476_p1 = scmp.lt.s32.totalorder %s4548_s25, 3 }
   0x7   : > { %p477_p2 = pnand %p3809_p0, %p476_p1 }
   0x9   : > { %480 = sbr.rel (%p477_p2) target bundleno = 2755 (0xac3), region = 72 }
  0x10   : > { %p554_p3 = scmp.lt.s32.totalorder %s4643_s26, 1  ;;  %s5681_s3 = sld [smem:[#allocation5_spill]] }
  0x11   : > { %s5682_s5 = sld [smem:[#allocation6_spill]]  ;;  %p3818_p4 = scmp.ne.s32.totalorder %s4643_s26, 0 }
  0x12   : > { %s4649_s27 = scalar_select %p554_p3, %s4643_s26, 1 }
  0x13   : > { %602 = sbr.rel (%p3818_p4) target bundleno = 26 (0x1a), region = 76  ;;  %v3907_v0 = vld [vmem:[%s5660_s0] sm:$0xff] (!%p3818_p4)   ;;  %vm617_vm0 = vcmask (!%p3818_p4), 261120   ;;  %v3918_v1 = vld [vmem:[%s5660_s0 + $0x8] sm:$0xff] (!%p3818_p4)   ;;  %v3919_v2 = vld [vmem:[%s5660_s0 + $0x10] sm:$0xff] (!%p3818_p4)   ;;  %vm624_vm1 = vcmask (!%p3818_p4), 257024  }
  0x14   : > { %s3895_s17 = sshll.u32 %s4649_s27, 4  ;;  %s578_s13 = scalar_lea.vmem %s5667_s7, %s4649_s27  ;;  %v3908_v3 = vunpack.c.l.bf16 (!%p3818_p4), %v3907_v0  ;;  %v3909_v4 = vunpack.c.h.bf16 (!%p3818_p4), %v3907_v0  ;;  %v3912_v5 = vunpack.c.l.bf16 (!%p3818_p4), %v3918_v1  ;;  %v3913_v6 = vunpack.c.h.bf16 (!%p3818_p4), %v3918_v1  ;;  %v609_v7 = vld [vmem:[%s5660_s0 + $0x18] sm:$0x3] (!%p3818_p4) }
  0x15   : > { %s581_s20 = scalar_lea.vmem %s5668_s8, %s4649_s27  ;;  %s597_s18 = scalar_lea.vmem %s5672_s12, %s4649_s27  ;;  %v3916_v8 = vunpack.c.l.bf16 (!%p3818_p4), %v3919_v2  ;;  %v3917_v9 = vunpack.c.h.bf16 (!%p3818_p4), %v3919_v2  ;;  %v616_v10 = vunpack.c.l.bf16 (!%p3818_p4), %v609_v7 }
  0x16   : > { %s4667_s23 = scalar_lea.vmem %s5681_s3, %s3895_s17  ;;  %s4689_s3 = scalar_lea.vmem %s5669_s9, %s3895_s17  ;;  %618 = vst.msk [vmem:[#allocation2] sm:$0xff] (!%p3818_p4), %vm617_vm0, %v3908_v3  ;;  %619 = vst.msk [vmem:[#allocation2 + $0x8] sm:$0xff] (!%p3818_p4), %vm617_vm0, %v3909_v4 }
  0x17   : > { %s4672_s29 = scalar_lea.vmem %s5682_s5, %s3895_s17  ;;  %s589_s5 = scalar_lea.vmem %s5670_s10, %s4649_s27  ;;  %620 = vst.msk [vmem:[#allocation2 + $0x10] sm:$0xff] (!%p3818_p4), %vm617_vm0, %v3912_v5  ;;  %621 = vst.msk [vmem:[#allocation2 + $0x18] sm:$0xff] (!%p3818_p4), %vm617_vm0, %v3913_v6 }
  0x18   : > { %5683 = sst [smem:[#allocation4_spill]] %s4672_s29  ;;  %s3898_s29 = sshll.u32 %s4649_s27, 6  ;;  %622 = vst.msk [vmem:[#allocation2 + $0x20] sm:$0xff] (!%p3818_p4), %vm617_vm0, %v3916_v8  ;;  %623 = vst.msk [vmem:[#allocation2 + $0x28] sm:$0xff] (!%p3818_p4), %vm617_vm0, %v3917_v9 }
  0x19   : > { %s4699_s14 = scalar_lea.vmem %s5671_s11, %s3898_s29  ;;  %625 = vst.msk [vmem:[#allocation2 + $0x30] sm:$0xf] (!%p3818_p4), %vm624_vm1, %v616_v10 }
  0x1a PF: > { %vm669_vm2 = vcmask 261120   ;;  %vm688_vm3 = vcmask 257024   ;;  %v4351_v60 = vld [vmem:[%s4667_s23] sm:$0xff]   ;;  %v4352_v61 = vld [vmem:[%s4667_s23 + $0x8] sm:$0xff]   ;;  %s5684_s16 = scalar_lea.vmem %s5661_s1, %s4649_s27  ;;  %s5685_s17 = scalar_lea.vmem %s5662_s2, %s4649_s27  ;;  %vm4551_vm4 = vmmov 0   ;;  %vm894_vm7 = vcmask 64512  }
  0x1b   : > { %4014 = vmatprep.subr.bf16.mxu1 %v4351_v60  ;;  %s5686_s24 = scalar_lea.vmem %s5664_s4, %s4649_s27  ;;  %vm1436_vm5 = vsmask.f32 5376  ;;  %s4552_s28 = smov 88   ;;  %vm2540_vm6 = vsmask.f32 4352  ;;  %vm974_vm8 = vcmask 1045504  }
  0x1c   : > { %4015 = vmatpush3.bf16.msra.mxu1 %v4351_v60  ;;  %s4553_s29 = smov 96   ;;  %s4554_s25 = smov 112   ;;  %vm975_vm9 = vcmask 1046528   ;;  %vm942_vm10 = vcmask 105472   ;;  %vm946_vm11 = vcmask 102400   ;;  %vm1424_vm12 = vcmask 130048  }
  0x1d   : > { %v662_v11 = vld [vmem:[#allocation2] sm:$0xff]  ;;  %v663_v13 = vld [vmem:[#allocation2 + $0x8] sm:$0xff]  ;;  %4016 = vmatprep.subr.bf16.mxu1 %v4352_v61  ;;  %s4555_s23 = smov 120   ;;  %s4556_s30 = smov 104   ;;  %vm1427_vm13 = vcmask 195584   ;;  %vm3105_vm14 = vcmask 1044480  }
  0x1e   : > { %v664_v12 = vld [vmem:[#allocation2 + $0x10] sm:$0xff]  ;;  %v670_v14 = vsel %vm669_vm2, %v662_v11, 0.0  ;;  %v665_v16 = vld [vmem:[#allocation2 + $0x18] sm:$0xff]  ;;  %v673_v19 = vsel %vm669_vm2, %v663_v13, 0.0  ;;  %s4558_s15 = smov 72   ;;  %s4559_s19 = smov 64  }
  0x1f   : > { %v676_v15 = vsel %vm669_vm2, %v664_v12, 0.0  ;;  %v666_v17 = vld [vmem:[#allocation2 + $0x20] sm:$0xff]  ;;  %v667_v18 = vld [vmem:[#allocation2 + $0x28] sm:$0xff]  ;;  %671 = vadd.xlane.f32.xlu0 %v670_v14  ;;  %v679_v20 = vsel %vm669_vm2, %v665_v16, 0.0  ;;  %s4561_s21 = smov 56   ;;  %s4562_s22 = smov 40  }
  0x20   : > { %677 = vadd.xlane.f32.xlu1 %v676_v15  ;;  %v682_v21 = vsel %vm669_vm2, %v666_v17, 0.0  ;;  %v668_v22 = vld [vmem:[#allocation2 + $0x30] sm:$0xf]  ;;  %v685_v23 = vsel %vm669_vm2, %v667_v18, 0.0  ;;  %4017 = vmatpush3.bf16.msra.mxu1 %v4352_v61  ;;  %vm3114_vm15 = vcmask 1041408   ;;  %p3885_p5 = scmp.ne.s32.totalorder %s4643_s26, 1 }
  0x21   : > { %v689_v24 = vsel %vm688_vm3, %v668_v22, 0.0  ;;  %vm3668_vm0 = vcmask (!%p3885_p5), 254976  }
  0x23   : > { %674 = vadd.xlane.f32.xlu0 %v673_v19 }
  0x24   : > { %680 = vadd.xlane.f32.xlu1 %v679_v20 }
  0x27   : > { %683 = vadd.xlane.f32.xlu0 %v682_v21  ;;  %v3819_v21 = vld [vmem:[%s5684_s16] ss:$0 sm:$0xff]  ;;  %s4557_s16 = smov 80  }
  0x28   : > { %686 = vadd.xlane.f32.xlu1 %v685_v23 }
  0x2b   : > { %690 = vadd.xlane.f32.xlu0 %v689_v24 }
  0xac   : > { %v672_v25 = vpop.xlane.xlu0 %671 }
  0xad   : > { %v678_v26 = vpop.xlane.xlu1 %677  ;;  %v693_v27 = vmul.f32 0.03125, %v672_v25  ;;  %v3820_v25 = vld [vmem:[%s5685_s17] ss:$0 sm:$0xff]  ;;  %s4560_s17 = smov 48  }
  0xae   : > { %v695_v28 = vmul.f32 0.03125, %v678_v26 }
  0xaf   : > { %v4731_v29 = vsub.f32 %v662_v11, %v693_v27 }
  0xb0   : > { %v4733_v30 = vsub.f32 %v664_v12, %v695_v28  ;;  %v675_v31 = vpop.xlane.xlu0 %674 }
  0xb1   : > { %v681_v32 = vpop.xlane.xlu1 %680  ;;  %v694_v33 = vmul.f32 0.03125, %v675_v31  ;;  %v707_v35 = vmul.f32 %v4731_v29, %v4731_v29 }
  0xb2   : > { %v696_v34 = vmul.f32 0.03125, %v681_v32  ;;  %v709_v36 = vmul.f32 %v4733_v30, %v4733_v30 }
  0xb3   : > { %v4739_v37 = vsub.f32 %v663_v13, %v694_v33  ;;  %v714_v39 = vsel %vm669_vm2, %v707_v35, 0.0 }
  0xb4   : > { %v4741_v38 = vsub.f32 %v665_v16, %v696_v34  ;;  %715 = vadd.xlane.f32.xlu1 %v714_v39  ;;  %v684_v40 = vpop.xlane.xlu0 %683  ;;  %v720_v42 = vsel %vm669_vm2, %v709_v36, 0.0 }
  0xb5   : > { %v687_v41 = vpop.xlane.xlu1 %686  ;;  %v697_v43 = vmul.f32 0.03125, %v684_v40  ;;  %v708_v45 = vmul.f32 %v4739_v37, %v4739_v37 }
  0xb6   : > { %v698_v44 = vmul.f32 0.03125, %v687_v41  ;;  %v710_v46 = vmul.f32 %v4741_v38, %v4741_v38 }
  0xb7   : > { %v4749_v47 = vsub.f32 %v666_v17, %v697_v43  ;;  %v717_v49 = vsel %vm669_vm2, %v708_v45, 0.0 }
  0xb8   : > { %v4751_v48 = vsub.f32 %v667_v18, %v698_v44  ;;  %721 = vadd.xlane.f32.xlu1 %v720_v42  ;;  %718 = vadd.xlane.f32.xlu0 %v717_v49  ;;  %v691_v50 = vpop.xlane.xlu0 %690  ;;  %v723_v52 = vsel %vm669_vm2, %v710_v46, 0.0 }
  0xb9   : > { %v699_v51 = vmul.f32 0.03125, %v691_v50  ;;  %v711_v53 = vmul.f32 %v4749_v47, %v4749_v47 }
  0xba   : > { %v712_v54 = vmul.f32 %v4751_v48, %v4751_v48 }
  0xbb   : > { %v4759_v55 = vsub.f32 %v668_v22, %v699_v51  ;;  %v726_v56 = vsel %vm669_vm2, %v711_v53, 0.0 }
  0xbc   : > { %724 = vadd.xlane.f32.xlu0 %v723_v52  ;;  %727 = vadd.xlane.f32.xlu1 %v726_v56  ;;  %v729_v57 = vsel %vm669_vm2, %v712_v54, 0.0  ;;  %v4550_v54 = vmov 0.0  }
  0xbd   : > { %v713_v58 = vmul.f32 %v4759_v55, %v4759_v55  ;;  %4026 = vmatprep.subr.bf16.mxu1 %v4550_v54  ;;  %4038 = vmatprep.subr.bf16.mxu0 %v4550_v54 }
  0xbe   : > { %4040 = vmatprep.mubr.msk.bf16.mxu0 %vm4551_vm4, %v4550_v54 }
  0xbf   : > { %v732_v59 = vsel %vm688_vm3, %v713_v58, 0.0 }
  0xc0   : > { %730 = vadd.xlane.f32.xlu0 %v729_v57  ;;  %733 = vadd.xlane.f32.xlu1 %v732_v59 }
 0x141   : > { %v716_v62 = vpop.xlane.xlu1 %715 }
 0x142   : > { %v735_v63 = vmul.f32 0.03125, %v716_v62 }
 0x144   : > { %v742_v0 = vadd.f32 1e-05, %v735_v63 }
 0x145   : > { %v722_v1 = vpop.xlane.xlu1 %721  ;;  %v719_v2 = vpop.xlane.xlu0 %718 }
 0x146   : > { %4365 = vrsqrt.f32 %v742_v0  ;;  %v737_v3 = vmul.f32 0.03125, %v722_v1  ;;  %v736_v4 = vmul.f32 0.03125, %v719_v2 }
 0x148   : > { %v744_v5 = vadd.f32 1e-05, %v737_v3  ;;  %v743_v6 = vadd.f32 1e-05, %v736_v4 }
 0x149   : > { %v728_v7 = vpop.xlane.xlu1 %727  ;;  %v725_v8 = vpop.xlane.xlu0 %724 }
 0x14a   : > { %4367 = vrsqrt.f32 %v744_v5  ;;  %v739_v9 = vmul.f32 0.03125, %v728_v7  ;;  %v738_v10 = vmul.f32 0.03125, %v725_v8 }
 0x14b   : > { %4369 = vrsqrt.f32 %v743_v6 }
 0x14c   : > { %v746_v11 = vadd.f32 1e-05, %v739_v9  ;;  %v745_v12 = vadd.f32 1e-05, %v738_v10 }
 0x14d   : > { %v734_v13 = vpop.xlane.xlu1 %733  ;;  %v731_v14 = vpop.xlane.xlu0 %730 }
 0x14e   : > { %4371 = vrsqrt.f32 %v746_v11  ;;  %v741_v15 = vmul.f32 0.03125, %v734_v13  ;;  %v740_v16 = vmul.f32 0.03125, %v731_v14 }
 0x14f   : > { %4373 = vrsqrt.f32 %v745_v12 }
 0x150   : > { %v4366_v17 = vpop.eup %4365  ;;  %v748_v18 = vadd.f32 1e-05, %v741_v15  ;;  %v747_v19 = vadd.f32 1e-05, %v740_v16 }
 0x151   : > { %v756_v20 = vmul.f32 %v4366_v17, %v4731_v29 }
 0x152   : > { %4375 = vrsqrt.f32 %v748_v18 }
 0x153   : > { %4377 = vrsqrt.f32 %v747_v19  ;;  %v769_v24 = vmul.f32 %v3819_v21, %v756_v20 }
 0x154   : > { %v4368_v22 = vpop.eup %4367 }
 0x155   : > { %v4370_v23 = vpop.eup %4369  ;;  %v758_v27 = vmul.f32 %v4368_v22, %v4733_v30  ;;  %v782_v32 = vadd.f32 %v3820_v25, %v769_v24 }
 0x156   : > { %v757_v26 = vmul.f32 %v4370_v23, %v4739_v37 }
 0x157   : > { %v771_v35 = vmul.f32 %v3819_v21, %v758_v27 }
 0x158   : > { %v4372_v28 = vpop.eup %4371  ;;  %v770_v29 = vmul.f32 %v3819_v21, %v757_v26 }
 0x159   : > { %v4374_v31 = vpop.eup %4373  ;;  %v760_v36 = vmul.f32 %v4372_v28, %v4749_v47  ;;  %v784_v37 = vadd.f32 %v3820_v25, %v771_v35 }
 0x15a   : > { %v783_v33 = vadd.f32 %v3820_v25, %v770_v29  ;;  %v759_v34 = vmul.f32 %v4374_v31, %v4741_v38 }
 0x15b   : > { %v773_v45 = vmul.f32 %v3819_v21, %v760_v36 }
 0x15c   : > { %v4376_v39 = vpop.eup %4375  ;;  %v789_v40 = vpack.c.bf16 %v783_v33, %v782_v32  ;;  %v772_v41 = vmul.f32 %v3819_v21, %v759_v34 }
 0x15d   : > { %v4378_v42 = vpop.eup %4377  ;;  %v762_v43 = vmul.f32 %v4376_v39, %v4759_v55  ;;  %v786_v47 = vadd.f32 %v3820_v25, %v773_v45 }
 0x15e   : > { %4018 = vmatprep.mubr.msk.bf16.mxu1 %vm669_vm2, %v789_v40  ;;  %v785_v30 = vadd.f32 %v3820_v25, %v772_v41  ;;  %v761_v44 = vmul.f32 %v4378_v42, %v4751_v48  ;;  %v3821_v48 = vld [vmem:[%s5686_s24] ss:$0 sm:$0xff]  ;;  %s4564_s24 = smov 8  }
 0x15f   : > { %v775_v38 = vmul.f32 %v3819_v21, %v762_v43 }
 0x160   : > { %v790_v46 = vpack.c.bf16 %v785_v30, %v784_v37  ;;  %v774_v49 = vmul.f32 %v3819_v21, %v761_v44 }
 0x161   : > { %v788_v52 = vadd.f32 %v3820_v25, %v775_v38 }
 0x162   : > { %4019 = vmatmul.mubr.msk.bf16.vlgmr.msra.gmra.mrb[0].mxu1 %vm669_vm2, %v790_v46  ;;  %v787_v50 = vadd.f32 %v3820_v25, %v774_v49 }
 0x163   : > { %v792_v53 = vpack.c.bf16 %v788_v52, %v788_v52 }
 0x164   : > { %v791_v51 = vpack.c.bf16 %v787_v50, %v786_v47 }
 0x166   : > { %4022 = vmatprep.mubr.msk.bf16.mxu1 %vm669_vm2, %v791_v51 }
 0x16a   : > { %4023 = vmatmul.mubr.msk.bf16.gmra.mrb[4].mxu1 %vm669_vm2, %v792_v53 }
 0x16b   : > { %4028 = vmatprep.mubr.msk.bf16.mxu1 %vm4551_vm4, %v4550_v54 }
 0x235   : > { %v4020_v55 = vpop.f32.mrb[0].mxu1 }
 0x236   : > { %v866_v56 = vadd.f32 %v4020_v55, %v3821_v48  ;;  %v857_v57 = vpop.f32.mrb[1].mxu1 }
 0x237   : > { %v858_v58 = vadd.f32 %v3821_v48, %v857_v57  ;;  %v4021_v59 = vpop.f32.mrb[2].mxu1 }
 0x238   : > { %v4800_v60 = vadd.f32 %v4021_v59, %v3821_v48  ;;  %v860_v61 = vpop.f32.mrb[3].mxu1  ;;  %v1430_v63 = vmul.f32 0.35355338, %v866_v56 }
 0x239   : > { %v861_v62 = vadd.f32 %v3821_v48, %v860_v61  ;;  %v887_v2 = vmul.f32 0.35355338, %v858_v58 }
 0x23a   : > { %v4803_v0 = vmul.f32 0.35355338, %v4800_v60  ;;  %v1435_v1 = vpack.c.bf16 %v4800_v60, %v4800_v60 }
 0x23b   : > { %v888_v3 = vmul.f32 0.35355338, %v861_v62  ;;  %v4807_v4 = vpack.c.bf16 %v861_v62, %v858_v58  ;;  %v1434_v5 = vpack.c.bf16 %v866_v56, %v861_v62 }
 0x23c   : > { %v1433_v6 = vpack.c.bf16 %v4803_v0, %v4803_v0  ;;  %v1463_v7 = vshrl.u32 %v1435_v1, 16  ;;  %v1466_v8 = vshll.u32 %v1435_v1, 16 }
 0x23d   : > { %v4811_v9 = vpack.c.bf16 %v888_v3, %v887_v2  ;;  %v1432_v10 = vpack.c.bf16 %v1430_v63, %v888_v3  ;;  %v1455_v11 = vshrl.u32 %v1434_v5, 16  ;;  %v1458_v12 = vshll.u32 %v1434_v5, 16  ;;  %v4024_v13 = vpop.f32.mrb[4].mxu1  ;;  %1025 = vrot.lane.b32.xlu1 %v4807_v4, %s4552_s28  ;;  %892 = vrot.lane.b32.xlu0 %v4807_v4, %s4553_s29 }
 0x23e   : > { %v1446_v14 = vshrl.u32 %v1433_v6, 16  ;;  %v1449_v15 = vshll.u32 %v1433_v6, 16  ;;  %v1465_v16 = vrot.slane %v1463_v7, 2  ;;  %v1468_v17 = vrot.slane %v1466_v8, 3  ;;  %v873_v18 = vpop.f32.mrb[5].mxu1 }
 0x23f   : > { %v1438_v19 = vshrl.u32 %v1432_v10, 16  ;;  %v1441_v20 = vshll.u32 %v1432_v10, 16  ;;  %v1457_v21 = vrot.slane %v1455_v11, 2  ;;  %v1460_v22 = vrot.slane %v1458_v12, 3  ;;  %v4025_v23 = vpop.f32.mrb[6].mxu1 }
 0x240   : > { %v1448_v24 = vrot.slane %v1446_v14, 2  ;;  %v1451_v25 = vrot.slane %v1449_v15, 3  ;;  %v1469_v26 = vor.u32 %v1468_v17, %v1465_v16  ;;  %v882_v27 = vadd.f32 %v4024_v13, %v3821_v48  ;;  %v876_v28 = vpop.f32.mrb[7].mxu1 }
 0x241   : > { %v1440_v29 = vrot.slane %v1438_v19, 2  ;;  %v1443_v31 = vrot.slane %v1441_v20, 3  ;;  %v1461_v32 = vor.u32 %v1460_v22, %v1457_v21  ;;  %v874_v33 = vadd.f32 %v3821_v48, %v873_v18  ;;  %1148 = vrot.lane.b32.xlu0 %v4811_v9, %s4554_s25  ;;  %1023 = vrot.lane.b32.xlu1 %v4811_v9, %s4555_s23 }
 0x242   : > { %v2535_v34 = vmul.f32 0.35355338, %v882_v27  ;;  %v2539_v35 = vpack.c.bf16 %v882_v27, %v882_v27  ;;  %v877_v36 = vadd.f32 %v3821_v48, %v876_v28  ;;  %v1452_v39 = vor.u32 %v1451_v25, %v1448_v24 }
 0x243   : > { %v4822_v40 = vsel %vm1436_vm5, %v1461_v32, %v1469_v26  ;;  %v1999_v41 = vmul.f32 0.35355338, %v874_v33  ;;  %v2001_v42 = vpack.c.bf16 %v874_v33, %v4800_v60  ;;  %v1444_v43 = vor.u32 %v1443_v31, %v1440_v29 }
 0x244   : > { %v2537_v37 = vpack.c.bf16 %v2535_v34, %v2535_v34  ;;  %v2567_v30 = vshrl.u32 %v2539_v35, 16  ;;  %v2570_v44 = vshll.u32 %v2539_v35, 16  ;;  %v2534_v45 = vmul.f32 0.35355338, %v877_v36 }
 0x245   : > { %v2000_v46 = vpack.c.bf16 %v1999_v41, %v4803_v0  ;;  %v2538_v49 = vpack.c.bf16 %v877_v36, %v874_v33  ;;  %1273 = vrot.lane.b32.xlu0 %v4811_v9, %s4556_s30  ;;  %1150 = vrot.lane.b32.xlu1 %v4807_v4, %s4557_s16  ;;  %v4831_v38 = vsel %vm1436_vm5, %v1444_v43, %v1452_v39  ;;  %v4847_v7 = vrot.slane %v2001_v42, 1 }
 0x246   : > { %v2550_v47 = vshrl.u32 %v2537_v37, 16  ;;  %v2553_v50 = vshll.u32 %v2537_v37, 16  ;;  %v2569_v51 = vrot.slane %v2567_v30, 3  ;;  %v2572_v52 = vrot.slane %v2570_v44, 4 }
 0x247   : > { %v2536_v53 = vpack.c.bf16 %v2534_v45, %v1999_v41  ;;  %v2559_v48 = vshrl.u32 %v2538_v49, 16  ;;  %v2562_v55 = vshll.u32 %v2538_v49, 16  ;;  %v4853_v8 = vrot.slane %v2000_v46, 1 }
 0x248   : > { %v2552_v56 = vrot.slane %v2550_v47, 3  ;;  %v2555_v57 = vrot.slane %v2553_v50, 4  ;;  %v2573_v62 = vor.u32 %v2572_v52, %v2569_v51  ;;  %v4563_v34 = vmov 65535  }
 0x249   : > { %v2542_v58 = vshrl.u32 %v2536_v53, 16  ;;  %v2545_v59 = vshll.u32 %v2536_v53, 16  ;;  %v2561_v60 = vrot.slane %v2559_v48, 3  ;;  %v2564_v61 = vrot.slane %v2562_v55, 4  ;;  %1596 = vrot.lane.b32.xlu0 %v4822_v40, %s4552_s28  ;;  %1275 = vrot.lane.b32.xlu1 %v4807_v4, %s4558_s15 }
 0x24a   : > { %v2556_v2 = vor.u32 %v2555_v57, %v2552_v56  ;;  %v976_v35 = vsel %vm974_vm8, 4294967295, %v4563_v34 }
 0x24b   : > { %v2544_v63 = vrot.slane %v2542_v58, 3  ;;  %v2547_v0 = vrot.slane %v2545_v59, 4  ;;  %v2565_v1 = vor.u32 %v2564_v61, %v2561_v60  ;;  %v4938_v41 = vsel %vm975_vm9, %v976_v35, 0 }
 0x24d   : > { %v4836_v3 = vsel %vm2540_vm6, %v2565_v1, %v2573_v62  ;;  %1721 = vrot.lane.b32.xlu0 %v4822_v40, %s4557_s16  ;;  %1471 = vrot.lane.b32.xlu1 %v4822_v40, %s4553_s29  ;;  %v2548_v5 = vor.u32 %v2547_v0, %v2544_v63 }
 0x24f   : > { %v4842_v6 = vsel %vm2540_vm6, %v2548_v5, %v2556_v2 }
 0x251   : > { %1846 = vrot.lane.b32.xlu0 %v4822_v40, %s4558_s15  ;;  %1594 = vrot.lane.b32.xlu1 %v4831_v38, %s4555_s23 }
 0x255   : > { %2006 = vrot.lane.b32.xlu0 %v4847_v7, %s4553_s29  ;;  %1719 = vrot.lane.b32.xlu1 %v4831_v38, %s4554_s25 }
 0x259   : > { %2129 = vrot.lane.b32.xlu0 %v4853_v8, %s4555_s23  ;;  %1844 = vrot.lane.b32.xlu1 %v4831_v38, %s4556_s30 }
 0x25d   : > { %2254 = vrot.lane.b32.xlu0 %v4853_v8, %s4554_s25  ;;  %2131 = vrot.lane.b32.xlu1 %v4847_v7, %s4552_s28 }
 0x261   : > { %2379 = vrot.lane.b32.xlu0 %v4853_v8, %s4556_s30  ;;  %2256 = vrot.lane.b32.xlu1 %v4847_v7, %s4557_s16 }
 0x265   : > { %2700 = vrot.lane.b32.xlu0 %v4836_v3, %s4552_s28  ;;  %2381 = vrot.lane.b32.xlu1 %v4847_v7, %s4558_s15  ;;  %s4565_s28 = smov 16  }
 0x269   : > { %2825 = vrot.lane.b32.xlu0 %v4836_v3, %s4557_s16  ;;  %2575 = vrot.lane.b32.xlu1 %v4836_v3, %s4553_s29  ;;  %s5687_s29 = sld [smem:[#allocation4_spill]]  ;;  %s5688_s16 = scalar_lea.vmem %s5666_s6, %s4649_s27 }
 0x26d   : > { %2950 = vrot.lane.b32.xlu0 %v4836_v3, %s4558_s15  ;;  %2698 = vrot.lane.b32.xlu1 %v4842_v6, %s4555_s23 }
 0x271   : > { %969 = vrot.lane.b32.xlu0 %v4807_v4, %s4559_s19  ;;  %2823 = vrot.lane.b32.xlu1 %v4842_v6, %s4554_s25  ;;  %s4566_s25 = smov 24  }
 0x275   : > { %1224 = vrot.lane.b32.xlu0 %v4807_v4, %s4560_s17  ;;  %2948 = vrot.lane.b32.xlu1 %v4842_v6, %s4556_s30 }
 0x279   : > { %1545 = vrot.lane.b32.xlu0 %v4822_v40, %s4559_s19  ;;  %1099 = vrot.lane.b32.xlu1 %v4807_v4, %s4561_s21 }
 0x27d   : > { %1670 = vrot.lane.b32.xlu0 %v4822_v40, %s4561_s21  ;;  %1349 = vrot.lane.b32.xlu1 %v4807_v4, %s4562_s22 }
 0x281   : > { %1920 = vrot.lane.b32.xlu0 %v4822_v40, %s4562_s22  ;;  %1795 = vrot.lane.b32.xlu1 %v4822_v40, %s4560_s17 }
 0x285   : > { %2205 = vrot.lane.b32.xlu0 %v4847_v7, %s4561_s21  ;;  %2080 = vrot.lane.b32.xlu1 %v4847_v7, %s4559_s19 }
 0x2af   : > { %v1026_v10 = vpop.permute.xlu1 %1025  ;;  %v893_v11 = vpop.permute.xlu0 %892 }
 0x2b0   : > { %v899_v12 = vsel %vm894_vm7, %v893_v11, 0  ;;  %v1031_v13 = vsel %vm894_vm7, %v1026_v10, 0 }
 0x2b1   : > { %4027 = vmatpush3.bf16.xpose.msra.mxu1 %v899_v12  ;;  %4039 = vmatpush3.bf16.xpose.msra.mxu0 %v1031_v13 }
 0x2b2   : > { %4050 = vmatprep.subr.bf16.mxu0 %v4550_v54  ;;  %4032 = vmatprep.subr.bf16.mxu1 %v4550_v54 }
 0x2b3   : > { %v1149_v4 = vpop.permute.xlu0 %1148  ;;  %v1024_v14 = vpop.permute.xlu1 %1023 }
 0x2b7   : > { %v1274_v15 = vpop.permute.xlu0 %1273  ;;  %v1151_v16 = vpop.permute.xlu1 %1150 }
 0x2b8   : > { %v1156_v17 = vsel %vm894_vm7, %v1151_v16, 0  ;;  %4029 = vmatmul.mubr.msk.bf16.vlgmr.msra.gmra.mrb[8].mxu1 %vm894_vm7, %v4811_v9  ;;  %4041 = vmatmul.mubr.msk.bf16.vlgmr.msra.gmra.mrb[0].mxu0 %vm894_vm7, %v1024_v14 }
 0x2b9   : > { %4051 = vmatpush3.bf16.xpose.msra.mxu0 %v1156_v17  ;;  %4052 = vmatprep.mubr.msk.bf16.mxu0 %vm4551_vm4, %v4550_v54 }
 0x2ba   : > { %4062 = vmatprep.subr.bf16.mxu0 %v4550_v54  ;;  %4034 = vmatprep.mubr.msk.bf16.mxu1 %vm4551_vm4, %v4550_v54 }
 0x2bb   : > { %v1597_v18 = vpop.permute.xlu0 %1596  ;;  %v1276_v19 = vpop.permute.xlu1 %1275 }
 0x2bc   : > { %v1281_v21 = vsel %vm894_vm7, %v1276_v19, 0  ;;  %v1602_v27 = vsel %vm894_vm7, %v1597_v18, 0 }
 0x2bf   : > { %v1722_v20 = vpop.permute.xlu0 %1721  ;;  %v1472_v22 = vpop.permute.xlu1 %1471 }
 0x2c0   : > { %4053 = vmatmul.mubr.msk.bf16.vlgmr.msra.gmra.mrb[4].mxu0 %vm894_vm7, %v1149_v4  ;;  %v1477_v24 = vsel %vm894_vm7, %v1472_v22, 0  ;;  %v1727_v32 = vsel %vm894_vm7, %v1722_v20, 0 }
 0x2c1   : > { %4063 = vmatpush3.bf16.xpose.msra.mxu0 %v1281_v21  ;;  %4064 = vmatprep.mubr.msk.bf16.mxu0 %vm4551_vm4, %v4550_v54 }
 0x2c2   : > { %4074 = vmatprep.subr.bf16.mxu0 %v4550_v54 }
 0x2c3   : > { %v1847_v9 = vpop.permute.xlu0 %1846  ;;  %v1595_v29 = vpop.permute.xlu1 %1594 }
 0x2c4   : > { %v1852_v40 = vsel %vm894_vm7, %v1847_v9, 0 }
 0x2c7   : > { %v2007_v23 = vpop.permute.xlu0 %2006  ;;  %v1720_v36 = vpop.permute.xlu1 %1719 }
 0x2c8   : > { %4065 = vmatmul.mubr.msk.bf16.vlgmr.msra.gmra.mrb[8].mxu0 %vm894_vm7, %v1274_v15  ;;  %v2012_v30 = vsel %vm894_vm7, %v2007_v23, 0 }
 0x2c9   : > { %4075 = vmatpush3.bf16.xpose.msra.mxu0 %v1477_v24  ;;  %4076 = vmatprep.mubr.msk.bf16.mxu0 %vm4551_vm4, %v4550_v54 }
 0x2ca   : > { %4086 = vmatprep.subr.bf16.mxu0 %v4550_v54 }
 0x2cb   : > { %v2130_v25 = vpop.permute.xlu0 %2129  ;;  %v1845_v37 = vpop.permute.xlu1 %1844 }
 0x2cf   : > { %v2255_v26 = vpop.permute.xlu0 %2254  ;;  %v2132_v44 = vpop.permute.xlu1 %2131 }
 0x2d0   : > { %4077 = vmatmul.mubr.msk.bf16.vlgmr.msra.gmra.mrb[12].mxu0 %vm894_vm7, %v4831_v38  ;;  %v2137_v45 = vsel %vm894_vm7, %v2132_v44, 0 }
 0x2d1   : > { %4087 = vmatpush3.bf16.xpose.msra.mxu0 %v1602_v27  ;;  %4088 = vmatprep.mubr.msk.bf16.mxu0 %vm4551_vm4, %v4550_v54 }
 0x2d2   : > { %4098 = vmatprep.subr.bf16.mxu0 %v4550_v54 }
 0x2d3   : > { %v2380_v28 = vpop.permute.xlu0 %2379  ;;  %v2257_v46 = vpop.permute.xlu1 %2256 }
 0x2d4   : > { %v2262_v49 = vsel %vm894_vm7, %v2257_v46, 0 }
 0x2d7   : > { %v2701_v31 = vpop.permute.xlu0 %2700  ;;  %v2382_v38 = vpop.permute.xlu1 %2381 }
 0x2d8   : > { %4089 = vmatmul.mubr.msk.bf16.vlgmr.msra.gmra.mrb[16].mxu0 %vm894_vm7, %v1595_v29  ;;  %v2387_v47 = vsel %vm894_vm7, %v2382_v38, 0  ;;  %v2706_v52 = vsel %vm894_vm7, %v2701_v31, 0 }
 0x2d9   : > { %4099 = vmatpush3.bf16.xpose.msra.mxu0 %v1727_v32  ;;  %4100 = vmatprep.mubr.msk.bf16.mxu0 %vm4551_vm4, %v4550_v54 }
 0x2da   : > { %4110 = vmatprep.subr.bf16.mxu0 %v4550_v54 }
 0x2db   : > { %v2826_v33 = vpop.permute.xlu0 %2825  ;;  %v2576_v50 = vpop.permute.xlu1 %2575 }
 0x2dc   : > { %v2581_v51 = vsel %vm894_vm7, %v2576_v50, 0  ;;  %v2831_v48 = vsel %vm894_vm7, %v2826_v33, 0 }
 0x2df   : > { %v2951_v39 = vpop.permute.xlu0 %2950  ;;  %v2699_v53 = vpop.permute.xlu1 %2698 }
 0x2e0   : > { %4101 = vmatmul.mubr.msk.bf16.vlgmr.msra.gmra.mrb[20].mxu0 %vm894_vm7, %v1720_v36  ;;  %v2956_v56 = vsel %vm894_vm7, %v2951_v39, 0 }
 0x2e1   : > { %4111 = vmatpush3.bf16.xpose.msra.mxu0 %v1852_v40  ;;  %4112 = vmatprep.mubr.msk.bf16.mxu0 %vm4551_vm4, %v4550_v54 }
 0x2e2   : > { %4122 = vmatprep.subr.bf16.mxu0 %v4550_v54 }
 0x2e3   : > { %v970_v42 = vpop.permute.xlu0 %969  ;;  %v2824_v55 = vpop.permute.xlu1 %2823 }
 0x2e4   : > { %v979_v43 = vand.u32 %v4938_v41, %v970_v42 }
 0x2e6   : > { %4033 = vmatpush3.bf16.msra.mxu1 %v979_v43 }
 0x2e7   : > { %4044 = vmatprep.subr.bf16.mxu1 %v4550_v54  ;;  %v2949_v57 = vpop.permute.xlu1 %2948 }
 0x2e8   : > { %4113 = vmatmul.mubr.msk.bf16.vlgmr.msra.gmra.mrb[24].mxu0 %vm894_vm7, %v1845_v37 }
 0x2e9   : > { %4123 = vmatpush3.bf16.xpose.msra.mxu0 %v2012_v30  ;;  %4124 = vmatprep.mubr.msk.bf16.mxu0 %vm4551_vm4, %v4550_v54 }
 0x2ea   : > { %4134 = vmatprep.subr.bf16.mxu0 %v4550_v54 }
 0x2f0   : > { %4125 = vmatmul.mubr.msk.bf16.vlgmr.msra.gmra.mrb[28].mxu0 %vm894_vm7, %v4853_v8 }
 0x2f1   : > { %4135 = vmatpush3.bf16.xpose.msra.mxu0 %v2137_v45  ;;  %4136 = vmatprep.mubr.msk.bf16.mxu0 %vm4551_vm4, %v4550_v54 }
 0x2f2   : > { %4146 = vmatprep.subr.bf16.mxu0 %v4550_v54 }
 0x2f8   : > { %4137 = vmatmul.mubr.msk.bf16.vlgmr.msra.gmra.mrb[32].mxu0 %vm894_vm7, %v2130_v25 }
 0x2f9   : > { %4147 = vmatpush3.bf16.xpose.msra.mxu0 %v2262_v49  ;;  %4148 = vmatprep.mubr.msk.bf16.mxu0 %vm4551_vm4, %v4550_v54 }
 0x2fa   : > { %4158 = vmatprep.subr.bf16.mxu0 %v4550_v54 }
 0x300   : > { %4149 = vmatmul.mubr.msk.bf16.vlgmr.msra.gmra.mrb[36].mxu0 %vm894_vm7, %v2255_v26 }
 0x301   : > { %4159 = vmatpush3.bf16.xpose.msra.mxu0 %v2387_v47  ;;  %4160 = vmatprep.mubr.msk.bf16.mxu0 %vm4551_vm4, %v4550_v54 }
 0x302   : > { %4170 = vmatprep.subr.bf16.mxu0 %v4550_v54 }
 0x308   : > { %4161 = vmatmul.mubr.msk.bf16.vlgmr.msra.gmra.mrb[40].mxu0 %vm894_vm7, %v2380_v28 }
 0x309   : > { %4171 = vmatpush3.bf16.xpose.msra.mxu0 %v2581_v51  ;;  %4172 = vmatprep.mubr.msk.bf16.mxu0 %vm4551_vm4, %v4550_v54 }
 0x30a   : > { %4182 = vmatprep.subr.bf16.mxu0 %v4550_v54 }
 0x310   : > { %4173 = vmatmul.mubr.msk.bf16.vlgmr.msra.gmra.mrb[44].mxu0 %vm894_vm7, %v4842_v6 }
 0x311   : > { %4183 = vmatpush3.bf16.xpose.msra.mxu0 %v2706_v52  ;;  %4184 = vmatprep.mubr.msk.bf16.mxu0 %vm4551_vm4, %v4550_v54 }
 0x312   : > { %4194 = vmatprep.subr.bf16.mxu0 %v4550_v54 }
 0x318   : > { %4185 = vmatmul.mubr.msk.bf16.vlgmr.msra.gmra.mrb[48].mxu0 %vm894_vm7, %v2699_v53 }
 0x319   : > { %4195 = vmatpush3.bf16.xpose.msra.mxu0 %v2831_v48  ;;  %4196 = vmatprep.mubr.msk.bf16.mxu0 %vm4551_vm4, %v4550_v54 }
 0x31a   : > { %4206 = vmatprep.subr.bf16.mxu0 %v4550_v54 }
 0x320   : > { %4197 = vmatmul.mubr.msk.bf16.vlgmr.msra.gmra.mrb[52].mxu0 %vm894_vm7, %v2824_v55 }
 0x321   : > { %4207 = vmatpush3.bf16.xpose.msra.mxu0 %v2956_v56  ;;  %4208 = vmatprep.mubr.msk.bf16.mxu0 %vm4551_vm4, %v4550_v54 }
 0x328   : > { %4209 = vmatmul.mubr.msk.bf16.vlgmr.msra.gmra.mrb[56].mxu0 %vm894_vm7, %v2949_v57 }
 0x38b   : > { %v4987_v58 = vpop.f32.mrb[8].mxu1  ;;  %v4989_v59 = vpop.f32.mrb[0].mxu0 }
 0x38c   : > { %v4030_v60 = vpop.f32.mrb[9].mxu1  ;;  %v4042_v61 = vpop.f32.mrb[1].mxu0  ;;  %v943_v62 = vsel %vm942_vm10, %v4987_v58, -inf  ;;  %v1074_v6 = vsel %vm942_vm10, %v4989_v59, -inf }
 0x38d   : > { %v4993_v63 = vpop.f32.mrb[2].mxu0  ;;  %944 = vmax.xlane.f32.xlu0 %v943_v62  ;;  %v4995_v0 = vpop.f32.mrb[10].mxu1 }
 0x38e   : > { %v4031_v1 = vpop.f32.mrb[11].mxu1  ;;  %v4043_v2 = vpop.f32.mrb[3].mxu0  ;;  %v947_v5 = vsel %vm946_vm11, %v4995_v0, -inf  ;;  %v1077_v11 = vsel %vm946_vm11, %v4993_v63, -inf }
 0x38f   : > { %948 = vmax.xlane.f32.xlu1 %v947_v5 }
 0x391   : > { %1075 = vmax.xlane.f32.xlu0 %v1074_v6 }
 0x393   : > { %v5001_v8 = vpop.f32.mrb[4].mxu0 }
 0x394   : > { %v4054_v10 = vpop.f32.mrb[5].mxu0  ;;  %v1199_v4 = vsel %vm942_vm10, %v5001_v8, -inf }
 0x395   : > { %v5005_v12 = vpop.f32.mrb[6].mxu0  ;;  %1078 = vmax.xlane.f32.xlu0 %v1077_v11 }
 0x396   : > { %v4055_v13 = vpop.f32.mrb[7].mxu0  ;;  %v1202_v43 = vsel %vm946_vm11, %v5005_v12, -inf }
 0x399   : > { %1200 = vmax.xlane.f32.xlu0 %v1199_v4 }
 0x39b   : > { %v5009_v14 = vpop.f32.mrb[8].mxu0 }
 0x39c   : > { %v4066_v15 = vpop.f32.mrb[9].mxu0  ;;  %v1324_v16 = vsel %vm942_vm10, %v5009_v14, -inf }
 0x39d   : > { %v5013_v17 = vpop.f32.mrb[10].mxu0  ;;  %1325 = vmax.xlane.f32.xlu0 %v1324_v16 }
 0x39e   : > { %v4067_v18 = vpop.f32.mrb[11].mxu0  ;;  %v1327_v46 = vsel %vm946_vm11, %v5013_v17, -inf }
 0x3a0   : > { %2330 = vrot.lane.b32.xlu1 %v4847_v7, %s4560_s17 }
 0x3a3   : > { %v5017_v19 = vpop.f32.mrb[12].mxu0 }
 0x3a4   : > { %v4078_v20 = vpop.f32.mrb[13].mxu0  ;;  %v1520_v21 = vsel %vm942_vm10, %v5017_v19, -inf }
 0x3a5   : > { %v5021_v9 = vpop.f32.mrb[14].mxu0  ;;  %1521 = vmax.xlane.f32.xlu0 %v1520_v21 }
 0x3a6   : > { %v4079_v22 = vpop.f32.mrb[15].mxu0  ;;  %v1523_v38 = vsel %vm946_vm11, %v5021_v9, -inf }
 0x3ab   : > { %v5023_v23 = vpop.f32.mrb[16].mxu0 }
 0x3ac   : > { %v4090_v24 = vpop.f32.mrb[17].mxu0  ;;  %v1645_v25 = vsel %vm942_vm10, %v5023_v23, -inf }
 0x3ad   : > { %v5027_v26 = vpop.f32.mrb[18].mxu0  ;;  %1646 = vmax.xlane.f32.xlu0 %v1645_v25 }
 0x3ae   : > { %v4091_v27 = vpop.f32.mrb[19].mxu0  ;;  %v1648_v53 = vsel %vm946_vm11, %v5027_v26, -inf }
 0x3b3   : > { %v5029_v28 = vpop.f32.mrb[20].mxu0 }
 0x3b4   : > { %v4102_v29 = vpop.f32.mrb[21].mxu0  ;;  %v1770_v31 = vsel %vm942_vm10, %v5029_v28, -inf }
 0x3b5   : > { %v5033_v32 = vpop.f32.mrb[22].mxu0  ;;  %1771 = vmax.xlane.f32.xlu0 %v1770_v31 }
 0x3b6   : > { %v4103_v33 = vpop.f32.mrb[23].mxu0  ;;  %v1773_v55 = vsel %vm946_vm11, %v5033_v32, -inf }
 0x3bb   : > { %v5035_v34 = vpop.f32.mrb[24].mxu0 }
 0x3bc   : > { %v4114_v35 = vpop.f32.mrb[25].mxu0  ;;  %v1895_v36 = vsel %vm942_vm10, %v5035_v34, -inf }
 0x3bd   : > { %v5039_v39 = vpop.f32.mrb[26].mxu0  ;;  %1896 = vmax.xlane.f32.xlu0 %v1895_v36 }
 0x3be   : > { %v4115_v40 = vpop.f32.mrb[27].mxu0  ;;  %v1898_v62 = vsel %vm946_vm11, %v5039_v39, -inf }
 0x3c3   : > { %v5041_v42 = vpop.f32.mrb[28].mxu0 }
 0x3c4   : > { %v4126_v37 = vpop.f32.mrb[29].mxu0  ;;  %1203 = vmax.xlane.f32.xlu1 %v1202_v43  ;;  %v2055_v30 = vsel %vm942_vm10, %v5041_v42, -inf }
 0x3c5   : > { %v5047_v44 = vpop.f32.mrb[30].mxu0  ;;  %2056 = vmax.xlane.f32.xlu0 %v2055_v30 }
 0x3c6   : > { %v4127_v45 = vpop.f32.mrb[31].mxu0  ;;  %v2058_v2 = vsel %vm946_vm11, %v5047_v44, -inf }
 0x3c8   : > { %1328 = vmax.xlane.f32.xlu1 %v1327_v46 }
 0x3cb   : > { %v5051_v49 = vpop.f32.mrb[32].mxu0 }
 0x3cc   : > { %v4138_v47 = vpop.f32.mrb[33].mxu0  ;;  %1524 = vmax.xlane.f32.xlu1 %v1523_v38  ;;  %v2180_v50 = vsel %vm942_vm10, %v5051_v49, -inf }
 0x3cd   : > { %v5057_v51 = vpop.f32.mrb[34].mxu0  ;;  %2181 = vmax.xlane.f32.xlu0 %v2180_v50 }
 0x3ce   : > { %v4139_v52 = vpop.f32.mrb[35].mxu0  ;;  %v2183_v13 = vsel %vm946_vm11, %v5057_v51, -inf }
 0x3cf   : > { %v5115_v52 = vpop.permute.xlu0 %1224 }
 0x3d0   : > { %1649 = vmax.xlane.f32.xlu1 %v1648_v53 }
 0x3d3   : > { %v5061_v48 = vpop.f32.mrb[36].mxu0 }
 0x3d4   : > { %v4150_v56 = vpop.f32.mrb[37].mxu0  ;;  %1774 = vmax.xlane.f32.xlu1 %v1773_v55  ;;  %v2305_v57 = vsel %vm942_vm10, %v5061_v48, -inf }
 0x3d5   : > { %v5067_v60 = vpop.f32.mrb[38].mxu0  ;;  %2306 = vmax.xlane.f32.xlu0 %v2305_v57  ;;  %v5119_v56 = vpop.permute.xlu0 %1545 }
 0x3d6   : > { %v4151_v61 = vpop.f32.mrb[39].mxu0  ;;  %v2308_v15 = vsel %vm946_vm11, %v5067_v60, -inf  ;;  %v5121_v57 = vpop.permute.xlu1 %1099 }
 0x3d8   : > { %1899 = vmax.xlane.f32.xlu1 %v1898_v62 }
 0x3d9   : > { %v5123_v61 = vpop.permute.xlu0 %1670 }
 0x3da   : > { %v5125_v62 = vpop.permute.xlu1 %1349 }
 0x3db   : > { %v5071_v1 = vpop.f32.mrb[40].mxu0 }
 0x3dc   : > { %v4162_v5 = vpop.f32.mrb[41].mxu0  ;;  %2059 = vmax.xlane.f32.xlu1 %v2058_v2  ;;  %v2430_v6 = vsel %vm942_vm10, %v5071_v1, -inf }
 0x3dd   : > { %v5077_v10 = vpop.f32.mrb[42].mxu0  ;;  %2431 = vmax.xlane.f32.xlu0 %v2430_v6  ;;  %v5127_v2 = vpop.permute.xlu0 %1920 }
 0x3de   : > { %v4163_v11 = vpop.f32.mrb[43].mxu0  ;;  %v2433_v22 = vsel %vm946_vm11, %v5077_v10, -inf  ;;  %v5129_v5 = vpop.permute.xlu1 %1795 }
 0x3e0   : > { %2184 = vmax.xlane.f32.xlu1 %v2183_v13 }
 0x3e1   : > { %v5131_v6 = vpop.permute.xlu0 %2205 }
 0x3e2   : > { %v5133_v11 = vpop.permute.xlu1 %2080 }
 0x3e3   : > { %v5081_v4 = vpop.f32.mrb[44].mxu0 }
 0x3e4   : > { %v4174_v16 = vpop.f32.mrb[45].mxu0  ;;  %2309 = vmax.xlane.f32.xlu1 %v2308_v15  ;;  %v2624_v18 = vsel %vm942_vm10, %v5081_v4, -inf }
 0x3e5   : > { %v5087_v20 = vpop.f32.mrb[46].mxu0  ;;  %2625 = vmax.xlane.f32.xlu0 %v2624_v18 }
 0x3e6   : > { %v4175_v21 = vpop.f32.mrb[47].mxu0  ;;  %v2627_v25 = vsel %vm946_vm11, %v5087_v20, -inf }
 0x3e8   : > { %2434 = vmax.xlane.f32.xlu1 %v2433_v22 }
 0x3eb   : > { %v5091_v24 = vpop.f32.mrb[48].mxu0 }
 0x3ec   : > { %v4186_v27 = vpop.f32.mrb[49].mxu0  ;;  %2628 = vmax.xlane.f32.xlu1 %v2627_v25  ;;  %v2749_v29 = vsel %vm942_vm10, %v5091_v24, -inf }
 0x3ed   : > { %v5097_v31 = vpop.f32.mrb[50].mxu0  ;;  %2750 = vmax.xlane.f32.xlu0 %v2749_v29 }
 0x3ee   : > { %v4187_v33 = vpop.f32.mrb[51].mxu0  ;;  %v2752_v35 = vsel %vm946_vm11, %v5097_v31, -inf }
 0x3f0   : > { %2753 = vmax.xlane.f32.xlu1 %v2752_v35 }
 0x3f3   : > { %v5101_v36 = vpop.f32.mrb[52].mxu0 }
 0x3f4   : > { %v4198_v40 = vpop.f32.mrb[53].mxu0  ;;  %v2874_v43 = vsel %vm942_vm10, %v5101_v36, -inf }
 0x3f5   : > { %v5105_v37 = vpop.f32.mrb[54].mxu0  ;;  %2875 = vmax.xlane.f32.xlu1 %v2874_v43 }
 0x3f6   : > { %v4199_v30 = vpop.f32.mrb[55].mxu0  ;;  %v2877_v45 = vsel %vm946_vm11, %v5105_v37, -inf }
 0x3f9   : > { %2878 = vmax.xlane.f32.xlu1 %v2877_v45 }
 0x3fb   : > { %v5109_v46 = vpop.f32.mrb[56].mxu0 }
 0x3fc   : > { %v4210_v38 = vpop.f32.mrb[57].mxu0  ;;  %v2999_v47 = vsel %vm942_vm10, %v5109_v46, -inf }
 0x3fd   : > { %v5113_v50 = vpop.f32.mrb[58].mxu0  ;;  %3000 = vmax.xlane.f32.xlu0 %v2999_v47 }
 0x3fe   : > { %v4211_v53 = vpop.f32.mrb[59].mxu0  ;;  %v3002_v55 = vsel %vm946_vm11, %v5113_v50, -inf }
 0x401   : > { %3003 = vmax.xlane.f32.xlu0 %v3002_v55 }
 0x41a   : > { %v945_v13 = vpop.xlane.xlu0 %944 }
 0x41b   : > { %v950_v15 = vsub.f32 %v4987_v58, %v945_v13 }
 0x41c   : > { %v949_v16 = vpop.xlane.xlu1 %948 }
 0x41d   : > { %v952_v18 = vmul.f32 1.442695, %v950_v15  ;;  %v951_v21 = vsub.f32 %v4995_v0, %v949_v16 }
 0x41e   : > { %v1076_v22 = vpop.xlane.xlu0 %1075 }
 0x41f   : > { %4379 = vpow2.f32 %v952_v18  ;;  %v954_v25 = vmul.f32 1.442695, %v951_v21  ;;  %v1080_v27 = vsub.f32 %v4989_v59, %v1076_v22 }
 0x420   : > { %v5160_v16 = vpop.permute.xlu1 %2330 }
 0x421   : > { %4381 = vpow2.f32 %v954_v25  ;;  %v1082_v29 = vmul.f32 1.442695, %v1080_v27 }
 0x422   : > { %v1079_v33 = vpop.xlane.xlu0 %1078 }
 0x423   : > { %4383 = vpow2.f32 %v1082_v29  ;;  %v1081_v35 = vsub.f32 %v4993_v63, %v1079_v33 }
 0x425   : > { %v1084_v40 = vmul.f32 1.442695, %v1081_v35 }
 0x426   : > { %v1201_v43 = vpop.xlane.xlu0 %1200 }
 0x427   : > { %4385 = vpow2.f32 %v1084_v40  ;;  %v1205_v58 = vsub.f32 %v5001_v8, %v1201_v43 }
 0x429   : > { %v5140_v30 = vpop.eup %4379  ;;  %v1207_v45 = vmul.f32 1.442695, %v1205_v58 }
 0x42a   : > { %v956_v0 = vsel %vm942_vm10, %v5140_v30, 0.0  ;;  %v1326_v15 = vpop.xlane.xlu0 %1325 }
 0x42b   : > { %v5144_v38 = vpop.eup %4381  ;;  %4387 = vpow2.f32 %v1207_v45  ;;  %957 = vadd.xlane.f32.xlu0 %v956_v0  ;;  %v1330_v21 = vsub.f32 %v5009_v14, %v1326_v15 }
 0x42c   : > { %v959_v59 = vsel %vm946_vm11, %v5144_v38, 0.0 }
 0x42d   : > { %v5148_v47 = vpop.eup %4383  ;;  %960 = vadd.xlane.f32.xlu1 %v959_v59  ;;  %v1332_v29 = vmul.f32 1.442695, %v1330_v21 }
 0x42e   : > { %v1086_v63 = vsel %vm942_vm10, %v5148_v47, 0.0 }
 0x42f   : > { %1087 = vadd.xlane.f32.xlu0 %v1086_v63 }
 0x431   : > { %v5152_v8 = vpop.eup %4385 }
 0x432   : > { %v1089_v53 = vsel %vm946_vm11, %v5152_v8, 0.0  ;;  %v1522_v18 = vpop.xlane.xlu0 %1521 }
 0x433   : > { %1090 = vadd.xlane.f32.xlu1 %v1089_v53  ;;  %v1526_v40 = vsub.f32 %v5017_v19, %v1522_v18 }
 0x435   : > { %v5156_v55 = vpop.eup %4387 }
 0x436   : > { %v1211_v13 = vsel %vm942_vm10, %v5156_v55, 0.0 }
 0x437   : > { %1212 = vadd.xlane.f32.xlu0 %v1211_v13 }
 0x43a   : > { %v1647_v27 = vpop.xlane.xlu0 %1646 }
 0x442   : > { %v1772_v58 = vpop.xlane.xlu0 %1771 }
 0x443   : > { %v1776_v59 = vsub.f32 %v5029_v28, %v1772_v58 }
 0x445   : > { %v1778_v13 = vmul.f32 1.442695, %v1776_v59 }
 0x44d   : > { %2455 = vrot.lane.b32.xlu0 %v4847_v7, %s4562_s22  ;;  %v1528_v7 = vmul.f32 1.442695, %v1526_v40 }
 0x451   : > { %v1204_v22 = vpop.xlane.xlu1 %1203 }
 0x452   : > { %v1206_v25 = vsub.f32 %v5005_v12, %v1204_v22  ;;  %v1651_v12 = vsub.f32 %v5023_v23, %v1647_v27  ;;  %v1897_v22 = vpop.xlane.xlu0 %1896 }
 0x454   : > { %v1209_v33 = vmul.f32 1.442695, %v1206_v25  ;;  %v1653_v15 = vmul.f32 1.442695, %v1651_v12 }
 0x455   : > { %v1329_v35 = vpop.xlane.xlu1 %1328 }
 0x456   : > { %4389 = vpow2.f32 %v1209_v33  ;;  %v1331_v43 = vsub.f32 %v5013_v17, %v1329_v35  ;;  %v1901_v33 = vsub.f32 %v5035_v34, %v1897_v22 }
 0x457   : > { %4391 = vpow2.f32 %v1332_v29 }
 0x458   : > { %v1334_v45 = vmul.f32 1.442695, %v1331_v43 }
 0x459   : > { %v1525_v0 = vpop.xlane.xlu1 %1524 }
 0x45a   : > { %v1527_v14 = vsub.f32 %v5021_v9, %v1525_v0  ;;  %4393 = vpow2.f32 %v1334_v45 }
 0x45b   : > { %4395 = vpow2.f32 %v1528_v7  ;;  %v1903_v7 = vmul.f32 1.442695, %v1901_v33 }
 0x45c   : > { %v1530_v63 = vmul.f32 1.442695, %v1527_v14  ;;  %v2057_v14 = vpop.xlane.xlu0 %2056 }
 0x45d   : > { %v1650_v53 = vpop.xlane.xlu1 %1649 }
 0x45e   : > { %4397 = vpow2.f32 %v1530_v63  ;;  %v1652_v17 = vsub.f32 %v5027_v26, %v1650_v53 }
 0x45f   : > { %4399 = vpow2.f32 %v1778_v13 }
 0x460   : > { %v5171_v19 = vpop.eup %4389  ;;  %4401 = vpow2.f32 %v1653_v15  ;;  %v1655_v9 = vmul.f32 1.442695, %v1652_v17  ;;  %v2061_v15 = vsub.f32 %v5041_v42, %v2057_v14 }
 0x461   : > { %v1775_v18 = vpop.xlane.xlu1 %1774  ;;  %v1214_v21 = vsel %vm946_vm11, %v5171_v19, 0.0  ;;  %v5176_v28 = vpop.eup %4391 }
 0x462   : > { %1215 = vadd.xlane.f32.xlu1 %v1214_v21  ;;  %v1777_v23 = vsub.f32 %v5033_v32, %v1775_v18  ;;  %v1336_v27 = vsel %vm942_vm10, %v5176_v28, 0.0  ;;  %4403 = vpow2.f32 %v1655_v9  ;;  %v2182_v18 = vpop.xlane.xlu0 %2181  ;;  %v2063_v22 = vmul.f32 1.442695, %v2061_v15 }
 0x464   : > { %v5181_v29 = vpop.eup %4393  ;;  %v1780_v35 = vmul.f32 1.442695, %v1777_v23 }
 0x465   : > { %v1900_v25 = vpop.xlane.xlu1 %1899  ;;  %v5183_v26 = vpop.eup %4395  ;;  %v1339_v43 = vsel %vm946_vm11, %v5181_v29, 0.0 }
 0x466   : > { %1337 = vadd.xlane.f32.xlu1 %v1336_v27  ;;  %v1532_v45 = vsel %vm942_vm10, %v5183_v26, 0.0  ;;  %4405 = vpow2.f32 %v1780_v35  ;;  %v1902_v34 = vsub.f32 %v5039_v39, %v1900_v25  ;;  %v2186_v25 = vsub.f32 %v5051_v49, %v2182_v18 }
 0x468   : > { %v5188_v58 = vpop.eup %4397  ;;  %v1905_v39 = vmul.f32 1.442695, %v1902_v34 }
 0x469   : > { %v2060_v40 = vpop.xlane.xlu1 %2059  ;;  %v5193_v0 = vpop.eup %4399  ;;  %v1535_v63 = vsel %vm946_vm11, %v5188_v58, 0.0 }
 0x46a   : > { %v2062_v32 = vsub.f32 %v5047_v44, %v2060_v40  ;;  %1340 = vadd.xlane.f32.xlu1 %v1339_v43  ;;  %v5198_v53 = vpop.eup %4401  ;;  %v1782_v13 = vsel %vm942_vm10, %v5193_v0, 0.0 }
 0x46b   : > { %v1657_v9 = vsel %vm942_vm10, %v5198_v53, 0.0 }
 0x46c   : > { %v2065_v59 = vmul.f32 1.442695, %v2062_v32  ;;  %1533 = vadd.xlane.f32.xlu0 %v1532_v45  ;;  %v5206_v23 = vpop.eup %4403 }
 0x46d   : > { %v2185_v12 = vpop.xlane.xlu1 %2184  ;;  %v1660_v33 = vsel %vm946_vm11, %v5206_v23, 0.0 }
 0x46e   : > { %4407 = vpow2.f32 %v2065_v59  ;;  %v2187_v44 = vsub.f32 %v5057_v51, %v2185_v12  ;;  %1536 = vadd.xlane.f32.xlu1 %v1535_v63 }
 0x46f   : > { %4409 = vpow2.f32 %v1903_v7 }
 0x470   : > { %v2190_v17 = vmul.f32 1.442695, %v2187_v44  ;;  %1783 = vadd.xlane.f32.xlu0 %v1782_v13  ;;  %v5212_v35 = vpop.eup %4405 }
 0x471   : > { %v2310_v21 = vpop.xlane.xlu1 %2309  ;;  %v1785_v49 = vsel %vm946_vm11, %v5212_v35, 0.0 }
 0x472   : > { %4411 = vpow2.f32 %v2190_v17  ;;  %v2312_v51 = vsub.f32 %v5067_v60, %v2310_v21  ;;  %1658 = vadd.xlane.f32.xlu1 %v1657_v9  ;;  %v2188_v60 = vmul.f32 1.442695, %v2186_v25 }
 0x473   : > { %4413 = vpow2.f32 %v1905_v39 }
 0x474   : > { %v2315_v27 = vmul.f32 1.442695, %v2312_v51 }
 0x475   : > { %v2435_v42 = vpop.xlane.xlu1 %2434 }
 0x476   : > { %4415 = vpow2.f32 %v2315_v27  ;;  %v2437_v40 = vsub.f32 %v5077_v10, %v2435_v42  ;;  %1661 = vadd.xlane.f32.xlu1 %v1660_v33 }
 0x477   : > { %4417 = vpow2.f32 %v2063_v22 }
 0x478   : > { %v5215_v43 = vpop.eup %4407  ;;  %v2440_v32 = vmul.f32 1.442695, %v2437_v40 }
 0x479   : > { %v2629_v45 = vpop.xlane.xlu1 %2628  ;;  %v2070_v7 = vsel %vm946_vm11, %v5215_v43, 0.0  ;;  %v5221_v34 = vpop.eup %4409 }
 0x47a   : > { %4419 = vpow2.f32 %v2440_v32  ;;  %v2631_v59 = vsub.f32 %v5087_v20, %v2629_v45  ;;  %1786 = vadd.xlane.f32.xlu1 %v1785_v49  ;;  %2071 = vadd.xlane.f32.xlu0 %v2070_v7  ;;  %v1907_v63 = vsel %vm942_vm10, %v5221_v34, 0.0 }
 0x47b   : > { %4421 = vpow2.f32 %v2188_v60  ;;  %v2307_v60 = vpop.xlane.xlu0 %2306 }
 0x47c   : > { %v5224_v10 = vpop.eup %4411  ;;  %v2634_v14 = vmul.f32 1.442695, %v2631_v59 }
 0x47d   : > { %v2754_v12 = vpop.xlane.xlu1 %2753  ;;  %v2195_v44 = vsel %vm946_vm11, %v5224_v10, 0.0  ;;  %v5230_v13 = vpop.eup %4413 }
 0x47e   : > { %4423 = vpow2.f32 %v2634_v14  ;;  %v2756_v15 = vsub.f32 %v5097_v31, %v2754_v12  ;;  %1908 = vadd.xlane.f32.xlu1 %v1907_v63  ;;  %2196 = vadd.xlane.f32.xlu0 %v2195_v44  ;;  %v1910_v17 = vsel %vm946_vm11, %v5230_v13, 0.0  ;;  %v2311_v14 = vsub.f32 %v5061_v48, %v2307_v60 }
 0x47f   : > { %v2432_v32 = vpop.xlane.xlu0 %2431 }
 0x480   : > { %v5233_v20 = vpop.eup %4415  ;;  %v2759_v39 = vmul.f32 1.442695, %v2756_v15  ;;  %v2436_v63 = vsub.f32 %v5071_v1, %v2432_v32  ;;  %v2313_v44 = vmul.f32 1.442695, %v2311_v14 }
 0x481   : > { %v2320_v18 = vsel %vm946_vm11, %v5233_v20, 0.0  ;;  %v5239_v21 = vpop.eup %4417 }
 0x482   : > { %4425 = vpow2.f32 %v2759_v39  ;;  %1911 = vadd.xlane.f32.xlu1 %v1910_v17  ;;  %2321 = vadd.xlane.f32.xlu0 %v2320_v18  ;;  %v2067_v31 = vsel %vm942_vm10, %v5239_v21, 0.0  ;;  %v2876_v7 = vpop.xlane.xlu1 %2875  ;;  %v2438_v18 = vmul.f32 1.442695, %v2436_v63 }
 0x483   : > { %v2626_v45 = vpop.xlane.xlu0 %2625  ;;  %4427 = vpow2.f32 %v2313_v44  ;;  %v2880_v48 = vsub.f32 %v5101_v36, %v2876_v7 }
 0x484   : > { %v5241_v9 = vpop.eup %4419  ;;  %v2630_v17 = vsub.f32 %v5081_v4, %v2626_v45  ;;  %4429 = vpow2.f32 %v2438_v18 }
 0x485   : > { %v2445_v51 = vsel %vm946_vm11, %v5241_v9, 0.0  ;;  %v5247_v22 = vpop.eup %4421  ;;  %v2882_v32 = vmul.f32 1.442695, %v2880_v48 }
 0x486   : > { %2068 = vadd.xlane.f32.xlu1 %v2067_v31  ;;  %2446 = vadd.xlane.f32.xlu0 %v2445_v51  ;;  %v2192_v27 = vsel %vm942_vm10, %v5247_v22, 0.0  ;;  %v2879_v12 = vpop.xlane.xlu1 %2878 }
 0x487   : > { %v2751_v49 = vpop.xlane.xlu0 %2750  ;;  %v2881_v15 = vsub.f32 %v5105_v37, %v2879_v12 }
 0x488   : > { %v5249_v25 = vpop.eup %4423 }
 0x489   : > { %v2639_v42 = vsel %vm946_vm11, %v5249_v25, 0.0  ;;  %v2884_v51 = vmul.f32 1.442695, %v2881_v15 }
 0x48a   : > { %2193 = vadd.xlane.f32.xlu1 %v2192_v27  ;;  %2640 = vadd.xlane.f32.xlu0 %v2639_v42  ;;  %v2632_v27 = vmul.f32 1.442695, %v2630_v17 }
 0x48b   : > { %v3001_v59 = vpop.xlane.xlu0 %3000  ;;  %4431 = vpow2.f32 %v2884_v51 }
 0x48c   : > { %v5255_v33 = vpop.eup %4425  ;;  %4433 = vpow2.f32 %v2632_v27 }
 0x48d   : > { %v2764_v40 = vsel %vm946_vm11, %v5255_v33, 0.0  ;;  %v5270_v4 = vpop.eup %4427 }
 0x48e   : > { %2765 = vadd.xlane.f32.xlu0 %v2764_v40  ;;  %v2755_v40 = vsub.f32 %v5091_v24, %v2751_v49  ;;  %v5273_v14 = vpop.eup %4429  ;;  %v2317_v24 = vsel %vm942_vm10, %v5270_v4, 0.0 }
 0x48f   : > { %v3004_v39 = vpop.xlane.xlu0 %3003 }
 0x490   : > { %v3006_v31 = vsub.f32 %v5113_v50, %v3004_v39  ;;  %v2757_v37 = vmul.f32 1.442695, %v2755_v40  ;;  %v3005_v50 = vsub.f32 %v5109_v46, %v3001_v59  ;;  %v2442_v46 = vsel %vm942_vm10, %v5273_v14, 0.0 }
 0x491   : > { %v1105_v40 = vand.u32 %v5121_v57, %v4938_v41 }
 0x492   : > { %v3009_v42 = vmul.f32 1.442695, %v3006_v31  ;;  %v3007_v12 = vmul.f32 1.442695, %v3005_v50  ;;  %v1230_v50 = vand.u32 %v5115_v52, %v4938_v41 }
 0x494   : > { %4435 = vpow2.f32 %v3009_v42 }
 0x495   : > { %v5277_v49 = vpop.eup %4431 }
 0x496   : > { %v5279_v7 = vpop.eup %4433  ;;  %v2889_v59 = vsel %vm946_vm11, %v5277_v49, 0.0 }
 0x497   : > { %v2636_v18 = vsel %vm942_vm10, %v5279_v7, 0.0 }
 0x49b   : > { %2649 = vrot.lane.b32.xlu1 %v4836_v3, %s4559_s19 }
 0x49e   : > { %v5281_v63 = vpop.eup %4435 }
 0x49f   : > { %v3014_v31 = vsel %vm946_vm11, %v5281_v63, 0.0 }
 0x4a4   : > { %2774 = vrot.lane.b32.xlu0 %v4836_v3, %s4561_s21  ;;  %s5689_s21 = sld [smem:[#allocation7_spill]] (!%p3885_p5) }
 0x4b8   : > { %v958_v1 = vpop.xlane.xlu0 %957 }
 0x4b9   : > { %4437 = vrcp.f32 %v958_v1 }
 0x4ba   : > { %v961_v60 = vpop.xlane.xlu1 %960 }
 0x4bb   : > { %4439 = vrcp.f32 %v961_v60 }
 0x4bc   : > { %4441 = vpow2.f32 %v2757_v37  ;;  %v1088_v45 = vpop.xlane.xlu0 %1087 }
 0x4bd   : > { %4443 = vpow2.f32 %v2882_v32 }
 0x4be   : > { %4445 = vrcp.f32 %v1088_v45 }
 0x4bf   : > { %2318 = vadd.xlane.f32.xlu1 %v2317_v24 }
 0x4c0   : > { %v1091_v36 = vpop.xlane.xlu1 %1090 }
 0x4c1   : > { %4447 = vrcp.f32 %v1091_v36 }
 0x4c2   : > { %4449 = vpow2.f32 %v3007_v12 }
 0x4c3   : > { %v4438_v44 = vpop.eup %4437  ;;  %2443 = vadd.xlane.f32.xlu1 %v2442_v46  ;;  %2890 = vadd.xlane.f32.xlu0 %v2889_v59 }
 0x4c4   : > { %v966_v39 = vmul.f32 %v4438_v44, %v5140_v30 }
 0x4c5   : > { %v4440_v15 = vpop.eup %4439 }
 0x4c6   : > { %v967_v17 = vmul.f32 %v4440_v15, %v5144_v38  ;;  %v5293_v51 = vpop.eup %4441 }
 0x4c7   : > { %2637 = vadd.xlane.f32.xlu1 %v2636_v18  ;;  %3015 = vadd.xlane.f32.xlu0 %v3014_v31  ;;  %v5295_v42 = vpop.eup %4443  ;;  %v2761_v30 = vsel %vm942_vm10, %v5293_v51, 0.0 }
 0x4c8   : > { %v968_v27 = vpack.c.bf16 %v967_v17, %v966_v39  ;;  %v4446_v48 = vpop.eup %4445  ;;  %v2886_v57 = vsel %vm942_vm10, %v5295_v42, 0.0  ;;  %v1355_v17 = vand.u32 %v5125_v62, %v4938_v41 }
 0x4c9   : > { %v1096_v37 = vmul.f32 %v4446_v48, %v5148_v47  ;;  %v1213_v47 = vpop.xlane.xlu0 %1212 }
 0x4ca   : > { %4035 = vmatmul.mubr.msk.bf16.vlgmr.msra.gmra.mrb[12].mxu1 %vm942_vm10, %v968_v27  ;;  %4451 = vrcp.f32 %v1213_v47 }
 0x4cb   : > { %v4448_v38 = vpop.eup %4447  ;;  %4045 = vmatpush3.bf16.msra.mxu1 %v1105_v40  ;;  %2762 = vadd.xlane.f32.xlu1 %v2761_v30  ;;  %v1551_v30 = vand.u32 %v5119_v56, %v4938_v41 }
 0x4cc   : > { %v1097_v1 = vmul.f32 %v4448_v38, %v5152_v8  ;;  %4046 = vmatprep.mubr.msk.bf16.mxu1 %vm4551_vm4, %v4550_v54  ;;  %4056 = vmatprep.subr.bf16.mxu1 %v4550_v54  ;;  %v5309_v60 = vpop.eup %4449 }
 0x4cd   : > { %v3011_v8 = vsel %vm942_vm10, %v5309_v60, 0.0  ;;  %v5323_v24 = vpop.permute.xlu0 %2455 }
 0x4ce   : > { %v1098_v32 = vpack.c.bf16 %v1097_v1, %v1096_v37 }
 0x4cf   : > { %2887 = vadd.xlane.f32.xlu1 %v2886_v57 }
 0x4d2   : > { %4047 = vmatmul.mubr.msk.bf16.vlgmr.msra.gmra.mrb[16].mxu1 %vm942_vm10, %v1098_v32 }
 0x4d3   : > { %4057 = vmatpush3.bf16.msra.mxu1 %v1230_v50  ;;  %3012 = vadd.xlane.f32.xlu1 %v3011_v8  ;;  %v1676_v50 = vand.u32 %v5123_v61, %v4938_v41  ;;  %v1801_v61 = vand.u32 %v5129_v5, %v4938_v41  ;;  %v1926_v5 = vand.u32 %v5127_v2, %v4938_v41 }
 0x4d4   : > { %4058 = vmatprep.mubr.msk.bf16.mxu1 %vm4551_vm4, %v4550_v54  ;;  %4068 = vmatprep.subr.bf16.mxu1 %v4550_v54  ;;  %v4452_v12 = vpop.eup %4451  ;;  %v2086_v2 = vand.u32 %v5133_v11, %v4938_v41 }
 0x4d5   : > { %v1221_v59 = vmul.f32 %v4452_v12, %v5156_v55 }
 0x4dd   : > { %3024 = vrot.lane.b32.xlu0 %v4836_v3, %s4562_s22 }
 0x4e4   : > { %2899 = vrot.lane.b32.xlu1 %v4836_v3, %s4560_s17 }
 0x4ef   : > { %v1216_v52 = vpop.xlane.xlu1 %1215 }
 0x4f0   : > { %4453 = vrcp.f32 %v1216_v52 }
 0x4f3   : > { %v1338_v45 = vpop.xlane.xlu1 %1337 }
 0x4f4   : > { %4455 = vrcp.f32 %v1338_v45 }
 0x4f7   : > { %v1341_v36 = vpop.xlane.xlu1 %1340 }
 0x4f8   : > { %4457 = vrcp.f32 %v1341_v36 }
 0x4f9   : > { %v1534_v15 = vpop.xlane.xlu0 %1533 }
 0x4fa   : > { %v4454_v46 = vpop.eup %4453 }
 0x4fb   : > { %v1222_v44 = vmul.f32 %v4454_v46, %v5171_v19  ;;  %v1537_v39 = vpop.xlane.xlu1 %1536 }
 0x4fc   : > { %4459 = vrcp.f32 %v1537_v39 }
 0x4fd   : > { %v1223_v3 = vpack.c.bf16 %v1222_v44, %v1221_v59  ;;  %4461 = vrcp.f32 %v1534_v15  ;;  %v1784_v37 = vpop.xlane.xlu0 %1783 }
 0x4fe   : > { %v4456_v31 = vpop.eup %4455 }
 0x4ff   : > { %4059 = vmatmul.mubr.msk.bf16.vlgmr.msra.gmra.mrb[20].mxu1 %vm942_vm10, %v1223_v3  ;;  %v1659_v18 = vpop.xlane.xlu1 %1658  ;;  %v1346_v19 = vmul.f32 %v4456_v31, %v5176_v28 }
 0x500   : > { %4069 = vmatpush3.bf16.msra.mxu1 %v1355_v17  ;;  %4070 = vmatprep.mubr.msk.bf16.mxu1 %vm4551_vm4, %v4550_v54 }
 0x501   : > { %4080 = vmatprep.subr.bf16.mxu1 %v4550_v54 }
 0x502   : > { %v4458_v55 = vpop.eup %4457 }
 0x503   : > { %v1347_v27 = vmul.f32 %v4458_v55, %v5181_v29  ;;  %v1662_v40 = vpop.xlane.xlu1 %1661 }
 0x504   : > { %4463 = vrcp.f32 %v1662_v40 }
 0x505   : > { %v1348_v48 = vpack.c.bf16 %v1347_v27, %v1346_v19  ;;  %4465 = vrcp.f32 %v1659_v18  ;;  %v2211_v27 = vand.u32 %v5131_v6, %v4938_v41 }
 0x506   : > { %v4460_v62 = vpop.eup %4459 }
 0x507   : > { %4071 = vmatmul.mubr.msk.bf16.vlgmr.msra.gmra.mrb[24].mxu1 %vm942_vm10, %v1348_v48  ;;  %v1787_v38 = vpop.xlane.xlu1 %1786  ;;  %v4462_v1 = vpop.eup %4461  ;;  %v1543_v28 = vmul.f32 %v4460_v62, %v5188_v58 }
 0x508   : > { %4081 = vmatpush3.bf16.msra.mxu1 %v1551_v30  ;;  %4082 = vmatprep.mubr.msk.bf16.mxu1 %vm4551_vm4, %v4550_v54  ;;  %v1542_v29 = vmul.f32 %v4462_v1, %v5183_v26  ;;  %4467 = vrcp.f32 %v1787_v38  ;;  %v2072_v46 = vpop.xlane.xlu0 %2071 }
 0x509   : > { %4092 = vmatprep.subr.bf16.mxu1 %v4550_v54  ;;  %4469 = vrcp.f32 %v1784_v37 }
 0x50a   : > { %v1544_v32 = vpack.c.bf16 %v1543_v28, %v1542_v29 }
 0x50b   : > { %v1909_v57 = vpop.xlane.xlu1 %1908 }
 0x50e   : > { %v4464_v56 = vpop.eup %4463 }
 0x50f   : > { %4083 = vmatmul.mubr.msk.bf16.vlgmr.msra.gmra.mrb[28].mxu1 %vm942_vm10, %v1544_v32  ;;  %v4466_v8 = vpop.eup %4465  ;;  %v1668_v58 = vmul.f32 %v4464_v56, %v5206_v23  ;;  %v1912_v47 = vpop.xlane.xlu1 %1911  ;;  %v2461_v32 = vand.u32 %v5323_v24, %v4938_v41 }
 0x510   : > { %4093 = vmatpush3.bf16.msra.mxu1 %v1676_v50  ;;  %4094 = vmatprep.mubr.msk.bf16.mxu1 %vm4551_vm4, %v4550_v54  ;;  %v1667_v26 = vmul.f32 %v4466_v8, %v5198_v53  ;;  %4471 = vrcp.f32 %v1912_v47 }
 0x511   : > { %4104 = vmatprep.subr.bf16.mxu1 %v4550_v54  ;;  %4473 = vrcp.f32 %v1909_v57 }
 0x512   : > { %v1669_v52 = vpack.c.bf16 %v1668_v58, %v1667_v26  ;;  %v4468_v45 = vpop.eup %4467 }
 0x513   : > { %v4470_v36 = vpop.eup %4469  ;;  %v1793_v23 = vmul.f32 %v4468_v45, %v5212_v35  ;;  %v2069_v12 = vpop.xlane.xlu1 %2068 }
 0x514   : > { %v1792_v53 = vmul.f32 %v4470_v36, %v5193_v0  ;;  %4475 = vrcp.f32 %v2069_v12  ;;  %v2197_v0 = vpop.xlane.xlu0 %2196 }
 0x515   : > { %4477 = vrcp.f32 %v2072_v46 }
 0x516   : > { %v1794_v59 = vpack.c.bf16 %v1793_v23, %v1792_v53 }
 0x517   : > { %4095 = vmatmul.mubr.msk.bf16.vlgmr.msra.gmra.mrb[32].mxu1 %vm942_vm10, %v1669_v52  ;;  %v2194_v39 = vpop.xlane.xlu1 %2193 }
 0x518   : > { %4105 = vmatpush3.bf16.msra.mxu1 %v1801_v61  ;;  %4106 = vmatprep.mubr.msk.bf16.mxu1 %vm4551_vm4, %v4550_v54  ;;  %4479 = vrcp.f32 %v2194_v39  ;;  %v2322_v6 = vpop.xlane.xlu0 %2321 }
 0x519   : > { %4116 = vmatprep.subr.bf16.mxu1 %v4550_v54  ;;  %4481 = vrcp.f32 %v2197_v0 }
 0x51a   : > { %v4472_v44 = vpop.eup %4471  ;;  %4483 = vrcp.f32 %v2322_v6 }
 0x51b   : > { %v4474_v15 = vpop.eup %4473  ;;  %v1918_v35 = vmul.f32 %v4472_v44, %v5230_v13  ;;  %v2650_v62 = vpop.permute.xlu1 %2649 }
 0x51c   : > { %v1917_v3 = vmul.f32 %v4474_v15, %v5221_v34  ;;  %v2447_v30 = vpop.xlane.xlu0 %2446  ;;  %v2655_v26 = vand.u32 %v2650_v62, %v4938_v41 }
 0x51e   : > { %v1919_v17 = vpack.c.bf16 %v1918_v35, %v1917_v3  ;;  %v4476_v18 = vpop.eup %4475 }
 0x51f   : > { %4107 = vmatmul.mubr.msk.bf16.vlgmr.msra.gmra.mrb[36].mxu1 %vm942_vm10, %v1794_v59  ;;  %v4478_v31 = vpop.eup %4477  ;;  %v2077_v13 = vmul.f32 %v4476_v18, %v5239_v21 }
 0x520   : > { %4117 = vmatpush3.bf16.msra.mxu1 %v1926_v5  ;;  %4118 = vmatprep.mubr.msk.bf16.mxu1 %vm4551_vm4, %v4550_v54  ;;  %v2078_v34 = vmul.f32 %v4478_v31, %v5215_v43  ;;  %v2336_v43 = vand.u32 %v5160_v16, %v4938_v41  ;;  %v2641_v29 = vpop.xlane.xlu0 %2640 }
 0x521   : > { %4128 = vmatprep.subr.bf16.mxu1 %v4550_v54 }
 0x522   : > { %v2079_v55 = vpack.c.bf16 %v2078_v34, %v2077_v13  ;;  %v4480_v19 = vpop.eup %4479 }
 0x523   : > { %v4482_v11 = vpop.eup %4481  ;;  %v2202_v40 = vmul.f32 %v4480_v19, %v5247_v22 }
 0x524   : > { %v2203_v21 = vmul.f32 %v4482_v11, %v5224_v10  ;;  %v4484_v10 = vpop.eup %4483  ;;  %v2766_v8 = vpop.xlane.xlu0 %2765 }
 0x525   : > { %v2328_v28 = vmul.f32 %v4484_v10, %v5233_v20 }
 0x526   : > { %v2204_v48 = vpack.c.bf16 %v2203_v21, %v2202_v40 }
 0x527   : > { %4119 = vmatmul.mubr.msk.bf16.vlgmr.msra.gmra.mrb[40].mxu1 %vm942_vm10, %v1919_v17 }
 0x528   : > { %4129 = vmatpush3.bf16.msra.mxu1 %v2086_v2  ;;  %4130 = vmatprep.mubr.msk.bf16.mxu1 %vm4551_vm4, %v4550_v54  ;;  %v2775_v52 = vpop.permute.xlu0 %2774 }
 0x529   : > { %4140 = vmatprep.subr.bf16.mxu1 %v4550_v54  ;;  %v2780_v46 = vand.u32 %v2775_v52, %v4938_v41 }
 0x52f   : > { %4131 = vmatmul.mubr.msk.bf16.vlgmr.msra.gmra.mrb[44].mxu1 %vm942_vm10, %v2079_v55 }
 0x530   : > { %4141 = vmatpush3.bf16.msra.mxu1 %v2211_v27  ;;  %4142 = vmatprep.mubr.msk.bf16.mxu1 %vm4551_vm4, %v4550_v54 }
 0x531   : > { %4152 = vmatprep.subr.bf16.mxu1 %v4550_v54 }
 0x537   : > { %4143 = vmatmul.mubr.msk.bf16.vlgmr.msra.gmra.mrb[48].mxu1 %vm942_vm10, %v2204_v48 }
 0x538   : > { %4153 = vmatpush3.bf16.msra.mxu1 %v2336_v43  ;;  %4154 = vmatprep.mubr.msk.bf16.mxu1 %vm4551_vm4, %v4550_v54 }
 0x539   : > { %4164 = vmatprep.subr.bf16.mxu1 %v4550_v54 }
 0x54c   : > { %v2319_v22 = vpop.xlane.xlu1 %2318 }
 0x54d   : > { %4485 = vrcp.f32 %v2319_v22 }
 0x550   : > { %v2444_v38 = vpop.xlane.xlu1 %2443  ;;  %v2891_v36 = vpop.xlane.xlu0 %2890 }
 0x551   : > { %4487 = vrcp.f32 %v2444_v38 }
 0x552   : > { %4489 = vrcp.f32 %v2447_v30 }
 0x554   : > { %v2638_v1 = vpop.xlane.xlu1 %2637  ;;  %v3016_v44 = vpop.xlane.xlu0 %3015 }
 0x555   : > { %4491 = vrcp.f32 %v2638_v1 }
 0x556   : > { %4493 = vrcp.f32 %v2641_v29 }
 0x557   : > { %v4486_v16 = vpop.eup %4485 }
 0x558   : > { %v2327_v37 = vmul.f32 %v4486_v16, %v5270_v4  ;;  %v2763_v58 = vpop.xlane.xlu1 %2762  ;;  %v3025_v3 = vpop.permute.xlu0 %3024 }
 0x559   : > { %4495 = vrcp.f32 %v2763_v58  ;;  %v3030_v2 = vand.u32 %v3025_v3, %v4938_v41 }
 0x55a   : > { %v2329_v57 = vpack.c.bf16 %v2328_v28, %v2327_v37  ;;  %4497 = vrcp.f32 %v2766_v8 }
 0x55b   : > { %v4488_v56 = vpop.eup %4487 }
 0x55c   : > { %4155 = vmatmul.mubr.msk.bf16.vlgmr.msra.gmra.mrb[52].mxu1 %vm942_vm10, %v2329_v57  ;;  %v4490_v50 = vpop.eup %4489  ;;  %v2452_v20 = vmul.f32 %v4488_v56, %v5273_v14  ;;  %v2888_v45 = vpop.xlane.xlu1 %2887 }
 0x55d   : > { %4165 = vmatpush3.bf16.msra.mxu1 %v2461_v32  ;;  %4166 = vmatprep.mubr.msk.bf16.mxu1 %vm4551_vm4, %v4550_v54  ;;  %v2453_v4 = vmul.f32 %v4490_v50, %v5241_v9  ;;  %4499 = vrcp.f32 %v2888_v45 }
 0x55e   : > { %4176 = vmatprep.subr.bf16.mxu1 %v4550_v54  ;;  %4501 = vrcp.f32 %v2891_v36 }
 0x55f   : > { %v2454_v47 = vpack.c.bf16 %v2453_v4, %v2452_v20  ;;  %v4492_v24 = vpop.eup %4491 }
 0x560   : > { %v4494_v61 = vpop.eup %4493  ;;  %v2646_v14 = vmul.f32 %v4492_v24, %v5279_v7  ;;  %v3013_v23 = vpop.xlane.xlu1 %3012 }
 0x561   : > { %v2647_v9 = vmul.f32 %v4494_v61, %v5249_v25  ;;  %4503 = vrcp.f32 %v3013_v23 }
 0x562   : > { %4505 = vrcp.f32 %v3016_v44 }
 0x563   : > { %v2648_v12 = vpack.c.bf16 %v2647_v9, %v2646_v14  ;;  %v4496_v53 = vpop.eup %4495 }
 0x564   : > { %4167 = vmatmul.mubr.msk.bf16.vlgmr.msra.gmra.mrb[56].mxu1 %vm942_vm10, %v2454_v47  ;;  %v4498_v59 = vpop.eup %4497  ;;  %v2771_v7 = vmul.f32 %v4496_v53, %v5293_v51  ;;  %v2900_v5 = vpop.permute.xlu1 %2899 }
 0x565   : > { %4177 = vmatpush3.bf16.msra.mxu1 %v2655_v26  ;;  %4178 = vmatprep.mubr.msk.bf16.mxu1 %vm4551_vm4, %v4550_v54  ;;  %v2772_v25 = vmul.f32 %v4498_v59, %v5255_v33  ;;  %v2905_v39 = vand.u32 %v2900_v5, %v4938_v41 }
 0x566   : > { %4188 = vmatprep.subr.bf16.mxu1 %v4550_v54 }
 0x567   : > { %v2773_v15 = vpack.c.bf16 %v2772_v25, %v2771_v7  ;;  %v4500_v35 = vpop.eup %4499  ;;  %v4353_v7 = vld [vmem:[%s5687_s29] sm:$0xff]  }
 0x568   : > { %v4502_v0 = vpop.eup %4501  ;;  %v2896_v51 = vmul.f32 %v4500_v35, %v5295_v42  ;;  %4218 = vmatprep.subr.bf16.mxu0 %v4353_v7 }
 0x569   : > { %v2897_v33 = vmul.f32 %v4502_v0, %v5277_v49  ;;  %4219 = vmatpush3.bf16.msra.mxu0 %v4353_v7 }
 0x56b   : > { %v2898_v17 = vpack.c.bf16 %v2897_v33, %v2896_v51  ;;  %v4504_v18 = vpop.eup %4503 }
 0x56c   : > { %4179 = vmatmul.mubr.msk.bf16.vlgmr.msra.gmra.mrb[60].mxu1 %vm942_vm10, %v2648_v12  ;;  %v4506_v31 = vpop.eup %4505  ;;  %v3021_v13 = vmul.f32 %v4504_v18, %v5309_v60 }
 0x56d   : > { %4189 = vmatpush3.bf16.msra.mxu1 %v2780_v46  ;;  %4190 = vmatprep.mubr.msk.bf16.mxu1 %vm4551_vm4, %v4550_v54  ;;  %v3022_v42 = vmul.f32 %v4506_v31, %v5281_v63 }
 0x56e   : > { %4200 = vmatprep.subr.bf16.mxu1 %v4550_v54 }
 0x56f   : > { %v3023_v34 = vpack.c.bf16 %v3022_v42, %v3021_v13 }
 0x574   : > { %4191 = vmatmul.mubr.msk.bf16.vlgmr.msra.gmra.mrb[64].mxu1 %vm942_vm10, %v2773_v15 }
 0x575   : > { %4201 = vmatpush3.bf16.msra.mxu1 %v2905_v39  ;;  %4202 = vmatprep.mubr.msk.bf16.mxu1 %vm4551_vm4, %v4550_v54  ;;  %v4354_v39 = vld [vmem:[%s5687_s29 + $0x8] sm:$0xff]  }
 0x576   : > { %4212 = vmatprep.subr.bf16.mxu1 %v4550_v54  ;;  %4220 = vmatprep.subr.bf16.mxu0 %v4354_v39 }
 0x577   : > { %4221 = vmatpush3.bf16.msra.mxu0 %v4354_v39 }
 0x57c   : > { %4203 = vmatmul.mubr.msk.bf16.vlgmr.msra.gmra.mrb[68].mxu1 %vm942_vm10, %v2898_v17 }
 0x57d   : > { %4213 = vmatpush3.bf16.msra.mxu1 %v3030_v2  ;;  %4214 = vmatprep.mubr.msk.bf16.mxu1 %vm4551_vm4, %v4550_v54 }
 0x584   : > { %4215 = vmatmul.mubr.msk.bf16.vlgmr.msra.gmra.mrb[72].mxu1 %vm942_vm10, %v3023_v34 }
 0x59d   : > { %v5427_v49 = vpop.f32.mrb[12].mxu1 }
 0x59e   : > { %v4036_v55 = vpop.f32.mrb[13].mxu1 }
 0x59f   : > { %v5429_v19 = vpop.f32.mrb[14].mxu1 }
 0x5a0   : > { %v4037_v41 = vpop.f32.mrb[15].mxu1 }
 0x5a5   : > { %v1141_v27 = vpop.f32.mrb[16].mxu1 }
 0x5a6   : > { %v4048_v11 = vpop.f32.mrb[17].mxu1 }
 0x5a7   : > { %v1144_v40 = vpop.f32.mrb[18].mxu1 }
 0x5a8   : > { %v4049_v21 = vpop.f32.mrb[19].mxu1 }
 0x5d2   : > { %v1266_v48 = vpop.f32.mrb[20].mxu1 }
 0x5d3   : > { %v4060_v43 = vpop.f32.mrb[21].mxu1 }
 0x5d4   : > { %v1269_v54 = vpop.f32.mrb[22].mxu1 }
 0x5d5   : > { %v4061_v6 = vpop.f32.mrb[23].mxu1 }
 0x5da   : > { %v1391_v60 = vpop.f32.mrb[24].mxu1 }
 0x5db   : > { %v4072_v62 = vpop.f32.mrb[25].mxu1 }
 0x5dc   : > { %v1394_v63 = vpop.f32.mrb[26].mxu1 }
 0x5dd   : > { %v4073_v22 = vpop.f32.mrb[27].mxu1 }
 0x5e2   : > { %v5431_v30 = vpop.f32.mrb[28].mxu1 }
 0x5e3   : > { %v4084_v38 = vpop.f32.mrb[29].mxu1 }
 0x5e4   : > { %v5433_v10 = vpop.f32.mrb[30].mxu1 }
 0x5e5   : > { %v4085_v1 = vpop.f32.mrb[31].mxu1 }
 0x5ea   : > { %v1712_v16 = vpop.f32.mrb[32].mxu1 }
 0x5eb   : > { %v4096_v28 = vpop.f32.mrb[33].mxu1 }
 0x5ec   : > { %v1715_v29 = vpop.f32.mrb[34].mxu1 }
 0x5ed   : > { %v4291_v37 = vpack.i.bf16 %v1715_v29, %v1712_v16  ;;  %v4097_v57 = vpop.f32.mrb[35].mxu1 }
 0x5ef   : > { %4292 = vrot.lane.b32.xlu0 %v4291_v37, %s4564_s24 }
 0x5f2   : > { %v1837_v32 = vpop.f32.mrb[36].mxu1 }
 0x5f3   : > { %v4108_v56 = vpop.f32.mrb[37].mxu1 }
 0x5f4   : > { %v1840_v50 = vpop.f32.mrb[38].mxu1 }
 0x5f5   : > { %v4296_v8 = vpack.i.bf16 %v1840_v50, %v1837_v32  ;;  %v4109_v20 = vpop.f32.mrb[39].mxu1 }
 0x5f7   : > { %4297 = vrot.lane.b32.xlu0 %v4296_v8, %s4565_s28 }
 0x5fa   : > { %v1962_v58 = vpop.f32.mrb[40].mxu1 }
 0x5fb   : > { %v4120_v4 = vpop.f32.mrb[41].mxu1 }
 0x5fc   : > { %v1965_v47 = vpop.f32.mrb[42].mxu1 }
 0x5fd   : > { %v4301_v24 = vpack.i.bf16 %v1965_v47, %v1962_v58  ;;  %v4121_v26 = vpop.f32.mrb[43].mxu1 }
 0x5ff   : > { %4302 = vrot.lane.b32.xlu1 %v4301_v24, %s4566_s25 }
 0x602   : > { %v5438_v52 = vpop.f32.mrb[44].mxu1 }
 0x603   : > { %v4132_v45 = vpop.f32.mrb[45].mxu1 }
 0x604   : > { %v5440_v61 = vpop.f32.mrb[46].mxu1 }
 0x605   : > { %v4133_v14 = vpop.f32.mrb[47].mxu1 }
 0x60a   : > { %v2247_v9 = vpop.f32.mrb[48].mxu1 }
 0x60b   : > { %v4306_v36 = vpack.i.bf16 %v1144_v40, %v2247_v9  ;;  %v4144_v23 = vpop.f32.mrb[49].mxu1 }
 0x60c   : > { %v2250_v12 = vpop.f32.mrb[50].mxu1 }
 0x60d   : > { %v4311_v53 = vpack.i.bf16 %v2250_v12, %v1141_v27  ;;  %4307 = vrot.lane.b32.xlu0 %v4306_v36, %s4564_s24  ;;  %v4145_v46 = vpop.f32.mrb[51].mxu1 }
 0x60f   : > { %4312 = vrot.lane.b32.xlu1 %v4311_v53, %s4564_s24 }
 0x62f   : > { %v2372_v59 = vpop.f32.mrb[52].mxu1 }
 0x630   : > { %v4316_v25 = vpack.i.bf16 %v1269_v54, %v2372_v59  ;;  %v4156_v44 = vpop.f32.mrb[53].mxu1 }
 0x631   : > { %v2375_v5 = vpop.f32.mrb[54].mxu1 }
 0x632   : > { %v4321_v15 = vpack.i.bf16 %v2375_v5, %v1266_v48  ;;  %4317 = vrot.lane.b32.xlu0 %v4316_v25, %s4565_s28  ;;  %v4157_v35 = vpop.f32.mrb[55].mxu1 }
 0x634   : > { %4322 = vrot.lane.b32.xlu1 %v4321_v15, %s4565_s28 }
 0x637   : > { %v2497_v0 = vpop.f32.mrb[56].mxu1 }
 0x638   : > { %v4326_v51 = vpack.i.bf16 %v1394_v63, %v2497_v0  ;;  %v4168_v33 = vpop.f32.mrb[57].mxu1 }
 0x639   : > { %v2500_v3 = vpop.f32.mrb[58].mxu1 }
 0x63a   : > { %v4331_v17 = vpack.i.bf16 %v2500_v3, %v1391_v60  ;;  %4327 = vrot.lane.b32.xlu0 %v4326_v51, %s4566_s25  ;;  %v4169_v18 = vpop.f32.mrb[59].mxu1 }
 0x63e   : > { %4332 = vrot.lane.b32.xlu0 %v4331_v17, %s4566_s25 }
 0x63f   : > { %v5450_v2 = vpop.f32.mrb[60].mxu1 }
 0x640   : > { %v4180_v31 = vpop.f32.mrb[61].mxu1 }
 0x641   : > { %v5452_v13 = vpop.f32.mrb[62].mxu1 }
 0x642   : > { %v4181_v42 = vpop.f32.mrb[63].mxu1 }
 0x647   : > { %v2816_v34 = vpop.f32.mrb[64].mxu1 }
 0x648   : > { %v4192_v55 = vpop.f32.mrb[65].mxu1 }
 0x649   : > { %v2819_v41 = vpop.f32.mrb[66].mxu1 }
 0x64a   : > { %v4336_v27 = vpack.i.bf16 %v2819_v41, %v2816_v34  ;;  %v4193_v11 = vpop.f32.mrb[67].mxu1 }
 0x64c   : > { %4337 = vrot.lane.b32.xlu1 %v4336_v27, %s4564_s24 }
 0x64f   : > { %v2941_v40 = vpop.f32.mrb[68].mxu1 }
 0x650   : > { %v4204_v21 = vpop.f32.mrb[69].mxu1 }
 0x651   : > { %v2944_v48 = vpop.f32.mrb[70].mxu1 }
 0x652   : > { %v4341_v43 = vpack.i.bf16 %v2944_v48, %v2941_v40  ;;  %v4205_v54 = vpop.f32.mrb[71].mxu1 }
 0x654   : > { %4342 = vrot.lane.b32.xlu0 %v4341_v43, %s4565_s28 }
 0x657   : > { %v3066_v6 = vpop.f32.mrb[72].mxu1 }
 0x658   : > { %v4216_v60 = vpop.f32.mrb[73].mxu1 }
 0x659   : > { %v3069_v62 = vpop.f32.mrb[74].mxu1 }
 0x65a   : > { %v4346_v63 = vpack.i.bf16 %v3069_v62, %v3066_v6  ;;  %v4217_v22 = vpop.f32.mrb[75].mxu1 }
 0x65c   : > { %4347 = vrot.lane.b32.xlu1 %v4346_v63, %s4566_s25 }
 0x661   : > { %v4293_v38 = vpop.permute.xlu0 %4292 }
 0x662   : > { %v4295_v16 = vunpack.i.h.bf16 %v4293_v38  ;;  %v4294_v28 = vunpack.i.l.bf16 %v4293_v38 }
 0x664   : > { %v1994_v32 = vsel %vm894_vm7, %v5433_v10, %v4295_v16  ;;  %v1993_v56 = vsel %vm894_vm7, %v5431_v30, %v4294_v28 }
 0x669   : > { %v4298_v1 = vpop.permute.xlu0 %4297 }
 0x66a   : > { %v4300_v29 = vunpack.i.h.bf16 %v4298_v1  ;;  %v4299_v37 = vunpack.i.l.bf16 %v4298_v1 }
 0x66c   : > { %v1996_v20 = vsel %vm1424_vm12, %v1994_v32, %v4300_v29  ;;  %v1995_v58 = vsel %vm1424_vm12, %v1993_v56, %v4299_v37 }
 0x671   : > { %v4303_v57 = vpop.permute.xlu1 %4302 }
 0x672   : > { %v4305_v50 = vunpack.i.h.bf16 %v4303_v57  ;;  %v4304_v8 = vunpack.i.l.bf16 %v4303_v57 }
 0x674   : > { %v1998_v4 = vsel %vm1427_vm13, %v1996_v20, %v4305_v50  ;;  %v1997_v47 = vsel %vm1427_vm13, %v1995_v58, %v4304_v8 }
 0x675   : > { %v3107_v24 = vrot.slane %v1998_v4, 3  ;;  %v3106_v26 = vrot.slane %v1997_v47, 3 }
 0x677   : > { %v3108_v45 = vsel %vm3105_vm14, %v3106_v26, %v3107_v24 }
 0x67f   : > { %v4308_v14 = vpop.permute.xlu0 %4307 }
 0x680   : > { %v4310_v36 = vunpack.i.h.bf16 %v4308_v14  ;;  %v4309_v30 = vunpack.i.l.bf16 %v4308_v14 }
 0x681   : > { %v4313_v10 = vpop.permute.xlu1 %4312 }
 0x682   : > { %v1423_v46 = vsel %vm894_vm7, %v5429_v19, %v4310_v36  ;;  %v2528_v59 = vsel %vm894_vm7, %v5438_v52, %v4309_v30  ;;  %v4315_v25 = vunpack.i.h.bf16 %v4313_v10  ;;  %v4314_v44 = vunpack.i.l.bf16 %v4313_v10  ;;  %v4535_v10 = vld [vmem:[#allocation2] sm:$0xff]  ;;  %v4536_v30 = vld [vmem:[#allocation2 + $0x10] sm:$0xff] }
 0x684   : > { %v2529_v18 = vsel %vm894_vm7, %v5440_v61, %v4315_v25  ;;  %v1422_v31 = vsel %vm894_vm7, %v5427_v49, %v4314_v44  ;;  %v4538_v25 = vld [vmem:[#allocation2 + $0x18] sm:$0xff] }
 0x6a4   : > { %v4318_v9 = vpop.permute.xlu0 %4317 }
 0x6a5   : > { %v4320_v23 = vunpack.i.h.bf16 %v4318_v9  ;;  %v4319_v12 = vunpack.i.l.bf16 %v4318_v9 }
 0x6a6   : > { %v4323_v53 = vpop.permute.xlu1 %4322 }
 0x6a7   : > { %v1426_v35 = vsel %vm1424_vm12, %v1423_v46, %v4320_v23  ;;  %v2530_v39 = vsel %vm1424_vm12, %v2528_v59, %v4319_v12  ;;  %v4325_v0 = vunpack.i.h.bf16 %v4323_v53  ;;  %v4324_v51 = vunpack.i.l.bf16 %v4323_v53  ;;  %v4537_v53 = vld [vmem:[#allocation2 + $0x8] sm:$0xff] }
 0x6a9   : > { %v2531_v55 = vsel %vm1424_vm12, %v2529_v18, %v4325_v0  ;;  %v1425_v41 = vsel %vm1424_vm12, %v1422_v31, %v4324_v51  ;;  %v4540_v18 = vld [vmem:[#allocation2 + $0x30] sm:$0xf] }
 0x6ac   : > { %v4328_v7 = vpop.permute.xlu0 %4327 }
 0x6ad   : > { %v4330_v5 = vunpack.i.h.bf16 %v4328_v7  ;;  %v4329_v15 = vunpack.i.l.bf16 %v4328_v7 }
 0x6af   : > { %v1429_v33 = vsel %vm1427_vm13, %v1426_v35, %v4330_v5  ;;  %v2532_v3 = vsel %vm1427_vm13, %v2530_v39, %v4329_v15 }
 0x6b0   : > { %v3115_v19 = vrot.slane %v2532_v3, 6  ;;  %v3128_v17 = vsel %vm3105_vm14, %v1429_v33, %v3106_v26  ;;  %v4333_v52 = vpop.permute.xlu0 %4332 }
 0x6b1   : > { %v4335_v42 = vunpack.i.h.bf16 %v4333_v52  ;;  %v4334_v34 = vunpack.i.l.bf16 %v4333_v52 }
 0x6b2   : > { %v3129_v27 = vsel %vm3114_vm15, %v3107_v24, %v3115_v19 }
 0x6b3   : > { %v2533_v11 = vsel %vm1427_vm13, %v2531_v55, %v4335_v42  ;;  %v1428_v40 = vsel %vm1427_vm13, %v1425_v41, %v4334_v34  ;;  %v3132_v21 = vpack.c.bf16 %v3129_v27, %v3108_v45  ;;  %v4541_v42 = vld [vmem:[#allocation2 + $0x28] sm:$0xff] }
 0x6b4   : > { %v3116_v48 = vrot.slane %v2533_v11, 6  ;;  %v3131_v43 = vpack.c.bf16 %v3128_v17, %v1428_v40 }
 0x6b6   : > { %4222 = vmatprep.mubr.msk.bf16.mxu0 %vm669_vm2, %v3131_v43  ;;  %v3117_v61 = vsel %vm3114_vm15, %v3115_v19, %v3116_v48  ;;  %v4539_v19 = vld [vmem:[#allocation2 + $0x20] sm:$0xff] }
 0x6b7   : > { %4223 = vmatmul.mubr.msk.bf16.vlgmr.msra.gmra.mrb[60].mxu0 %vm669_vm2, %v3132_v21 }
 0x6be   : > { %v4338_v49 = vpop.permute.xlu1 %4337 }
 0x6bf   : > { %v4340_v6 = vunpack.i.h.bf16 %v4338_v49  ;;  %v4339_v60 = vunpack.i.l.bf16 %v4338_v49 }
 0x6c1   : > { %v3098_v38 = vsel %vm894_vm7, %v5452_v13, %v4340_v6  ;;  %v3097_v1 = vsel %vm894_vm7, %v5450_v2, %v4339_v60  ;;  %v3860_v2 = vld [vmem:[%s5688_s16] ss:$0 sm:$0xff] }
 0x6c6   : > { %v4343_v54 = vpop.permute.xlu0 %4342 }
 0x6c7   : > { %v4345_v62 = vunpack.i.h.bf16 %v4343_v54  ;;  %v4344_v63 = vunpack.i.l.bf16 %v4343_v54 }
 0x6c9   : > { %v3100_v29 = vsel %vm1424_vm12, %v3098_v38, %v4345_v62  ;;  %v3099_v37 = vsel %vm1424_vm12, %v3097_v1, %v4344_v63 }
 0x6ce   : > { %v4348_v22 = vpop.permute.xlu1 %4347 }
 0x6cf   : > { %v4350_v16 = vunpack.i.h.bf16 %v4348_v22  ;;  %v4349_v28 = vunpack.i.l.bf16 %v4348_v22 }
 0x6d1   : > { %v3102_v57 = vsel %vm1427_vm13, %v3100_v29, %v4350_v16  ;;  %v3101_v32 = vsel %vm1427_vm13, %v3099_v37, %v4349_v28 }
 0x6d2   : > { %v3123_v56 = vrot.slane %v3102_v57, 1  ;;  %v3122_v50 = vrot.slane %v3101_v32, 1 }
 0x6d4   : > { %v3124_v8 = vsel %vm975_vm9, %v3122_v50, %v3123_v56  ;;  %v3130_v13 = vsel %vm975_vm9, %v3117_v61, %v3122_v50  ;;  %v3134_v58 = vpack.c.bf16 %v3123_v56, %v3123_v56 }
 0x6d5   : > { %v3133_v20 = vpack.c.bf16 %v3124_v8, %v3130_v13 }
 0x6d7   : > { %4226 = vmatprep.mubr.msk.bf16.mxu0 %vm669_vm2, %v3133_v20 }
 0x6d8   : > { %4227 = vmatmul.mubr.msk.bf16.gmra.mrb[64].mxu0 %vm669_vm2, %v3134_v58 }
 0x78a   : > { %v4224_v4 = vpop.f32.mrb[60].mxu0 }
 0x78b   : > { %v3199_v47 = vpop.f32.mrb[61].mxu0  ;;  %v3208_v24 = vadd.f32 %v4224_v4, %v3860_v2 }
 0x78c   : > { %v3200_v26 = vadd.f32 %v3860_v2, %v3199_v47  ;;  %v4225_v45 = vpop.f32.mrb[62].mxu0 }
 0x78d   : > { %v3202_v14 = vpop.f32.mrb[63].mxu0  ;;  %v5506_v23 = vadd.f32 %v4536_v30, %v3208_v24  ;;  %v3211_v12 = vadd.f32 %v4225_v45, %v3860_v2  ;;  %v4356_v30 = vld [vmem:[%s4689_s3 + $0x8] sm:$0xff]  }
 0x78e   : > { %v5504_v9 = vadd.f32 %v4535_v10, %v3200_v26  ;;  %v3203_v36 = vadd.f32 %v3860_v2, %v3202_v14 }
 0x78f   : > { %v5514_v44 = vadd.f32 %v4538_v25, %v3211_v12  ;;  %v3242_v5 = vsel %vm669_vm2, %v5506_v23, 0.0  ;;  %v4357_v12 = vld [vmem:[%s4699_s14] sm:$0xff]  }
 0x790   : > { %v5508_v46 = vadd.f32 %v4537_v53, %v3203_v36  ;;  %v3236_v59 = vsel %vm669_vm2, %v5504_v9, 0.0  ;;  %v4355_v36 = vld [vmem:[%s4689_s3] sm:$0xff]   ;;  %v4358_v53 = vld [vmem:[%s4699_s14 + $0x8] sm:$0xff]   ;;  %4242 = vmatprep.subr.bf16.mxu0 %v4357_v12 }
 0x791   : > { %3237 = vadd.xlane.f32.xlu0 %v3236_v59  ;;  %v3245_v15 = vsel %vm669_vm2, %v5514_v44, 0.0  ;;  %4230 = vmatprep.subr.bf16.mxu1 %v4355_v36 }
 0x792   : > { %v3239_v7 = vsel %vm669_vm2, %v5508_v46, 0.0  ;;  %4231 = vmatpush3.bf16.msra.mxu1 %v4355_v36  ;;  %4243 = vmatpush3.bf16.msra.mxu0 %v4357_v12 }
 0x793   : > { %3240 = vadd.xlane.f32.xlu1 %v3239_v7  ;;  %4232 = vmatprep.subr.bf16.mxu1 %v4356_v30 }
 0x794   : > { %4244 = vmatprep.subr.bf16.mxu0 %v4358_v53 }
 0x795   : > { %3243 = vadd.xlane.f32.xlu0 %v3242_v5 }
 0x796   : > { %4233 = vmatpush3.bf16.msra.mxu1 %v4356_v30  ;;  %4245 = vmatpush3.bf16.msra.mxu0 %v4358_v53 }
 0x799   : > { %3246 = vadd.xlane.f32.xlu0 %v3245_v15 }
 0x7ab   : > { %v4228_v35 = vpop.f32.mrb[64].mxu0 }
 0x7ac   : > { %v3215_v39 = vpop.f32.mrb[65].mxu0  ;;  %v3224_v0 = vadd.f32 %v4228_v35, %v3860_v2 }
 0x7ad   : > { %v3216_v51 = vadd.f32 %v3860_v2, %v3215_v39  ;;  %v4229_v33 = vpop.f32.mrb[66].mxu0 }
 0x7ae   : > { %v3218_v3 = vpop.f32.mrb[67].mxu0  ;;  %v5522_v31 = vadd.f32 %v4540_v18, %v3224_v0  ;;  %v3867_v18 = vld [vmem:[%s578_s13] ss:$0 sm:$0xff] }
 0x7af   : > { %v5520_v17 = vadd.f32 %v4539_v19, %v3216_v51  ;;  %v3219_v52 = vadd.f32 %v3860_v2, %v3218_v3 }
 0x7b0   : > { %v3254_v27 = vsel %vm688_vm3, %v5522_v31, 0.0 }
 0x7b1   : > { %v5524_v34 = vadd.f32 %v4541_v42, %v3219_v52  ;;  %v3248_v55 = vsel %vm669_vm2, %v5520_v17, 0.0 }
 0x7b2   : > { %3249 = vadd.xlane.f32.xlu0 %v3248_v55 }
 0x7b3   : > { %v3251_v41 = vsel %vm669_vm2, %v5524_v34, 0.0 }
 0x7b4   : > { %3252 = vadd.xlane.f32.xlu1 %v3251_v41 }
 0x7b6   : > { %3255 = vadd.xlane.f32.xlu0 %v3254_v27 }
 0x81e   : > { %v3238_v11 = vpop.xlane.xlu0 %3237 }
 0x81f   : > { %v3257_v40 = vmul.f32 0.03125, %v3238_v11 }
 0x820   : > { %v3241_v21 = vpop.xlane.xlu1 %3240 }
 0x821   : > { %v5533_v48 = vsub.f32 %v5504_v9, %v3257_v40  ;;  %v3258_v43 = vmul.f32 0.03125, %v3241_v21  ;;  %v3868_v40 = vld [vmem:[%s581_s20] ss:$0 sm:$0xff] }
 0x822   : > { %v3244_v61 = vpop.xlane.xlu0 %3243 }
 0x823   : > { %v5536_v49 = vsub.f32 %v5508_v46, %v3258_v43  ;;  %v3259_v54 = vmul.f32 0.03125, %v3244_v61  ;;  %v3271_v6 = vmul.f32 %v5533_v48, %v5533_v48 }
 0x825   : > { %v5541_v60 = vsub.f32 %v5506_v23, %v3259_v54  ;;  %v3278_v62 = vsel %vm669_vm2, %v3271_v6, 0.0  ;;  %v3272_v63 = vmul.f32 %v5536_v49, %v5536_v49 }
 0x826   : > { %v3247_v22 = vpop.xlane.xlu0 %3246  ;;  %3279 = vadd.xlane.f32.xlu1 %v3278_v62 }
 0x827   : > { %v3260_v38 = vmul.f32 0.03125, %v3247_v22  ;;  %v3281_v1 = vsel %vm669_vm2, %v3272_v63, 0.0  ;;  %v3273_v16 = vmul.f32 %v5541_v60, %v5541_v60 }
 0x828   : > { %3282 = vadd.xlane.f32.xlu0 %v3281_v1 }
 0x829   : > { %v5550_v28 = vsub.f32 %v5514_v44, %v3260_v38  ;;  %v3284_v29 = vsel %vm669_vm2, %v3273_v16, 0.0 }
 0x82a   : > { %3285 = vadd.xlane.f32.xlu1 %v3284_v29 }
 0x82b   : > { %v3274_v37 = vmul.f32 %v5550_v28, %v5550_v28 }
 0x82d   : > { %v3287_v57 = vsel %vm669_vm2, %v3274_v37, 0.0 }
 0x82e   : > { %3288 = vadd.xlane.f32.xlu0 %v3287_v57 }
 0x83f   : > { %v3250_v32 = vpop.xlane.xlu0 %3249 }
 0x840   : > { %v3261_v56 = vmul.f32 0.03125, %v3250_v32 }
 0x841   : > { %v3253_v50 = vpop.xlane.xlu1 %3252 }
 0x842   : > { %v5557_v8 = vsub.f32 %v5520_v17, %v3261_v56  ;;  %v3262_v13 = vmul.f32 0.03125, %v3253_v50 }
 0x843   : > { %v3256_v20 = vpop.xlane.xlu0 %3255 }
 0x844   : > { %v5560_v58 = vsub.f32 %v5524_v34, %v3262_v13  ;;  %v3263_v2 = vmul.f32 0.03125, %v3256_v20  ;;  %v3275_v4 = vmul.f32 %v5557_v8, %v5557_v8 }
 0x846   : > { %v5565_v47 = vsub.f32 %v5522_v31, %v3263_v2  ;;  %v3290_v24 = vsel %vm669_vm2, %v3275_v4, 0.0  ;;  %v3276_v26 = vmul.f32 %v5560_v58, %v5560_v58 }
 0x847   : > { %3291 = vadd.xlane.f32.xlu1 %v3290_v24 }
 0x848   : > { %v3293_v45 = vsel %vm669_vm2, %v3276_v26, 0.0  ;;  %v3277_v14 = vmul.f32 %v5565_v47, %v5565_v47 }
 0x849   : > { %3294 = vadd.xlane.f32.xlu0 %v3293_v45 }
 0x84a   : > { %v3296_v10 = vsel %vm688_vm3, %v3277_v14, 0.0 }
 0x84b   : > { %3297 = vadd.xlane.f32.xlu1 %v3296_v10 }
 0x8b3   : > { %v3280_v59 = vpop.xlane.xlu1 %3279 }
 0x8b4   : > { %v3299_v7 = vmul.f32 0.03125, %v3280_v59  ;;  %v4361_v59 = vld [vmem:[%s4699_s14 + $0x20] sm:$0xff]  }
 0x8b5   : > { %v3283_v25 = vpop.xlane.xlu0 %3282 }
 0x8b6   : > { %v3306_v5 = vadd.f32 1e-05, %v3299_v7  ;;  %v3300_v15 = vmul.f32 0.03125, %v3283_v25  ;;  %v4362_v7 = vld [vmem:[%s4699_s14 + $0x28] sm:$0xff]   ;;  %v4363_v25 = vld [vmem:[%s4699_s14 + $0x30] sm:$0xff]  }
 0x8b7   : > { %v3286_v35 = vpop.xlane.xlu1 %3285 }
 0x8b8   : > { %4507 = vrsqrt.f32 %v3306_v5  ;;  %v3307_v39 = vadd.f32 1e-05, %v3300_v15  ;;  %v3301_v0 = vmul.f32 0.03125, %v3286_v35  ;;  %v4364_v5 = vld [vmem:[%s4699_s14 + $0x38] sm:$0xff]   ;;  %v3869_v15 = vld [vmem:[%s589_s5] ss:$0 sm:$0xff] }
 0x8ba   : > { %4509 = vrsqrt.f32 %v3307_v39  ;;  %v3308_v51 = vadd.f32 1e-05, %v3301_v0 }
 0x8bb   : > { %v3289_v33 = vpop.xlane.xlu0 %3288 }
 0x8bc   : > { %4511 = vrsqrt.f32 %v3308_v51  ;;  %v3302_v3 = vmul.f32 0.03125, %v3289_v33 }
 0x8be   : > { %v3309_v19 = vadd.f32 1e-05, %v3302_v3 }
 0x8c0   : > { %4513 = vrsqrt.f32 %v3309_v19 }
 0x8c2   : > { %v4508_v52 = vpop.eup %4507 }
 0x8c3   : > { %v3320_v42 = vmul.f32 %v4508_v52, %v5533_v48 }
 0x8c4   : > { %v4510_v55 = vpop.eup %4509 }
 0x8c5   : > { %v3321_v41 = vmul.f32 %v4510_v55, %v5536_v49  ;;  %v3333_v27 = vmul.f32 %v3867_v18, %v3320_v42 }
 0x8c6   : > { %v4512_v11 = vpop.eup %4511 }
 0x8c7   : > { %v3322_v21 = vmul.f32 %v4512_v11, %v5541_v60  ;;  %v3334_v43 = vmul.f32 %v3867_v18, %v3321_v41  ;;  %v3346_v61 = vadd.f32 %v3868_v40, %v3333_v27 }
 0x8c9   : > { %v3347_v54 = vadd.f32 %v3868_v40, %v3334_v43  ;;  %v3335_v62 = vmul.f32 %v3867_v18, %v3322_v21 }
 0x8ca   : > { %v4514_v6 = vpop.eup %4513 }
 0x8cb   : > { %v3323_v63 = vmul.f32 %v4514_v6, %v5550_v28  ;;  %v3353_v48 = vpack.c.bf16 %v3347_v54, %v3346_v61  ;;  %v3348_v49 = vadd.f32 %v3868_v40, %v3335_v62 }
 0x8cd   : > { %v3336_v22 = vmul.f32 %v3867_v18, %v3323_v63  ;;  %4234 = vmatprep.mubr.msk.bf16.mxu1 %vm669_vm2, %v3353_v48 }
 0x8cf   : > { %v3349_v38 = vadd.f32 %v3868_v40, %v3336_v22 }
 0x8d1   : > { %v3354_v1 = vpack.c.bf16 %v3349_v38, %v3348_v49 }
 0x8d3   : > { %4235 = vmatmul.mubr.msk.bf16.vlgmr.msra.gmra.mrb[76].mxu1 %vm669_vm2, %v3354_v1 }
 0x8d4   : > { %v3292_v16 = vpop.xlane.xlu1 %3291 }
 0x8d5   : > { %v3303_v29 = vmul.f32 0.03125, %v3292_v16 }
 0x8d6   : > { %v3295_v37 = vpop.xlane.xlu0 %3294 }
 0x8d7   : > { %v3310_v60 = vadd.f32 1e-05, %v3303_v29  ;;  %v3304_v57 = vmul.f32 0.03125, %v3295_v37 }
 0x8d8   : > { %v3298_v32 = vpop.xlane.xlu1 %3297 }
 0x8d9   : > { %4515 = vrsqrt.f32 %v3310_v60  ;;  %v3311_v56 = vadd.f32 1e-05, %v3304_v57  ;;  %v3305_v50 = vmul.f32 0.03125, %v3298_v32 }
 0x8db   : > { %4517 = vrsqrt.f32 %v3311_v56  ;;  %v3312_v28 = vadd.f32 1e-05, %v3305_v50 }
 0x8dd   : > { %4519 = vrsqrt.f32 %v3312_v28 }
 0x8e3   : > { %v4516_v13 = vpop.eup %4515 }
 0x8e4   : > { %v3324_v20 = vmul.f32 %v4516_v13, %v5557_v8 }
 0x8e5   : > { %v4518_v2 = vpop.eup %4517 }
 0x8e6   : > { %v3325_v4 = vmul.f32 %v4518_v2, %v5560_v58  ;;  %v3337_v24 = vmul.f32 %v3867_v18, %v3324_v20  ;;  %v4359_v58 = vld [vmem:[%s4699_s14 + $0x10] sm:$0xff]  }
 0x8e7   : > { %v4520_v26 = vpop.eup %4519  ;;  %4246 = vmatprep.subr.bf16.mxu0 %v4359_v58 }
 0x8e8   : > { %v3326_v45 = vmul.f32 %v4520_v26, %v5565_v47  ;;  %v3338_v14 = vmul.f32 %v3867_v18, %v3325_v4  ;;  %v3350_v10 = vadd.f32 %v3868_v40, %v3337_v24  ;;  %4247 = vmatpush3.bf16.msra.mxu0 %v4359_v58  ;;  %v4360_v47 = vld [vmem:[%s4699_s14 + $0x18] sm:$0xff]  }
 0x8e9   : > { %4248 = vmatprep.subr.bf16.mxu0 %v4360_v47 }
 0x8ea   : > { %v3351_v36 = vadd.f32 %v3868_v40, %v3338_v14  ;;  %v3339_v30 = vmul.f32 %v3867_v18, %v3326_v45 }
 0x8ec   : > { %v3355_v12 = vpack.c.bf16 %v3351_v36, %v3350_v10  ;;  %v3352_v53 = vadd.f32 %v3868_v40, %v3339_v30  ;;  %4249 = vmatpush3.bf16.msra.mxu0 %v4360_v47 }
 0x8ed   : > { %4250 = vmatprep.subr.bf16.mxu0 %v4361_v59 }
 0x8ee   : > { %4238 = vmatprep.mubr.msk.bf16.mxu1 %vm669_vm2, %v3355_v12  ;;  %v3356_v8 = vpack.c.bf16 %v3352_v53, %v3352_v53 }
 0x8f0   : > { %4239 = vmatmul.mubr.msk.bf16.gmra.mrb[80].mxu1 %vm669_vm2, %v3356_v8  ;;  %4251 = vmatpush3.bf16.msra.mxu0 %v4361_v59 }
 0x8f1   : > { %4252 = vmatprep.subr.bf16.mxu0 %v4362_v7 }
 0x8f4   : > { %4253 = vmatpush3.bf16.msra.mxu0 %v4362_v7 }
 0x8f5   : > { %4254 = vmatprep.subr.bf16.mxu0 %v4363_v25 }
 0x8f8   : > { %4255 = vmatpush3.bf16.msra.mxu0 %v4363_v25  ;;  %v3876_v25 = vld [vmem:[%s597_s18] ss:$0 sm:$0xff] }
 0x8f9   : > { %4256 = vmatprep.subr.bf16.mxu0 %v4364_v5 }
 0x8fc   : > { %4257 = vmatpush3.bf16.msra.mxu0 %v4364_v5 }
 0x9a6   : > { %v4236_v35 = vpop.f32.mrb[76].mxu1 }
 0x9a7   : > { %v3430_v39 = vadd.f32 %v4236_v35, %v3869_v15  ;;  %v3421_v0 = vpop.f32.mrb[77].mxu1 }
 0x9a8   : > { %v3422_v51 = vadd.f32 %v3869_v15, %v3421_v0  ;;  %v4237_v33 = vpop.f32.mrb[78].mxu1 }
 0x9a9   : > { %v3460_v3 = vmul.f32 0.70710677, %v3430_v39  ;;  %v3433_v19 = vadd.f32 %v4237_v33, %v3869_v15  ;;  %v3424_v52 = vpop.f32.mrb[79].mxu1  ;;  %v3453_v54 = vmul.f32 0.5, %v3430_v39 }
 0x9aa   : > { %v3458_v18 = vmul.f32 0.70710677, %v3422_v51  ;;  %v3425_v42 = vadd.f32 %v3869_v15, %v3424_v52  ;;  %v3451_v63 = vmul.f32 0.5, %v3422_v51 }
 0x9ab   : > { %4521 = verf.f32 %v3460_v3  ;;  %v3461_v55 = vmul.f32 0.70710677, %v3433_v19  ;;  %v3454_v6 = vmul.f32 0.5, %v3433_v19 }
 0x9ac   : > { %4523 = verf.f32 %v3458_v18  ;;  %v3459_v41 = vmul.f32 0.70710677, %v3425_v42  ;;  %v3452_v48 = vmul.f32 0.5, %v3425_v42 }
 0x9ad   : > { %4525 = verf.f32 %v3461_v55 }
 0x9ae   : > { %4527 = verf.f32 %v3459_v41 }
 0x9b5   : > { %v4522_v27 = vpop.eup %4521 }
 0x9b6   : > { %v4524_v11 = vpop.eup %4523  ;;  %v3474_v40 = vadd.f32 1.0, %v4522_v27 }
 0x9b7   : > { %v4526_v21 = vpop.eup %4525  ;;  %v3472_v43 = vadd.f32 1.0, %v4524_v11 }
 0x9b8   : > { %v4528_v61 = vpop.eup %4527  ;;  %v3475_v62 = vadd.f32 1.0, %v4526_v21  ;;  %v3481_v49 = vmul.f32 %v3474_v40, %v3453_v54 }
 0x9b9   : > { %v3473_v22 = vadd.f32 1.0, %v4528_v61  ;;  %v3479_v1 = vmul.f32 %v3472_v43, %v3451_v63 }
 0x9ba   : > { %v3482_v38 = vmul.f32 %v3475_v62, %v3454_v6 }
 0x9bb   : > { %v3480_v16 = vmul.f32 %v3473_v22, %v3452_v48 }
 0x9bc   : > { %v3487_v29 = vpack.c.bf16 %v3482_v38, %v3481_v49 }
 0x9bd   : > { %v3486_v37 = vpack.c.bf16 %v3480_v16, %v3479_v1 }
 0x9bf   : > { %4258 = vmatprep.mubr.bf16.mxu0 %v3486_v37 }
 0x9c0   : > { %4259 = vmatmul.mubr.bf16.vlgmr.msra.gmra.mrb[68].mxu0 %v3487_v29 }
 0x9c3   : > { %v4240_v60 = vpop.f32.mrb[80].mxu1 }
 0x9c4   : > { %v3446_v57 = vadd.f32 %v4240_v60, %v3869_v15  ;;  %v3437_v32 = vpop.f32.mrb[81].mxu1 }
 0x9c5   : > { %v3438_v56 = vadd.f32 %v3869_v15, %v3437_v32  ;;  %v4241_v50 = vpop.f32.mrb[82].mxu1 }
 0x9c6   : > { %v3464_v28 = vmul.f32 0.70710677, %v3446_v57  ;;  %v3440_v13 = vpop.f32.mrb[83].mxu1  ;;  %v3457_v36 = vmul.f32 0.5, %v3446_v57 }
 0x9c7   : > { %v3462_v20 = vmul.f32 0.70710677, %v3438_v56  ;;  %v3441_v2 = vadd.f32 %v3869_v15, %v3440_v13  ;;  %v3455_v30 = vmul.f32 0.5, %v3438_v56 }
 0x9c8   : > { %4529 = verf.f32 %v3464_v28 }
 0x9c9   : > { %4531 = verf.f32 %v3462_v20  ;;  %v3463_v4 = vmul.f32 0.70710677, %v3441_v2  ;;  %v3456_v12 = vmul.f32 0.5, %v3441_v2 }
 0x9cb   : > { %4533 = verf.f32 %v3463_v4 }
 0x9d2   : > { %v4530_v24 = vpop.eup %4529 }
 0x9d3   : > { %v4532_v26 = vpop.eup %4531  ;;  %v3478_v45 = vadd.f32 1.0, %v4530_v24 }
 0x9d4   : > { %v3476_v14 = vadd.f32 1.0, %v4532_v26 }
 0x9d5   : > { %v4534_v10 = vpop.eup %4533  ;;  %v3485_v8 = vmul.f32 %v3478_v45, %v3457_v36 }
 0x9d6   : > { %v3477_v53 = vadd.f32 1.0, %v4534_v10  ;;  %v3483_v58 = vmul.f32 %v3476_v14, %v3455_v30 }
 0x9d7   : > { %v3489_v7 = vpack.c.bf16 %v3485_v8, %v3485_v8 }
 0x9d8   : > { %v3484_v47 = vmul.f32 %v3477_v53, %v3456_v12 }
 0x9da   : > { %v3488_v59 = vpack.c.bf16 %v3484_v47, %v3483_v58 }
 0x9dc   : > { %4262 = vmatprep.mubr.bf16.mxu0 %v3488_v59 }
 0x9dd   : > { %4263 = vmatmul.mubr.bf16.gmra.mrb[72].mxu0 %v3489_v7 }
 0xa93   : > { %v4260_v5 = vpop.f32.mrb[68].mxu0 }
 0xa94   : > { %v3587_v15 = vadd.f32 %v4260_v5, %v3876_v25  ;;  %v3578_v35 = vpop.f32.mrb[69].mxu0 }
 0xa95   : > { %v3579_v39 = vadd.f32 %v3876_v25, %v3578_v35  ;;  %v4261_v0 = vpop.f32.mrb[70].mxu0 }
 0xa96   : > { %v3610_v51 = vadd.f32 %v3587_v15, %v5506_v23  ;;  %v3590_v33 = vadd.f32 %v4261_v0, %v3876_v25  ;;  %v3581_v3 = vpop.f32.mrb[71].mxu0 }
 0xa97   : > { %v3608_v19 = vadd.f32 %v3579_v39, %v5504_v9  ;;  %v3582_v52 = vadd.f32 %v3876_v25, %v3581_v3 }
 0xa98   : > { %3617 = vst.msk [vmem:[#allocation2 + $0x10] sm:$0xff] %vm669_vm2, %v3610_v51  ;;  %v3611_v18 = vadd.f32 %v3590_v33, %v5514_v44 }
 0xa99   : > { %3615 = vst.msk [vmem:[#allocation2] sm:$0xff] %vm669_vm2, %v3608_v19  ;;  %v3609_v42 = vadd.f32 %v3582_v52, %v5508_v46 }
 0xa9a   : > { %3618 = vst.msk [vmem:[#allocation2 + $0x18] sm:$0xff] %vm669_vm2, %v3611_v18 }
 0xa9b   : > { %3616 = vst.msk [vmem:[#allocation2 + $0x8] sm:$0xff] %vm669_vm2, %v3609_v42 }
 0xa9f   : > { %v3628_v54 = vld [vmem:[#allocation2 + $0x10] sm:$0xff] (!%p3885_p5) }
 0xaa0   : > { %v3626_v44 = vld [vmem:[#allocation2] sm:$0xff] (!%p3885_p5)  ;;  %v3901_v62 = vpack.c.bf16 (!%p3885_p5), %v3628_v54, %v3628_v54 }
 0xaa1   : > { %v3899_v6 = vpack.c.bf16 (!%p3885_p5), %v3626_v44, %v3626_v44  ;;  %v3629_v63 = vld [vmem:[#allocation2 + $0x18] sm:$0xff] (!%p3885_p5) }
 0xaa2   : > { %v3627_v61 = vld [vmem:[#allocation2 + $0x8] sm:$0xff] (!%p3885_p5)  ;;  %v3902_v22 = vpack.c.bf16 (!%p3885_p5), %v3629_v63, %v3629_v63  ;;  %3664 = vst.msk [vmem:[%s5689_s21 + $0x8] sm:$0xf] (!%p3885_p5), %vm688_vm3, %v3901_v62 }
 0xaa3   : > { %3662 = vst.msk [vmem:[%s5689_s21] sm:$0xf] (!%p3885_p5), %vm688_vm3, %v3899_v6 }
 0xaa4   : > { %3665 = vst.msk [vmem:[%s5689_s21 + $0xc] sm:$0xf] (!%p3885_p5), %vm688_vm3, %v3902_v22 }
 0xab0   : > { %v4264_v55 = vpop.f32.mrb[72].mxu0 }
 0xab1   : > { %v3603_v41 = vadd.f32 %v4264_v55, %v3876_v25  ;;  %v3594_v23 = vpop.f32.mrb[73].mxu0 }
 0xab2   : > { %v3595_v27 = vadd.f32 %v3876_v25, %v3594_v23  ;;  %v4265_v11 = vpop.f32.mrb[74].mxu0  ;;  %3625 = sbr.rel (%p3885_p5) target bundleno = 2755 (0xac3), region = 80 }
 0xab3   : > { %v3614_v9 = vadd.f32 %v3603_v41, %v5522_v31  ;;  %v3597_v40 = vpop.f32.mrb[75].mxu0  ;;  %v3900_v31 = vpack.c.bf16 (!%p3885_p5), %v3627_v61, %v3627_v61 }
 0xab4   : > { %v3612_v21 = vadd.f32 %v3595_v27, %v5520_v17  ;;  %v3598_v43 = vadd.f32 %v3876_v25, %v3597_v40 }
 0xab5   : > { %3621 = vst.msk [vmem:[#allocation2 + $0x30] sm:$0xf] %vm688_vm3, %v3614_v9  ;;  %3663 = vst.msk [vmem:[%s5689_s21 + $0x4] sm:$0xf] (!%p3885_p5), %vm688_vm3, %v3900_v31 }
 0xab6   : > { %3619 = vst.msk [vmem:[#allocation2 + $0x20] sm:$0xff] %vm669_vm2, %v3612_v21  ;;  %v3613_v46 = vadd.f32 %v3598_v43, %v5524_v34 }
 0xab8   : > { %3620 = vst.msk [vmem:[#allocation2 + $0x28] sm:$0xff] %vm669_vm2, %v3613_v46 }
 0xabc   : > { %v3632_v1 = vld [vmem:[#allocation2 + $0x30] sm:$0xf] }
 0xabd   : > { %v3630_v17 = vld [vmem:[#allocation2 + $0x20] sm:$0xff]  ;;  %v3905_v34 = vpack.c.bf16 %v3632_v1, %v3632_v1 }
 0xabe   : > { %v3903_v49 = vpack.c.bf16 %v3630_v17, %v3630_v17 }
 0xabf   : > { %v3631_v48 = vld [vmem:[#allocation2 + $0x28] sm:$0xff]  ;;  %3669 = vst.msk [vmem:[%s5689_s21 + $0x18] sm:$0x3] %vm3668_vm0, %v3905_v34 }
 0xac0   : > { %v3904_v38 = vpack.c.bf16 %v3631_v48, %v3631_v48  ;;  %3666 = vst.msk [vmem:[%s5689_s21 + $0x10] sm:$0xf] %vm688_vm3, %v3903_v49 }
 0xac2   : > { %3667 = vst.msk [vmem:[%s5689_s21 + $0x14] sm:$0xf] %vm688_vm3, %v3904_v38 }
 0xac3 PF: > { %s5690_s17 = sld [smem:[#allocation3_spill]] }
 0xac9   : > { %s23_s25 = sadd.s32 1, %s5690_s17  }
 0xaca   : > { %p20_p6 = scmp.ge.s32.totalorder %s23_s25, 4  }
 0xacc   :  { %22 = sbr.rel (!%p20_p6) target bundleno = 4 (0x4), region = 139 }

// kernel: cavmae_forward.11
= control target key start
LH: loop header
LB: loop body
LE: loop exit
PB: predicated region body
PF: predicated region fallthrough
CT: control target
= control target key end

     0   :  { %vm46_vm0 = vcmask 261120   ;;  %s603_s0 = inlined_call_operand.vmem [shape: bf16[2,30,32], index: 0, kind: input, shape index: {}]   ;;  %s604_s1 = inlined_call_operand.vmem [shape: f32[1,32], index: 1, kind: input, shape index: {}]   ;;  %s605_s2 = inlined_call_operand.vmem [shape: f32[1,32], index: 2, kind: input, shape index: {}]   ;;  %s606_s3 = inlined_call_operand.vmem [shape: f32[1,32], index: 3, kind: input, shape index: {}]   ;;  %s607_s4 = inlined_call_operand.vmem [shape: f32[1,32], index: 4, kind: input, shape index: {}]   ;;  %s608_s5 = inlined_call_operand.vmem [shape: bf16[32,128], index: 5, kind: input, shape index: {}]   ;;  %s609_s6 = inlined_call_operand.vmem [shape: f32[1,128], index: 6, kind: input, shape index: {}]   ;;  %s610_s7 = inlined_call_operand.hbm [shape: f32[2,128], index: 7, kind: output, shape index: {}]  }
   0x1   :  { %v374_v0 = vld [vmem:[%s603_s0] sm:$0xff]   ;;  %v381_v1 = vld [vmem:[%s603_s0 + $0x10] sm:$0xff]   ;;  %v30_v6 = vld [vmem:[%s603_s0 + $0x8] ss:$16 sps:$4 sm:$0xff]  }
   0x2   :  { %v375_v2 = vunpack.c.l.bf16 %v374_v0  ;;  %v379_v3 = vunpack.c.l.bf16 %v381_v1  ;;  %v376_v4 = vunpack.c.h.bf16 %v374_v0  ;;  %v380_v5 = vunpack.c.h.bf16 %v381_v1 }
   0x4   :  { %v47_v7 = vsel %vm46_vm0, %v375_v2, 0.0  ;;  %v60_v8 = vsel %vm46_vm0, %v379_v3, 0.0 }
   0x5   :  { %12 = vsyncpa [#allocation3], 0  ;;  %48 = vadd.xlane.f32.xlu0 %v47_v7  ;;  %61 = vadd.xlane.f32.xlu1 %v60_v8  ;;  %v50_v9 = vsel %vm46_vm0, %v376_v4, 0.0  ;;  %v63_v10 = vsel %vm46_vm0, %v380_v5, 0.0  ;;  %v38_v11 = vunpack.c.l.bf16 %v30_v6  ;;  %v42_v12 = vunpack.c.h.bf16 %v30_v6  ;;  %v31_v13 = vld [vmem:[%s603_s0 + $0xc] sm:$0x7] }
   0x6   :  { %v35_v14 = vld [vmem:[%s603_s0 + $0x1c] sm:$0x7]  ;;  %v39_v17 = vunpack.c.l.bf16 %v31_v13  ;;  %vm56_vm1 = vcmask 259072   ;;  %vm214_vm2 = vcmask 1041409   ;;  %vm217_vm3 = vcmask 254976  }
   0x7   :  { %v53_v15 = vsel %vm46_vm0, %v38_v11, 0.0  ;;  %v66_v16 = vsel %vm46_vm0, %v42_v12, 0.0  ;;  %v43_v18 = vunpack.c.l.bf16 %v35_v14  ;;  %vm445_vm4 = vmmov 0  }
   0x8   :  { %v57_v19 = vsel %vm56_vm1, %v39_v17, 0.0  ;;  %vm338_vm5 = vcmask 1041408  }
   0x9   :  { %51 = vadd.xlane.f32.xlu0 %v50_v9  ;;  %64 = vadd.xlane.f32.xlu1 %v63_v10  ;;  %v69_v20 = vsel %vm56_vm1, %v43_v18, 0.0 }
   0xd   :  { %54 = vadd.xlane.f32.xlu0 %v53_v15  ;;  %67 = vadd.xlane.f32.xlu1 %v66_v16 }
  0x11   :  { %58 = vadd.xlane.f32.xlu0 %v57_v19  ;;  %70 = vadd.xlane.f32.xlu1 %v69_v20 }
  0x92   :  { %v49_v21 = vpop.xlane.xlu0 %48  ;;  %v62_v22 = vpop.xlane.xlu1 %61 }
  0x93   :  { %v73_v23 = vmul.f32 0.03125, %v49_v21  ;;  %v77_v24 = vmul.f32 0.03125, %v62_v22 }
  0x95   :  { %v510_v25 = vsub.f32 %v375_v2, %v73_v23  ;;  %v512_v26 = vsub.f32 %v379_v3, %v77_v24 }
  0x96   :  { %v52_v27 = vpop.xlane.xlu0 %51  ;;  %v65_v28 = vpop.xlane.xlu1 %64 }
  0x97   :  { %v74_v29 = vmul.f32 0.03125, %v52_v27  ;;  %v78_v30 = vmul.f32 0.03125, %v65_v28  ;;  %v89_v31 = vmul.f32 %v510_v25, %v510_v25  ;;  %v93_v32 = vmul.f32 %v512_v26, %v512_v26  ;;  %v365_v27 = vld [vmem:[%s604_s1] ss:$0 sm:$0xff] }
  0x99   :  { %v518_v33 = vsub.f32 %v376_v4, %v74_v29  ;;  %v520_v34 = vsub.f32 %v380_v5, %v78_v30  ;;  %v97_v35 = vsel %vm46_vm0, %v89_v31, 0.0  ;;  %v109_v38 = vsel %vm46_vm0, %v93_v32, 0.0 }
  0x9a   :  { %98 = vadd.xlane.f32.xlu0 %v97_v35  ;;  %v55_v36 = vpop.xlane.xlu0 %54  ;;  %v68_v37 = vpop.xlane.xlu1 %67 }
  0x9b   :  { %v75_v39 = vmul.f32 0.03125, %v55_v36  ;;  %v79_v40 = vmul.f32 0.03125, %v68_v37  ;;  %v90_v41 = vmul.f32 %v518_v33, %v518_v33  ;;  %v94_v42 = vmul.f32 %v520_v34, %v520_v34  ;;  %v366_v36 = vld [vmem:[%s605_s2] ss:$0 sm:$0xff] }
  0x9d   :  { %v528_v43 = vsub.f32 %v38_v11, %v75_v39  ;;  %v530_v44 = vsub.f32 %v42_v12, %v79_v40  ;;  %v100_v45 = vsel %vm46_vm0, %v90_v41, 0.0  ;;  %v112_v48 = vsel %vm46_vm0, %v94_v42, 0.0 }
  0x9e   :  { %110 = vadd.xlane.f32.xlu0 %v109_v38  ;;  %101 = vadd.xlane.f32.xlu1 %v100_v45  ;;  %v59_v46 = vpop.xlane.xlu0 %58  ;;  %v71_v47 = vpop.xlane.xlu1 %70 }
  0x9f   :  { %v76_v49 = vmul.f32 0.03125, %v59_v46  ;;  %v80_v50 = vmul.f32 0.03125, %v71_v47  ;;  %v91_v51 = vmul.f32 %v528_v43, %v528_v43  ;;  %v95_v52 = vmul.f32 %v530_v44, %v530_v44 }
  0xa1   :  { %v538_v53 = vsub.f32 %v39_v17, %v76_v49  ;;  %v540_v54 = vsub.f32 %v43_v18, %v80_v50  ;;  %v103_v55 = vsel %vm46_vm0, %v91_v51, 0.0  ;;  %v115_v56 = vsel %vm46_vm0, %v95_v52, 0.0 }
  0xa2   :  { %113 = vadd.xlane.f32.xlu1 %v112_v48  ;;  %104 = vadd.xlane.f32.xlu0 %v103_v55 }
  0xa3   :  { %v92_v57 = vmul.f32 %v538_v53, %v538_v53  ;;  %v96_v58 = vmul.f32 %v540_v54, %v540_v54 }
  0xa5   :  { %v106_v59 = vsel %vm56_vm1, %v92_v57, 0.0  ;;  %v118_v60 = vsel %vm56_vm1, %v96_v58, 0.0 }
  0xa6   :  { %116 = vadd.xlane.f32.xlu1 %v115_v56  ;;  %107 = vadd.xlane.f32.xlu0 %v106_v59 }
  0xaa   :  { %119 = vadd.xlane.f32.xlu1 %v118_v60 }
 0x127   :  { %v99_v61 = vpop.xlane.xlu0 %98 }
 0x128   :  { %v121_v62 = vmul.f32 0.03125, %v99_v61 }
 0x12a   :  { %v129_v63 = vadd.f32 1e-05, %v121_v62 }
 0x12b   :  { %v102_v0 = vpop.xlane.xlu1 %101  ;;  %v111_v1 = vpop.xlane.xlu0 %110 }
 0x12c   :  { %v122_v2 = vmul.f32 0.03125, %v102_v0  ;;  %v125_v3 = vmul.f32 0.03125, %v111_v1  ;;  %398 = vrsqrt.f32 %v129_v63 }
 0x12e   :  { %v130_v4 = vadd.f32 1e-05, %v122_v2  ;;  %v133_v5 = vadd.f32 1e-05, %v125_v3 }
 0x12f   :  { %v114_v6 = vpop.xlane.xlu1 %113  ;;  %v105_v7 = vpop.xlane.xlu0 %104 }
 0x130   :  { %400 = vrsqrt.f32 %v130_v4  ;;  %v126_v8 = vmul.f32 0.03125, %v114_v6  ;;  %v123_v9 = vmul.f32 0.03125, %v105_v7 }
 0x131   :  { %402 = vrsqrt.f32 %v133_v5 }
 0x132   :  { %v134_v10 = vadd.f32 1e-05, %v126_v8  ;;  %v131_v11 = vadd.f32 1e-05, %v123_v9 }
 0x133   :  { %v117_v12 = vpop.xlane.xlu1 %116  ;;  %v108_v13 = vpop.xlane.xlu0 %107 }
 0x134   :  { %404 = vrsqrt.f32 %v134_v10  ;;  %v127_v14 = vmul.f32 0.03125, %v117_v12  ;;  %v124_v15 = vmul.f32 0.03125, %v108_v13 }
 0x135   :  { %406 = vrsqrt.f32 %v131_v11 }
 0x136   :  { %v135_v16 = vadd.f32 1e-05, %v127_v14  ;;  %v132_v17 = vadd.f32 1e-05, %v124_v15  ;;  %v399_v18 = vpop.eup %398 }
 0x137   :  { %v120_v19 = vpop.xlane.xlu1 %119  ;;  %v145_v22 = vmul.f32 %v399_v18, %v510_v25 }
 0x138   :  { %408 = vrsqrt.f32 %v135_v16  ;;  %v128_v20 = vmul.f32 0.03125, %v120_v19 }
 0x139   :  { %410 = vrsqrt.f32 %v132_v17  ;;  %v159_v32 = vmul.f32 %v365_v27, %v145_v22 }
 0x13a   :  { %v401_v21 = vpop.eup %400  ;;  %v136_v23 = vadd.f32 1e-05, %v128_v20 }
 0x13b   :  { %v403_v24 = vpop.eup %402  ;;  %v146_v28 = vmul.f32 %v401_v21, %v518_v33  ;;  %v173_v33 = vadd.f32 %v366_v36, %v159_v32 }
 0x13c   :  { %412 = vrsqrt.f32 %v136_v23  ;;  %v149_v30 = vmul.f32 %v403_v24, %v512_v26 }
 0x13d   :  { %v160_v29 = vmul.f32 %v365_v27, %v146_v28 }
 0x13e   :  { %v405_v31 = vpop.eup %404  ;;  %v163_v39 = vmul.f32 %v365_v27, %v149_v30 }
 0x13f   :  { %v407_v35 = vpop.eup %406  ;;  %v150_v25 = vmul.f32 %v405_v31, %v520_v34  ;;  %v174_v37 = vadd.f32 %v366_v36, %v160_v29 }
 0x140   :  { %v147_v38 = vmul.f32 %v407_v35, %v528_v43  ;;  %v177_v50 = vadd.f32 %v366_v36, %v163_v39  ;;  %v181_v43 = vsel %vm46_vm0, %v173_v33, 0.0  ;;  %v396_v35 = vld [vmem:[%s608_s5] sm:$0xff]  }
 0x141   :  { %v164_v40 = vmul.f32 %v365_v27, %v150_v25  ;;  %v182_v49 = vsel %vm46_vm0, %v174_v37, 0.0  ;;  %v397_v25 = vld [vmem:[%s608_s5 + $0x8] sm:$0xff]  }
 0x142   :  { %v409_v41 = vpop.eup %408  ;;  %v161_v42 = vmul.f32 %v365_v27, %v147_v38  ;;  %v183_v58 = vadd.f32 %v182_v49, %v181_v43 }
 0x143   :  { %v411_v45 = vpop.eup %410  ;;  %v178_v46 = vadd.f32 %v366_v36, %v164_v40  ;;  %v151_v26 = vmul.f32 %v409_v41, %v530_v44  ;;  %v367_v41 = vld [vmem:[%s606_s3] ss:$0 sm:$0xff] }
 0x144   :  { %v175_v47 = vadd.f32 %v366_v36, %v161_v42  ;;  %v148_v48 = vmul.f32 %v411_v45, %v538_v53  ;;  %v194_v53 = vsel %vm46_vm0, %v177_v50, 0.0  ;;  %v368_v45 = vld [vmem:[%s607_s4] ss:$0 sm:$0xff]  ;;  %s446_s4 = smov [#allocation2]  }
 0x145   :  { %v165_v51 = vmul.f32 %v365_v27, %v151_v26  ;;  %v195_v59 = vsel %vm46_vm0, %v178_v46, 0.0  ;;  %s357_s20 = sshll.u32 %s446_s4, 4  ;;  %s358_s20 = int_to_ptr.vmem [resolvable:$true] %s357_s20 }
 0x146   :  { %v413_v34 = vpop.eup %412  ;;  %v162_v52 = vmul.f32 %v365_v27, %v148_v48  ;;  %v184_v55 = vsel %vm46_vm0, %v175_v47, 0.0  ;;  %v196_v0 = vadd.f32 %v195_v59, %v194_v53  ;;  %p425_p1 = scmp.lt.s32.totalorder %s358_s20, %s358_s20 }
 0x147   :  { %v179_v56 = vadd.f32 %v366_v36, %v165_v51  ;;  %v152_v57 = vmul.f32 %v413_v34, %v540_v54  ;;  %v185_v61 = vadd.f32 %v184_v55, %v183_v58 }
 0x148   :  { %v176_v44 = vadd.f32 %v366_v36, %v162_v52 }
 0x149   :  { %v166_v60 = vmul.f32 %v365_v27, %v152_v57  ;;  %v197_v62 = vsel %vm46_vm0, %v179_v56, 0.0  ;;  %v369_v57 = vld [vmem:[%s609_s6] ss:$0 sm:$0xff]  ;;  %s420_s6 = scalar_lea.vmem %s358_s20, 32 }
 0x14a   :  { %v186_v63 = vsel %vm56_vm1, %v176_v44, 0.0  ;;  %v198_v3 = vadd.f32 %v197_v62, %v196_v0  ;;  %p421_p0 = scmp.ne.s32.totalorder %s358_s20, %s420_s6  ;;  %p426_p2 = scmp.lt.s32.totalorder %s420_s6, %s420_s6 }
 0x14b   :  { %v180_v1 = vadd.f32 %v366_v36, %v166_v60  ;;  %v187_v2 = vadd.f32 %v186_v63, %v185_v61  ;;  %v444_v36 = vmov 0.0  }
 0x14c   :  { %385 = vmatprep.subr.bf16.mxu0 %v444_v36  ;;  %389 = vmatprep.mubr.msk.bf16.mxu0 %vm445_vm4, %v444_v36  ;;  %p427_p3 = por %p426_p2, %p425_p1 }
 0x14d   :  { %v188_v4 = vrot.slane %v187_v2, 4  ;;  %v199_v5 = vsel %vm56_vm1, %v180_v1, 0.0  ;;  %386 = vmatpush3.bf16.msra.mxu0 %v396_v35 }
 0x14e   :  { %v200_v54 = vadd.f32 %v199_v5, %v198_v3  ;;  %387 = vmatprep.subr.bf16.mxu0 %v444_v36  ;;  %p428_p4 = pnand %p427_p3, %p421_p0 }
 0x14f   :  { %v189_v6 = vadd.f32 %v188_v4, %v187_v2 }
 0x150   :  { %v201_v7 = vrot.slane %v200_v54, 4 }
 0x151   :  { %v190_v8 = vrot.slane %v189_v6, 2  ;;  %388 = vmatpush3.bf16.msra.mxu0 %v397_v25 }
 0x152   :  { %v202_v9 = vadd.f32 %v201_v7, %v200_v54 }
 0x153   :  { %v191_v10 = vadd.f32 %v190_v8, %v189_v6 }
 0x154   :  { %v203_v11 = vrot.slane %v202_v9, 2 }
 0x155   :  { %v192_v12 = vrot.slane %v191_v10, 1 }
 0x156   :  { %v204_v13 = vadd.f32 %v203_v11, %v202_v9 }
 0x157   :  { %v193_v14 = vadd.f32 %v192_v12, %v191_v10 }
 0x158   :  { %v205_v15 = vrot.slane %v204_v13, 1 }
 0x159   :  { %v208_v17 = vmul.f32 0.033333335, %v193_v14 }
 0x15a   :  { %v206_v16 = vadd.f32 %v205_v15, %v204_v13 }
 0x15c   :  { %v209_v18 = vmul.f32 0.033333335, %v206_v16 }
 0x15e   :  { %v215_v19 = vsel %vm214_vm2, %v209_v18, %v208_v17 }
 0x15f   :  { %v218_v20 = vsel %vm217_vm3, %v215_v19, 0.0 }
 0x160   :  { %219 = vadd.xlane.f32.xlu0 %v218_v20 }
 0x1ed   :  { %v220_v21 = vpop.xlane.xlu0 %219 }
 0x1ee   :  { %v221_v22 = vmul.f32 0.03125, %v220_v21 }
 0x1f0   :  { %v223_v23 = vrot.slane %v221_v22, 1  ;;  %v226_v24 = vsub.f32 %v208_v17, %v221_v22 }
 0x1f2   :  { %v227_v27 = vsub.f32 %v209_v18, %v223_v23  ;;  %v228_v29 = vmul.f32 %v226_v24, %v226_v24 }
 0x1f4   :  { %v229_v28 = vmul.f32 %v227_v27, %v227_v27 }
 0x1f6   :  { %v232_v30 = vrot.slane %v229_v28, 7 }
 0x1f8   :  { %v233_v31 = vsel %vm214_vm2, %v232_v30, %v228_v29 }
 0x1f9   :  { %v235_v32 = vsel %vm217_vm3, %v233_v31, 0.0 }
 0x1fa   :  { %236 = vadd.xlane.f32.xlu1 %v235_v32 }
 0x287   :  { %v237_v37 = vpop.xlane.xlu1 %236 }
 0x288   :  { %v238_v38 = vmul.f32 0.03125, %v237_v37 }
 0x28a   :  { %v239_v39 = vadd.f32 1e-05, %v238_v38 }
 0x28c   :  { %414 = vrsqrt.f32 %v239_v39 }
 0x296   :  { %v415_v40 = vpop.eup %414 }
 0x297   :  { %v242_v33 = vrot.slane %v415_v40, 1  ;;  %v245_v42 = vmul.f32 %v415_v40, %v226_v24 }
 0x299   :  { %v246_v46 = vmul.f32 %v242_v33, %v227_v27  ;;  %v253_v26 = vmul.f32 %v367_v41, %v245_v42 }
 0x29b   :  { %v254_v47 = vmul.f32 %v367_v41, %v246_v46  ;;  %v261_v48 = vadd.f32 %v368_v45, %v253_v26 }
 0x29d   :  { %v262_v49 = vadd.f32 %v368_v45, %v254_v47  ;;  %v263_v50 = vpack.c.bf16 %v261_v48, %v261_v48 }
 0x29f   :  { %v264_v51 = vpack.c.bf16 %v262_v49, %v262_v49  ;;  %v278_v52 = vunpack.c.l.b16 %v263_v50 }
 0x2a1   :  { %v279_v34 = vunpack.c.l.b16 %v264_v51 }
 0x2a3   :  { %v280_v43 = vrot.slane %v279_v34, 7 }
 0x2a5   :  { %v281_v55 = vsel %vm214_vm2, %v280_v43, %v278_v52 }
 0x2a6   :  { %v282_v56 = vpack.c.b16 %v281_v55, %v281_v55 }
 0x2a8   :  { %390 = vmatmul.mubr.msk.bf16.vlgmr.msra.gmra.mrb[0].mxu0 %vm46_vm0, %v282_v56 }
 0x37b   :  { %v332_v58 = vpop.f32.mrb[0].mxu0 }
 0x37c   :  { %v333_v59 = vadd.f32 %v369_v57, %v332_v58  ;;  %v391_v44 = vpop.f32.mrb[1].mxu0 }
 0x37d   :  { %v335_v60 = vpop.f32.mrb[2].mxu0 }
 0x37e   :  { %v392_v61 = vpop.f32.mrb[3].mxu0  ;;  %v339_v53 = vsel %vm338_vm5, %v333_v59, -inf }
 0x37f   :  { %340 = vmax.xlane.f32.xlu0 %v339_v53 }
 0x40c   :  { %v341_v62 = vpop.xlane.xlu0 %340 }
 0x40d   :  { %v342_v63 = vsub.f32 %v333_v59, %v341_v62 }
 0x40f   :  { %v343_v0 = vmul.f32 1.442695, %v342_v63 }
 0x411   :  { %416 = vpow2.f32 %v343_v0 }
 0x41b   :  { %v417_v1 = vpop.eup %416 }
 0x41c   :  { %v345_v2 = vsel %vm338_vm5, %v417_v1, 0.0 }
 0x41d   :  { %346 = vadd.xlane.f32.xlu1 %v345_v2 }
 0x4aa   :  { %v347_v3 = vpop.xlane.xlu1 %346 }
 0x4ab   :  { %418 = vrcp.f32 %v347_v3 }
 0x4b5   :  { %v419_v4 = vpop.eup %418 }
 0x4b6   :  { %v349_v5 = vmul.f32 %v419_v4, %v417_v1 }
 0x4b8   :  { %350 = vst [vmem:[#allocation2] sm:$0x3] %v349_v5 }
 0x4b9   :  { %431 = shalt.err (!%p428_p4)
}
 0x4ba   :  { %s432_s23 = scalar_lea.hbm %s610_s7, 32 }
 0x4bb   :  { %p433_p5 = scmp.ne.s32.totalorder %s610_s7, %s432_s23  ;;  %p436_p6 = scmp.lt.u32.totalorder %s432_s23, %s610_s7 }
 0x4bd   :  { %p438_p7 = pnand %p436_p6, %p433_p5 }
 0x4bf   :  { %441 = shalt.err (!%p438_p7)
}
 0x4c0   :  { %360 = dma.vmem_to_hbm [thread:$0]  %s358_s20, 32, %s610_s7, [#allocation3]  }
 0x4c1   :  { %442 = dma.done.wait [#allocation3], 32  }
 0x4c2   :  { %443 = vsyncadd [#allocation3], 4294967264 }
 0x4c3   :  { %364 = vsyncpa [#allocation3], 1 }

// kernel: cavmae_forward.8
= control target key start
LH: loop header
LB: loop body
LE: loop exit
PB: predicated region body
PF: predicated region fallthrough
CT: control target
= control target key end

     0   :  { %s3621_s25 = smov 0   ;;  %s4281_s0 = inlined_call_operand.vmem [shape: bf16[34,32], index: 0, kind: input, shape index: {}, may-alias: {0,13}]   ;;  %s4282_s1 = inlined_call_operand.vmem [shape: f32[2,1,32], index: 1, kind: input, shape index: {}]   ;;  %s4283_s2 = inlined_call_operand.vmem [shape: f32[2,1,32], index: 2, kind: input, shape index: {}]   ;;  %s4284_s3 = inlined_call_operand.vmem [shape: bf16[2,32,96], index: 3, kind: input, shape index: {}]   ;;  %s4285_s4 = inlined_call_operand.vmem [shape: f32[2,1,96], index: 4, kind: input, shape index: {}]   ;;  %s4286_s5 = inlined_call_operand.vmem [shape: bf16[2,32,32], index: 5, kind: input, shape index: {}]   ;;  %s4287_s6 = inlined_call_operand.vmem [shape: f32[2,1,32], index: 6, kind: input, shape index: {}]   ;;  %s4288_s7 = inlined_call_operand.vmem [shape: f32[2,1,32], index: 7, kind: input, shape index: {}]   ;;  %s4289_s8 = inlined_call_operand.vmem [shape: f32[2,1,32], index: 8, kind: input, shape index: {}]   ;;  %s4290_s9 = inlined_call_operand.vmem [shape: bf16[2,32,128], index: 9, kind: input, shape index: {}]   ;;  %s4291_s10 = inlined_call_operand.vmem [shape: f32[2,1,128], index: 10, kind: input, shape index: {}]   ;;  %s4292_s11 = inlined_call_operand.vmem [shape: bf16[2,128,32], index: 11, kind: input, shape index: {}]   ;;  %s4293_s12 = inlined_call_operand.vmem [shape: f32[2,1,32], index: 12, kind: input, shape index: {}]   ;;  %s4294_s13 = inlined_call_operand.vmem [shape: bf16[34,32], index: 13, kind: output, shape index: {}, may-alias: {0,13}]  }
   0x1   :  { %4298 = sst [smem:[#allocation5_spill]] %s4284_s3 }
   0x2   :  { %4299 = sst [smem:[#allocation6_spill]] %s4286_s5 }
   0x3   :  { %4300 = sst [smem:[#allocation7_spill]] %s4294_s13 }
   0x4 LB: > { %4301 = sst [smem:[#allocation3_spill]] %s3532_s25  ;;  %s3627_s26 = sadd.s32 4294967295, %s3532_s25   ;;  %s3532_s25 = sphi %s3621_s25, %s23_s25  }
   0x5   : > { %p2917_p0 = scmp.ge.s32.totalorder %s3532_s25, 1  ;;  %p476_p1 = scmp.lt.s32.totalorder %s3532_s25, 3 }
   0x7   : > { %p477_p2 = pnand %p2917_p0, %p476_p1 }
   0x9   : > { %480 = sbr.rel (%p477_p2) target bundleno = 5372 (0x14fc), region = 72 }
  0x10   : > { %p554_p3 = scmp.lt.s32.totalorder %s3627_s26, 1  ;;  %s4302_s3 = sld [smem:[#allocation5_spill]] }
  0x11   : > { %s4303_s5 = sld [smem:[#allocation6_spill]]  ;;  %p2926_p4 = scmp.ne.s32.totalorder %s3627_s26, 0 }
  0x12   : > { %s3633_s27 = scalar_select %p554_p3, %s3627_s26, 1 }
  0x13   : > { %602 = sbr.rel (%p2926_p4) target bundleno = 26 (0x1a), region = 76  ;;  %v3008_v0 = vld [vmem:[%s4281_s0] sm:$0xff] (!%p2926_p4)   ;;  %vm613_vm0 = vcmask (!%p2926_p4), 261120   ;;  %v3015_v1 = vld [vmem:[%s4281_s0 + $0x8] sm:$0xff] (!%p2926_p4)   ;;  %v607_v2 = vld [vmem:[%s4281_s0 + $0x10] sm:$0x1] (!%p2926_p4) }
  0x14   : > { %s2998_s17 = sshll.u32 %s3633_s27, 4  ;;  %s578_s13 = scalar_lea.vmem %s4288_s7, %s3633_s27  ;;  %vm618_vm1 = vcmask (!%p2926_p4), 254976   ;;  %v3009_v3 = vunpack.c.l.bf16 (!%p2926_p4), %v3008_v0  ;;  %v3010_v4 = vunpack.c.h.bf16 (!%p2926_p4), %v3008_v0  ;;  %v3013_v5 = vunpack.c.l.bf16 (!%p2926_p4), %v3015_v1 }
  0x15   : > { %s581_s20 = scalar_lea.vmem %s4289_s8, %s3633_s27  ;;  %s597_s18 = scalar_lea.vmem %s4293_s12, %s3633_s27  ;;  %v3014_v6 = vunpack.c.h.bf16 (!%p2926_p4), %v3015_v1  ;;  %v612_v7 = vunpack.c.l.bf16 (!%p2926_p4), %v607_v2 }
  0x16   : > { %s3651_s23 = scalar_lea.vmem %s4302_s3, %s2998_s17  ;;  %s3673_s3 = scalar_lea.vmem %s4290_s9, %s2998_s17  ;;  %614 = vst.msk [vmem:[#allocation2] sm:$0xff] (!%p2926_p4), %vm613_vm0, %v3009_v3  ;;  %615 = vst.msk [vmem:[#allocation2 + $0x8] sm:$0xff] (!%p2926_p4), %vm613_vm0, %v3010_v4 }
  0x17   : > { %s3656_s29 = scalar_lea.vmem %s4303_s5, %s2998_s17  ;;  %s589_s5 = scalar_lea.vmem %s4291_s10, %s3633_s27  ;;  %616 = vst.msk [vmem:[#allocation2 + $0x10] sm:$0xff] (!%p2926_p4), %vm613_vm0, %v3013_v5  ;;  %617 = vst.msk [vmem:[#allocation2 + $0x18] sm:$0xff] (!%p2926_p4), %vm613_vm0, %v3014_v6 }
  0x18   : > { %4304 = sst [smem:[#allocation4_spill]] %s3656_s29  ;;  %s3001_s29 = sshll.u32 %s3633_s27, 6  ;;  %619 = vst.msk [vmem:[#allocation2 + $0x20] sm:$0x3] (!%p2926_p4), %vm618_vm1, %v612_v7 }
  0x19   : > { %s3683_s14 = scalar_lea.vmem %s4292_s11, %s3001_s29 }
  0x1a PF: > { %vm661_vm2 = vcmask 261120   ;;  %vm674_vm3 = vcmask 254976   ;;  %v3381_v38 = vld [vmem:[%s3651_s23] sm:$0xff]   ;;  %v3534_v39 = vmov 0.0   ;;  %vm3535_vm4 = vmmov 0   ;;  %v3382_v40 = vld [vmem:[%s3651_s23 + $0x8] sm:$0xff]   ;;  %s4305_s25 = scalar_lea.vmem %s4282_s1, %s3633_s27  ;;  %s4306_s15 = scalar_lea.vmem %s4283_s2, %s3633_s27 }
  0x1b   : > { %3106 = vmatprep.subr.bf16.mxu1 %v3534_v39  ;;  %3110 = vmatprep.mubr.msk.bf16.mxu1 %vm3535_vm4, %v3534_v39  ;;  %v2927_v60 = vld [vmem:[%s4305_s25] ss:$0 sm:$0xff]  ;;  %s4307_s21 = scalar_lea.vmem %s4285_s4, %s3633_s27  ;;  %vm850_vm5 = vcmask 64512   ;;  %s3536_s22 = smov 88   ;;  %vm1575_vm6 = vsmask.f32 7424 }
  0x1c   : > { %3107 = vmatpush3.bf16.msra.mxu1 %v3381_v38  ;;  %v2928_v1 = vld [vmem:[%s4306_s15] ss:$0 sm:$0xff]  ;;  %s3537_s24 = smov 96   ;;  %s3538_s28 = smov 120   ;;  %vm911_vm7 = vcmask 138240   ;;  %vm918_vm8 = vcmask 131072  }
  0x1d   : > { %v656_v8 = vld [vmem:[#allocation2] sm:$0xff]  ;;  %v657_v10 = vld [vmem:[#allocation2 + $0x8] sm:$0xff]  ;;  %3108 = vmatprep.subr.bf16.mxu1 %v3534_v39  ;;  %s3539_s23 = smov 112   ;;  %s3540_s29 = smov 80   ;;  %vm962_vm9 = vcmask 1040384   ;;  %vm1561_vm10 = vcmask 130048  }
  0x1e   : > { %v658_v9 = vld [vmem:[#allocation2 + $0x10] sm:$0xff]  ;;  %v662_v11 = vsel %vm661_vm2, %v656_v8, 0.0  ;;  %v659_v13 = vld [vmem:[#allocation2 + $0x18] sm:$0xff]  ;;  %v665_v14 = vsel %vm661_vm2, %v657_v10, 0.0  ;;  %s3541_s25 = smov 64   ;;  %s3542_s30 = smov 56  }
  0x1f   : > { %v668_v12 = vsel %vm661_vm2, %v658_v9, 0.0  ;;  %663 = vadd.xlane.f32.xlu0 %v662_v11  ;;  %v671_v15 = vsel %vm661_vm2, %v659_v13, 0.0  ;;  %v660_v34 = vld [vmem:[#allocation2 + $0x20] sm:$0x3]  ;;  %s3543_s16 = smov 48   ;;  %s3544_s15 = smov 72  }
  0x20   : > { %669 = vadd.xlane.f32.xlu1 %v668_v12  ;;  %v675_v36 = vsel %vm674_vm3, %v660_v34, 0.0  ;;  %3109 = vmatpush3.bf16.msra.mxu1 %v3382_v40  ;;  %s3545_s19 = smov 104   ;;  %s3547_s17 = smov 40   ;;  %vm1565_vm11 = vcmask 195584  }
  0x21   : > { %p2990_p5 = scmp.ne.s32.totalorder %s3627_s26, 1 }
  0x22   : > { %vm2771_vm12 = vcmask (!%p2990_p5), 257024   ;;  %vm2776_vm13 = vcmask (!%p2990_p5), 253952  }
  0x23   : > { %666 = vadd.xlane.f32.xlu0 %v665_v14 }
  0x24   : > { %672 = vadd.xlane.f32.xlu1 %v671_v15 }
  0xac   : > { %v664_v16 = vpop.xlane.xlu0 %663 }
  0xad   : > { %v670_v17 = vpop.xlane.xlu1 %669  ;;  %v679_v18 = vmul.f32 0.03125, %v664_v16 }
  0xae   : > { %v681_v19 = vmul.f32 0.03125, %v670_v17 }
  0xaf   : > { %v684_v20 = vsub.f32 %v656_v8, %v679_v18 }
  0xb0   : > { %v3703_v21 = vsub.f32 %v658_v9, %v681_v19  ;;  %v667_v22 = vpop.xlane.xlu0 %666 }
  0xb1   : > { %v673_v23 = vpop.xlane.xlu1 %672  ;;  %v680_v24 = vmul.f32 0.03125, %v667_v22  ;;  %v689_v26 = vmul.f32 %v684_v20, %v684_v20  ;;  %v3742_v22 = vld [vmem:[%s4307_s21] ss:$0 sm:$0xff]  ;;  %s3548_s21 = smov 8  }
  0xb2   : > { %v682_v25 = vmul.f32 0.03125, %v673_v23  ;;  %v691_v27 = vmul.f32 %v3703_v21, %v3703_v21 }
  0xb3   : > { %v685_v28 = vsub.f32 %v657_v10, %v680_v24  ;;  %v694_v30 = vsel %vm661_vm2, %v689_v26, 0.0 }
  0xb4   : > { %v687_v29 = vsub.f32 %v659_v13, %v682_v25  ;;  %695 = vadd.xlane.f32.xlu0 %v694_v30  ;;  %v700_v31 = vsel %vm661_vm2, %v691_v27, 0.0 }
  0xb5   : > { %v690_v32 = vmul.f32 %v685_v28, %v685_v28 }
  0xb6   : > { %v692_v33 = vmul.f32 %v687_v29, %v687_v29 }
  0xb7   : > { %v697_v35 = vsel %vm661_vm2, %v690_v32, 0.0 }
  0xb8   : > { %701 = vadd.xlane.f32.xlu0 %v700_v31  ;;  %698 = vadd.xlane.f32.xlu1 %v697_v35  ;;  %v703_v37 = vsel %vm661_vm2, %v692_v33, 0.0 }
  0xbc   : > { %676 = vadd.xlane.f32.xlu0 %v675_v36  ;;  %704 = vadd.xlane.f32.xlu1 %v703_v37 }
 0x141   : > { %v696_v41 = vpop.xlane.xlu0 %695 }
 0x142   : > { %v709_v42 = vmul.f32 0.03125, %v696_v41 }
 0x144   : > { %v714_v43 = vadd.f32 1e-05, %v709_v42 }
 0x145   : > { %v699_v44 = vpop.xlane.xlu1 %698  ;;  %v702_v45 = vpop.xlane.xlu0 %701 }
 0x146   : > { %3395 = vrsqrt.f32 %v714_v43  ;;  %v710_v46 = vmul.f32 0.03125, %v699_v44  ;;  %v711_v47 = vmul.f32 0.03125, %v702_v45 }
 0x148   : > { %v715_v48 = vadd.f32 1e-05, %v710_v46  ;;  %v716_v49 = vadd.f32 1e-05, %v711_v47 }
 0x149   : > { %v705_v50 = vpop.xlane.xlu1 %704  ;;  %v677_v51 = vpop.xlane.xlu0 %676 }
 0x14a   : > { %3397 = vrsqrt.f32 %v715_v48  ;;  %v712_v52 = vmul.f32 0.03125, %v705_v50  ;;  %v683_v53 = vmul.f32 0.03125, %v677_v51 }
 0x14b   : > { %3399 = vrsqrt.f32 %v716_v49 }
 0x14c   : > { %v717_v54 = vadd.f32 1e-05, %v712_v52  ;;  %v688_v55 = vsub.f32 %v660_v34, %v683_v53 }
 0x14e   : > { %3401 = vrsqrt.f32 %v717_v54  ;;  %v693_v56 = vmul.f32 %v688_v55, %v688_v55 }
 0x150   : > { %v3396_v57 = vpop.eup %3395  ;;  %v706_v58 = vsel %vm674_vm3, %v693_v56, 0.0 }
 0x151   : > { %707 = vadd.xlane.f32.xlu1 %v706_v58  ;;  %v724_v59 = vmul.f32 %v3396_v57, %v684_v20 }
 0x153   : > { %v735_v63 = vmul.f32 %v2927_v60, %v724_v59 }
 0x154   : > { %v3398_v61 = vpop.eup %3397 }
 0x155   : > { %v725_v62 = vmul.f32 %v3398_v61, %v685_v28  ;;  %v3400_v0 = vpop.eup %3399  ;;  %v746_v4 = vadd.f32 %v2928_v1, %v735_v63 }
 0x156   : > { %v726_v6 = vmul.f32 %v3400_v0, %v3703_v21 }
 0x157   : > { %v736_v2 = vmul.f32 %v2927_v60, %v725_v62 }
 0x158   : > { %v3402_v3 = vpop.eup %3401  ;;  %v737_v10 = vmul.f32 %v2927_v60, %v726_v6 }
 0x159   : > { %v747_v5 = vadd.f32 %v2928_v1, %v736_v2  ;;  %v727_v7 = vmul.f32 %v3402_v3, %v687_v29 }
 0x15a   : > { %v748_v12 = vadd.f32 %v2928_v1, %v737_v10 }
 0x15b   : > { %v751_v8 = vpack.c.bf16 %v747_v5, %v746_v4  ;;  %v738_v9 = vmul.f32 %v2927_v60, %v727_v7 }
 0x15d   : > { %3111 = vmatmul.mubr.msk.bf16.vlgmr.msra.gmra.mrb[0].mxu1 %vm661_vm2, %v751_v8  ;;  %v749_v11 = vadd.f32 %v2928_v1, %v738_v9 }
 0x15e   : > { %3114 = vmatprep.mubr.msk.bf16.mxu1 %vm3535_vm4, %v3534_v39 }
 0x15f   : > { %v752_v13 = vpack.c.bf16 %v749_v11, %v748_v12 }
 0x165   : > { %3115 = vmatmul.mubr.msk.bf16.gmra.mrb[4].mxu1 %vm661_vm2, %v752_v13 }
 0x166   : > { %3118 = vmatprep.mubr.msk.bf16.mxu1 %vm3535_vm4, %v3534_v39 }
 0x1de   : > { %v708_v14 = vpop.xlane.xlu1 %707 }
 0x1df   : > { %v713_v15 = vmul.f32 0.03125, %v708_v14 }
 0x1e1   : > { %v718_v16 = vadd.f32 1e-05, %v713_v15 }
 0x1e3   : > { %3403 = vrsqrt.f32 %v718_v16 }
 0x1ed   : > { %v3404_v17 = vpop.eup %3403 }
 0x1ee   : > { %v728_v18 = vmul.f32 %v3404_v17, %v688_v55 }
 0x1f0   : > { %v739_v19 = vmul.f32 %v2927_v60, %v728_v18 }
 0x1f2   : > { %v750_v20 = vadd.f32 %v2928_v1, %v739_v19 }
 0x1f4   : > { %v753_v21 = vpack.c.bf16 %v750_v20, %v750_v20 }
 0x1f6   : > { %3119 = vmatmul.mubr.msk.bf16.gmra.mrb[8].mxu1 %vm661_vm2, %v753_v21 }
 0x230   : > { %v815_v23 = vpop.f32.mrb[0].mxu1 }
 0x231   : > { %v816_v24 = vadd.f32 %v3742_v22, %v815_v23  ;;  %v3112_v25 = vpop.f32.mrb[1].mxu1 }
 0x232   : > { %v818_v26 = vpop.f32.mrb[2].mxu1 }
 0x233   : > { %v819_v27 = vadd.f32 %v3742_v22, %v818_v26  ;;  %v3113_v28 = vpop.f32.mrb[3].mxu1  ;;  %v837_v29 = vmul.f32 0.35355338, %v816_v24 }
 0x235   : > { %v838_v30 = vmul.f32 0.35355338, %v819_v27  ;;  %v3746_v31 = vpack.c.bf16 %v819_v27, %v816_v24 }
 0x237   : > { %v3748_v32 = vpack.c.bf16 %v838_v30, %v837_v29  ;;  %1022 = vrot.lane.b32.xlu1 %v3746_v31, %s3536_s22  ;;  %846 = vrot.lane.b32.xlu0 %v3746_v31, %s3537_s24 }
 0x238   : > { %v823_v33 = vpop.f32.mrb[4].mxu1 }
 0x239   : > { %v824_v34 = vadd.f32 %v3742_v22, %v823_v33  ;;  %v3116_v35 = vpop.f32.mrb[5].mxu1  ;;  %3126 = vmatprep.mubr.msk.bf16.mxu1 %vm850_vm5, %v3748_v32 }
 0x23a   : > { %v826_v36 = vpop.f32.mrb[6].mxu1 }
 0x23b   : > { %v839_v37 = vmul.f32 0.35355338, %v824_v34  ;;  %v3757_v38 = vpack.c.bf16 %v824_v34, %v824_v34  ;;  %v827_v40 = vadd.f32 %v3742_v22, %v826_v36  ;;  %1018 = vrot.lane.b32.xlu0 %v3748_v32, %s3538_s28  ;;  %v3117_v41 = vpop.f32.mrb[7].mxu1 }
 0x23d   : > { %v3762_v42 = vpack.c.bf16 %v839_v37, %v839_v37  ;;  %v1569_v43 = vmul.f32 0.35355338, %v827_v40  ;;  %v1573_v44 = vpack.c.bf16 %v827_v40, %v824_v34  ;;  %848 = vrot.lane.b32.xlu1 %v3757_v38, %s3537_s24 }
 0x23f   : > { %v3766_v45 = vpack.c.bf16 %v1569_v43, %v839_v37  ;;  %1020 = vrot.lane.b32.xlu0 %v3762_v42, %s3538_s28  ;;  %v1593_v61 = vshll.u32 %v1573_v44, 16  ;;  %v1591_v9 = vshrl.u32 %v1573_v44, 16 }
 0x241   : > { %1024 = vrot.lane.b32.xlu1 %v3757_v38, %s3536_s22  ;;  %v1579_v63 = vshll.u32 %v3766_v45, 16  ;;  %v1595_v4 = vrot.slane %v1593_v61, 1  ;;  %v1577_v12 = vshrl.u32 %v3766_v45, 16 }
 0x243   : > { %1186 = vrot.lane.b32.xlu0 %v3748_v32, %s3539_s23  ;;  %v1581_v8 = vrot.slane %v1579_v63, 1  ;;  %v1596_v13 = vor.u32 %v1595_v4, %v1591_v9 }
 0x245   : > { %1190 = vrot.lane.b32.xlu1 %v3746_v31, %s3540_s29  ;;  %v1582_v18 = vor.u32 %v1581_v8, %v1577_v12 }
 0x249   : > { %1192 = vrot.lane.b32.xlu1 %v3757_v38, %s3540_s29 }
 0x24d   : > { %1188 = vrot.lane.b32.xlu1 %v3762_v42, %s3539_s23 }
 0x2a9   : > { %v1023_v46 = vpop.permute.xlu1 %1022  ;;  %v847_v47 = vpop.permute.xlu0 %846 }
 0x2aa   : > { %3310 = vmatprep.subr.msk.bf16.mxu1 %vm850_vm5, %v847_v47  ;;  %3312 = vmatprep.subr.msk.bf16.mxu0 %vm850_vm5, %v1023_v46  ;;  %v858_v48 = vsel %vm850_vm5, %v847_v47, 0  ;;  %v1033_v49 = vsel %vm850_vm5, %v1023_v46, 0 }
 0x2ab   : > { %3123 = vmatpush3.bf16.xpose.msra.mxu1 %v858_v48  ;;  %3139 = vmatpush3.bf16.xpose.msra.mxu0 %v1033_v49 }
 0x2ad   : > { %v1019_v50 = vpop.permute.xlu0 %1018 }
 0x2ae   : > { %3142 = vmatprep.mubr.msk.bf16.mxu0 %vm850_vm5, %v1019_v50 }
 0x2af   : > { %v849_v51 = vpop.permute.xlu1 %848 }
 0x2b0   : > { %3311 = vmatprep.subr.msk.bf16.mxu1 %vm850_vm5, %v849_v51  ;;  %v861_v52 = vsel %vm850_vm5, %v849_v51, 0 }
 0x2b1   : > { %v1021_v55 = vpop.permute.xlu0 %1020 }
 0x2b3   : > { %3125 = vmatpush3.bf16.xpose.msra.mxu1 %v861_v52  ;;  %v1025_v53 = vpop.permute.xlu1 %1024 }
 0x2b4   : > { %3313 = vmatprep.subr.msk.bf16.mxu0 %vm850_vm5, %v1025_v53  ;;  %v1036_v54 = vsel %vm850_vm5, %v1025_v53, 0 }
 0x2b5   : > { %3141 = vmatpush3.bf16.xpose.msra.mxu0 %v1036_v54  ;;  %v1187_v57 = vpop.permute.xlu0 %1186 }
 0x2b7   : > { %v1191_v56 = vpop.permute.xlu1 %1190 }
 0x2b8   : > { %3314 = vmatprep.subr.msk.bf16.mxu0 %vm850_vm5, %v1191_v56  ;;  %v1201_v58 = vsel %vm850_vm5, %v1191_v56, 0 }
 0x2ba   : > { %3127 = vmatmul.mubr.msk.bf16.vlgmr.msra.gmra.mrb[12].mxu1 %vm850_vm5, %v3762_v42 }
 0x2bb   : > { %v1193_v59 = vpop.permute.xlu1 %1192 }
 0x2bc   : > { %3143 = vmatmul.mubr.msk.bf16.vlgmr.msra.gmra.mrb[0].mxu0 %vm850_vm5, %v1021_v55  ;;  %v1204_v60 = vsel %vm850_vm5, %v1193_v59, 0 }
 0x2bd   : > { %3155 = vmatpush3.bf16.xpose.msra.mxu0 %v1201_v58  ;;  %3158 = vmatprep.mubr.msk.bf16.mxu0 %vm850_vm5, %v1187_v57 }
 0x2be   : > { %3315 = vmatprep.subr.msk.bf16.mxu0 %vm850_vm5, %v1193_v59 }
 0x2bf   : > { %v1189_v2 = vpop.permute.xlu1 %1188 }
 0x2c5   : > { %3157 = vmatpush3.bf16.xpose.msra.mxu0 %v1204_v60 }
 0x2c9   : > { %v831_v62 = vpop.f32.mrb[8].mxu1 }
 0x2ca   : > { %v832_v0 = vadd.f32 %v3742_v22, %v831_v62  ;;  %v3120_v1 = vpop.f32.mrb[9].mxu1 }
 0x2cb   : > { %v834_v3 = vpop.f32.mrb[10].mxu1 }
 0x2cc   : > { %v1570_v5 = vmul.f32 0.35355338, %v832_v0  ;;  %v3799_v6 = vpack.c.bf16 %v832_v0, %v832_v0  ;;  %3159 = vmatmul.mubr.msk.bf16.vlgmr.msra.gmra.mrb[4].mxu0 %vm850_vm5, %v1189_v2  ;;  %v3121_v7 = vpop.f32.mrb[11].mxu1 }
 0x2ce   : > { %v3802_v10 = vpack.c.bf16 %v1570_v5, %v1570_v5  ;;  %v1598_v11 = vshll.u32 %v3799_v6, 16 }
 0x2d0   : > { %v1584_v14 = vshll.u32 %v3802_v10, 16  ;;  %v1600_v15 = vrot.slane %v1598_v11, 1 }
 0x2d2   : > { %v1586_v16 = vrot.slane %v1584_v14, 1  ;;  %v3807_v17 = vsel %vm1575_vm6, %v1596_v13, %v1600_v15 }
 0x2d4   : > { %v3809_v19 = vsel %vm1575_vm6, %v1582_v18, %v1586_v16 }
 0x38d   : > { %v3128_v20 = vpop.f32.mrb[12].mxu1 }
 0x38e   : > { %v897_v21 = vpop.f32.mrb[13].mxu1  ;;  %v919_v30 = vsel %vm918_vm8, %v3128_v20, -inf }
 0x38f   : > { %v3129_v22 = vpop.f32.mrb[14].mxu1  ;;  %v3144_v23 = vpop.f32.mrb[0].mxu0  ;;  %v912_v24 = vsel %vm911_vm7, %v897_v21, -inf }
 0x390   : > { %v1072_v25 = vpop.f32.mrb[1].mxu0  ;;  %913 = vmax.xlane.f32.xlu0 %v912_v24  ;;  %v900_v26 = vpop.f32.mrb[15].mxu1  ;;  %v1092_v33 = vsel %vm918_vm8, %v3144_v23, -inf }
 0x391   : > { %v3145_v27 = vpop.f32.mrb[2].mxu0  ;;  %v915_v28 = vsel %vm911_vm7, %v900_v26, -inf  ;;  %v1086_v34 = vsel %vm911_vm7, %v1072_v25, -inf }
 0x392   : > { %v1075_v29 = vpop.f32.mrb[3].mxu0  ;;  %916 = vmax.xlane.f32.xlu1 %v915_v28 }
 0x393   : > { %v1089_v35 = vsel %vm911_vm7, %v1075_v29, -inf }
 0x394   : > { %920 = vmax.xlane.f32.xlu0 %v919_v30 }
 0x396   : > { %1093 = vmax.xlane.f32.xlu1 %v1092_v33 }
 0x398   : > { %1087 = vmax.xlane.f32.xlu0 %v1086_v34 }
 0x39c   : > { %1090 = vmax.xlane.f32.xlu0 %v1089_v35 }
 0x39f   : > { %v3160_v36 = vpop.f32.mrb[4].mxu0 }
 0x3a0   : > { %v1240_v37 = vpop.f32.mrb[5].mxu0  ;;  %v1260_v45 = vsel %vm918_vm8, %v3160_v36, -inf }
 0x3a1   : > { %v3161_v40 = vpop.f32.mrb[6].mxu0  ;;  %v1254_v41 = vsel %vm911_vm7, %v1240_v37, -inf }
 0x3a2   : > { %v1243_v43 = vpop.f32.mrb[7].mxu0  ;;  %1255 = vmax.xlane.f32.xlu0 %v1254_v41 }
 0x3a3   : > { %v1257_v44 = vsel %vm911_vm7, %v1243_v43, -inf }
 0x3a4   : > { %1258 = vmax.xlane.f32.xlu1 %v1257_v44 }
 0x3a6   : > { %1261 = vmax.xlane.f32.xlu0 %v1260_v45 }
 0x3b5   : > { %951 = vrot.lane.b32.xlu1 %v3746_v31, %s3541_s25 }
 0x41d   : > { %v914_v46 = vpop.xlane.xlu0 %913 }
 0x41e   : > { %v922_v47 = vsub.f32 %v897_v21, %v914_v46 }
 0x41f   : > { %v917_v48 = vpop.xlane.xlu1 %916 }
 0x420   : > { %v925_v51 = vmul.f32 1.442695, %v922_v47  ;;  %v923_v55 = vsub.f32 %v900_v26, %v917_v48 }
 0x421   : > { %v921_v49 = vpop.xlane.xlu0 %920 }
 0x422   : > { %v924_v50 = vsub.f32 %v3128_v20, %v921_v49  ;;  %v927_v60 = vmul.f32 1.442695, %v923_v55 }
 0x423   : > { %v1094_v52 = vpop.xlane.xlu1 %1093 }
 0x424   : > { %v929_v53 = vmul.f32 1.442695, %v924_v50  ;;  %v1097_v54 = vsub.f32 %v3144_v23, %v1094_v52  ;;  %v3546_v52 = vmov 0  }
 0x425   : > { %v1088_v56 = vpop.xlane.xlu0 %1087 }
 0x426   : > { %3405 = vpow2.f32 %v929_v53  ;;  %v1102_v57 = vmul.f32 1.442695, %v1097_v54  ;;  %v1095_v58 = vsub.f32 %v1072_v25, %v1088_v56  ;;  %v3876_v53 = vsel %vm962_vm9, 65535, %v3546_v52 }
 0x427   : > { %3407 = vpow2.f32 %v925_v51 }
 0x428   : > { %3409 = vpow2.f32 %v1102_v57  ;;  %v1098_v59 = vmul.f32 1.442695, %v1095_v58 }
 0x429   : > { %v1091_v61 = vpop.xlane.xlu0 %1090 }
 0x42a   : > { %3411 = vpow2.f32 %v1098_v59  ;;  %v1096_v62 = vsub.f32 %v1075_v29, %v1091_v61 }
 0x42b   : > { %3413 = vpow2.f32 %v927_v60 }
 0x42c   : > { %v1100_v63 = vmul.f32 1.442695, %v1096_v62 }
 0x42e   : > { %3415 = vpow2.f32 %v1100_v63 }
 0x42f   : > { %v1256_v0 = vpop.xlane.xlu0 %1255 }
 0x430   : > { %v3822_v1 = vpop.eup %3405  ;;  %v1263_v7 = vsub.f32 %v1240_v37, %v1256_v0 }
 0x431   : > { %v3824_v2 = vpop.eup %3407  ;;  %v1259_v3 = vpop.xlane.xlu1 %1258  ;;  %v937_v4 = vsel %vm918_vm8, %v3822_v1, 0.0 }
 0x432   : > { %v3828_v5 = vpop.eup %3409  ;;  %938 = vadd.xlane.f32.xlu1 %v937_v4  ;;  %v931_v14 = vsel %vm911_vm7, %v3824_v2, 0.0  ;;  %v1266_v15 = vmul.f32 1.442695, %v1263_v7  ;;  %v1264_v16 = vsub.f32 %v1243_v43, %v1259_v3 }
 0x433   : > { %v1262_v8 = vpop.xlane.xlu0 %1261  ;;  %v1110_v9 = vsel %vm918_vm8, %v3828_v5, 0.0 }
 0x434   : > { %v3832_v11 = vpop.eup %3411  ;;  %v1265_v12 = vsub.f32 %v3160_v36, %v1262_v8  ;;  %1111 = vadd.xlane.f32.xlu0 %v1110_v9  ;;  %v1268_v24 = vmul.f32 1.442695, %v1264_v16 }
 0x435   : > { %v952_v13 = vpop.permute.xlu1 %951  ;;  %v3414_v20 = vpop.eup %3413  ;;  %v1104_v21 = vsel %vm911_vm7, %v3832_v11, 0.0 }
 0x436   : > { %v1270_v18 = vmul.f32 1.442695, %v1265_v12  ;;  %932 = vadd.xlane.f32.xlu1 %v931_v14  ;;  %3130 = vmatprep.subr.bf16.mxu1 %v952_v13  ;;  %v934_v25 = vsel %vm911_vm7, %v3414_v20, 0.0 }
 0x437   : > { %3131 = vmatpush3.bf16.msra.mxu1 %v952_v13 }
 0x438   : > { %v3838_v22 = vpop.eup %3415  ;;  %3417 = vpow2.f32 %v1270_v18  ;;  %1105 = vadd.xlane.f32.xlu0 %v1104_v21 }
 0x439   : > { %v1107_v23 = vsel %vm911_vm7, %v3838_v22, 0.0  ;;  %3419 = vpow2.f32 %v1266_v15 }
 0x43a   : > { %1108 = vadd.xlane.f32.xlu1 %v1107_v23  ;;  %3421 = vpow2.f32 %v1268_v24 }
 0x43c   : > { %935 = vadd.xlane.f32.xlu0 %v934_v25 }
 0x442   : > { %v3843_v26 = vpop.eup %3417 }
 0x443   : > { %v1278_v27 = vsel %vm918_vm8, %v3843_v26, 0.0  ;;  %v3847_v28 = vpop.eup %3419 }
 0x444   : > { %1279 = vadd.xlane.f32.xlu0 %v1278_v27  ;;  %v1272_v29 = vsel %vm911_vm7, %v3847_v28, 0.0  ;;  %v3851_v30 = vpop.eup %3421 }
 0x445   : > { %v1275_v33 = vsel %vm911_vm7, %v3851_v30, 0.0 }
 0x448   : > { %1273 = vadd.xlane.f32.xlu0 %v1272_v29 }
 0x44b   : > { %1124 = vrot.lane.b32.xlu1 %v3746_v31, %s3542_s30 }
 0x44c   : > { %1276 = vadd.xlane.f32.xlu0 %v1275_v33 }
 0x44f   : > { %1126 = vrot.lane.b32.xlu1 %v3757_v38, %s3542_s30 }
 0x453   : > { %1292 = vrot.lane.b32.xlu1 %v3746_v31, %s3543_s16 }
 0x457   : > { %1294 = vrot.lane.b32.xlu1 %v3757_v38, %s3543_s16 }
 0x45b   : > { %1358 = vrot.lane.b32.xlu1 %v3746_v31, %s3544_s15 }
 0x45f   : > { %1360 = vrot.lane.b32.xlu1 %v3757_v38, %s3544_s15 }
 0x462   : > { %953 = vrot.lane.b32.xlu0 %v3757_v38, %s3541_s25 }
 0x463   : > { %1356 = vrot.lane.b32.xlu1 %v3762_v42, %s3545_s19 }
 0x466   : > { %1354 = vrot.lane.b32.xlu0 %v3748_v32, %s3545_s19 }
 0x4bf   : > { %v939_v34 = vpop.xlane.xlu1 %938 }
 0x4c1   : > { %v1112_v35 = vpop.xlane.xlu0 %1111 }
 0x4c3   : > { %v933_v36 = vpop.xlane.xlu1 %932 }
 0x4c4   : > { %3423 = vrcp.f32 %v933_v36 }
 0x4c5   : > { %v1106_v37 = vpop.xlane.xlu0 %1105 }
 0x4c7   : > { %v1109_v41 = vpop.xlane.xlu1 %1108 }
 0x4c9   : > { %v936_v40 = vpop.xlane.xlu0 %935 }
 0x4ca   : > { %3425 = vrcp.f32 %v936_v40 }
 0x4cb   : > { %3427 = vrcp.f32 %v939_v34  ;;  %v1125_v48 = vpop.permute.xlu1 %1124 }
 0x4cc   : > { %3429 = vrcp.f32 %v1109_v41 }
 0x4cd   : > { %3431 = vrcp.f32 %v1106_v37 }
 0x4ce   : > { %v3424_v44 = vpop.eup %3423  ;;  %3433 = vrcp.f32 %v1112_v35 }
 0x4cf   : > { %v946_v42 = vmul.f32 %v3424_v44, %v3824_v2  ;;  %v1127_v54 = vpop.permute.xlu1 %1126 }
 0x4d0   : > { %v1136_v3 = vand.u32 %v1127_v54, %v3876_v53 }
 0x4d1   : > { %v1280_v43 = vpop.xlane.xlu0 %1279 }
 0x4d3   : > { %v1293_v63 = vpop.permute.xlu1 %1292 }
 0x4d4   : > { %v3426_v45 = vpop.eup %3425 }
 0x4d5   : > { %v1274_v46 = vpop.xlane.xlu0 %1273  ;;  %v947_v47 = vmul.f32 %v3426_v45, %v3414_v20  ;;  %v3428_v50 = vpop.eup %3427 }
 0x4d6   : > { %v3430_v51 = vpop.eup %3429  ;;  %v948_v57 = vmul.f32 %v3428_v50, %v3822_v1 }
 0x4d7   : > { %v949_v32 = vpack.c.bf16 %v947_v47, %v946_v42  ;;  %v3432_v56 = vpop.eup %3431  ;;  %v1120_v59 = vmul.f32 %v3430_v51, %v3838_v22  ;;  %v1295_v8 = vpop.permute.xlu1 %1294 }
 0x4d8   : > { %v1119_v60 = vmul.f32 %v3432_v56, %v3832_v11  ;;  %v950_v61 = vpack.c.bf16 %v948_v57, %v948_v57  ;;  %v3434_v62 = vpop.eup %3433  ;;  %v1304_v14 = vand.u32 %v1295_v8, %v3876_v53 }
 0x4d9   : > { %v1277_v49 = vpop.xlane.xlu0 %1276  ;;  %3134 = vmatprep.mubr.msk.bf16.mxu1 %vm911_vm7, %v949_v32  ;;  %v1121_v4 = vmul.f32 %v3434_v62, %v3828_v5 }
 0x4da   : > { %3435 = vrcp.f32 %v1277_v49  ;;  %v1122_v0 = vpack.c.bf16 %v1120_v59, %v1119_v60 }
 0x4db   : > { %3437 = vrcp.f32 %v1274_v46  ;;  %v1123_v11 = vpack.c.bf16 %v1121_v4, %v1121_v4  ;;  %v1359_v15 = vpop.permute.xlu1 %1358 }
 0x4dc   : > { %3439 = vrcp.f32 %v1280_v43  ;;  %v1369_v20 = vsel %vm850_vm5, %v1359_v15, 0 }
 0x4dd   : > { %v954_v55 = vpop.permute.xlu0 %953 }
 0x4de   : > { %v966_v58 = vand.u32 %v3876_v53, %v954_v55 }
 0x4df   : > { %v1361_v21 = vpop.permute.xlu1 %1360 }
 0x4e0   : > { %3132 = vmatprep.subr.bf16.mxu1 %v966_v58  ;;  %v1372_v22 = vsel %vm850_vm5, %v1361_v21, 0 }
 0x4e1   : > { %3133 = vmatpush3.bf16.msra.mxu1 %v966_v58  ;;  %v1355_v18 = vpop.permute.xlu0 %1354 }
 0x4e2   : > { %3146 = vmatprep.subr.bf16.mxu1 %v1125_v48 }
 0x4e3   : > { %v1357_v23 = vpop.permute.xlu1 %1356 }
 0x4e4   : > { %v3436_v2 = vpop.eup %3435  ;;  %3135 = vmatmul.mubr.msk.bf16.vlgmr.msra.gmra.mrb[16].mxu1 %vm911_vm7, %v950_v61 }
 0x4e5   : > { %3147 = vmatpush3.bf16.msra.mxu1 %v1125_v48  ;;  %3150 = vmatprep.mubr.msk.bf16.mxu1 %vm911_vm7, %v1122_v0  ;;  %v3438_v1 = vpop.eup %3437  ;;  %v1288_v7 = vmul.f32 %v3436_v2, %v3851_v30  ;;  %v3934_v0 = vshrl.u32 %v3799_v6, 16 }
 0x4e6   : > { %3148 = vmatprep.subr.bf16.mxu1 %v1136_v3  ;;  %v1287_v9 = vmul.f32 %v3438_v1, %v3847_v28  ;;  %v3440_v12 = vpop.eup %3439 }
 0x4e7   : > { %v1289_v5 = vmul.f32 %v3440_v12, %v3843_v26 }
 0x4e8   : > { %v1290_v13 = vpack.c.bf16 %v1288_v7, %v1287_v9 }
 0x4e9   : > { %3149 = vmatpush3.bf16.msra.mxu1 %v1136_v3  ;;  %v1291_v16 = vpack.c.bf16 %v1289_v5, %v1289_v5 }
 0x4ea   : > { %3162 = vmatprep.subr.bf16.mxu1 %v1293_v63 }
 0x4ec   : > { %3151 = vmatmul.mubr.msk.bf16.vlgmr.msra.gmra.mrb[20].mxu1 %vm911_vm7, %v1123_v11 }
 0x4ed   : > { %3163 = vmatpush3.bf16.msra.mxu1 %v1293_v63  ;;  %3166 = vmatprep.mubr.msk.bf16.mxu1 %vm911_vm7, %v1290_v13 }
 0x4ee   : > { %3164 = vmatprep.subr.bf16.mxu1 %v1304_v14 }
 0x4f1   : > { %3165 = vmatpush3.bf16.msra.mxu1 %v1304_v14 }
 0x4f2   : > { %3316 = vmatprep.subr.msk.bf16.mxu1 %vm850_vm5, %v1359_v15 }
 0x4f4   : > { %3167 = vmatmul.mubr.msk.bf16.vlgmr.msra.gmra.mrb[24].mxu1 %vm911_vm7, %v1291_v16 }
 0x4f5   : > { %3174 = vmatprep.mubr.msk.bf16.mxu1 %vm850_vm5, %v1355_v18 }
 0x4fa   : > { %3171 = vmatpush3.bf16.xpose.msra.mxu1 %v1369_v20  ;;  %v3948_v20 = vshrl.u32 %v3802_v10, 16 }
 0x4fb   : > { %3317 = vmatprep.subr.msk.bf16.mxu1 %vm850_vm5, %v1361_v21 }
 0x502   : > { %3173 = vmatpush3.bf16.xpose.msra.mxu1 %v1372_v22 }
 0x509   : > { %3175 = vmatmul.mubr.msk.bf16.vlgmr.msra.gmra.mrb[28].mxu1 %vm850_vm5, %v1357_v23 }
 0x5b7   : > { %v3899_v24 = vpop.f32.mrb[16].mxu1 }
 0x5b8   : > { %v3901_v25 = vpop.f32.mrb[17].mxu1 }
 0x5b9   : > { %v3137_v26 = vpop.f32.mrb[18].mxu1 }
 0x5ba   : > { %v3903_v27 = vpop.f32.mrb[19].mxu1 }
 0x5bf   : > { %v3905_v28 = vpop.f32.mrb[20].mxu1 }
 0x5c0   : > { %v3907_v29 = vpop.f32.mrb[21].mxu1 }
 0x5c1   : > { %v3153_v30 = vpop.f32.mrb[22].mxu1 }
 0x5c2   : > { %v3909_v33 = vpop.f32.mrb[23].mxu1 }
 0x5c3   : > { %v3351_v34 = vpack.i.bf16 %v3909_v33, %v3907_v29 }
 0x5c7   : > { %v3913_v35 = vpop.f32.mrb[24].mxu1 }
 0x5c8   : > { %v3915_v36 = vpop.f32.mrb[25].mxu1 }
 0x5c9   : > { %v3169_v37 = vpop.f32.mrb[26].mxu1 }
 0x5ca   : > { %v3917_v40 = vpop.f32.mrb[27].mxu1 }
 0x5cb   : > { %v3356_v41 = vpack.i.bf16 %v3917_v40, %v3915_v36 }
 0x5dc   : > { %v3176_v43 = vpop.f32.mrb[28].mxu1 }
 0x5dd   : > { %v1408_v44 = vpop.f32.mrb[29].mxu1  ;;  %v1428_v48 = vsel %vm918_vm8, %v3176_v43, -inf }
 0x5de   : > { %v3177_v45 = vpop.f32.mrb[30].mxu1  ;;  %v1422_v46 = vsel %vm911_vm7, %v1408_v44, -inf }
 0x5df   : > { %1423 = vmax.xlane.f32.xlu0 %v1422_v46  ;;  %v1411_v42 = vpop.f32.mrb[31].mxu1 }
 0x5e0   : > { %v1425_v47 = vsel %vm911_vm7, %v1411_v42, -inf }
 0x5e1   : > { %1426 = vmax.xlane.f32.xlu1 %v1425_v47 }
 0x5e3   : > { %1429 = vmax.xlane.f32.xlu0 %v1428_v48 }
 0x66c   : > { %v1424_v32 = vpop.xlane.xlu0 %1423 }
 0x66d   : > { %v1431_v49 = vsub.f32 %v1408_v44, %v1424_v32 }
 0x66e   : > { %v1427_v50 = vpop.xlane.xlu1 %1426 }
 0x66f   : > { %v1434_v51 = vmul.f32 1.442695, %v1431_v49  ;;  %v1432_v52 = vsub.f32 %v1411_v42, %v1427_v50 }
 0x670   : > { %v1430_v54 = vpop.xlane.xlu0 %1429 }
 0x671   : > { %3441 = vpow2.f32 %v1434_v51  ;;  %v1436_v55 = vmul.f32 1.442695, %v1432_v52  ;;  %v1433_v56 = vsub.f32 %v3176_v43, %v1430_v54 }
 0x673   : > { %3443 = vpow2.f32 %v1436_v55  ;;  %v1438_v57 = vmul.f32 1.442695, %v1433_v56 }
 0x675   : > { %3445 = vpow2.f32 %v1438_v57 }
 0x67b   : > { %v3442_v58 = vpop.eup %3441 }
 0x67c   : > { %v1440_v59 = vsel %vm911_vm7, %v3442_v58, 0.0 }
 0x67d   : > { %v3444_v60 = vpop.eup %3443  ;;  %1441 = vadd.xlane.f32.xlu0 %v1440_v59 }
 0x67e   : > { %v1443_v63 = vsel %vm911_vm7, %v3444_v60, 0.0 }
 0x67f   : > { %v3446_v61 = vpop.eup %3445 }
 0x680   : > { %v1446_v62 = vsel %vm918_vm8, %v3446_v61, 0.0 }
 0x681   : > { %1447 = vadd.xlane.f32.xlu1 %v1446_v62  ;;  %1444 = vadd.xlane.f32.xlu0 %v1443_v63 }
 0x692   : > { %1462 = vrot.lane.b32.xlu1 %v3757_v38, %s3547_s17 }
 0x696   : > { %1604 = vrot.lane.b32.xlu1 %v3807_v17, %s3537_s24 }
 0x697   : > { %1460 = vrot.lane.b32.xlu0 %v3746_v31, %s3547_s17 }
 0x69a   : > { %1606 = vrot.lane.b32.xlu1 %v3934_v0, %s3537_s24  ;;  %s3550_s24 = smov 24  }
 0x70a   : > { %v1442_v2 = vpop.xlane.xlu0 %1441 }
 0x70b   : > { %3447 = vrcp.f32 %v1442_v2 }
 0x70e   : > { %v1445_v3 = vpop.xlane.xlu0 %1444  ;;  %v1448_v1 = vpop.xlane.xlu1 %1447 }
 0x70f   : > { %3449 = vrcp.f32 %v1445_v3 }
 0x710   : > { %3451 = vrcp.f32 %v1448_v1 }
 0x712   : > { %v1461_v4 = vpop.permute.xlu0 %1460  ;;  %v1463_v38 = vpop.permute.xlu1 %1462 }
 0x713   : > { %v1472_v7 = vand.u32 %v1463_v38, %v3876_v53  ;;  %3178 = vmatprep.subr.bf16.mxu0 %v1461_v4 }
 0x714   : > { %3179 = vmatpush3.bf16.msra.mxu0 %v1461_v4 }
 0x715   : > { %3180 = vmatprep.subr.bf16.mxu0 %v1472_v7  ;;  %v3448_v31 = vpop.eup %3447 }
 0x716   : > { %v1605_v8 = vpop.permute.xlu1 %1604  ;;  %v1455_v11 = vmul.f32 %v3448_v31, %v3442_v58 }
 0x717   : > { %v1615_v15 = vsel %vm850_vm5, %v1605_v8, 0 }
 0x718   : > { %3181 = vmatpush3.bf16.msra.mxu0 %v1472_v7 }
 0x719   : > { %v3450_v6 = vpop.eup %3449  ;;  %3318 = vmatprep.subr.msk.bf16.mxu0 %vm850_vm5, %v1605_v8 }
 0x71a   : > { %v3452_v9 = vpop.eup %3451  ;;  %v1456_v12 = vmul.f32 %v3450_v6, %v3444_v60  ;;  %v1607_v16 = vpop.permute.xlu1 %1606 }
 0x71b   : > { %v1457_v13 = vmul.f32 %v3452_v9, %v3446_v61  ;;  %v1618_v18 = vsel %vm850_vm5, %v1607_v16, 0 }
 0x71c   : > { %v1458_v14 = vpack.c.bf16 %v1456_v12, %v1455_v11 }
 0x71d   : > { %v1459_v5 = vpack.c.bf16 %v1457_v13, %v1457_v13 }
 0x71e   : > { %3182 = vmatprep.mubr.msk.bf16.mxu0 %vm911_vm7, %v1458_v14 }
 0x71f   : > { %3183 = vmatmul.mubr.msk.bf16.vlgmr.msra.gmra.mrb[8].mxu0 %vm911_vm7, %v1459_v5 }
 0x720   : > { %3190 = vmatprep.mubr.msk.bf16.mxu0 %vm850_vm5, %v3809_v19 }
 0x721   : > { %3187 = vmatpush3.bf16.xpose.msra.mxu0 %v1615_v15 }
 0x722   : > { %3319 = vmatprep.subr.msk.bf16.mxu0 %vm850_vm5, %v1607_v16 }
 0x729   : > { %3189 = vmatpush3.bf16.xpose.msra.mxu0 %v1618_v18 }
 0x730   : > { %3191 = vmatmul.mubr.msk.bf16.vlgmr.msra.gmra.mrb[12].mxu0 %vm850_vm5, %v3948_v20 }
 0x7f2   : > { %v3952_v21 = vpop.f32.mrb[8].mxu0 }
 0x7f3   : > { %v3954_v22 = vpop.f32.mrb[9].mxu0 }
 0x7f4   : > { %v3185_v23 = vpop.f32.mrb[10].mxu0 }
 0x7f5   : > { %v3956_v26 = vpop.f32.mrb[11].mxu0 }
 0x7f6   : > { %v3361_v30 = vpack.i.bf16 %v3956_v26, %v3954_v22 }
 0x803   : > { %v3192_v37 = vpop.f32.mrb[12].mxu0 }
 0x804   : > { %v1654_v43 = vpop.f32.mrb[13].mxu0  ;;  %v1674_v42 = vsel %vm918_vm8, %v3192_v37, -inf }
 0x805   : > { %v3193_v44 = vpop.f32.mrb[14].mxu0  ;;  %v1668_v45 = vsel %vm911_vm7, %v1654_v43, -inf }
 0x806   : > { %1669 = vmax.xlane.f32.xlu0 %v1668_v45  ;;  %v1657_v10 = vpop.f32.mrb[15].mxu0 }
 0x807   : > { %v1671_v46 = vsel %vm911_vm7, %v1657_v10, -inf }
 0x808   : > { %1672 = vmax.xlane.f32.xlu1 %v1671_v46 }
 0x80a   : > { %1675 = vmax.xlane.f32.xlu0 %v1674_v42 }
 0x893   : > { %v1670_v47 = vpop.xlane.xlu0 %1669 }
 0x894   : > { %v1677_v48 = vsub.f32 %v1654_v43, %v1670_v47 }
 0x895   : > { %v1673_v32 = vpop.xlane.xlu1 %1672 }
 0x896   : > { %v1680_v49 = vmul.f32 1.442695, %v1677_v48  ;;  %v1678_v50 = vsub.f32 %v1657_v10, %v1673_v32 }
 0x897   : > { %v1676_v51 = vpop.xlane.xlu0 %1675 }
 0x898   : > { %3453 = vpow2.f32 %v1680_v49  ;;  %v1682_v52 = vmul.f32 1.442695, %v1678_v50  ;;  %v1679_v54 = vsub.f32 %v3192_v37, %v1676_v51 }
 0x89a   : > { %3455 = vpow2.f32 %v1682_v52  ;;  %v1684_v55 = vmul.f32 1.442695, %v1679_v54 }
 0x89c   : > { %3457 = vpow2.f32 %v1684_v55 }
 0x8a2   : > { %v3454_v56 = vpop.eup %3453 }
 0x8a3   : > { %v1686_v57 = vsel %vm911_vm7, %v3454_v56, 0.0 }
 0x8a4   : > { %v3456_v58 = vpop.eup %3455  ;;  %1687 = vadd.xlane.f32.xlu0 %v1686_v57 }
 0x8a5   : > { %v1689_v61 = vsel %vm911_vm7, %v3456_v58, 0.0 }
 0x8a6   : > { %v3458_v59 = vpop.eup %3457 }
 0x8a7   : > { %v1692_v60 = vsel %vm918_vm8, %v3458_v59, 0.0 }
 0x8a8   : > { %1693 = vadd.xlane.f32.xlu1 %v1692_v60  ;;  %1690 = vadd.xlane.f32.xlu0 %v1689_v61 }
 0x8b9   : > { %1708 = vrot.lane.b32.xlu1 %v3934_v0, %s3541_s25 }
 0x8bd   : > { %1772 = vrot.lane.b32.xlu1 %v3807_v17, %s3536_s22 }
 0x8be   : > { %1706 = vrot.lane.b32.xlu0 %v3807_v17, %s3541_s25  ;;  %s4309_s25 = scalar_lea.vmem %s4287_s6, %s3633_s27 }
 0x8c1   : > { %1774 = vrot.lane.b32.xlu1 %v3934_v0, %s3536_s22  ;;  %s3549_s22 = smov 16  }
 0x8c2   : > { %1768 = vrot.lane.b32.xlu0 %v3809_v19, %s3538_s28 }
 0x8c5   : > { %1770 = vrot.lane.b32.xlu1 %v3948_v20, %s3538_s28  ;;  %s4308_s28 = sld [smem:[#allocation4_spill]] }
 0x931   : > { %v1688_v62 = vpop.xlane.xlu0 %1687 }
 0x932   : > { %3459 = vrcp.f32 %v1688_v62 }
 0x935   : > { %v1691_v63 = vpop.xlane.xlu0 %1690  ;;  %v1694_v2 = vpop.xlane.xlu1 %1693 }
 0x936   : > { %3461 = vrcp.f32 %v1691_v63 }
 0x937   : > { %3463 = vrcp.f32 %v1694_v2 }
 0x939   : > { %v1707_v3 = vpop.permute.xlu0 %1706  ;;  %v1709_v1 = vpop.permute.xlu1 %1708 }
 0x93a   : > { %v1718_v4 = vand.u32 %v1709_v1, %v3876_v53  ;;  %3194 = vmatprep.subr.bf16.mxu1 %v1707_v3 }
 0x93b   : > { %3195 = vmatpush3.bf16.msra.mxu1 %v1707_v3 }
 0x93c   : > { %3196 = vmatprep.subr.bf16.mxu1 %v1718_v4  ;;  %v3460_v38 = vpop.eup %3459 }
 0x93d   : > { %v1773_v7 = vpop.permute.xlu1 %1772  ;;  %v1701_v6 = vmul.f32 %v3460_v38, %v3454_v56  ;;  %v1769_v14 = vpop.permute.xlu0 %1768 }
 0x93e   : > { %v1783_v5 = vsel %vm850_vm5, %v1773_v7, 0 }
 0x93f   : > { %3197 = vmatpush3.bf16.msra.mxu1 %v1718_v4 }
 0x940   : > { %v3462_v31 = vpop.eup %3461  ;;  %3320 = vmatprep.subr.msk.bf16.mxu1 %vm850_vm5, %v1773_v7 }
 0x941   : > { %v3464_v8 = vpop.eup %3463  ;;  %v1702_v9 = vmul.f32 %v3462_v31, %v3456_v58  ;;  %v1775_v15 = vpop.permute.xlu1 %1774 }
 0x942   : > { %v1703_v11 = vmul.f32 %v3464_v8, %v3458_v59  ;;  %v1786_v16 = vsel %vm850_vm5, %v1775_v15, 0 }
 0x943   : > { %v1704_v12 = vpack.c.bf16 %v1702_v9, %v1701_v6 }
 0x944   : > { %v1705_v13 = vpack.c.bf16 %v1703_v11, %v1703_v11 }
 0x945   : > { %3198 = vmatprep.mubr.msk.bf16.mxu1 %vm911_vm7, %v1704_v12  ;;  %v1771_v18 = vpop.permute.xlu1 %1770 }
 0x946   : > { %3199 = vmatmul.mubr.msk.bf16.vlgmr.msra.gmra.mrb[32].mxu1 %vm911_vm7, %v1705_v13 }
 0x947   : > { %3206 = vmatprep.mubr.msk.bf16.mxu1 %vm850_vm5, %v1769_v14 }
 0x948   : > { %3203 = vmatpush3.bf16.xpose.msra.mxu1 %v1783_v5 }
 0x949   : > { %3321 = vmatprep.subr.msk.bf16.mxu1 %vm850_vm5, %v1775_v15 }
 0x950   : > { %3205 = vmatpush3.bf16.xpose.msra.mxu1 %v1786_v16 }
 0x957   : > { %3207 = vmatmul.mubr.msk.bf16.vlgmr.msra.gmra.mrb[36].mxu1 %vm850_vm5, %v1771_v18 }
 0xa19   : > { %v3987_v23 = vpop.f32.mrb[32].mxu1 }
 0xa1a   : > { %v3989_v37 = vpop.f32.mrb[33].mxu1 }
 0xa1b   : > { %v3201_v43 = vpop.f32.mrb[34].mxu1 }
 0xa1c   : > { %v3991_v44 = vpop.f32.mrb[35].mxu1 }
 0xa2a   : > { %v3208_v45 = vpop.f32.mrb[36].mxu1 }
 0xa2b   : > { %v1822_v10 = vpop.f32.mrb[37].mxu1  ;;  %v1842_v32 = vsel %vm918_vm8, %v3208_v45, -inf }
 0xa2c   : > { %v3209_v46 = vpop.f32.mrb[38].mxu1  ;;  %v1836_v42 = vsel %vm911_vm7, %v1822_v10, -inf }
 0xa2d   : > { %1837 = vmax.xlane.f32.xlu0 %v1836_v42  ;;  %v1825_v47 = vpop.f32.mrb[39].mxu1 }
 0xa2e   : > { %v1839_v48 = vsel %vm911_vm7, %v1825_v47, -inf }
 0xa2f   : > { %1840 = vmax.xlane.f32.xlu1 %v1839_v48 }
 0xa31   : > { %1843 = vmax.xlane.f32.xlu0 %v1842_v32 }
 0xaba   : > { %v1838_v49 = vpop.xlane.xlu0 %1837 }
 0xabb   : > { %v1845_v50 = vsub.f32 %v1822_v10, %v1838_v49 }
 0xabc   : > { %v1841_v51 = vpop.xlane.xlu1 %1840 }
 0xabd   : > { %v1848_v52 = vmul.f32 1.442695, %v1845_v50  ;;  %v1846_v54 = vsub.f32 %v1825_v47, %v1841_v51 }
 0xabe   : > { %v1844_v55 = vpop.xlane.xlu0 %1843 }
 0xabf   : > { %3465 = vpow2.f32 %v1848_v52  ;;  %v1850_v56 = vmul.f32 1.442695, %v1846_v54  ;;  %v1847_v57 = vsub.f32 %v3208_v45, %v1844_v55 }
 0xac1   : > { %3467 = vpow2.f32 %v1850_v56  ;;  %v1852_v58 = vmul.f32 1.442695, %v1847_v57 }
 0xac3   : > { %3469 = vpow2.f32 %v1852_v58 }
 0xac9   : > { %v3466_v59 = vpop.eup %3465 }
 0xaca   : > { %v1854_v60 = vsel %vm911_vm7, %v3466_v59, 0.0 }
 0xacb   : > { %v3468_v61 = vpop.eup %3467  ;;  %1855 = vadd.xlane.f32.xlu0 %v1854_v60 }
 0xacc   : > { %v1857_v2 = vsel %vm911_vm7, %v3468_v61, 0.0 }
 0xacd   : > { %v3470_v62 = vpop.eup %3469 }
 0xace   : > { %v1860_v63 = vsel %vm918_vm8, %v3470_v62, 0.0 }
 0xacf   : > { %1861 = vadd.xlane.f32.xlu1 %v1860_v63  ;;  %1858 = vadd.xlane.f32.xlu0 %v1857_v2 }
 0xae0   : > { %1876 = vrot.lane.b32.xlu1 %v3934_v0, %s3542_s30 }
 0xae4   : > { %1940 = vrot.lane.b32.xlu1 %v3807_v17, %s3540_s29 }
 0xae5   : > { %1874 = vrot.lane.b32.xlu0 %v3807_v17, %s3542_s30 }
 0xae8   : > { %1942 = vrot.lane.b32.xlu1 %v3934_v0, %s3540_s29 }
 0xae9   : > { %1936 = vrot.lane.b32.xlu0 %v3809_v19, %s3539_s23 }
 0xaec   : > { %1938 = vrot.lane.b32.xlu1 %v3948_v20, %s3539_s23 }
 0xb58   : > { %v1856_v3 = vpop.xlane.xlu0 %1855 }
 0xb59   : > { %3471 = vrcp.f32 %v1856_v3 }
 0xb5c   : > { %v1859_v1 = vpop.xlane.xlu0 %1858  ;;  %v1862_v4 = vpop.xlane.xlu1 %1861 }
 0xb5d   : > { %3473 = vrcp.f32 %v1859_v1 }
 0xb5e   : > { %3475 = vrcp.f32 %v1862_v4 }
 0xb60   : > { %v1875_v38 = vpop.permute.xlu0 %1874  ;;  %v1877_v7 = vpop.permute.xlu1 %1876 }
 0xb61   : > { %v1886_v31 = vand.u32 %v1877_v7, %v3876_v53  ;;  %3210 = vmatprep.subr.bf16.mxu0 %v1875_v38 }
 0xb62   : > { %3211 = vmatpush3.bf16.msra.mxu0 %v1875_v38 }
 0xb63   : > { %3212 = vmatprep.subr.bf16.mxu0 %v1886_v31  ;;  %v3472_v8 = vpop.eup %3471 }
 0xb64   : > { %v1941_v6 = vpop.permute.xlu1 %1940  ;;  %v1869_v12 = vmul.f32 %v3472_v8, %v3466_v59  ;;  %v1937_v16 = vpop.permute.xlu0 %1936 }
 0xb65   : > { %v1951_v18 = vsel %vm850_vm5, %v1941_v6, 0 }
 0xb66   : > { %3213 = vmatpush3.bf16.msra.mxu0 %v1886_v31 }
 0xb67   : > { %v3474_v9 = vpop.eup %3473  ;;  %3322 = vmatprep.subr.msk.bf16.mxu0 %vm850_vm5, %v1941_v6 }
 0xb68   : > { %v3476_v11 = vpop.eup %3475  ;;  %v1870_v13 = vmul.f32 %v3474_v9, %v3468_v61  ;;  %v1943_v43 = vpop.permute.xlu1 %1942 }
 0xb69   : > { %v1871_v14 = vmul.f32 %v3476_v11, %v3470_v62  ;;  %v1954_v45 = vsel %vm850_vm5, %v1943_v43, 0 }
 0xb6a   : > { %v1872_v5 = vpack.c.bf16 %v1870_v13, %v1869_v12 }
 0xb6b   : > { %v1873_v15 = vpack.c.bf16 %v1871_v14, %v1871_v14 }
 0xb6c   : > { %3214 = vmatprep.mubr.msk.bf16.mxu0 %vm911_vm7, %v1872_v5  ;;  %v1939_v10 = vpop.permute.xlu1 %1938 }
 0xb6d   : > { %3215 = vmatmul.mubr.msk.bf16.vlgmr.msra.gmra.mrb[16].mxu0 %vm911_vm7, %v1873_v15 }
 0xb6e   : > { %3222 = vmatprep.mubr.msk.bf16.mxu0 %vm850_vm5, %v1937_v16 }
 0xb6f   : > { %3219 = vmatpush3.bf16.xpose.msra.mxu0 %v1951_v18 }
 0xb70   : > { %3323 = vmatprep.subr.msk.bf16.mxu0 %vm850_vm5, %v1943_v43 }
 0xb77   : > { %3221 = vmatpush3.bf16.xpose.msra.mxu0 %v1954_v45 }
 0xb7e   : > { %3223 = vmatmul.mubr.msk.bf16.vlgmr.msra.gmra.mrb[20].mxu0 %vm850_vm5, %v1939_v10 }
 0xc40   : > { %v4020_v46 = vpop.f32.mrb[16].mxu0 }
 0xc41   : > { %v4022_v42 = vpop.f32.mrb[17].mxu0 }
 0xc42   : > { %v3217_v47 = vpop.f32.mrb[18].mxu0 }
 0xc43   : > { %v4024_v48 = vpop.f32.mrb[19].mxu0 }
 0xc44   : > { %v3366_v32 = vpack.i.bf16 %v4024_v48, %v4022_v42 }
 0xc51   : > { %v3224_v49 = vpop.f32.mrb[20].mxu0 }
 0xc52   : > { %v1990_v50 = vpop.f32.mrb[21].mxu0  ;;  %v2010_v56 = vsel %vm918_vm8, %v3224_v49, -inf }
 0xc53   : > { %v3225_v51 = vpop.f32.mrb[22].mxu0  ;;  %v2004_v52 = vsel %vm911_vm7, %v1990_v50, -inf }
 0xc54   : > { %2005 = vmax.xlane.f32.xlu0 %v2004_v52  ;;  %v1993_v54 = vpop.f32.mrb[23].mxu0 }
 0xc55   : > { %v2007_v55 = vsel %vm911_vm7, %v1993_v54, -inf }
 0xc56   : > { %2008 = vmax.xlane.f32.xlu1 %v2007_v55 }
 0xc58   : > { %2011 = vmax.xlane.f32.xlu0 %v2010_v56 }
 0xce1   : > { %v2006_v57 = vpop.xlane.xlu0 %2005 }
 0xce2   : > { %v2013_v58 = vsub.f32 %v1990_v50, %v2006_v57 }
 0xce3   : > { %v2009_v59 = vpop.xlane.xlu1 %2008 }
 0xce4   : > { %v2016_v60 = vmul.f32 1.442695, %v2013_v58  ;;  %v2014_v61 = vsub.f32 %v1993_v54, %v2009_v59 }
 0xce5   : > { %v2012_v62 = vpop.xlane.xlu0 %2011 }
 0xce6   : > { %3477 = vpow2.f32 %v2016_v60  ;;  %v2018_v63 = vmul.f32 1.442695, %v2014_v61  ;;  %v2015_v2 = vsub.f32 %v3224_v49, %v2012_v62 }
 0xce8   : > { %3479 = vpow2.f32 %v2018_v63  ;;  %v2020_v3 = vmul.f32 1.442695, %v2015_v2 }
 0xcea   : > { %3481 = vpow2.f32 %v2020_v3 }
 0xcf0   : > { %v3478_v1 = vpop.eup %3477 }
 0xcf1   : > { %v2022_v4 = vsel %vm911_vm7, %v3478_v1, 0.0 }
 0xcf2   : > { %v3480_v38 = vpop.eup %3479  ;;  %2023 = vadd.xlane.f32.xlu0 %v2022_v4 }
 0xcf3   : > { %v2025_v8 = vsel %vm911_vm7, %v3480_v38, 0.0 }
 0xcf4   : > { %v3482_v7 = vpop.eup %3481 }
 0xcf5   : > { %v2028_v31 = vsel %vm918_vm8, %v3482_v7, 0.0 }
 0xcf6   : > { %2029 = vadd.xlane.f32.xlu1 %v2028_v31  ;;  %2026 = vadd.xlane.f32.xlu0 %v2025_v8 }
 0xd07   : > { %2044 = vrot.lane.b32.xlu1 %v3934_v0, %s3543_s16 }
 0xd0b   : > { %2108 = vrot.lane.b32.xlu1 %v3807_v17, %s3544_s15 }
 0xd0c   : > { %2042 = vrot.lane.b32.xlu0 %v3807_v17, %s3543_s16 }
 0xd0f   : > { %2110 = vrot.lane.b32.xlu1 %v3934_v0, %s3544_s15 }
 0xd10   : > { %2104 = vrot.lane.b32.xlu0 %v3809_v19, %s3545_s19 }
 0xd13   : > { %2106 = vrot.lane.b32.xlu1 %v3948_v20, %s3545_s19  ;;  %s4310_s19 = sld [smem:[#allocation7_spill]] (!%p2990_p5) }
 0xd7f   : > { %v2024_v6 = vpop.xlane.xlu0 %2023 }
 0xd80   : > { %3483 = vrcp.f32 %v2024_v6 }
 0xd83   : > { %v2027_v9 = vpop.xlane.xlu0 %2026  ;;  %v2030_v11 = vpop.xlane.xlu1 %2029 }
 0xd84   : > { %3485 = vrcp.f32 %v2027_v9 }
 0xd85   : > { %3487 = vrcp.f32 %v2030_v11 }
 0xd87   : > { %v2043_v12 = vpop.permute.xlu0 %2042  ;;  %v2045_v13 = vpop.permute.xlu1 %2044 }
 0xd88   : > { %v2054_v14 = vand.u32 %v2045_v13, %v3876_v53  ;;  %3226 = vmatprep.subr.bf16.mxu1 %v2043_v12 }
 0xd89   : > { %3227 = vmatpush3.bf16.msra.mxu1 %v2043_v12 }
 0xd8a   : > { %3228 = vmatprep.subr.bf16.mxu1 %v2054_v14  ;;  %v3484_v5 = vpop.eup %3483 }
 0xd8b   : > { %v2109_v15 = vpop.permute.xlu1 %2108  ;;  %v2037_v16 = vmul.f32 %v3484_v5, %v3478_v1  ;;  %v2105_v47 = vpop.permute.xlu0 %2104 }
 0xd8c   : > { %v2119_v49 = vsel %vm850_vm5, %v2109_v15, 0 }
 0xd8d   : > { %3229 = vmatpush3.bf16.msra.mxu1 %v2054_v14 }
 0xd8e   : > { %v3486_v19 = vpop.eup %3485  ;;  %3324 = vmatprep.subr.msk.bf16.mxu1 %vm850_vm5, %v2109_v15 }
 0xd8f   : > { %v3488_v20 = vpop.eup %3487  ;;  %v2038_v18 = vmul.f32 %v3486_v19, %v3480_v38  ;;  %v2111_v50 = vpop.permute.xlu1 %2110 }
 0xd90   : > { %v2039_v43 = vmul.f32 %v3488_v20, %v3482_v7  ;;  %v2122_v51 = vsel %vm850_vm5, %v2111_v50, 0 }
 0xd91   : > { %v2040_v45 = vpack.c.bf16 %v2038_v18, %v2037_v16 }
 0xd92   : > { %v2041_v10 = vpack.c.bf16 %v2039_v43, %v2039_v43 }
 0xd93   : > { %3230 = vmatprep.mubr.msk.bf16.mxu1 %vm911_vm7, %v2040_v45  ;;  %v2107_v52 = vpop.permute.xlu1 %2106  ;;  %v3383_v45 = vld [vmem:[%s4308_s28] sm:$0xff]  }
 0xd94   : > { %3231 = vmatmul.mubr.msk.bf16.vlgmr.msra.gmra.mrb[40].mxu1 %vm911_vm7, %v2041_v10 }
 0xd95   : > { %3238 = vmatprep.mubr.msk.bf16.mxu1 %vm850_vm5, %v2105_v47 }
 0xd96   : > { %3235 = vmatpush3.bf16.xpose.msra.mxu1 %v2119_v49 }
 0xd97   : > { %3325 = vmatprep.subr.msk.bf16.mxu1 %vm850_vm5, %v2111_v50 }
 0xd9e   : > { %3237 = vmatpush3.bf16.xpose.msra.mxu1 %v2122_v51 }
 0xd9f   : > { %3266 = vmatprep.subr.bf16.mxu1 %v3534_v39 }
 0xda5   : > { %3239 = vmatmul.mubr.msk.bf16.vlgmr.msra.gmra.mrb[44].mxu1 %vm850_vm5, %v2107_v52 }
 0xda6   : > { %3270 = vmatprep.mubr.msk.bf16.mxu1 %vm3535_vm4, %v3534_v39 }
 0xe67   : > { %v4058_v54 = vpop.f32.mrb[40].mxu1 }
 0xe68   : > { %v2090_v55 = vpop.f32.mrb[41].mxu1 }
 0xe69   : > { %v3233_v56 = vpop.f32.mrb[42].mxu1 }
 0xe6a   : > { %v2093_v57 = vpop.f32.mrb[43].mxu1  ;;  %v3384_v56 = vld [vmem:[%s4308_s28 + $0x8] sm:$0xff]  }
 0xe6b   : > { %v3371_v58 = vpack.i.bf16 %v2093_v57, %v2090_v55 }
 0xe78   : > { %v3240_v59 = vpop.f32.mrb[44].mxu1 }
 0xe79   : > { %v2158_v60 = vpop.f32.mrb[45].mxu1  ;;  %v2178_v3 = vsel %vm918_vm8, %v3240_v59, -inf }
 0xe7a   : > { %v3241_v61 = vpop.f32.mrb[46].mxu1  ;;  %v2172_v62 = vsel %vm911_vm7, %v2158_v60, -inf }
 0xe7b   : > { %2173 = vmax.xlane.f32.xlu0 %v2172_v62  ;;  %v2161_v63 = vpop.f32.mrb[47].mxu1 }
 0xe7c   : > { %v2175_v2 = vsel %vm911_vm7, %v2161_v63, -inf }
 0xe7d   : > { %2176 = vmax.xlane.f32.xlu1 %v2175_v2 }
 0xe7f   : > { %2179 = vmax.xlane.f32.xlu0 %v2178_v3  ;;  %v4121_v3 = vld [vmem:[%s4309_s25] ss:$0 sm:$0xff] }
 0xf08   : > { %v2174_v1 = vpop.xlane.xlu0 %2173 }
 0xf09   : > { %v2181_v4 = vsub.f32 %v2158_v60, %v2174_v1 }
 0xf0a   : > { %v2177_v38 = vpop.xlane.xlu1 %2176 }
 0xf0b   : > { %v2184_v7 = vmul.f32 1.442695, %v2181_v4  ;;  %v2182_v31 = vsub.f32 %v2161_v63, %v2177_v38  ;;  %v3521_v4 = vld [vmem:[#allocation2 + $0x8] sm:$0xff] }
 0xf0c   : > { %v2180_v8 = vpop.xlane.xlu0 %2179 }
 0xf0d   : > { %3489 = vpow2.f32 %v2184_v7  ;;  %v2186_v6 = vmul.f32 1.442695, %v2182_v31  ;;  %v2183_v9 = vsub.f32 %v3240_v59, %v2180_v8  ;;  %v3522_v31 = vld [vmem:[#allocation2] sm:$0xff] }
 0xf0f   : > { %3491 = vpow2.f32 %v2186_v6  ;;  %v2188_v11 = vmul.f32 1.442695, %v2183_v9 }
 0xf11   : > { %3493 = vpow2.f32 %v2188_v11 }
 0xf17   : > { %v3490_v12 = vpop.eup %3489 }
 0xf18   : > { %v2190_v13 = vsel %vm911_vm7, %v3490_v12, 0.0 }
 0xf19   : > { %v3492_v14 = vpop.eup %3491  ;;  %2191 = vadd.xlane.f32.xlu0 %v2190_v13 }
 0xf1a   : > { %v2193_v19 = vsel %vm911_vm7, %v3492_v14, 0.0 }
 0xf1b   : > { %v3494_v5 = vpop.eup %3493 }
 0xf1c   : > { %v2196_v15 = vsel %vm918_vm8, %v3494_v5, 0.0 }
 0xf1d   : > { %2197 = vadd.xlane.f32.xlu1 %v2196_v15  ;;  %2194 = vadd.xlane.f32.xlu0 %v2193_v19 }
 0xf2e   : > { %2212 = vrot.lane.b32.xlu1 %v3934_v0, %s3547_s17 }
 0xf32   : > { %3352 = vrot.lane.b32.xlu1 %v3351_v34, %s3548_s21 }
 0xf33   : > { %2210 = vrot.lane.b32.xlu0 %v3807_v17, %s3547_s17 }
 0xf36   : > { %3357 = vrot.lane.b32.xlu1 %v3356_v41, %s3549_s22 }
 0xf37   : > { %3362 = vrot.lane.b32.xlu0 %v3361_v30, %s3550_s24 }
 0xf3a   : > { %3367 = vrot.lane.b32.xlu1 %v3366_v32, %s3548_s21 }
 0xf3b   : > { %3372 = vrot.lane.b32.xlu0 %v3371_v58, %s3549_s22 }
 0xf3e   : > { %1529 = vrot.lane.b32.xlu1 %v3905_v28, %s3548_s21 }
 0xf42   : > { %1541 = vrot.lane.b32.xlu1 %v3913_v35, %s3549_s22 }
 0xf46   : > { %2279 = vrot.lane.b32.xlu1 %v4020_v46, %s3548_s21 }
 0xfa6   : > { %v2192_v17 = vpop.xlane.xlu0 %2191 }
 0xfa7   : > { %3495 = vrcp.f32 %v2192_v17 }
 0xfaa   : > { %v2195_v29 = vpop.xlane.xlu0 %2194  ;;  %v2198_v33 = vpop.xlane.xlu1 %2197 }
 0xfab   : > { %3497 = vrcp.f32 %v2195_v29 }
 0xfac   : > { %3499 = vrcp.f32 %v2198_v33 }
 0xfae   : > { %v2211_v34 = vpop.permute.xlu0 %2210  ;;  %v2213_v36 = vpop.permute.xlu1 %2212 }
 0xfaf   : > { %v2222_v40 = vand.u32 %v2213_v36, %v3876_v53  ;;  %3242 = vmatprep.subr.bf16.mxu0 %v2211_v34 }
 0xfb0   : > { %3243 = vmatpush3.bf16.msra.mxu0 %v2211_v34 }
 0xfb1   : > { %3244 = vmatprep.subr.bf16.mxu0 %v2222_v40  ;;  %v3496_v28 = vpop.eup %3495 }
 0xfb2   : > { %v3353_v41 = vpop.permute.xlu1 %3352  ;;  %v3363_v22 = vpop.permute.xlu0 %3362  ;;  %v2205_v42 = vmul.f32 %v3496_v28, %v3490_v12 }
 0xfb3   : > { %v3355_v0 = vunpack.i.h.bf16 %v3353_v41  ;;  %v3354_v26 = vunpack.i.l.bf16 %v3353_v41  ;;  %v3365_v20 = vunpack.i.h.bf16 %v3363_v22  ;;  %v3364_v10 = vunpack.i.l.bf16 %v3363_v22 }
 0xfb4   : > { %3245 = vmatpush3.bf16.msra.mxu0 %v2222_v40 }
 0xfb5   : > { %v3498_v35 = vpop.eup %3497  ;;  %3250 = vmatprep.subr.bf16.mxu0 %v3534_v39  ;;  %v1559_v16 = vsel %vm850_vm5, %v3903_v27, %v3355_v0  ;;  %v1558_v47 = vsel %vm850_vm5, %v3901_v25, %v3354_v26 }
 0xfb6   : > { %v3500_v30 = vpop.eup %3499  ;;  %v3358_v46 = vpop.permute.xlu1 %3357  ;;  %v2206_v48 = vmul.f32 %v3498_v35, %v3492_v14 }
 0xfb7   : > { %v2207_v32 = vmul.f32 %v3500_v30, %v3494_v5  ;;  %v3360_v53 = vunpack.i.h.bf16 %v3358_v46  ;;  %v3359_v18 = vunpack.i.l.bf16 %v3358_v46  ;;  %v3373_v13 = vpop.permute.xlu0 %3372 }
 0xfb8   : > { %v2208_v43 = vpack.c.bf16 %v2206_v48, %v2205_v42  ;;  %v3375_v19 = vunpack.i.h.bf16 %v3373_v13  ;;  %v3374_v17 = vunpack.i.l.bf16 %v3373_v13 }
 0xfb9   : > { %v1563_v49 = vsel %vm1561_vm10, %v1559_v16, %v3360_v53  ;;  %v2209_v50 = vpack.c.bf16 %v2207_v32, %v2207_v32  ;;  %v1562_v51 = vsel %vm1561_vm10, %v1558_v47, %v3359_v18 }
 0xfba   : > { %v1567_v52 = vsel %vm1565_vm11, %v1563_v49, %v3365_v20  ;;  %3246 = vmatprep.mubr.msk.bf16.mxu0 %vm911_vm7, %v2208_v43  ;;  %v1566_v55 = vsel %vm1565_vm11, %v1562_v51, %v3364_v10  ;;  %v3368_v6 = vpop.permute.xlu1 %3367 }
 0xfbb   : > { %3247 = vmatmul.mubr.msk.bf16.vlgmr.msra.gmra.mrb[24].mxu0 %vm911_vm7, %v2209_v50  ;;  %v2329_v27 = vpack.c.bf16 %v1567_v52, %v1566_v55  ;;  %v3370_v11 = vunpack.i.h.bf16 %v3368_v6  ;;  %v3369_v12 = vunpack.i.l.bf16 %v3368_v6 }
 0xfbc   : > { %3251 = vmatpush3.bf16.msra.mxu0 %v3383_v45  ;;  %3254 = vmatprep.mubr.msk.bf16.mxu0 %vm3535_vm4, %v3534_v39 }
 0xfbd   : > { %3252 = vmatprep.subr.bf16.mxu0 %v3534_v39  ;;  %v2309_v14 = vsel %vm850_vm5, %v3991_v44, %v3370_v11  ;;  %v2308_v5 = vsel %vm850_vm5, %v3989_v37, %v3369_v12 }
 0xfbe   : > { %v1530_v9 = vpop.permute.xlu1 %1529  ;;  %v2311_v36 = vsel %vm1561_vm10, %v2308_v5, %v3374_v17  ;;  %v2312_v40 = vsel %vm1561_vm10, %v2309_v14, %v3375_v19  ;;  %v3385_v14 = vld [vmem:[%s3673_s3] sm:$0xff]  }
 0xfbf   : > { %v1560_v41 = vsel %vm850_vm5, %v3899_v24, %v1530_v9  ;;  %3267 = vmatpush3.bf16.msra.mxu1 %v3385_v14 }
 0xfc0   : > { %3253 = vmatpush3.bf16.msra.mxu0 %v3384_v56  ;;  %3268 = vmatprep.subr.bf16.mxu1 %v3534_v39 }
 0xfc1   : > { %3282 = vmatprep.subr.bf16.mxu0 %v3534_v39 }
 0xfc2   : > { %v1542_v15 = vpop.permute.xlu1 %1541 }
 0xfc3   : > { %3255 = vmatmul.mubr.msk.bf16.vlgmr.msra.gmra.mrb[28].mxu0 %vm661_vm2, %v2329_v27  ;;  %v1564_v0 = vsel %vm1561_vm10, %v1560_v41, %v1542_v15 }
 0xfc4   : > { %3258 = vmatprep.mubr.msk.bf16.mxu0 %vm3535_vm4, %v3534_v39 }
 0xfc6   : > { %v2280_v26 = vpop.permute.xlu1 %2279 }
 0xfc7   : > { %v2310_v24 = vsel %vm850_vm5, %v3987_v23, %v2280_v26 }
0x108e   : > { %v3248_v25 = vpop.f32.mrb[24].mxu0 }
0x108f   : > { %2303 = vrot.lane.b32.xlu1 %v3248_v25, %s3550_s24  ;;  %v2258_v57 = vpop.f32.mrb[25].mxu0  ;;  %v3523_v25 = vld [vmem:[#allocation2 + $0x10] sm:$0xff] }
0x1090   : > { %v3249_v58 = vpop.f32.mrb[26].mxu0 }
0x1091   : > { %v2261_v59 = vpop.f32.mrb[27].mxu0 }
0x1092   : > { %v3376_v60 = vpack.i.bf16 %v2261_v59, %v2258_v57 }
0x1094   : > { %3377 = vrot.lane.b32.xlu0 %v3376_v60, %s3550_s24 }
0x1096   : > { %v2393_v61 = vpop.f32.mrb[28].mxu0 }
0x1097   : > { %v3256_v62 = vpop.f32.mrb[29].mxu0  ;;  %v2394_v7 = vadd.f32 %v4121_v3, %v2393_v61  ;;  %v3524_v61 = vld [vmem:[#allocation2 + $0x18] sm:$0xff] }
0x1098   : > { %1553 = vrot.lane.b32.xlu0 %v3952_v21, %s3550_s24  ;;  %v2396_v63 = vpop.f32.mrb[30].mxu0 }
0x1099   : > { %v3257_v2 = vpop.f32.mrb[31].mxu0  ;;  %v2397_v1 = vadd.f32 %v4121_v3, %v2396_v63  ;;  %v4129_v8 = vadd.f32 %v3522_v31, %v2394_v7 }
0x109b   : > { %v4124_v38 = vadd.f32 %v3521_v4, %v2397_v1 }
0x109c   : > { %2291 = vrot.lane.b32.xlu0 %v4058_v54, %s3549_s22  ;;  %v2420_v54 = vsel %vm661_vm2, %v4129_v8, 0.0 }
0x109d   : > { %v2423_v21 = vsel %vm661_vm2, %v4124_v38, 0.0 }
0x10b3   : > { %2424 = vadd.xlane.f32.xlu1 %v2423_v21 }
0x10bb   : > { %2421 = vadd.xlane.f32.xlu0 %v2420_v54  ;;  %v3525_v54 = vld [vmem:[#allocation2 + $0x20] sm:$0x3] }
0x1101   : > { %v2304_v53 = vpop.permute.xlu1 %2303 }
0x1106   : > { %v3378_v29 = vpop.permute.xlu0 %3377 }
0x1107   : > { %v3380_v33 = vunpack.i.h.bf16 %v3378_v29  ;;  %v3379_v34 = vunpack.i.l.bf16 %v3378_v29 }
0x1109   : > { %v2314_v28 = vsel %vm1565_vm11, %v2311_v36, %v3379_v34  ;;  %v2315_v44 = vsel %vm1565_vm11, %v2312_v40, %v3380_v33 }
0x110a   : > { %v2320_v37 = vrot.slane %v2314_v28, 7  ;;  %v2321_v35 = vrot.slane %v2315_v44, 7  ;;  %v1554_v22 = vpop.permute.xlu0 %1553 }
0x110b   : > { %v1568_v30 = vsel %vm1565_vm11, %v1564_v0, %v1554_v22 }
0x110c   : > { %v2322_v46 = vsel %vm962_vm9, %v2320_v37, %v2321_v35  ;;  %v2328_v42 = vsel %vm962_vm9, %v1568_v30, %v2320_v37 }
0x110d   : > { %v2330_v48 = vpack.c.bf16 %v2322_v46, %v2328_v42 }
0x110e   : > { %v2292_v32 = vpop.permute.xlu0 %2291 }
0x110f   : > { %v2313_v20 = vsel %vm1561_vm10, %v2310_v24, %v2292_v32  ;;  %3259 = vmatmul.mubr.msk.bf16.gmra.mrb[32].mxu0 %vm661_vm2, %v2330_v48 }
0x1110   : > { %v2316_v16 = vsel %vm1565_vm11, %v2313_v20, %v2304_v53  ;;  %3262 = vmatprep.mubr.msk.bf16.mxu0 %vm3535_vm4, %v3534_v39  ;;  %v2973_v53 = vld [vmem:[%s578_s13] ss:$0 sm:$0xff] }
0x1111   : > { %v2323_v18 = vrot.slane %v2316_v16, 7 }
0x1113   : > { %v2324_v43 = vsel %vm962_vm9, %v2321_v35, %v2323_v18 }
0x1114   : > { %v2331_v45 = vpack.c.bf16 %v2324_v43, %v2324_v43  ;;  %v2974_v43 = vld [vmem:[%s581_s20] ss:$0 sm:$0xff] }
0x1117   : > { %3263 = vmatmul.mubr.msk.bf16.gmra.mrb[36].mxu0 %vm661_vm2, %v2331_v45 }
0x1118   : > { %3298 = vmatprep.mubr.msk.bf16.mxu0 %vm3535_vm4, %v3534_v39 }
0x1140   : > { %v2425_v27 = vpop.xlane.xlu1 %2424 }
0x1141   : > { %v2436_v60 = vmul.f32 0.03125, %v2425_v27  ;;  %v3392_v27 = vld [vmem:[%s3683_s14 + $0x28] sm:$0xff]  }
0x1143   : > { %v2441_v1 = vsub.f32 %v4124_v38, %v2436_v60 }
0x1145   : > { %v2446_v12 = vmul.f32 %v2441_v1, %v2441_v1 }
0x1147   : > { %v2453_v13 = vsel %vm661_vm2, %v2446_v12, 0.0 }
0x1148   : > { %v2422_v23 = vpop.xlane.xlu0 %2421 }
0x1149   : > { %v2435_v10 = vmul.f32 0.03125, %v2422_v23 }
0x114b   : > { %v4159_v47 = vsub.f32 %v4129_v8, %v2435_v10 }
0x114d   : > { %v2445_v49 = vmul.f32 %v4159_v47, %v4159_v47 }
0x114f   : > { %v2450_v50 = vsel %vm661_vm2, %v2445_v49, 0.0  ;;  %v3387_v49 = vld [vmem:[%s3683_s14] sm:$0xff]  }
0x1150   : > { %2451 = vadd.xlane.f32.xlu1 %v2450_v50  ;;  %3283 = vmatpush3.bf16.msra.mxu0 %v3387_v49  ;;  %v3388_v50 = vld [vmem:[%s3683_s14 + $0x8] sm:$0xff]  }
0x1151   : > { %3284 = vmatprep.subr.bf16.mxu0 %v3534_v39 }
0x1154   : > { %3285 = vmatpush3.bf16.msra.mxu0 %v3388_v50 }
0x1155   : > { %3286 = vmatprep.subr.bf16.mxu0 %v3534_v39 }
0x11dd   : > { %v2452_v5 = vpop.xlane.xlu1 %2451 }
0x11de   : > { %v2465_v17 = vmul.f32 0.03125, %v2452_v5 }
0x11e0   : > { %v2470_v40 = vadd.f32 1e-05, %v2465_v17 }
0x11e2   : > { %v2401_v51 = vpop.f32.mrb[32].mxu0  ;;  %3501 = vrsqrt.f32 %v2470_v40 }
0x11e3   : > { %v2402_v52 = vadd.f32 %v4121_v3, %v2401_v51  ;;  %v3260_v55 = vpop.f32.mrb[33].mxu0  ;;  %v3389_v51 = vld [vmem:[%s3683_s14 + $0x10] sm:$0xff]  }
0x11e4   : > { %v2404_v56 = vpop.f32.mrb[34].mxu0  ;;  %3287 = vmatpush3.bf16.msra.mxu0 %v3389_v51  ;;  %v3391_v55 = vld [vmem:[%s3683_s14 + $0x20] sm:$0xff]  }
0x11e5   : > { %v4165_v57 = vadd.f32 %v3523_v25, %v2402_v52  ;;  %v2405_v58 = vadd.f32 %v4121_v3, %v2404_v56  ;;  %v3261_v59 = vpop.f32.mrb[35].mxu0  ;;  %3288 = vmatprep.subr.bf16.mxu0 %v3534_v39  ;;  %v3390_v52 = vld [vmem:[%s3683_s14 + $0x18] sm:$0xff]   ;;  %v3393_v56 = vld [vmem:[%s3683_s14 + $0x30] sm:$0xff]  }
0x11e6   : > { %v3394_v25 = vld [vmem:[%s3683_s14 + $0x38] sm:$0xff]  }
0x11e7   : > { %v4168_v62 = vadd.f32 %v3524_v61, %v2405_v58  ;;  %v2426_v63 = vsel %vm661_vm2, %v4165_v57, 0.0 }
0x11e8   : > { %2427 = vadd.xlane.f32.xlu0 %v2426_v63  ;;  %3289 = vmatpush3.bf16.msra.mxu0 %v3390_v52 }
0x11e9   : > { %v2429_v21 = vsel %vm661_vm2, %v4168_v62, 0.0  ;;  %3290 = vmatprep.subr.bf16.mxu0 %v3534_v39 }
0x11ea   : > { %v2409_v2 = vpop.f32.mrb[36].mxu0 }
0x11eb   : > { %v2410_v4 = vadd.f32 %v4121_v3, %v2409_v2  ;;  %v3264_v7 = vpop.f32.mrb[37].mxu0  ;;  %v3386_v3 = vld [vmem:[%s3673_s3 + $0x8] sm:$0xff]  }
0x11ec   : > { %2430 = vadd.xlane.f32.xlu0 %v2429_v21  ;;  %v2412_v31 = vpop.f32.mrb[38].mxu0  ;;  %3269 = vmatpush3.bf16.msra.mxu1 %v3386_v3  ;;  %v3502_v24 = vpop.eup %3501 }
0x11ed   : > { %v4176_v6 = vadd.f32 %v3525_v54, %v2410_v4  ;;  %v3265_v9 = vpop.f32.mrb[39].mxu0  ;;  %v2480_v32 = vmul.f32 %v3502_v24, %v4159_v47  ;;  %3291 = vmatpush3.bf16.msra.mxu0 %v3391_v55 }
0x11ee   : > { %3292 = vmatprep.subr.bf16.mxu0 %v3534_v39 }
0x11ef   : > { %v2432_v11 = vsel %vm674_vm3, %v4176_v6, 0.0  ;;  %v2491_v16 = vmul.f32 %v2973_v53, %v2480_v32 }
0x11f0   : > { %2433 = vadd.xlane.f32.xlu0 %v2432_v11 }
0x11f1   : > { %v2502_v23 = vadd.f32 %v2974_v43, %v2491_v16  ;;  %3293 = vmatpush3.bf16.msra.mxu0 %v3392_v27 }
0x11f2   : > { %3294 = vmatprep.subr.bf16.mxu0 %v3534_v39 }
0x11f4   : > { %2454 = vadd.xlane.f32.xlu0 %v2453_v13 }
0x11f5   : > { %3295 = vmatpush3.bf16.msra.mxu0 %v3393_v56 }
0x11f6   : > { %3296 = vmatprep.subr.bf16.mxu0 %v3534_v39 }
0x11f9   : > { %3297 = vmatpush3.bf16.msra.mxu0 %v3394_v25 }
0x1275   : > { %v2428_v15 = vpop.xlane.xlu0 %2427 }
0x1276   : > { %v2437_v19 = vmul.f32 0.03125, %v2428_v15 }
0x1278   : > { %v4185_v29 = vsub.f32 %v4165_v57, %v2437_v19 }
0x1279   : > { %v2431_v33 = vpop.xlane.xlu0 %2430 }
0x127a   : > { %v2438_v34 = vmul.f32 0.03125, %v2431_v33  ;;  %v2447_v36 = vmul.f32 %v4185_v29, %v4185_v29  ;;  %v2975_v33 = vld [vmem:[%s589_s5] ss:$0 sm:$0xff] }
0x127c   : > { %v4190_v41 = vsub.f32 %v4168_v62, %v2438_v34  ;;  %v2456_v28 = vsel %vm661_vm2, %v2447_v36, 0.0 }
0x127d   : > { %2457 = vadd.xlane.f32.xlu1 %v2456_v28  ;;  %v2434_v44 = vpop.xlane.xlu0 %2433 }
0x127e   : > { %v2439_v0 = vmul.f32 0.03125, %v2434_v44  ;;  %v2448_v37 = vmul.f32 %v4190_v41, %v4190_v41 }
0x1280   : > { %v4196_v35 = vsub.f32 %v4176_v6, %v2439_v0  ;;  %v2459_v22 = vsel %vm661_vm2, %v2448_v37, 0.0 }
0x1281   : > { %2460 = vadd.xlane.f32.xlu0 %v2459_v22  ;;  %v2455_v26 = vpop.xlane.xlu0 %2454 }
0x1282   : > { %v2466_v30 = vmul.f32 0.03125, %v2455_v26  ;;  %v2449_v46 = vmul.f32 %v4196_v35, %v4196_v35 }
0x1284   : > { %v2471_v42 = vadd.f32 1e-05, %v2466_v30  ;;  %v2462_v48 = vsel %vm674_vm3, %v2449_v46, 0.0 }
0x1285   : > { %2463 = vadd.xlane.f32.xlu1 %v2462_v48 }
0x1286   : > { %3503 = vrsqrt.f32 %v2471_v42 }
0x1290   : > { %v3504_v20 = vpop.eup %3503 }
0x1291   : > { %v2481_v18 = vmul.f32 %v3504_v20, %v2441_v1 }
0x1293   : > { %v2492_v45 = vmul.f32 %v2973_v53, %v2481_v18 }
0x1295   : > { %v2503_v10 = vadd.f32 %v2974_v43, %v2492_v45 }
0x1297   : > { %v2507_v47 = vpack.c.bf16 %v2503_v10, %v2502_v23 }
0x1299   : > { %3271 = vmatmul.mubr.msk.bf16.vlgmr.msra.gmra.mrb[48].mxu1 %vm661_vm2, %v2507_v47 }
0x129a   : > { %3274 = vmatprep.mubr.msk.bf16.mxu1 %vm3535_vm4, %v3534_v39 }
0x130a   : > { %v2458_v58 = vpop.xlane.xlu1 %2457 }
0x130b   : > { %v2467_v59 = vmul.f32 0.03125, %v2458_v58 }
0x130d   : > { %v2472_v60 = vadd.f32 1e-05, %v2467_v59 }
0x130e   : > { %v2461_v61 = vpop.xlane.xlu0 %2460 }
0x130f   : > { %3505 = vrsqrt.f32 %v2472_v60  ;;  %v2468_v63 = vmul.f32 0.03125, %v2461_v61 }
0x1311   : > { %v2473_v2 = vadd.f32 1e-05, %v2468_v63 }
0x1312   : > { %v2464_v1 = vpop.xlane.xlu1 %2463 }
0x1313   : > { %3507 = vrsqrt.f32 %v2473_v2  ;;  %v2469_v4 = vmul.f32 0.03125, %v2464_v1 }
0x1315   : > { %v2474_v7 = vadd.f32 1e-05, %v2469_v4 }
0x1317   : > { %3509 = vrsqrt.f32 %v2474_v7 }
0x1319   : > { %v3506_v21 = vpop.eup %3505 }
0x131a   : > { %v2482_v31 = vmul.f32 %v3506_v21, %v4185_v29 }
0x131c   : > { %v2493_v11 = vmul.f32 %v2973_v53, %v2482_v31 }
0x131d   : > { %v3508_v54 = vpop.eup %3507 }
0x131e   : > { %v2483_v9 = vmul.f32 %v3508_v54, %v4190_v41  ;;  %v2504_v3 = vadd.f32 %v2974_v43, %v2493_v11  ;;  %v2981_v54 = vld [vmem:[%s597_s18] ss:$0 sm:$0xff] }
0x1320   : > { %v2494_v12 = vmul.f32 %v2973_v53, %v2483_v9 }
0x1321   : > { %v3510_v13 = vpop.eup %3509 }
0x1322   : > { %v2484_v14 = vmul.f32 %v3510_v13, %v4196_v35  ;;  %v2505_v5 = vadd.f32 %v2974_v43, %v2494_v12 }
0x1324   : > { %v2508_v15 = vpack.c.bf16 %v2505_v5, %v2504_v3  ;;  %v2495_v19 = vmul.f32 %v2973_v53, %v2484_v14 }
0x1326   : > { %3275 = vmatmul.mubr.msk.bf16.gmra.mrb[52].mxu1 %vm661_vm2, %v2508_v15  ;;  %v2506_v17 = vadd.f32 %v2974_v43, %v2495_v19 }
0x1327   : > { %3278 = vmatprep.mubr.msk.bf16.mxu1 %vm3535_vm4, %v3534_v39 }
0x1328   : > { %v2509_v29 = vpack.c.bf16 %v2506_v17, %v2506_v17 }
0x132e   : > { %3279 = vmatmul.mubr.msk.bf16.gmra.mrb[56].mxu1 %vm661_vm2, %v2509_v29 }
0x136c   : > { %v2571_v34 = vpop.f32.mrb[48].mxu1 }
0x136d   : > { %v2572_v36 = vadd.f32 %v2975_v33, %v2571_v34  ;;  %v3272_v40 = vpop.f32.mrb[49].mxu1 }
0x136e   : > { %v2574_v41 = vpop.f32.mrb[50].mxu1 }
0x136f   : > { %v2598_v28 = vmul.f32 0.70710677, %v2572_v36  ;;  %v2575_v44 = vadd.f32 %v2975_v33, %v2574_v41  ;;  %v3273_v0 = vpop.f32.mrb[51].mxu1  ;;  %v2593_v30 = vmul.f32 0.5, %v2572_v36 }
0x1371   : > { %3511 = verf.f32 %v2598_v28  ;;  %v2599_v37 = vmul.f32 0.70710677, %v2575_v44  ;;  %v2594_v46 = vmul.f32 0.5, %v2575_v44 }
0x1373   : > { %3513 = verf.f32 %v2599_v37 }
0x137b   : > { %v3512_v35 = vpop.eup %3511 }
0x137c   : > { %v2608_v22 = vadd.f32 1.0, %v3512_v35 }
0x137d   : > { %v3514_v26 = vpop.eup %3513 }
0x137e   : > { %v2609_v42 = vadd.f32 1.0, %v3514_v26  ;;  %v2613_v48 = vmul.f32 %v2608_v22, %v2593_v30 }
0x1380   : > { %v2614_v24 = vmul.f32 %v2609_v42, %v2594_v46 }
0x1382   : > { %v2618_v32 = vpack.c.bf16 %v2614_v24, %v2613_v48 }
0x1384   : > { %3299 = vmatmul.mubr.bf16.vlgmr.msra.gmra.mrb[40].mxu0 %v2618_v32 }
0x1385   : > { %3302 = vmatprep.mubr.msk.bf16.mxu0 %vm3535_vm4, %v3534_v39 }
0x13f9   : > { %v2579_v53 = vpop.f32.mrb[52].mxu1 }
0x13fa   : > { %v2580_v20 = vadd.f32 %v2975_v33, %v2579_v53  ;;  %v3276_v16 = vpop.f32.mrb[53].mxu1 }
0x13fb   : > { %v2582_v18 = vpop.f32.mrb[54].mxu1 }
0x13fc   : > { %v2600_v43 = vmul.f32 0.70710677, %v2580_v20  ;;  %v2583_v45 = vadd.f32 %v2975_v33, %v2582_v18  ;;  %v3277_v23 = vpop.f32.mrb[55].mxu1  ;;  %v2595_v58 = vmul.f32 0.5, %v2580_v20 }
0x13fe   : > { %3515 = verf.f32 %v2600_v43  ;;  %v2601_v10 = vmul.f32 0.70710677, %v2583_v45  ;;  %v2596_v59 = vmul.f32 0.5, %v2583_v45 }
0x1400   : > { %3517 = verf.f32 %v2601_v10 }
0x1401   : > { %v2587_v47 = vpop.f32.mrb[56].mxu1 }
0x1402   : > { %v2588_v49 = vadd.f32 %v2975_v33, %v2587_v47  ;;  %v3280_v50 = vpop.f32.mrb[57].mxu1 }
0x1403   : > { %v2590_v51 = vpop.f32.mrb[58].mxu1 }
0x1404   : > { %v2602_v52 = vmul.f32 0.70710677, %v2588_v49  ;;  %v3281_v55 = vpop.f32.mrb[59].mxu1  ;;  %v2597_v4 = vmul.f32 0.5, %v2588_v49 }
0x1406   : > { %3519 = verf.f32 %v2602_v52 }
0x1408   : > { %v3516_v27 = vpop.eup %3515 }
0x1409   : > { %v2610_v56 = vadd.f32 1.0, %v3516_v27 }
0x140a   : > { %v3518_v25 = vpop.eup %3517 }
0x140b   : > { %v2611_v60 = vadd.f32 1.0, %v3518_v25  ;;  %v2615_v61 = vmul.f32 %v2610_v56, %v2595_v58 }
0x140d   : > { %v2616_v63 = vmul.f32 %v2611_v60, %v2596_v59 }
0x140f   : > { %v2619_v2 = vpack.c.bf16 %v2616_v63, %v2615_v61 }
0x1410   : > { %v3520_v1 = vpop.eup %3519 }
0x1411   : > { %v2612_v7 = vadd.f32 1.0, %v3520_v1  ;;  %3303 = vmatmul.mubr.bf16.gmra.mrb[44].mxu0 %v2619_v2 }
0x1412   : > { %3306 = vmatprep.mubr.msk.bf16.mxu0 %vm3535_vm4, %v3534_v39 }
0x1413   : > { %v2617_v21 = vmul.f32 %v2612_v7, %v2597_v4 }
0x1415   : > { %v2620_v31 = vpack.c.bf16 %v2617_v21, %v2617_v21 }
0x1419   : > { %3307 = vmatmul.mubr.bf16.gmra.mrb[48].mxu0 %v2620_v31 }
0x1457   : > { %v2709_v9 = vpop.f32.mrb[40].mxu0 }
0x1458   : > { %v2710_v11 = vadd.f32 %v2981_v54, %v2709_v9  ;;  %v3300_v12 = vpop.f32.mrb[41].mxu0 }
0x1459   : > { %v2712_v13 = vpop.f32.mrb[42].mxu0 }
0x145a   : > { %v2731_v14 = vadd.f32 %v2710_v11, %v4129_v8  ;;  %v2713_v3 = vadd.f32 %v2981_v54, %v2712_v13  ;;  %v3301_v5 = vpop.f32.mrb[43].mxu0 }
0x145c   : > { %2736 = vst.msk [vmem:[#allocation2] sm:$0xff] %vm661_vm2, %v2731_v14  ;;  %v2732_v39 = vadd.f32 %v2713_v3, %v4124_v38 }
0x145e   : > { %2737 = vst.msk [vmem:[#allocation2 + $0x8] sm:$0xff] %vm661_vm2, %v2732_v39 }
0x1465   : > { %v2746_v37 = vld [vmem:[#allocation2 + $0x8] sm:$0xff] (!%p2990_p5) }
0x14e4   : > { %v2717_v15 = vpop.f32.mrb[44].mxu0 }
0x14e5   : > { %v2718_v19 = vadd.f32 %v2981_v54, %v2717_v15  ;;  %v3304_v17 = vpop.f32.mrb[45].mxu0 }
0x14e6   : > { %v2720_v29 = vpop.f32.mrb[46].mxu0 }
0x14e7   : > { %v2733_v33 = vadd.f32 %v2718_v19, %v4165_v57  ;;  %v2721_v34 = vadd.f32 %v2981_v54, %v2720_v29  ;;  %v3305_v36 = vpop.f32.mrb[47].mxu0  ;;  %v2745_v57 = vld [vmem:[#allocation2] sm:$0xff] (!%p2990_p5) }
0x14e8   : > { %v3002_v22 = vpack.c.bf16 (!%p2990_p5), %v2745_v57, %v2745_v57 }
0x14e9   : > { %2738 = vst.msk [vmem:[#allocation2 + $0x10] sm:$0xff] %vm661_vm2, %v2733_v33  ;;  %v2734_v8 = vadd.f32 %v2721_v34, %v4168_v62  ;;  %v3003_v62 = vpack.c.bf16 (!%p2990_p5), %v2746_v37, %v2746_v37 }
0x14ea   : > { %2772 = vst.msk [vmem:[%s4310_s19] sm:$0xf] (!%p2990_p5), %vm2771_vm12, %v3002_v22 }
0x14eb   : > { %2739 = vst.msk [vmem:[#allocation2 + $0x18] sm:$0xff] %vm661_vm2, %v2734_v8  ;;  %2744 = sbr.rel (%p2990_p5) target bundleno = 5372 (0x14fc), region = 80 }
0x14ec   : > { %v2725_v40 = vpop.f32.mrb[48].mxu0  ;;  %2773 = vst.msk [vmem:[%s4310_s19 + $0x4] sm:$0xf] (!%p2990_p5), %vm2771_vm12, %v3003_v62 }
0x14ed   : > { %v2726_v41 = vadd.f32 %v2981_v54, %v2725_v40  ;;  %v3308_v28 = vpop.f32.mrb[49].mxu0 }
0x14ee   : > { %v2728_v38 = vpop.f32.mrb[50].mxu0 }
0x14ef   : > { %v2735_v44 = vadd.f32 %v2726_v41, %v4176_v6  ;;  %v3309_v0 = vpop.f32.mrb[51].mxu0 }
0x14f0   : > { %v2747_v35 = vld [vmem:[#allocation2 + $0x10] sm:$0xff] (!%p2990_p5) }
0x14f1   : > { %2740 = vst.msk [vmem:[#allocation2 + $0x20] sm:$0x3] %vm674_vm3, %v2735_v44  ;;  %v3004_v26 = vpack.c.bf16 (!%p2990_p5), %v2747_v35, %v2747_v35 }
0x14f2   : > { %v2748_v30 = vld [vmem:[#allocation2 + $0x18] sm:$0xff] }
0x14f3   : > { %v3005_v42 = vpack.c.bf16 %v2748_v30, %v2748_v30  ;;  %2774 = vst.msk [vmem:[%s4310_s19 + $0x8] sm:$0xf] %vm2771_vm12, %v3004_v26 }
0x14f5   : > { %2775 = vst.msk [vmem:[%s4310_s19 + $0xc] sm:$0xf] %vm2771_vm12, %v3005_v42 }
0x14f8   : > { %v2749_v46 = vld [vmem:[#allocation2 + $0x20] sm:$0x3] }
0x14f9   : > { %v3006_v48 = vpack.c.bf16 %v2749_v46, %v2749_v46 }
0x14fb   : > { %2777 = vst.msk [vmem:[%s4310_s19 + $0x10] sm:$0x1] %vm2776_vm13, %v3006_v48 }
0x14fc PF: > { %s4311_s25 = sld [smem:[#allocation3_spill]] }
0x1502   : > { %s23_s25 = sadd.s32 1, %s4311_s25  }
0x1503   : > { %p20_p6 = scmp.ge.s32.totalorder %s23_s25, 4  }
0x1505   :  { %22 = sbr.rel (!%p20_p6) target bundleno = 4 (0x4), region = 139 }

// kernel: cavmae_forward.10
= control target key start
LH: loop header
LB: loop body
LE: loop exit
PB: predicated region body
PF: predicated region fallthrough
CT: control target
= control target key end

     0   :  { %vm65_vm0 = vcmask 261120   ;;  %vm73_vm1 = vcmask 257024   ;;  %s3231_s24 = smov 96   ;;  %vm367_vm2 = vcmask 64512   ;;  %s3233_s25 = smov 120   ;;  %vm1168_vm3 = vcmask 1044480   ;;  %s4011_s0 = inlined_call_operand.vmem [shape: bf16[60,32], index: 0, kind: input, shape index: {}, may-alias: {0,13}]   ;;  %s4012_s3 = inlined_call_operand.vmem [shape: bf16[1,32,96], index: 3, kind: input, shape index: {}]   ;;  %s4013_s1 = inlined_call_operand.vmem [shape: f32[1,1,32], index: 1, kind: input, shape index: {}]   ;;  %s4014_s2 = inlined_call_operand.vmem [shape: f32[1,1,32], index: 2, kind: input, shape index: {}]   ;;  %s4015_s4 = inlined_call_operand.vmem [shape: f32[1,1,96], index: 4, kind: input, shape index: {}]   ;;  %s4016_s5 = inlined_call_operand.vmem [shape: bf16[1,32,32], index: 5, kind: input, shape index: {}]   ;;  %s4017_s6 = inlined_call_operand.vmem [shape: f32[1,1,32], index: 6, kind: input, shape index: {}]   ;;  %s4018_s9 = inlined_call_operand.vmem [shape: bf16[1,32,128], index: 9, kind: input, shape index: {}]   ;;  %s4019_s11 = inlined_call_operand.vmem [shape: bf16[1,128,32], index: 11, kind: input, shape index: {}]   ;;  %s4020_s7 = inlined_call_operand.vmem [shape: f32[1,1,32], index: 7, kind: input, shape index: {}]   ;;  %s4021_s8 = inlined_call_operand.vmem [shape: f32[1,1,32], index: 8, kind: input, shape index: {}]   ;;  %s4022_s10 = inlined_call_operand.vmem [shape: f32[1,1,128], index: 10, kind: input, shape index: {}]   ;;  %s4023_s12 = inlined_call_operand.vmem [shape: f32[1,1,32], index: 12, kind: input, shape index: {}]   ;;  %s4024_s13 = inlined_call_operand.vmem [shape: bf16[60,32], index: 13, kind: output, shape index: {}, may-alias: {0,13}]  }
   0x1   :  { %v2640_v0 = vld [vmem:[%s4011_s0] sm:$0xff]   ;;  %v2651_v1 = vld [vmem:[%s4011_s0 + $0x8] sm:$0xff]   ;;  %v2652_v14 = vld [vmem:[%s4011_s0 + $0x10] sm:$0xff]   ;;  %vm429_vm4 = vcmask 244736   ;;  %vm439_vm5 = vcmask 242688   ;;  %s3234_s26 = smov 64  }
   0x2   :  { %v2641_v2 = vunpack.c.l.bf16 %v2640_v0  ;;  %v2645_v3 = vunpack.c.l.bf16 %v2651_v1  ;;  %v2642_v4 = vunpack.c.h.bf16 %v2640_v0  ;;  %v2646_v5 = vunpack.c.h.bf16 %v2651_v1  ;;  %v55_v17 = vld [vmem:[%s4011_s0 + $0x18] sm:$0xf]  ;;  %v56_v18 = vld [vmem:[%s4011_s0 + $0x1c] sm:$0x3]  ;;  %v3033_v49 = vld [vmem:[%s4012_s3] sm:$0xff]   ;;  %s3235_s27 = smov 56  }
   0x3   :  { %v2649_v15 = vunpack.c.l.bf16 %v2652_v14  ;;  %v2650_v16 = vunpack.c.h.bf16 %v2652_v14  ;;  %v63_v19 = vunpack.c.l.bf16 %v55_v17  ;;  %v64_v20 = vunpack.c.l.bf16 %v56_v18  ;;  %2747 = vmatprep.subr.bf16.mxu1 %v3033_v49  ;;  %v3034_v50 = vld [vmem:[%s4012_s3 + $0x8] sm:$0xff]   ;;  %s3236_s28 = smov 80   ;;  %s3237_s29 = smov 112  }
   0x4   :  { %66 = vst.msk [vmem:[#allocation2] sm:$0xff] %vm65_vm0, %v2641_v2  ;;  %68 = vst.msk [vmem:[#allocation2 + $0x10] sm:$0xff] %vm65_vm0, %v2645_v3  ;;  %2748 = vmatpush3.bf16.msra.mxu1 %v3033_v49  ;;  %vm492_vm6 = vcmask 1046528   ;;  %s3238_s30 = smov 48   ;;  %s3239_s14 = smov 72   ;;  %vm1145_vm7 = vcmask 130048  }
   0x5   :  { %67 = vst.msk [vmem:[#allocation2 + $0x8] sm:$0xff] %vm65_vm0, %v2642_v4  ;;  %69 = vst.msk [vmem:[#allocation2 + $0x18] sm:$0xff] %vm65_vm0, %v2646_v5  ;;  %2749 = vmatprep.subr.bf16.mxu1 %v3034_v50  ;;  %s3240_s15 = smov 104   ;;  %s3241_s16 = smov 40   ;;  %vm1150_vm8 = vcmask 195584   ;;  %vm1970_vm9 = vcmask 1045504  }
   0x6   :  { %70 = vst.msk [vmem:[#allocation2 + $0x20] sm:$0xff] %vm65_vm0, %v2649_v15  ;;  %71 = vst.msk [vmem:[#allocation2 + $0x28] sm:$0xff] %vm65_vm0, %v2650_v16  ;;  %v2557_v16 = vld [vmem:[%s4013_s1] ss:$0 sm:$0xff]  ;;  %s3242_s17 = smov 8   ;;  %s3243_s0 = smov 16  }
   0x7   :  { %72 = vst.msk [vmem:[#allocation2 + $0x30] sm:$0xff] %vm65_vm0, %v63_v19  ;;  %s3244_s18 = smov 24   ;;  %vm2551_vm10 = vcmask 254976  }
   0x8   :  { %74 = vst.msk [vmem:[#allocation2 + $0x38] sm:$0xf] %vm73_vm1, %v64_v20  ;;  %2750 = vmatpush3.bf16.msra.mxu1 %v3034_v50 }
   0xb   :  { %v111_v6 = vld [vmem:[#allocation2] sm:$0xff]  ;;  %v113_v7 = vld [vmem:[#allocation2 + $0x10] sm:$0xff] }
   0xc   :  { %v112_v8 = vld [vmem:[#allocation2 + $0x8] sm:$0xff]  ;;  %v120_v9 = vsel %vm65_vm0, %v111_v6, 0.0  ;;  %v126_v10 = vsel %vm65_vm0, %v113_v7, 0.0  ;;  %v114_v11 = vld [vmem:[#allocation2 + $0x18] sm:$0xff] }
   0xd   :  { %121 = vadd.xlane.f32.xlu0 %v120_v9  ;;  %127 = vadd.xlane.f32.xlu1 %v126_v10  ;;  %v123_v12 = vsel %vm65_vm0, %v112_v8, 0.0  ;;  %v129_v13 = vsel %vm65_vm0, %v114_v11, 0.0  ;;  %v115_v39 = vld [vmem:[#allocation2 + $0x20] sm:$0xff]  ;;  %v116_v43 = vld [vmem:[#allocation2 + $0x28] sm:$0xff] }
   0xe   :  { %v132_v42 = vsel %vm65_vm0, %v115_v39, 0.0  ;;  %v117_v44 = vld [vmem:[#allocation2 + $0x30] sm:$0xff]  ;;  %v135_v45 = vsel %vm65_vm0, %v116_v43, 0.0 }
   0xf   :  { %v138_v46 = vsel %vm65_vm0, %v117_v44, 0.0  ;;  %v118_v47 = vld [vmem:[#allocation2 + $0x38] sm:$0xf] }
  0x10   :  { %v142_v48 = vsel %vm73_vm1, %v118_v47, 0.0 }
  0x11   :  { %124 = vadd.xlane.f32.xlu0 %v123_v12  ;;  %130 = vadd.xlane.f32.xlu1 %v129_v13 }
  0x9a   :  { %v122_v21 = vpop.xlane.xlu0 %121  ;;  %v128_v22 = vpop.xlane.xlu1 %127 }
  0x9b   :  { %v146_v23 = vmul.f32 0.03125, %v122_v21  ;;  %v148_v24 = vmul.f32 0.03125, %v128_v22 }
  0x9d   :  { %v3342_v25 = vsub.f32 %v111_v6, %v146_v23  ;;  %v3344_v26 = vsub.f32 %v113_v7, %v148_v24 }
  0x9e   :  { %v125_v27 = vpop.xlane.xlu0 %124  ;;  %v131_v28 = vpop.xlane.xlu1 %130 }
  0x9f   :  { %v147_v29 = vmul.f32 0.03125, %v125_v27  ;;  %v149_v30 = vmul.f32 0.03125, %v131_v28  ;;  %v162_v31 = vmul.f32 %v3342_v25, %v3342_v25  ;;  %v164_v32 = vmul.f32 %v3344_v26, %v3344_v26 }
  0xa1   :  { %v3350_v33 = vsub.f32 %v112_v8, %v147_v29  ;;  %v3352_v34 = vsub.f32 %v114_v11, %v149_v30  ;;  %v170_v35 = vsel %vm65_vm0, %v162_v31, 0.0  ;;  %v176_v36 = vsel %vm65_vm0, %v164_v32, 0.0 }
  0xa2   :  { %171 = vadd.xlane.f32.xlu0 %v170_v35 }
  0xa3   :  { %v163_v37 = vmul.f32 %v3350_v33, %v3350_v33  ;;  %v165_v38 = vmul.f32 %v3352_v34, %v3352_v34 }
  0xa5   :  { %v173_v40 = vsel %vm65_vm0, %v163_v37, 0.0  ;;  %v179_v41 = vsel %vm65_vm0, %v165_v38, 0.0 }
  0xa6   :  { %177 = vadd.xlane.f32.xlu0 %v176_v36  ;;  %174 = vadd.xlane.f32.xlu1 %v173_v40 }
  0xaa   :  { %180 = vadd.xlane.f32.xlu1 %v179_v41  ;;  %133 = vadd.xlane.f32.xlu0 %v132_v42 }
  0xae   :  { %136 = vadd.xlane.f32.xlu1 %v135_v45  ;;  %139 = vadd.xlane.f32.xlu0 %v138_v46 }
  0xb2   :  { %143 = vadd.xlane.f32.xlu1 %v142_v48 }
 0x12f   :  { %v172_v51 = vpop.xlane.xlu0 %171 }
 0x130   :  { %v194_v52 = vmul.f32 0.03125, %v172_v51 }
 0x132   :  { %v202_v53 = vadd.f32 1e-05, %v194_v52 }
 0x133   :  { %v175_v54 = vpop.xlane.xlu1 %174  ;;  %v178_v55 = vpop.xlane.xlu0 %177 }
 0x134   :  { %3047 = vrsqrt.f32 %v202_v53  ;;  %v195_v56 = vmul.f32 0.03125, %v175_v54  ;;  %v196_v57 = vmul.f32 0.03125, %v178_v55 }
 0x136   :  { %v203_v58 = vadd.f32 1e-05, %v195_v56  ;;  %v204_v59 = vadd.f32 1e-05, %v196_v57 }
 0x137   :  { %v181_v60 = vpop.xlane.xlu1 %180  ;;  %v134_v61 = vpop.xlane.xlu0 %133 }
 0x138   :  { %3049 = vrsqrt.f32 %v203_v58  ;;  %v197_v62 = vmul.f32 0.03125, %v181_v60  ;;  %v150_v63 = vmul.f32 0.03125, %v134_v61 }
 0x139   :  { %3051 = vrsqrt.f32 %v204_v59 }
 0x13a   :  { %v205_v0 = vadd.f32 1e-05, %v197_v62  ;;  %v3372_v1 = vsub.f32 %v115_v39, %v150_v63 }
 0x13b   :  { %v137_v2 = vpop.xlane.xlu1 %136  ;;  %v140_v3 = vpop.xlane.xlu0 %139 }
 0x13c   :  { %3053 = vrsqrt.f32 %v205_v0  ;;  %v151_v4 = vmul.f32 0.03125, %v137_v2  ;;  %v152_v5 = vmul.f32 0.03125, %v140_v3  ;;  %v166_v6 = vmul.f32 %v3372_v1, %v3372_v1 }
 0x13e   :  { %v3048_v7 = vpop.eup %3047  ;;  %v159_v8 = vsub.f32 %v116_v43, %v151_v4  ;;  %v160_v9 = vsub.f32 %v117_v44, %v152_v5  ;;  %v182_v10 = vsel %vm65_vm0, %v166_v6, 0.0 }
 0x13f   :  { %v144_v11 = vpop.xlane.xlu1 %143  ;;  %183 = vadd.xlane.f32.xlu0 %v182_v10  ;;  %v218_v12 = vmul.f32 %v3048_v7, %v3342_v25  ;;  %v2558_v25 = vld [vmem:[%s4014_s2] ss:$0 sm:$0xff] }
 0x140   :  { %v153_v13 = vmul.f32 0.03125, %v144_v11  ;;  %v167_v14 = vmul.f32 %v159_v8, %v159_v8  ;;  %v168_v15 = vmul.f32 %v160_v9, %v160_v9 }
 0x141   :  { %v232_v23 = vmul.f32 %v2557_v16, %v218_v12 }
 0x142   :  { %v3050_v17 = vpop.eup %3049  ;;  %v161_v18 = vsub.f32 %v118_v47, %v153_v13  ;;  %v185_v19 = vsel %vm65_vm0, %v167_v14, 0.0  ;;  %v188_v20 = vsel %vm65_vm0, %v168_v15, 0.0 }
 0x143   :  { %v3052_v21 = vpop.eup %3051  ;;  %186 = vadd.xlane.f32.xlu1 %v185_v19  ;;  %189 = vadd.xlane.f32.xlu0 %v188_v20  ;;  %v219_v22 = vmul.f32 %v3050_v17, %v3350_v33  ;;  %v246_v31 = vadd.f32 %v2558_v25, %v232_v23 }
 0x144   :  { %v169_v24 = vmul.f32 %v161_v18, %v161_v18  ;;  %v220_v27 = vmul.f32 %v3052_v21, %v3344_v26 }
 0x145   :  { %v233_v28 = vmul.f32 %v2557_v16, %v219_v22 }
 0x146   :  { %v3054_v29 = vpop.eup %3053  ;;  %v191_v30 = vsel %vm73_vm1, %v169_v24, 0.0  ;;  %v234_v36 = vmul.f32 %v2557_v16, %v220_v27 }
 0x147   :  { %192 = vadd.xlane.f32.xlu1 %v191_v30  ;;  %v247_v32 = vadd.f32 %v2558_v25, %v233_v28  ;;  %v221_v35 = vmul.f32 %v3054_v29, %v3352_v34 }
 0x148   :  { %v248_v38 = vadd.f32 %v2558_v25, %v234_v36 }
 0x149   :  { %v254_v37 = vpack.c.bf16 %v247_v32, %v246_v31  ;;  %v235_v33 = vmul.f32 %v2557_v16, %v221_v35 }
 0x14b   :  { %2751 = vmatprep.mubr.msk.bf16.mxu1 %vm65_vm0, %v254_v37  ;;  %v249_v39 = vadd.f32 %v2558_v25, %v235_v33 }
 0x14d   :  { %v255_v40 = vpack.c.bf16 %v249_v39, %v248_v38 }
 0x14f   :  { %2752 = vmatmul.mubr.msk.bf16.vlgmr.msra.gmra.mrb[0].mxu1 %vm65_vm0, %v255_v40 }
 0x1cc   :  { %v184_v26 = vpop.xlane.xlu0 %183 }
 0x1cd   :  { %v198_v41 = vmul.f32 0.03125, %v184_v26 }
 0x1cf   :  { %v206_v42 = vadd.f32 1e-05, %v198_v41 }
 0x1d0   :  { %v187_v43 = vpop.xlane.xlu1 %186  ;;  %v190_v44 = vpop.xlane.xlu0 %189 }
 0x1d1   :  { %v199_v45 = vmul.f32 0.03125, %v187_v43  ;;  %3055 = vrsqrt.f32 %v206_v42  ;;  %v200_v46 = vmul.f32 0.03125, %v190_v44 }
 0x1d3   :  { %v207_v47 = vadd.f32 1e-05, %v199_v45  ;;  %v208_v34 = vadd.f32 1e-05, %v200_v46 }
 0x1d4   :  { %v193_v48 = vpop.xlane.xlu1 %192 }
 0x1d5   :  { %3057 = vrsqrt.f32 %v207_v47  ;;  %v201_v49 = vmul.f32 0.03125, %v193_v48 }
 0x1d6   :  { %3059 = vrsqrt.f32 %v208_v34 }
 0x1d7   :  { %v209_v50 = vadd.f32 1e-05, %v201_v49 }
 0x1d9   :  { %3061 = vrsqrt.f32 %v209_v50 }
 0x1db   :  { %v3056_v51 = vpop.eup %3055 }
 0x1dc   :  { %v222_v52 = vmul.f32 %v3056_v51, %v3372_v1  ;;  %v2559_v1 = vld [vmem:[%s4015_s4] ss:$0 sm:$0xff]  ;;  %s3232_s4 = smov 88  }
 0x1de   :  { %v236_v53 = vmul.f32 %v2557_v16, %v222_v52 }
 0x1df   :  { %v3058_v54 = vpop.eup %3057 }
 0x1e0   :  { %v3060_v55 = vpop.eup %3059  ;;  %v223_v56 = vmul.f32 %v3058_v54, %v159_v8  ;;  %v250_v59 = vadd.f32 %v2558_v25, %v236_v53 }
 0x1e1   :  { %v224_v57 = vmul.f32 %v3060_v55, %v160_v9 }
 0x1e2   :  { %v237_v58 = vmul.f32 %v2557_v16, %v223_v56 }
 0x1e3   :  { %v3062_v60 = vpop.eup %3061  ;;  %v238_v61 = vmul.f32 %v2557_v16, %v224_v57 }
 0x1e4   :  { %v251_v62 = vadd.f32 %v2558_v25, %v237_v58  ;;  %v225_v63 = vmul.f32 %v3062_v60, %v161_v18 }
 0x1e5   :  { %v252_v3 = vadd.f32 %v2558_v25, %v238_v61 }
 0x1e6   :  { %v256_v0 = vpack.c.bf16 %v251_v62, %v250_v59  ;;  %v239_v2 = vmul.f32 %v2557_v16, %v225_v63 }
 0x1e8   :  { %2755 = vmatprep.mubr.msk.bf16.mxu1 %vm65_vm0, %v256_v0  ;;  %v253_v4 = vadd.f32 %v2558_v25, %v239_v2 }
 0x1ea   :  { %v257_v5 = vpack.c.bf16 %v253_v4, %v252_v3 }
 0x1ec   :  { %2756 = vmatmul.mubr.msk.bf16.gmra.mrb[4].mxu1 %vm65_vm0, %v257_v5 }
 0x222   :  { %v2753_v6 = vpop.f32.mrb[0].mxu1 }
 0x223   :  { %v322_v7 = vpop.f32.mrb[1].mxu1  ;;  %v331_v10 = vadd.f32 %v2753_v6, %v2559_v1 }
 0x224   :  { %v323_v8 = vadd.f32 %v2559_v1, %v322_v7  ;;  %v2754_v9 = vpop.f32.mrb[2].mxu1 }
 0x225   :  { %v334_v11 = vadd.f32 %v2754_v9, %v2559_v1  ;;  %v325_v12 = vpop.f32.mrb[3].mxu1  ;;  %v355_v20 = vmul.f32 0.35355338, %v331_v10 }
 0x226   :  { %v326_v13 = vadd.f32 %v2559_v1, %v325_v12  ;;  %v353_v15 = vmul.f32 0.35355338, %v323_v8 }
 0x227   :  { %v3398_v14 = vpack.c.bf16 %v334_v11, %v331_v10  ;;  %v356_v19 = vmul.f32 0.35355338, %v334_v11 }
 0x228   :  { %v354_v16 = vmul.f32 0.35355338, %v326_v13  ;;  %v3400_v17 = vpack.c.bf16 %v326_v13, %v323_v8 }
 0x229   :  { %365 = vrot.lane.b32.xlu1 %v3398_v14, %s3231_s24  ;;  %v3416_v21 = vpack.c.bf16 %v356_v19, %v355_v20 }
 0x22a   :  { %v3404_v18 = vpack.c.bf16 %v354_v16, %v353_v15  ;;  %363 = vrot.lane.b32.xlu0 %v3400_v17, %s3231_s24 }
 0x22c   :  { %2763 = vmatprep.mubr.msk.bf16.mxu1 %vm367_vm2, %v3404_v18 }
 0x22d   :  { %551 = vrot.lane.b32.xlu1 %v3400_v17, %s3232_s4 }
 0x22e   :  { %547 = vrot.lane.b32.xlu0 %v3404_v18, %s3233_s25 }
 0x231   :  { %553 = vrot.lane.b32.xlu1 %v3398_v14, %s3232_s4 }
 0x235   :  { %549 = vrot.lane.b32.xlu1 %v3416_v21, %s3233_s25 }
 0x29b   :  { %v366_v24 = vpop.permute.xlu1 %365 }
 0x29c   :  { %v364_v22 = vpop.permute.xlu0 %363  ;;  %v378_v25 = vsel %vm367_vm2, %v366_v24, 0 }
 0x29d   :  { %2935 = vmatprep.subr.msk.bf16.mxu1 %vm367_vm2, %v364_v22  ;;  %v375_v23 = vsel %vm367_vm2, %v364_v22, 0 }
 0x29e   :  { %2760 = vmatpush3.bf16.xpose.msra.mxu1 %v375_v23 }
 0x29f   :  { %2936 = vmatprep.subr.msk.bf16.mxu1 %vm367_vm2, %v366_v24  ;;  %v552_v27 = vpop.permute.xlu1 %551 }
 0x2a0   :  { %v548_v28 = vpop.permute.xlu0 %547  ;;  %v562_v29 = vsel %vm367_vm2, %v552_v27, 0 }
 0x2a3   :  { %v554_v30 = vpop.permute.xlu1 %553 }
 0x2a4   :  { %v565_v31 = vsel %vm367_vm2, %v554_v30, 0 }
 0x2a6   :  { %2762 = vmatpush3.bf16.xpose.msra.mxu1 %v378_v25 }
 0x2a7   :  { %2938 = vmatprep.subr.msk.bf16.mxu1 %vm367_vm2, %v552_v27  ;;  %v550_v32 = vpop.permute.xlu1 %549 }
 0x2ad   :  { %2764 = vmatmul.mubr.msk.bf16.vlgmr.msra.gmra.mrb[8].mxu1 %vm367_vm2, %v3416_v21 }
 0x2ae   :  { %2776 = vmatpush3.bf16.xpose.msra.mxu1 %v562_v29  ;;  %2779 = vmatprep.mubr.msk.bf16.mxu1 %vm367_vm2, %v548_v28 }
 0x2af   :  { %2939 = vmatprep.subr.msk.bf16.mxu1 %vm367_vm2, %v554_v30 }
 0x2b6   :  { %2778 = vmatpush3.bf16.xpose.msra.mxu1 %v565_v31 }
 0x2bd   :  { %2780 = vmatmul.mubr.msk.bf16.vlgmr.msra.gmra.mrb[12].mxu1 %vm367_vm2, %v550_v32 }
 0x2bf   :  { %v2757_v35 = vpop.f32.mrb[4].mxu1 }
 0x2c0   :  { %v347_v36 = vadd.f32 %v2757_v35, %v2559_v1  ;;  %v338_v37 = vpop.f32.mrb[5].mxu1 }
 0x2c1   :  { %v339_v33 = vadd.f32 %v2559_v1, %v338_v37  ;;  %v2758_v38 = vpop.f32.mrb[6].mxu1 }
 0x2c2   :  { %v350_v39 = vadd.f32 %v2758_v38, %v2559_v1  ;;  %v341_v40 = vpop.f32.mrb[7].mxu1  ;;  %v1157_v26 = vmul.f32 0.35355338, %v347_v36 }
 0x2c3   :  { %v1155_v41 = vmul.f32 0.35355338, %v339_v33  ;;  %v1162_v42 = vpack.c.bf16 %v339_v33, %v334_v11  ;;  %v342_v43 = vadd.f32 %v2559_v1, %v341_v40 }
 0x2c4   :  { %v1158_v44 = vmul.f32 0.35355338, %v350_v39  ;;  %v1164_v45 = vpack.c.bf16 %v350_v39, %v350_v39 }
 0x2c5   :  { %v1159_v46 = vpack.c.bf16 %v1155_v41, %v356_v19  ;;  %v1156_v47 = vmul.f32 0.35355338, %v342_v43  ;;  %v1163_v34 = vpack.c.bf16 %v347_v36, %v342_v43  ;;  %v1177_v50 = vrot.slane %v1162_v42, 3 }
 0x2c6   :  { %v1161_v48 = vpack.c.bf16 %v1158_v44, %v1158_v44  ;;  %v1180_v49 = vrot.slane %v1164_v45, 3 }
 0x2c7   :  { %v1160_v51 = vpack.c.bf16 %v1157_v26, %v1156_v47  ;;  %v1178_v52 = vrot.slane %v1163_v34, 3  ;;  %v1169_v54 = vrot.slane %v1159_v46, 3 }
 0x2c8   :  { %v1172_v53 = vrot.slane %v1161_v48, 3 }
 0x2c9   :  { %v1170_v55 = vrot.slane %v1160_v51, 3  ;;  %v3432_v56 = vsel %vm1168_vm3, %v1177_v50, %v1178_v52  ;;  %v3434_v57 = vsel %vm1168_vm3, %v1178_v52, %v1180_v49 }
 0x2cb   :  { %v3436_v58 = vsel %vm1168_vm3, %v1169_v54, %v1170_v55  ;;  %v3438_v59 = vsel %vm1168_vm3, %v1170_v55, %v1172_v53 }
 0x380   :  { %v2765_v60 = vpop.f32.mrb[8].mxu1 }
 0x381   :  { %v414_v61 = vpop.f32.mrb[9].mxu1  ;;  %v436_v3 = vsel %vm429_vm4, %v2765_v60, -inf }
 0x382   :  { %v2766_v62 = vpop.f32.mrb[10].mxu1  ;;  %v430_v63 = vsel %vm429_vm4, %v414_v61, -inf }
 0x383   :  { %431 = vmax.xlane.f32.xlu0 %v430_v63  ;;  %v417_v0 = vpop.f32.mrb[11].mxu1  ;;  %v440_v4 = vsel %vm439_vm5, %v2766_v62, -inf }
 0x384   :  { %v433_v2 = vsel %vm429_vm4, %v417_v0, -inf }
 0x385   :  { %434 = vmax.xlane.f32.xlu1 %v433_v2 }
 0x387   :  { %437 = vmax.xlane.f32.xlu0 %v436_v3 }
 0x38b   :  { %441 = vmax.xlane.f32.xlu0 %v440_v4 }
 0x390   :  { %v3444_v5 = vpop.f32.mrb[12].mxu1 }
 0x391   :  { %v3446_v1 = vpop.f32.mrb[13].mxu1  ;;  %v622_v10 = vsel %vm429_vm4, %v3444_v5, -inf }
 0x392   :  { %v2782_v6 = vpop.f32.mrb[14].mxu1  ;;  %v616_v7 = vsel %vm429_vm4, %v3446_v1, -inf }
 0x393   :  { %617 = vmax.xlane.f32.xlu0 %v616_v7  ;;  %v604_v8 = vpop.f32.mrb[15].mxu1  ;;  %v625_v11 = vsel %vm439_vm5, %v2782_v6, -inf }
 0x394   :  { %v619_v9 = vsel %vm429_vm4, %v604_v8, -inf }
 0x395   :  { %620 = vmax.xlane.f32.xlu1 %v619_v9 }
 0x397   :  { %623 = vmax.xlane.f32.xlu0 %v622_v10 }
 0x399   :  { %626 = vmax.xlane.f32.xlu1 %v625_v11 }
 0x3aa   :  { %483 = vrot.lane.b32.xlu1 %v3398_v14, %s3234_s26 }
 0x3ae   :  { %666 = vrot.lane.b32.xlu1 %v3400_v17, %s3235_s27 }
 0x410   :  { %v432_v12 = vpop.xlane.xlu0 %431 }
 0x411   :  { %v443_v13 = vsub.f32 %v414_v61, %v432_v12 }
 0x412   :  { %v435_v15 = vpop.xlane.xlu1 %434 }
 0x413   :  { %v447_v20 = vmul.f32 1.442695, %v443_v13  ;;  %v444_v22 = vsub.f32 %v417_v0, %v435_v15 }
 0x414   :  { %v438_v16 = vpop.xlane.xlu0 %437 }
 0x415   :  { %v445_v19 = vsub.f32 %v2765_v60, %v438_v16  ;;  %v449_v27 = vmul.f32 1.442695, %v444_v22 }
 0x417   :  { %v451_v23 = vmul.f32 1.442695, %v445_v19 }
 0x418   :  { %v442_v24 = vpop.xlane.xlu0 %441 }
 0x419   :  { %3063 = vpow2.f32 %v451_v23  ;;  %v446_v25 = vsub.f32 %v2766_v62, %v442_v24 }
 0x41a   :  { %3065 = vpow2.f32 %v447_v20 }
 0x41b   :  { %v453_v28 = vmul.f32 1.442695, %v446_v25 }
 0x41d   :  { %3067 = vpow2.f32 %v453_v28 }
 0x41e   :  { %3069 = vpow2.f32 %v449_v27 }
 0x420   :  { %v618_v47 = vpop.xlane.xlu0 %617 }
 0x421   :  { %v628_v49 = vsub.f32 %v3446_v1, %v618_v47 }
 0x422   :  { %v621_v29 = vpop.xlane.xlu1 %620 }
 0x423   :  { %v3458_v30 = vpop.eup %3063  ;;  %v629_v35 = vsub.f32 %v604_v8, %v621_v29  ;;  %v632_v51 = vmul.f32 1.442695, %v628_v49 }
 0x424   :  { %v461_v31 = vsel %vm429_vm4, %v3458_v30, 0.0  ;;  %v3462_v32 = vpop.eup %3065  ;;  %v624_v34 = vpop.xlane.xlu0 %623 }
 0x425   :  { %462 = vadd.xlane.f32.xlu0 %v461_v31  ;;  %v455_v38 = vsel %vm429_vm4, %v3462_v32, 0.0  ;;  %v634_v26 = vmul.f32 1.442695, %v629_v35  ;;  %v630_v48 = vsub.f32 %v3444_v5, %v624_v34 }
 0x426   :  { %v627_v36 = vpop.xlane.xlu1 %626 }
 0x427   :  { %v3464_v37 = vpop.eup %3067  ;;  %v631_v33 = vsub.f32 %v2782_v6, %v627_v36  ;;  %v636_v50 = vmul.f32 1.442695, %v630_v48 }
 0x428   :  { %v464_v39 = vsel %vm439_vm5, %v3464_v37, 0.0  ;;  %v3070_v40 = vpop.eup %3069 }
 0x429   :  { %v638_v41 = vmul.f32 1.442695, %v631_v33  ;;  %456 = vadd.xlane.f32.xlu0 %v455_v38  ;;  %465 = vadd.xlane.f32.xlu1 %v464_v39  ;;  %v458_v42 = vsel %vm429_vm4, %v3070_v40, 0.0 }
 0x42a   :  { %v484_v60 = vpop.permute.xlu1 %483 }
 0x42b   :  { %3071 = vpow2.f32 %v638_v41  ;;  %v494_v4 = vsel %vm492_vm6, %v484_v60, 0 }
 0x42c   :  { %3073 = vpow2.f32 %v634_v26 }
 0x42d   :  { %459 = vadd.xlane.f32.xlu1 %v458_v42  ;;  %3075 = vpow2.f32 %v636_v50 }
 0x42e   :  { %3077 = vpow2.f32 %v632_v51  ;;  %v667_v61 = vpop.permute.xlu1 %666 }
 0x435   :  { %v3471_v43 = vpop.eup %3071 }
 0x436   :  { %v649_v44 = vsel %vm439_vm5, %v3471_v43, 0.0  ;;  %v3475_v45 = vpop.eup %3073 }
 0x437   :  { %650 = vadd.xlane.f32.xlu1 %v649_v44  ;;  %v643_v46 = vsel %vm429_vm4, %v3475_v45, 0.0  ;;  %v3076_v52 = vpop.eup %3075 }
 0x438   :  { %v646_v53 = vsel %vm429_vm4, %v3076_v52, 0.0  ;;  %v3078_v54 = vpop.eup %3077 }
 0x439   :  { %v640_v55 = vsel %vm429_vm4, %v3078_v54, 0.0 }
 0x43b   :  { %644 = vadd.xlane.f32.xlu1 %v643_v46 }
 0x43f   :  { %481 = vrot.lane.b32.xlu0 %v3400_v17, %s3234_s26 }
 0x44c   :  { %668 = vrot.lane.b32.xlu1 %v3398_v14, %s3235_s27 }
 0x450   :  { %735 = vrot.lane.b32.xlu1 %v3398_v14, %s3236_s28 }
 0x454   :  { %731 = vrot.lane.b32.xlu1 %v3416_v21, %s3237_s29 }
 0x45e   :  { %647 = vadd.xlane.f32.xlu0 %v646_v53 }
 0x462   :  { %641 = vadd.xlane.f32.xlu0 %v640_v55 }
 0x478   :  { %733 = vrot.lane.b32.xlu0 %v3400_v17, %s3236_s28 }
 0x47c   :  { %729 = vrot.lane.b32.xlu0 %v3404_v18, %s3237_s29 }
 0x4b2   :  { %v463_v62 = vpop.xlane.xlu0 %462 }
 0x4b6   :  { %v466_v63 = vpop.xlane.xlu1 %465  ;;  %v457_v0 = vpop.xlane.xlu0 %456 }
 0x4b7   :  { %3079 = vrcp.f32 %v466_v63 }
 0x4b8   :  { %3081 = vrcp.f32 %v457_v0 }
 0x4b9   :  { %3083 = vrcp.f32 %v463_v62 }
 0x4ba   :  { %v460_v2 = vpop.xlane.xlu1 %459  ;;  %v482_v3 = vpop.permute.xlu0 %481 }
 0x4bb   :  { %3085 = vrcp.f32 %v460_v2  ;;  %2767 = vmatprep.subr.bf16.mxu0 %v482_v3 }
 0x4bc   :  { %2768 = vmatpush3.bf16.msra.mxu0 %v482_v3 }
 0x4bd   :  { %2937 = vmatprep.subr.msk.bf16.mxu0 %vm492_vm6, %v484_v60 }
 0x4c0   :  { %2770 = vmatpush3.bf16.msra.mxu0 %v494_v4 }
 0x4c1   :  { %2783 = vmatprep.subr.bf16.mxu0 %v667_v61  ;;  %v3080_v5 = vpop.eup %3079 }
 0x4c2   :  { %v3082_v1 = vpop.eup %3081  ;;  %v478_v9 = vmul.f32 %v3080_v5, %v3464_v37 }
 0x4c3   :  { %v3084_v6 = vpop.eup %3083  ;;  %v475_v10 = vmul.f32 %v3082_v1, %v3462_v32 }
 0x4c4   :  { %v651_v7 = vpop.xlane.xlu1 %650  ;;  %v477_v12 = vmul.f32 %v3084_v6, %v3458_v30 }
 0x4c5   :  { %v3086_v8 = vpop.eup %3085 }
 0x4c6   :  { %v476_v11 = vmul.f32 %v3086_v8, %v3070_v40  ;;  %v480_v16 = vpack.c.bf16 %v478_v9, %v477_v12 }
 0x4c8   :  { %v645_v13 = vpop.xlane.xlu1 %644  ;;  %v479_v15 = vpack.c.bf16 %v476_v11, %v475_v10 }
 0x4ca   :  { %2771 = vmatprep.mubr.msk.bf16.mxu0 %vm429_vm4, %v479_v15 }
 0x4cb   :  { %2772 = vmatmul.mubr.msk.bf16.vlgmr.msra.gmra.mrb[0].mxu0 %vm429_vm4, %v480_v16 }
 0x4cc   :  { %2784 = vmatpush3.bf16.msra.mxu0 %v667_v61  ;;  %v669_v19 = vpop.permute.xlu1 %668 }
 0x4cd   :  { %2940 = vmatprep.subr.msk.bf16.mxu0 %vm492_vm6, %v669_v19  ;;  %v678_v20 = vsel %vm492_vm6, %v669_v19, 0 }
 0x4d0   :  { %2786 = vmatpush3.bf16.msra.mxu0 %v678_v20  ;;  %v736_v39 = vpop.permute.xlu1 %735 }
 0x4d1   :  { %v747_v40 = vsel %vm367_vm2, %v736_v39, 0 }
 0x4d4   :  { %v732_v26 = vpop.permute.xlu1 %731 }
 0x4eb   :  { %v648_v22 = vpop.xlane.xlu0 %647 }
 0x4ec   :  { %3087 = vrcp.f32 %v648_v22 }
 0x4ed   :  { %3089 = vrcp.f32 %v645_v13 }
 0x4ee   :  { %3091 = vrcp.f32 %v651_v7 }
 0x4ef   :  { %v642_v23 = vpop.xlane.xlu0 %641 }
 0x4f0   :  { %3093 = vrcp.f32 %v642_v23 }
 0x4f3   :  { %v734_v24 = vpop.permute.xlu0 %733 }
 0x4f4   :  { %2941 = vmatprep.subr.msk.bf16.mxu0 %vm367_vm2, %v734_v24  ;;  %v744_v38 = vsel %vm367_vm2, %v734_v24, 0 }
 0x4f6   :  { %v3088_v25 = vpop.eup %3087 }
 0x4f7   :  { %v3090_v27 = vpop.eup %3089  ;;  %v662_v30 = vmul.f32 %v3088_v25, %v3076_v52  ;;  %v730_v33 = vpop.permute.xlu0 %729 }
 0x4f8   :  { %v3092_v28 = vpop.eup %3091  ;;  %v661_v32 = vmul.f32 %v3090_v27, %v3475_v45 }
 0x4f9   :  { %v663_v35 = vmul.f32 %v3092_v28, %v3471_v43 }
 0x4fa   :  { %v3094_v29 = vpop.eup %3093 }
 0x4fb   :  { %v660_v31 = vmul.f32 %v3094_v29, %v3078_v54  ;;  %v665_v37 = vpack.c.bf16 %v663_v35, %v662_v30 }
 0x4fd   :  { %v664_v36 = vpack.c.bf16 %v661_v32, %v660_v31 }
 0x4ff   :  { %2787 = vmatprep.mubr.msk.bf16.mxu0 %vm429_vm4, %v664_v36 }
 0x500   :  { %2788 = vmatmul.mubr.msk.bf16.vlgmr.msra.gmra.mrb[4].mxu0 %vm429_vm4, %v665_v37 }
 0x501   :  { %2792 = vmatpush3.bf16.xpose.msra.mxu0 %v744_v38  ;;  %2795 = vmatprep.mubr.msk.bf16.mxu0 %vm367_vm2, %v730_v33 }
 0x502   :  { %2942 = vmatprep.subr.msk.bf16.mxu0 %vm367_vm2, %v736_v39 }
 0x509   :  { %2794 = vmatpush3.bf16.xpose.msra.mxu0 %v747_v40 }
 0x510   :  { %2796 = vmatmul.mubr.msk.bf16.vlgmr.msra.gmra.mrb[8].mxu0 %vm367_vm2, %v732_v26 }
 0x59e   :  { %v3514_v41 = vpop.f32.mrb[0].mxu0 }
 0x59f   :  { %v3516_v42 = vpop.f32.mrb[1].mxu0 }
 0x5a0   :  { %v3518_v43 = vpop.f32.mrb[2].mxu0 }
 0x5a1   :  { %v3520_v44 = vpop.f32.mrb[3].mxu0 }
 0x5d3   :  { %v3522_v45 = vpop.f32.mrb[4].mxu0 }
 0x5d4   :  { %v3524_v46 = vpop.f32.mrb[5].mxu0 }
 0x5d5   :  { %v3526_v47 = vpop.f32.mrb[6].mxu0 }
 0x5d6   :  { %v3528_v34 = vpop.f32.mrb[7].mxu0 }
 0x5d7   :  { %v2983_v48 = vpack.i.bf16 %v3526_v47, %v3528_v34 }
 0x5e3   :  { %v2797_v49 = vpop.f32.mrb[8].mxu0 }
 0x5e4   :  { %v783_v50 = vpop.f32.mrb[9].mxu0  ;;  %v804_v55 = vsel %vm429_vm4, %v2797_v49, -inf }
 0x5e5   :  { %v2798_v51 = vpop.f32.mrb[10].mxu0  ;;  %v798_v52 = vsel %vm429_vm4, %v783_v50, -inf }
 0x5e6   :  { %799 = vmax.xlane.f32.xlu0 %v798_v52  ;;  %v786_v53 = vpop.f32.mrb[11].mxu0  ;;  %v807_v60 = vsel %vm439_vm5, %v2798_v51, -inf }
 0x5e7   :  { %v801_v54 = vsel %vm429_vm4, %v786_v53, -inf }
 0x5e8   :  { %802 = vmax.xlane.f32.xlu1 %v801_v54 }
 0x5ea   :  { %805 = vmax.xlane.f32.xlu0 %v804_v55 }
 0x5ee   :  { %808 = vmax.xlane.f32.xlu0 %v807_v60 }
 0x5f9   :  { %850 = vrot.lane.b32.xlu1 %v3398_v14, %s3238_s30 }
 0x673   :  { %v800_v61 = vpop.xlane.xlu0 %799 }
 0x674   :  { %v810_v62 = vsub.f32 %v783_v50, %v800_v61 }
 0x675   :  { %v803_v63 = vpop.xlane.xlu1 %802 }
 0x676   :  { %v814_v3 = vmul.f32 1.442695, %v810_v62  ;;  %v811_v4 = vsub.f32 %v786_v53, %v803_v63 }
 0x677   :  { %v806_v0 = vpop.xlane.xlu0 %805 }
 0x678   :  { %v812_v2 = vsub.f32 %v2797_v49, %v806_v0  ;;  %v816_v7 = vmul.f32 1.442695, %v811_v4 }
 0x679   :  { %v851_v20 = vpop.permute.xlu1 %850 }
 0x67a   :  { %v818_v5 = vmul.f32 1.442695, %v812_v2  ;;  %v860_v28 = vsel %vm492_vm6, %v851_v20, 0 }
 0x67b   :  { %v809_v1 = vpop.xlane.xlu0 %808 }
 0x67c   :  { %3095 = vpow2.f32 %v818_v5  ;;  %v813_v6 = vsub.f32 %v2798_v51, %v809_v1 }
 0x67d   :  { %3097 = vpow2.f32 %v814_v3 }
 0x67e   :  { %v820_v8 = vmul.f32 1.442695, %v813_v6 }
 0x680   :  { %3099 = vpow2.f32 %v820_v8 }
 0x681   :  { %3101 = vpow2.f32 %v816_v7 }
 0x686   :  { %v3096_v9 = vpop.eup %3095 }
 0x687   :  { %v828_v10 = vsel %vm429_vm4, %v3096_v9, 0.0  ;;  %v3098_v11 = vpop.eup %3097 }
 0x688   :  { %829 = vadd.xlane.f32.xlu0 %v828_v10  ;;  %v822_v13 = vsel %vm429_vm4, %v3098_v11, 0.0 }
 0x68a   :  { %v3100_v12 = vpop.eup %3099 }
 0x68b   :  { %v831_v15 = vsel %vm439_vm5, %v3100_v12, 0.0  ;;  %v3102_v16 = vpop.eup %3101 }
 0x68c   :  { %823 = vadd.xlane.f32.xlu0 %v822_v13  ;;  %832 = vadd.xlane.f32.xlu1 %v831_v15  ;;  %v825_v19 = vsel %vm429_vm4, %v3102_v16, 0.0 }
 0x690   :  { %826 = vadd.xlane.f32.xlu1 %v825_v19 }
 0x6a1   :  { %915 = vrot.lane.b32.xlu1 %v3400_v17, %s3239_s14 }
 0x6a2   :  { %848 = vrot.lane.b32.xlu0 %v3400_v17, %s3238_s30 }
 0x6a5   :  { %917 = vrot.lane.b32.xlu1 %v3398_v14, %s3239_s14 }
 0x6a6   :  { %911 = vrot.lane.b32.xlu0 %v3404_v18, %s3240_s15 }
 0x6a9   :  { %913 = vrot.lane.b32.xlu1 %v3416_v21, %s3240_s15 }
 0x715   :  { %v830_v22 = vpop.xlane.xlu0 %829 }
 0x719   :  { %v824_v23 = vpop.xlane.xlu0 %823  ;;  %v833_v24 = vpop.xlane.xlu1 %832 }
 0x71a   :  { %3103 = vrcp.f32 %v833_v24 }
 0x71b   :  { %3105 = vrcp.f32 %v824_v23 }
 0x71c   :  { %3107 = vrcp.f32 %v830_v22 }
 0x71d   :  { %v849_v25 = vpop.permute.xlu0 %848  ;;  %v827_v27 = vpop.xlane.xlu1 %826 }
 0x71e   :  { %3109 = vrcp.f32 %v827_v27  ;;  %2799 = vmatprep.subr.bf16.mxu1 %v849_v25 }
 0x71f   :  { %2800 = vmatpush3.bf16.msra.mxu1 %v849_v25 }
 0x720   :  { %2943 = vmatprep.subr.msk.bf16.mxu1 %vm492_vm6, %v851_v20 }
 0x721   :  { %v916_v18 = vpop.permute.xlu1 %915  ;;  %v912_v39 = vpop.permute.xlu0 %911 }
 0x722   :  { %v926_v40 = vsel %vm367_vm2, %v916_v18, 0 }
 0x723   :  { %2802 = vmatpush3.bf16.msra.mxu1 %v860_v28 }
 0x724   :  { %2944 = vmatprep.subr.msk.bf16.mxu1 %vm367_vm2, %v916_v18  ;;  %v3104_v21 = vpop.eup %3103 }
 0x725   :  { %v3106_v29 = vpop.eup %3105  ;;  %v845_v32 = vmul.f32 %v3104_v21, %v3100_v12  ;;  %v918_v26 = vpop.permute.xlu1 %917 }
 0x726   :  { %v3108_v30 = vpop.eup %3107  ;;  %v842_v35 = vmul.f32 %v3106_v29, %v3098_v11  ;;  %v929_v49 = vsel %vm367_vm2, %v918_v26, 0 }
 0x727   :  { %v844_v37 = vmul.f32 %v3108_v30, %v3096_v9 }
 0x728   :  { %v3110_v31 = vpop.eup %3109 }
 0x729   :  { %v843_v36 = vmul.f32 %v3110_v31, %v3102_v16  ;;  %v847_v38 = vpack.c.bf16 %v845_v32, %v844_v37  ;;  %v914_v50 = vpop.permute.xlu1 %913 }
 0x72b   :  { %v846_v33 = vpack.c.bf16 %v843_v36, %v842_v35 }
 0x72d   :  { %2803 = vmatprep.mubr.msk.bf16.mxu1 %vm429_vm4, %v846_v33 }
 0x72e   :  { %2804 = vmatmul.mubr.msk.bf16.vlgmr.msra.gmra.mrb[16].mxu1 %vm429_vm4, %v847_v38 }
 0x72f   :  { %2808 = vmatpush3.bf16.xpose.msra.mxu1 %v926_v40  ;;  %2811 = vmatprep.mubr.msk.bf16.mxu1 %vm367_vm2, %v912_v39 }
 0x730   :  { %2945 = vmatprep.subr.msk.bf16.mxu1 %vm367_vm2, %v918_v26 }
 0x737   :  { %2810 = vmatpush3.bf16.xpose.msra.mxu1 %v929_v49 }
 0x73e   :  { %2812 = vmatmul.mubr.msk.bf16.vlgmr.msra.gmra.mrb[20].mxu1 %vm367_vm2, %v914_v50 }
 0x801   :  { %v3562_v51 = vpop.f32.mrb[16].mxu1 }
 0x802   :  { %v3564_v52 = vpop.f32.mrb[17].mxu1 }
 0x803   :  { %v3566_v53 = vpop.f32.mrb[18].mxu1 }
 0x804   :  { %v3568_v54 = vpop.f32.mrb[19].mxu1 }
 0x805   :  { %v2993_v55 = vpack.i.bf16 %v3566_v53, %v3568_v54 }
 0x811   :  { %v2813_v60 = vpop.f32.mrb[20].mxu1 }
 0x812   :  { %v965_v61 = vpop.f32.mrb[21].mxu1  ;;  %v986_v3 = vsel %vm429_vm4, %v2813_v60, -inf }
 0x813   :  { %v2814_v62 = vpop.f32.mrb[22].mxu1  ;;  %v980_v63 = vsel %vm429_vm4, %v965_v61, -inf }
 0x814   :  { %981 = vmax.xlane.f32.xlu0 %v980_v63  ;;  %v968_v0 = vpop.f32.mrb[23].mxu1  ;;  %v989_v4 = vsel %vm439_vm5, %v2814_v62, -inf }
 0x815   :  { %v983_v2 = vsel %vm429_vm4, %v968_v0, -inf }
 0x816   :  { %984 = vmax.xlane.f32.xlu1 %v983_v2 }
 0x818   :  { %987 = vmax.xlane.f32.xlu0 %v986_v3 }
 0x81c   :  { %990 = vmax.xlane.f32.xlu0 %v989_v4 }
 0x827   :  { %1032 = vrot.lane.b32.xlu1 %v3398_v14, %s3241_s16 }
 0x8a1   :  { %v982_v5 = vpop.xlane.xlu0 %981 }
 0x8a2   :  { %v992_v1 = vsub.f32 %v965_v61, %v982_v5 }
 0x8a3   :  { %v985_v6 = vpop.xlane.xlu1 %984 }
 0x8a4   :  { %v996_v9 = vmul.f32 1.442695, %v992_v1  ;;  %v993_v10 = vsub.f32 %v968_v0, %v985_v6 }
 0x8a5   :  { %v988_v7 = vpop.xlane.xlu0 %987 }
 0x8a6   :  { %v994_v8 = vsub.f32 %v2813_v60, %v988_v7  ;;  %v998_v15 = vmul.f32 1.442695, %v993_v10 }
 0x8a7   :  { %v1033_v28 = vpop.permute.xlu1 %1032 }
 0x8a8   :  { %v1000_v11 = vmul.f32 1.442695, %v994_v8  ;;  %v1042_v32 = vsel %vm492_vm6, %v1033_v28, 0 }
 0x8a9   :  { %v991_v12 = vpop.xlane.xlu0 %990 }
 0x8aa   :  { %3111 = vpow2.f32 %v1000_v11  ;;  %v995_v13 = vsub.f32 %v2814_v62, %v991_v12 }
 0x8ab   :  { %3113 = vpow2.f32 %v996_v9 }
 0x8ac   :  { %v1002_v16 = vmul.f32 1.442695, %v995_v13 }
 0x8ae   :  { %3115 = vpow2.f32 %v1002_v16 }
 0x8af   :  { %3117 = vpow2.f32 %v998_v15 }
 0x8b4   :  { %v3112_v19 = vpop.eup %3111 }
 0x8b5   :  { %v1010_v20 = vsel %vm429_vm4, %v3112_v19, 0.0  ;;  %v3114_v14 = vpop.eup %3113 }
 0x8b6   :  { %1011 = vadd.xlane.f32.xlu0 %v1010_v20  ;;  %v1004_v23 = vsel %vm429_vm4, %v3114_v14, 0.0 }
 0x8b8   :  { %v3116_v22 = vpop.eup %3115 }
 0x8b9   :  { %v1013_v24 = vsel %vm439_vm5, %v3116_v22, 0.0  ;;  %v3118_v25 = vpop.eup %3117 }
 0x8ba   :  { %1005 = vadd.xlane.f32.xlu0 %v1004_v23  ;;  %1014 = vadd.xlane.f32.xlu1 %v1013_v24  ;;  %v1007_v27 = vsel %vm429_vm4, %v3118_v25, 0.0 }
 0x8be   :  { %1008 = vadd.xlane.f32.xlu1 %v1007_v27 }
 0x8cf   :  { %1182 = vrot.lane.b32.xlu1 %v3432_v56, %s3231_s24 }
 0x8d0   :  { %1030 = vrot.lane.b32.xlu0 %v3400_v17, %s3241_s16 }
 0x8d3   :  { %1184 = vrot.lane.b32.xlu1 %v3434_v57, %s3231_s24 }
 0x943   :  { %v1012_v18 = vpop.xlane.xlu0 %1011 }
 0x947   :  { %v1006_v21 = vpop.xlane.xlu0 %1005  ;;  %v1015_v29 = vpop.xlane.xlu1 %1014 }
 0x948   :  { %3119 = vrcp.f32 %v1015_v29 }
 0x949   :  { %3121 = vrcp.f32 %v1006_v21 }
 0x94a   :  { %3123 = vrcp.f32 %v1012_v18 }
 0x94b   :  { %v1031_v30 = vpop.permute.xlu0 %1030  ;;  %v1009_v31 = vpop.xlane.xlu1 %1008 }
 0x94c   :  { %3125 = vrcp.f32 %v1009_v31  ;;  %2815 = vmatprep.subr.bf16.mxu0 %v1031_v30 }
 0x94d   :  { %2816 = vmatpush3.bf16.msra.mxu0 %v1031_v30 }
 0x94e   :  { %2946 = vmatprep.subr.msk.bf16.mxu0 %vm492_vm6, %v1033_v28 }
 0x94f   :  { %v1183_v17 = vpop.permute.xlu1 %1182 }
 0x950   :  { %v1193_v60 = vsel %vm367_vm2, %v1183_v17, 0 }
 0x951   :  { %2818 = vmatpush3.bf16.msra.mxu0 %v1042_v32 }
 0x952   :  { %2947 = vmatprep.subr.msk.bf16.mxu0 %vm367_vm2, %v1183_v17  ;;  %v3120_v35 = vpop.eup %3119 }
 0x953   :  { %v3122_v36 = vpop.eup %3121  ;;  %v1027_v38 = vmul.f32 %v3120_v35, %v3116_v22  ;;  %v1185_v61 = vpop.permute.xlu1 %1184 }
 0x954   :  { %v3124_v37 = vpop.eup %3123  ;;  %v1024_v39 = vmul.f32 %v3122_v36, %v3114_v14  ;;  %v1196_v62 = vsel %vm367_vm2, %v1185_v61, 0 }
 0x955   :  { %v1026_v26 = vmul.f32 %v3124_v37, %v3112_v19 }
 0x956   :  { %v3126_v33 = vpop.eup %3125 }
 0x957   :  { %v1025_v40 = vmul.f32 %v3126_v33, %v3118_v25  ;;  %v1029_v50 = vpack.c.bf16 %v1027_v38, %v1026_v26 }
 0x959   :  { %v1028_v49 = vpack.c.bf16 %v1025_v40, %v1024_v39 }
 0x95b   :  { %2819 = vmatprep.mubr.msk.bf16.mxu0 %vm429_vm4, %v1028_v49 }
 0x95c   :  { %2820 = vmatmul.mubr.msk.bf16.vlgmr.msra.gmra.mrb[12].mxu0 %vm429_vm4, %v1029_v50 }
 0x95d   :  { %2824 = vmatpush3.bf16.xpose.msra.mxu0 %v1193_v60  ;;  %2827 = vmatprep.mubr.msk.bf16.mxu0 %vm367_vm2, %v3436_v58 }
 0x95e   :  { %2948 = vmatprep.subr.msk.bf16.mxu0 %vm367_vm2, %v1185_v61 }
 0x965   :  { %2826 = vmatpush3.bf16.xpose.msra.mxu0 %v1196_v62 }
 0x96c   :  { %2828 = vmatmul.mubr.msk.bf16.vlgmr.msra.gmra.mrb[16].mxu0 %vm367_vm2, %v3438_v59 }
 0xa2f   :  { %v3600_v63 = vpop.f32.mrb[12].mxu0 }
 0xa30   :  { %v3602_v0 = vpop.f32.mrb[13].mxu0 }
 0xa31   :  { %v3604_v2 = vpop.f32.mrb[14].mxu0 }
 0xa32   :  { %v3606_v3 = vpop.f32.mrb[15].mxu0 }
 0xa33   :  { %v3003_v4 = vpack.i.bf16 %v3604_v2, %v3606_v3 }
 0xa3f   :  { %v2829_v5 = vpop.f32.mrb[16].mxu0 }
 0xa40   :  { %v1232_v1 = vpop.f32.mrb[17].mxu0  ;;  %v1253_v10 = vsel %vm429_vm4, %v2829_v5, -inf }
 0xa41   :  { %v2830_v6 = vpop.f32.mrb[18].mxu0  ;;  %v1247_v7 = vsel %vm429_vm4, %v1232_v1, -inf }
 0xa42   :  { %1248 = vmax.xlane.f32.xlu0 %v1247_v7  ;;  %v1235_v8 = vpop.f32.mrb[19].mxu0  ;;  %v1256_v11 = vsel %vm439_vm5, %v2830_v6, -inf }
 0xa43   :  { %v1250_v9 = vsel %vm429_vm4, %v1235_v8, -inf }
 0xa44   :  { %1251 = vmax.xlane.f32.xlu1 %v1250_v9 }
 0xa46   :  { %1254 = vmax.xlane.f32.xlu0 %v1253_v10 }
 0xa4a   :  { %1257 = vmax.xlane.f32.xlu0 %v1256_v11 }
 0xa55   :  { %1299 = vrot.lane.b32.xlu1 %v3434_v57, %s3234_s26 }
 0xacf   :  { %v1249_v12 = vpop.xlane.xlu0 %1248 }
 0xad0   :  { %v1259_v13 = vsub.f32 %v1232_v1, %v1249_v12 }
 0xad1   :  { %v1252_v15 = vpop.xlane.xlu1 %1251 }
 0xad2   :  { %v1263_v20 = vmul.f32 1.442695, %v1259_v13  ;;  %v1260_v14 = vsub.f32 %v1235_v8, %v1252_v15 }
 0xad3   :  { %v1255_v16 = vpop.xlane.xlu0 %1254 }
 0xad4   :  { %v1261_v19 = vsub.f32 %v2829_v5, %v1255_v16  ;;  %v1265_v25 = vmul.f32 1.442695, %v1260_v14 }
 0xad5   :  { %v1300_v35 = vpop.permute.xlu1 %1299 }
 0xad6   :  { %v1267_v22 = vmul.f32 1.442695, %v1261_v19  ;;  %v1309_v40 = vsel %vm492_vm6, %v1300_v35, 0 }
 0xad7   :  { %v1258_v23 = vpop.xlane.xlu0 %1257 }
 0xad8   :  { %3127 = vpow2.f32 %v1267_v22  ;;  %v1262_v24 = vsub.f32 %v2830_v6, %v1258_v23 }
 0xad9   :  { %3129 = vpow2.f32 %v1263_v20 }
 0xada   :  { %v1269_v27 = vmul.f32 1.442695, %v1262_v24 }
 0xadc   :  { %3131 = vpow2.f32 %v1269_v27 }
 0xadd   :  { %3133 = vpow2.f32 %v1265_v25 }
 0xae2   :  { %v3128_v28 = vpop.eup %3127 }
 0xae3   :  { %v1277_v18 = vsel %vm429_vm4, %v3128_v28, 0.0  ;;  %v3130_v21 = vpop.eup %3129 }
 0xae4   :  { %1278 = vadd.xlane.f32.xlu0 %v1277_v18  ;;  %v1271_v30 = vsel %vm429_vm4, %v3130_v21, 0.0 }
 0xae6   :  { %v3132_v29 = vpop.eup %3131 }
 0xae7   :  { %v1280_v31 = vsel %vm439_vm5, %v3132_v29, 0.0  ;;  %v3134_v32 = vpop.eup %3133 }
 0xae8   :  { %1272 = vadd.xlane.f32.xlu0 %v1271_v30  ;;  %1281 = vadd.xlane.f32.xlu1 %v1280_v31  ;;  %v1274_v17 = vsel %vm429_vm4, %v3134_v32, 0.0 }
 0xaec   :  { %1275 = vadd.xlane.f32.xlu1 %v1274_v17 }
 0xafd   :  { %1364 = vrot.lane.b32.xlu1 %v3432_v56, %s3232_s4 }
 0xafe   :  { %1297 = vrot.lane.b32.xlu0 %v3432_v56, %s3234_s26 }
 0xb01   :  { %1366 = vrot.lane.b32.xlu1 %v3434_v57, %s3232_s4 }
 0xb02   :  { %1360 = vrot.lane.b32.xlu0 %v3436_v58, %s3233_s25 }
 0xb05   :  { %1362 = vrot.lane.b32.xlu1 %v3438_v59, %s3233_s25 }
 0xb71   :  { %v1279_v36 = vpop.xlane.xlu0 %1278 }
 0xb75   :  { %v1273_v37 = vpop.xlane.xlu0 %1272  ;;  %v1282_v33 = vpop.xlane.xlu1 %1281 }
 0xb76   :  { %3135 = vrcp.f32 %v1282_v33 }
 0xb77   :  { %3137 = vrcp.f32 %v1273_v37 }
 0xb78   :  { %3139 = vrcp.f32 %v1279_v36 }
 0xb79   :  { %v1298_v38 = vpop.permute.xlu0 %1297  ;;  %v1276_v39 = vpop.xlane.xlu1 %1275 }
 0xb7a   :  { %3141 = vrcp.f32 %v1276_v39  ;;  %2831 = vmatprep.subr.bf16.mxu1 %v1298_v38 }
 0xb7b   :  { %2832 = vmatpush3.bf16.msra.mxu1 %v1298_v38 }
 0xb7c   :  { %2949 = vmatprep.subr.msk.bf16.mxu1 %vm492_vm6, %v1300_v35 }
 0xb7d   :  { %v1365_v26 = vpop.permute.xlu1 %1364  ;;  %v1361_v9 = vpop.permute.xlu0 %1360 }
 0xb7e   :  { %v1375_v10 = vsel %vm367_vm2, %v1365_v26, 0 }
 0xb7f   :  { %2834 = vmatpush3.bf16.msra.mxu1 %v1309_v40 }
 0xb80   :  { %2950 = vmatprep.subr.msk.bf16.mxu1 %vm367_vm2, %v1365_v26  ;;  %v3136_v49 = vpop.eup %3135 }
 0xb81   :  { %v3138_v50 = vpop.eup %3137  ;;  %v1294_v62 = vmul.f32 %v3136_v49, %v3132_v29  ;;  %v1367_v11 = vpop.permute.xlu1 %1366 }
 0xb82   :  { %v3140_v60 = vpop.eup %3139  ;;  %v1291_v5 = vmul.f32 %v3138_v50, %v3130_v21  ;;  %v1378_v12 = vsel %vm367_vm2, %v1367_v11, 0 }
 0xb83   :  { %v1293_v6 = vmul.f32 %v3140_v60, %v3128_v28 }
 0xb84   :  { %v3142_v61 = vpop.eup %3141 }
 0xb85   :  { %v1292_v1 = vmul.f32 %v3142_v61, %v3134_v32  ;;  %v1296_v8 = vpack.c.bf16 %v1294_v62, %v1293_v6  ;;  %v1363_v13 = vpop.permute.xlu1 %1362 }
 0xb87   :  { %v1295_v7 = vpack.c.bf16 %v1292_v1, %v1291_v5 }
 0xb89   :  { %2835 = vmatprep.mubr.msk.bf16.mxu1 %vm429_vm4, %v1295_v7 }
 0xb8a   :  { %2836 = vmatmul.mubr.msk.bf16.vlgmr.msra.gmra.mrb[24].mxu1 %vm429_vm4, %v1296_v8 }
 0xb8b   :  { %2840 = vmatpush3.bf16.xpose.msra.mxu1 %v1375_v10  ;;  %2843 = vmatprep.mubr.msk.bf16.mxu1 %vm367_vm2, %v1361_v9 }
 0xb8c   :  { %2951 = vmatprep.subr.msk.bf16.mxu1 %vm367_vm2, %v1367_v11 }
 0xb93   :  { %2842 = vmatpush3.bf16.xpose.msra.mxu1 %v1378_v12 }
 0xb9a   :  { %2844 = vmatmul.mubr.msk.bf16.vlgmr.msra.gmra.mrb[28].mxu1 %vm367_vm2, %v1363_v13 }
 0xc5d   :  { %v3640_v15 = vpop.f32.mrb[24].mxu1 }
 0xc5e   :  { %v3642_v16 = vpop.f32.mrb[25].mxu1 }
 0xc5f   :  { %v3644_v19 = vpop.f32.mrb[26].mxu1 }
 0xc60   :  { %v3646_v20 = vpop.f32.mrb[27].mxu1 }
 0xc6d   :  { %v2845_v14 = vpop.f32.mrb[28].mxu1 }
 0xc6e   :  { %v1414_v22 = vpop.f32.mrb[29].mxu1  ;;  %v1435_v28 = vsel %vm429_vm4, %v2845_v14, -inf }
 0xc6f   :  { %v2846_v23 = vpop.f32.mrb[30].mxu1  ;;  %v1429_v24 = vsel %vm429_vm4, %v1414_v22, -inf }
 0xc70   :  { %1430 = vmax.xlane.f32.xlu0 %v1429_v24  ;;  %v1417_v25 = vpop.f32.mrb[31].mxu1  ;;  %v1438_v18 = vsel %vm439_vm5, %v2846_v23, -inf }
 0xc71   :  { %v1432_v27 = vsel %vm429_vm4, %v1417_v25, -inf }
 0xc72   :  { %1433 = vmax.xlane.f32.xlu1 %v1432_v27 }
 0xc74   :  { %1436 = vmax.xlane.f32.xlu0 %v1435_v28 }
 0xc78   :  { %1439 = vmax.xlane.f32.xlu0 %v1438_v18 }
 0xc83   :  { %1481 = vrot.lane.b32.xlu1 %v3434_v57, %s3235_s27 }
 0xcfd   :  { %v1431_v21 = vpop.xlane.xlu0 %1430 }
 0xcfe   :  { %v1441_v29 = vsub.f32 %v1414_v22, %v1431_v21 }
 0xcff   :  { %v1434_v30 = vpop.xlane.xlu1 %1433 }
 0xd00   :  { %v1445_v17 = vmul.f32 1.442695, %v1441_v29  ;;  %v1442_v35 = vsub.f32 %v1417_v25, %v1434_v30 }
 0xd01   :  { %v1437_v31 = vpop.xlane.xlu0 %1436 }
 0xd02   :  { %v1443_v32 = vsub.f32 %v2845_v14, %v1437_v31  ;;  %v1447_v38 = vmul.f32 1.442695, %v1442_v35 }
 0xd03   :  { %v1482_v1 = vpop.permute.xlu1 %1481 }
 0xd04   :  { %v1449_v36 = vmul.f32 1.442695, %v1443_v32  ;;  %v1491_v11 = vsel %vm492_vm6, %v1482_v1, 0 }
 0xd05   :  { %v1440_v37 = vpop.xlane.xlu0 %1439 }
 0xd06   :  { %3143 = vpow2.f32 %v1449_v36  ;;  %v1444_v33 = vsub.f32 %v2846_v23, %v1440_v37 }
 0xd07   :  { %3145 = vpow2.f32 %v1445_v17 }
 0xd08   :  { %v1451_v39 = vmul.f32 1.442695, %v1444_v33 }
 0xd0a   :  { %3147 = vpow2.f32 %v1451_v39 }
 0xd0b   :  { %3149 = vpow2.f32 %v1447_v38 }
 0xd10   :  { %v3144_v40 = vpop.eup %3143 }
 0xd11   :  { %v1459_v26 = vsel %vm429_vm4, %v3144_v40, 0.0  ;;  %v3146_v49 = vpop.eup %3145 }
 0xd12   :  { %1460 = vadd.xlane.f32.xlu0 %v1459_v26  ;;  %v1453_v60 = vsel %vm429_vm4, %v3146_v49, 0.0 }
 0xd14   :  { %v3148_v50 = vpop.eup %3147 }
 0xd15   :  { %v1462_v61 = vsel %vm439_vm5, %v3148_v50, 0.0  ;;  %v3150_v62 = vpop.eup %3149 }
 0xd16   :  { %1454 = vadd.xlane.f32.xlu0 %v1453_v60  ;;  %1463 = vadd.xlane.f32.xlu1 %v1462_v61  ;;  %v1456_v5 = vsel %vm429_vm4, %v3150_v62, 0.0 }
 0xd1a   :  { %1457 = vadd.xlane.f32.xlu1 %v1456_v5 }
 0xd2b   :  { %1546 = vrot.lane.b32.xlu1 %v3432_v56, %s3236_s28 }
 0xd2c   :  { %1479 = vrot.lane.b32.xlu0 %v3432_v56, %s3235_s27 }
 0xd2f   :  { %1548 = vrot.lane.b32.xlu1 %v3434_v57, %s3236_s28 }
 0xd30   :  { %1542 = vrot.lane.b32.xlu0 %v3436_v58, %s3237_s29 }
 0xd33   :  { %1544 = vrot.lane.b32.xlu1 %v3438_v59, %s3237_s29 }
 0xd9f   :  { %v1461_v6 = vpop.xlane.xlu0 %1460 }
 0xda3   :  { %v1455_v7 = vpop.xlane.xlu0 %1454  ;;  %v1464_v8 = vpop.xlane.xlu1 %1463 }
 0xda4   :  { %3151 = vrcp.f32 %v1464_v8 }
 0xda5   :  { %3153 = vrcp.f32 %v1455_v7 }
 0xda6   :  { %3155 = vrcp.f32 %v1461_v6 }
 0xda7   :  { %v1480_v9 = vpop.permute.xlu0 %1479  ;;  %v1458_v10 = vpop.xlane.xlu1 %1457 }
 0xda8   :  { %3157 = vrcp.f32 %v1458_v10  ;;  %2847 = vmatprep.subr.bf16.mxu0 %v1480_v9 }
 0xda9   :  { %2848 = vmatpush3.bf16.msra.mxu0 %v1480_v9 }
 0xdaa   :  { %2952 = vmatprep.subr.msk.bf16.mxu0 %vm492_vm6, %v1482_v1 }
 0xdab   :  { %v1547_v12 = vpop.permute.xlu1 %1546  ;;  %v1543_v29 = vpop.permute.xlu0 %1542 }
 0xdac   :  { %v1557_v30 = vsel %vm367_vm2, %v1547_v12, 0 }
 0xdad   :  { %2850 = vmatpush3.bf16.msra.mxu0 %v1491_v11 }
 0xdae   :  { %2953 = vmatprep.subr.msk.bf16.mxu0 %vm367_vm2, %v1547_v12  ;;  %v3152_v13 = vpop.eup %3151 }
 0xdaf   :  { %v3154_v14 = vpop.eup %3153  ;;  %v1476_v24 = vmul.f32 %v3152_v13, %v3148_v50  ;;  %v1549_v31 = vpop.permute.xlu1 %1548 }
 0xdb0   :  { %v3156_v22 = vpop.eup %3155  ;;  %v1473_v25 = vmul.f32 %v3154_v14, %v3146_v49  ;;  %v1560_v32 = vsel %vm367_vm2, %v1549_v31, 0 }
 0xdb1   :  { %v1475_v28 = vmul.f32 %v3156_v22, %v3144_v40 }
 0xdb2   :  { %v3158_v23 = vpop.eup %3157 }
 0xdb3   :  { %v1474_v27 = vmul.f32 %v3158_v23, %v3150_v62  ;;  %v1478_v21 = vpack.c.bf16 %v1476_v24, %v1475_v28  ;;  %v1545_v17 = vpop.permute.xlu1 %1544 }
 0xdb5   :  { %v1477_v18 = vpack.c.bf16 %v1474_v27, %v1473_v25 }
 0xdb7   :  { %2851 = vmatprep.mubr.msk.bf16.mxu0 %vm429_vm4, %v1477_v18 }
 0xdb8   :  { %2852 = vmatmul.mubr.msk.bf16.vlgmr.msra.gmra.mrb[20].mxu0 %vm429_vm4, %v1478_v21 }
 0xdb9   :  { %2856 = vmatpush3.bf16.xpose.msra.mxu0 %v1557_v30  ;;  %2859 = vmatprep.mubr.msk.bf16.mxu0 %vm367_vm2, %v1543_v29 }
 0xdba   :  { %2954 = vmatprep.subr.msk.bf16.mxu0 %vm367_vm2, %v1549_v31 }
 0xdc1   :  { %2858 = vmatpush3.bf16.xpose.msra.mxu0 %v1560_v32 }
 0xdc8   :  { %2860 = vmatmul.mubr.msk.bf16.vlgmr.msra.gmra.mrb[24].mxu0 %vm367_vm2, %v1545_v17 }
 0xe8b   :  { %v3678_v35 = vpop.f32.mrb[20].mxu0 }
 0xe8c   :  { %v3680_v36 = vpop.f32.mrb[21].mxu0 }
 0xe8d   :  { %v2973_v37 = vpack.i.bf16 %v3524_v46, %v3680_v36  ;;  %v3684_v33 = vpop.f32.mrb[22].mxu0 }
 0xe8e   :  { %v3013_v38 = vpack.i.bf16 %v3684_v33, %v3678_v35  ;;  %v3688_v39 = vpop.f32.mrb[23].mxu0 }
 0xe8f   :  { %v2988_v40 = vpack.i.bf16 %v3688_v39, %v3522_v45 }
 0xe9b   :  { %v2861_v26 = vpop.f32.mrb[24].mxu0 }
 0xe9c   :  { %v1596_v49 = vpop.f32.mrb[25].mxu0  ;;  %v1617_v5 = vsel %vm429_vm4, %v2861_v26, -inf }
 0xe9d   :  { %v2862_v50 = vpop.f32.mrb[26].mxu0  ;;  %v1611_v60 = vsel %vm429_vm4, %v1596_v49, -inf }
 0xe9e   :  { %1612 = vmax.xlane.f32.xlu0 %v1611_v60  ;;  %v1599_v61 = vpop.f32.mrb[27].mxu0  ;;  %v1620_v1 = vsel %vm439_vm5, %v2862_v50, -inf }
 0xe9f   :  { %v1614_v62 = vsel %vm429_vm4, %v1599_v61, -inf }
 0xea0   :  { %1615 = vmax.xlane.f32.xlu1 %v1614_v62 }
 0xea2   :  { %1618 = vmax.xlane.f32.xlu0 %v1617_v5 }
 0xea6   :  { %1621 = vmax.xlane.f32.xlu0 %v1620_v1 }
 0xeb1   :  { %1663 = vrot.lane.b32.xlu1 %v3434_v57, %s3238_s30 }
 0xf2b   :  { %v1613_v6 = vpop.xlane.xlu0 %1612 }
 0xf2c   :  { %v1623_v7 = vsub.f32 %v1596_v49, %v1613_v6 }
 0xf2d   :  { %v1616_v8 = vpop.xlane.xlu1 %1615 }
 0xf2e   :  { %v1627_v11 = vmul.f32 1.442695, %v1623_v7  ;;  %v1624_v12 = vsub.f32 %v1599_v61, %v1616_v8 }
 0xf2f   :  { %v1619_v9 = vpop.xlane.xlu0 %1618 }
 0xf30   :  { %v1625_v10 = vsub.f32 %v2861_v26, %v1619_v9  ;;  %v1629_v23 = vmul.f32 1.442695, %v1624_v12 }
 0xf31   :  { %v1664_v32 = vpop.permute.xlu1 %1663 }
 0xf32   :  { %v1631_v13 = vmul.f32 1.442695, %v1625_v10  ;;  %v1673_v61 = vsel %vm492_vm6, %v1664_v32, 0 }
 0xf33   :  { %v1622_v14 = vpop.xlane.xlu0 %1621 }
 0xf34   :  { %3159 = vpow2.f32 %v1631_v13  ;;  %v1626_v22 = vsub.f32 %v2862_v50, %v1622_v14 }
 0xf35   :  { %3161 = vpow2.f32 %v1627_v11 }
 0xf36   :  { %v1633_v24 = vmul.f32 1.442695, %v1626_v22 }
 0xf38   :  { %3163 = vpow2.f32 %v1633_v24 }
 0xf39   :  { %3165 = vpow2.f32 %v1629_v23 }
 0xf3e   :  { %v3160_v25 = vpop.eup %3159 }
 0xf3f   :  { %v1641_v27 = vsel %vm429_vm4, %v3160_v25, 0.0  ;;  %v3162_v28 = vpop.eup %3161 }
 0xf40   :  { %1642 = vadd.xlane.f32.xlu0 %v1641_v27  ;;  %v1635_v21 = vsel %vm429_vm4, %v3162_v28, 0.0 }
 0xf42   :  { %v3164_v18 = vpop.eup %3163 }
 0xf43   :  { %v1644_v29 = vsel %vm439_vm5, %v3164_v18, 0.0  ;;  %v3166_v30 = vpop.eup %3165 }
 0xf44   :  { %1636 = vadd.xlane.f32.xlu0 %v1635_v21  ;;  %1645 = vadd.xlane.f32.xlu1 %v1644_v29  ;;  %v1638_v31 = vsel %vm429_vm4, %v3166_v30, 0.0 }
 0xf48   :  { %1639 = vadd.xlane.f32.xlu1 %v1638_v31 }
 0xf59   :  { %1728 = vrot.lane.b32.xlu1 %v3432_v56, %s3239_s14 }
 0xf5a   :  { %1661 = vrot.lane.b32.xlu0 %v3432_v56, %s3238_s30 }
 0xf5d   :  { %1730 = vrot.lane.b32.xlu1 %v3434_v57, %s3239_s14 }
 0xf5e   :  { %1724 = vrot.lane.b32.xlu0 %v3436_v58, %s3240_s15 }
 0xf61   :  { %1726 = vrot.lane.b32.xlu1 %v3438_v59, %s3240_s15 }
 0xfcd   :  { %v1643_v17 = vpop.xlane.xlu0 %1642 }
 0xfd1   :  { %v1637_v26 = vpop.xlane.xlu0 %1636  ;;  %v1646_v49 = vpop.xlane.xlu1 %1645 }
 0xfd2   :  { %3167 = vrcp.f32 %v1646_v49 }
 0xfd3   :  { %3169 = vrcp.f32 %v1637_v26 }
 0xfd4   :  { %3171 = vrcp.f32 %v1643_v17 }
 0xfd5   :  { %v1662_v50 = vpop.permute.xlu0 %1661  ;;  %v1640_v60 = vpop.xlane.xlu1 %1639 }
 0xfd6   :  { %3173 = vrcp.f32 %v1640_v60  ;;  %2863 = vmatprep.subr.bf16.mxu1 %v1662_v50 }
 0xfd7   :  { %2864 = vmatpush3.bf16.msra.mxu1 %v1662_v50 }
 0xfd8   :  { %2955 = vmatprep.subr.msk.bf16.mxu1 %vm492_vm6, %v1664_v32 }
 0xfd9   :  { %v1729_v58 = vpop.permute.xlu1 %1728  ;;  %v1725_v12 = vpop.permute.xlu0 %1724 }
 0xfda   :  { %v1739_v13 = vsel %vm367_vm2, %v1729_v58, 0 }
 0xfdb   :  { %2866 = vmatpush3.bf16.msra.mxu1 %v1673_v61 }
 0xfdc   :  { %2956 = vmatprep.subr.msk.bf16.mxu1 %vm367_vm2, %v1729_v58  ;;  %v3168_v59 = vpop.eup %3167 }
 0xfdd   :  { %v3170_v62 = vpop.eup %3169  ;;  %v1658_v6 = vmul.f32 %v3168_v59, %v3164_v18  ;;  %v1731_v14 = vpop.permute.xlu1 %1730 }
 0xfde   :  { %v3172_v5 = vpop.eup %3171  ;;  %v1655_v7 = vmul.f32 %v3170_v62, %v3162_v28  ;;  %v1742_v22 = vsel %vm367_vm2, %v1731_v14, 0 }
 0xfdf   :  { %v1657_v9 = vmul.f32 %v3172_v5, %v3160_v25 }
 0xfe0   :  { %v3174_v1 = vpop.eup %3173 }
 0xfe1   :  { %v1656_v8 = vmul.f32 %v3174_v1, %v3166_v30  ;;  %v1660_v11 = vpack.c.bf16 %v1658_v6, %v1657_v9  ;;  %v1727_v23 = vpop.permute.xlu1 %1726 }
 0xfe3   :  { %v1659_v10 = vpack.c.bf16 %v1656_v8, %v1655_v7 }
 0xfe5   :  { %2867 = vmatprep.mubr.msk.bf16.mxu1 %vm429_vm4, %v1659_v10 }
 0xfe6   :  { %2868 = vmatmul.mubr.msk.bf16.vlgmr.msra.gmra.mrb[32].mxu1 %vm429_vm4, %v1660_v11 }
 0xfe7   :  { %2872 = vmatpush3.bf16.xpose.msra.mxu1 %v1739_v13  ;;  %2875 = vmatprep.mubr.msk.bf16.mxu1 %vm367_vm2, %v1725_v12 }
 0xfe8   :  { %2957 = vmatprep.subr.msk.bf16.mxu1 %vm367_vm2, %v1731_v14 }
 0xfef   :  { %2874 = vmatpush3.bf16.xpose.msra.mxu1 %v1742_v22 }
 0xff6   :  { %2876 = vmatmul.mubr.msk.bf16.vlgmr.msra.gmra.mrb[36].mxu1 %vm367_vm2, %v1727_v23 }
0x10b9   :  { %v3722_v24 = vpop.f32.mrb[32].mxu1 }
0x10ba   :  { %v1709_v25 = vpop.f32.mrb[33].mxu1 }
0x10bb   :  { %v2978_v27 = vpack.i.bf16 %v3564_v52, %v1709_v25  ;;  %v3725_v28 = vpop.f32.mrb[34].mxu1 }
0x10bc   :  { %v3023_v18 = vpack.i.bf16 %v3725_v28, %v3722_v24  ;;  %v1712_v21 = vpop.f32.mrb[35].mxu1 }
0x10bd   :  { %v2998_v29 = vpack.i.bf16 %v1712_v21, %v3562_v51  ;;  %v3036_v21 = vld [vmem:[%s4016_s5 + $0x8] sm:$0xff]  }
0x10c9   :  { %v2877_v30 = vpop.f32.mrb[36].mxu1 }
0x10ca   :  { %v1778_v31 = vpop.f32.mrb[37].mxu1  ;;  %v1799_v52 = vsel %vm429_vm4, %v2877_v30, -inf }
0x10cb   :  { %v2878_v32 = vpop.f32.mrb[38].mxu1  ;;  %v1793_v17 = vsel %vm429_vm4, %v1778_v31, -inf }
0x10cc   :  { %1794 = vmax.xlane.f32.xlu0 %v1793_v17  ;;  %v1781_v26 = vpop.f32.mrb[39].mxu1  ;;  %v1802_v50 = vsel %vm439_vm5, %v2878_v32, -inf }
0x10cd   :  { %v1796_v49 = vsel %vm429_vm4, %v1781_v26, -inf }
0x10ce   :  { %1797 = vmax.xlane.f32.xlu1 %v1796_v49 }
0x10d0   :  { %1800 = vmax.xlane.f32.xlu0 %v1799_v52 }
0x10d4   :  { %1803 = vmax.xlane.f32.xlu0 %v1802_v50 }
0x1159   :  { %v1795_v60 = vpop.xlane.xlu0 %1794 }
0x115a   :  { %v1805_v61 = vsub.f32 %v1778_v31, %v1795_v60 }
0x115b   :  { %v1798_v58 = vpop.xlane.xlu1 %1797 }
0x115c   :  { %v1809_v62 = vmul.f32 1.442695, %v1805_v61  ;;  %v1806_v5 = vsub.f32 %v1781_v26, %v1798_v58 }
0x115d   :  { %v1801_v51 = vpop.xlane.xlu0 %1800 }
0x115e   :  { %v1807_v59 = vsub.f32 %v2877_v30, %v1801_v51  ;;  %v1811_v8 = vmul.f32 1.442695, %v1806_v5 }
0x1160   :  { %v1813_v1 = vmul.f32 1.442695, %v1807_v59 }
0x1161   :  { %v1804_v6 = vpop.xlane.xlu0 %1803 }
0x1162   :  { %3175 = vpow2.f32 %v1813_v1  ;;  %v1808_v7 = vsub.f32 %v2878_v32, %v1804_v6 }
0x1163   :  { %3177 = vpow2.f32 %v1809_v62 }
0x1164   :  { %v1815_v9 = vmul.f32 1.442695, %v1808_v7 }
0x1166   :  { %3179 = vpow2.f32 %v1815_v9 }
0x1167   :  { %3181 = vpow2.f32 %v1811_v8 }
0x116c   :  { %v3176_v10 = vpop.eup %3175 }
0x116d   :  { %v1823_v11 = vsel %vm429_vm4, %v3176_v10, 0.0  ;;  %v3178_v12 = vpop.eup %3177 }
0x116e   :  { %1824 = vadd.xlane.f32.xlu0 %v1823_v11  ;;  %v1817_v14 = vsel %vm429_vm4, %v3178_v12, 0.0 }
0x1170   :  { %v3180_v13 = vpop.eup %3179 }
0x1171   :  { %v1826_v22 = vsel %vm439_vm5, %v3180_v13, 0.0  ;;  %v3182_v23 = vpop.eup %3181 }
0x1172   :  { %1818 = vadd.xlane.f32.xlu0 %v1817_v14  ;;  %1827 = vadd.xlane.f32.xlu1 %v1826_v22  ;;  %v1820_v25 = vsel %vm429_vm4, %v3182_v23, 0.0 }
0x1176   :  { %1821 = vadd.xlane.f32.xlu1 %v1820_v25 }
0x1187   :  { %1845 = vrot.lane.b32.xlu1 %v3434_v57, %s3241_s16 }
0x1188   :  { %1843 = vrot.lane.b32.xlu0 %v3432_v56, %s3241_s16 }
0x118b   :  { %2974 = vrot.lane.b32.xlu1 %v2973_v37, %s3242_s17 }
0x118c   :  { %2984 = vrot.lane.b32.xlu0 %v2983_v48, %s3242_s17 }
0x118f   :  { %2979 = vrot.lane.b32.xlu1 %v2978_v27, %s3243_s0  ;;  %v3035_v27 = vld [vmem:[%s4016_s5] sm:$0xff]  }
0x1190   :  { %2989 = vrot.lane.b32.xlu0 %v2988_v40, %s3242_s17 }
0x1193   :  { %2994 = vrot.lane.b32.xlu1 %v2993_v55, %s3243_s0 }
0x1194   :  { %2999 = vrot.lane.b32.xlu0 %v2998_v29, %s3243_s0 }
0x1197   :  { %3004 = vrot.lane.b32.xlu1 %v3003_v4, %s3244_s18 }
0x11fb   :  { %v1825_v56 = vpop.xlane.xlu0 %1824 }
0x11ff   :  { %v1819_v57 = vpop.xlane.xlu0 %1818  ;;  %v1828_v46 = vpop.xlane.xlu1 %1827 }
0x1200   :  { %3183 = vrcp.f32 %v1828_v46 }
0x1201   :  { %3185 = vrcp.f32 %v1819_v57 }
0x1202   :  { %3187 = vrcp.f32 %v1825_v56 }
0x1203   :  { %v1844_v45 = vpop.permute.xlu0 %1843  ;;  %v1822_v47 = vpop.xlane.xlu1 %1821 }
0x1204   :  { %3189 = vrcp.f32 %v1822_v47  ;;  %2879 = vmatprep.subr.bf16.mxu0 %v1844_v45 }
0x1205   :  { %2880 = vmatpush3.bf16.msra.mxu0 %v1844_v45 }
0x1207   :  { %v1846_v34 = vpop.permute.xlu1 %1845  ;;  %v2985_v52 = vpop.permute.xlu0 %2984 }
0x1208   :  { %v1855_v48 = vsel %vm492_vm6, %v1846_v34, 0  ;;  %2958 = vmatprep.subr.msk.bf16.mxu0 %vm492_vm6, %v1846_v34  ;;  %v2987_v58 = vunpack.i.h.bf16 %v2985_v52  ;;  %v2986_v51 = vunpack.i.l.bf16 %v2985_v52 }
0x1209   :  { %2882 = vmatpush3.bf16.msra.mxu0 %v1855_v48 }
0x120a   :  { %v3184_v53 = vpop.eup %3183  ;;  %2887 = vmatprep.subr.bf16.mxu0 %v3035_v27  ;;  %v1144_v28 = vsel %vm367_vm2, %v3518_v43, %v2987_v58  ;;  %v1142_v8 = vsel %vm367_vm2, %v3520_v44, %v2986_v51 }
0x120b   :  { %v3186_v54 = vpop.eup %3185  ;;  %v1840_v3 = vmul.f32 %v3184_v53, %v3180_v13 }
0x120c   :  { %v3188_v55 = vpop.eup %3187  ;;  %v1837_v4 = vmul.f32 %v3186_v54, %v3178_v12 }
0x120d   :  { %v1839_v37 = vmul.f32 %v3188_v55, %v3176_v10 }
0x120e   :  { %v3190_v2 = vpop.eup %3189 }
0x120f   :  { %v1838_v36 = vmul.f32 %v3190_v2, %v3182_v23  ;;  %v1842_v40 = vpack.c.bf16 %v1840_v3, %v1839_v37 }
0x1211   :  { %v1841_v39 = vpack.c.bf16 %v1838_v36, %v1837_v4 }
0x1213   :  { %2883 = vmatprep.mubr.msk.bf16.mxu0 %vm429_vm4, %v1841_v39 }
0x1214   :  { %2884 = vmatmul.mubr.msk.bf16.vlgmr.msra.gmra.mrb[28].mxu0 %vm429_vm4, %v1842_v40 }
0x1215   :  { %2888 = vmatpush3.bf16.msra.mxu0 %v3035_v27 }
0x1216   :  { %2889 = vmatprep.subr.bf16.mxu0 %v3036_v21 }
0x1219   :  { %2890 = vmatpush3.bf16.msra.mxu0 %v3036_v21 }
0x12e7   :  { %v2885_v29 = vpop.f32.mrb[28].mxu0 }
0x12e8   :  { %v1891_v30 = vpop.f32.mrb[29].mxu0 }
0x12e9   :  { %v3008_v31 = vpack.i.bf16 %v3602_v0, %v1891_v30  ;;  %v2886_v32 = vpop.f32.mrb[30].mxu0  ;;  %v2975_v0 = vpop.permute.xlu1 %2974 }
0x12ea   :  { %v3028_v17 = vpack.i.bf16 %v2886_v32, %v2885_v29  ;;  %v1894_v26 = vpop.f32.mrb[31].mxu0  ;;  %v2977_v5 = vunpack.i.h.bf16 %v2975_v0  ;;  %v2976_v33 = vunpack.i.l.bf16 %v2975_v0 }
0x12eb   :  { %v3018_v49 = vpack.i.bf16 %v1894_v26, %v3600_v63  ;;  %3009 = vrot.lane.b32.xlu1 %v3008_v31, %s3244_s18  ;;  %v2990_v63 = vpop.permute.xlu0 %2989 }
0x12ec   :  { %v2992_v59 = vunpack.i.h.bf16 %v2990_v63  ;;  %v2991_v62 = vunpack.i.l.bf16 %v2990_v63  ;;  %v1141_v11 = vsel %vm367_vm2, %v3516_v42, %v2977_v5  ;;  %v1954_v12 = vsel %vm367_vm2, %v3642_v16, %v2976_v33 }
0x12ed   :  { %3019 = vrot.lane.b32.xlu0 %v3018_v49, %s3244_s18  ;;  %v2980_v50 = vpop.permute.xlu1 %2979 }
0x12ee   :  { %v2982_v1 = vunpack.i.h.bf16 %v2980_v50  ;;  %v1955_v9 = vsel %vm367_vm2, %v3646_v20, %v2992_v59  ;;  %v1143_v10 = vsel %vm367_vm2, %v3514_v41, %v2991_v62  ;;  %v2598_v59 = vld [vmem:[%s4017_s6] ss:$0 sm:$0xff] }
0x12ef   :  { %3014 = vrot.lane.b32.xlu1 %v3013_v38, %s3242_s17  ;;  %v3000_v61 = vpop.permute.xlu0 %2999 }
0x12f0   :  { %v3001_v38 = vunpack.i.l.bf16 %v3000_v61  ;;  %v3002_v13 = vunpack.i.h.bf16 %v3000_v61  ;;  %v1146_v23 = vsel %vm1145_vm7, %v1141_v11, %v2982_v1 }
0x12f1   :  { %3024 = vrot.lane.b32.xlu0 %v3023_v18, %s3243_s0  ;;  %v2995_v60 = vpop.permute.xlu1 %2994  ;;  %v2981_v18 = vunpack.i.l.bf16 %v2980_v50 }
0x12f2   :  { %v2996_v24 = vunpack.i.l.bf16 %v2995_v60  ;;  %v2997_v6 = vunpack.i.h.bf16 %v2995_v60  ;;  %v1148_v43 = vsel %vm1145_vm7, %v1143_v10, %v3001_v38  ;;  %v1959_v34 = vsel %vm1145_vm7, %v1955_v9, %v3002_v13  ;;  %v3225_v9 = vld [vmem:[#allocation2 + $0x8] sm:$0xff] }
0x12f3   :  { %3029 = vrot.lane.b32.xlu1 %v3028_v17, %s3244_s18  ;;  %v1958_v56 = vsel %vm1145_vm7, %v1954_v12, %v2981_v18 }
0x12f4   :  { %v1147_v44 = vsel %vm1145_vm7, %v1142_v8, %v2996_v24  ;;  %v1149_v41 = vsel %vm1145_vm7, %v1144_v28, %v2997_v6  ;;  %v3223_v24 = vld [vmem:[#allocation2] sm:$0xff]  ;;  %v3224_v6 = vld [vmem:[#allocation2 + $0x10] sm:$0xff] }
0x12f5   :  { %v3005_v35 = vpop.permute.xlu1 %3004 }
0x12f6   :  { %v3006_v7 = vunpack.i.l.bf16 %v3005_v35  ;;  %v3007_v14 = vunpack.i.h.bf16 %v3005_v35 }
0x12f8   :  { %v1152_v42 = vsel %vm1150_vm8, %v1147_v44, %v3006_v7  ;;  %v1154_v48 = vsel %vm1150_vm8, %v1149_v41, %v3007_v14 }
0x135d   :  { %v3010_v22 = vpop.permute.xlu1 %3009 }
0x135e   :  { %v3012_v25 = vunpack.i.h.bf16 %v3010_v22  ;;  %v3011_v20 = vunpack.i.l.bf16 %v3010_v22 }
0x135f   :  { %v3020_v57 = vpop.permute.xlu0 %3019 }
0x1360   :  { %v1151_v16 = vsel %vm1150_vm8, %v1146_v23, %v3012_v25  ;;  %v1962_v46 = vsel %vm1150_vm8, %v1958_v56, %v3011_v20  ;;  %v3022_v45 = vunpack.i.h.bf16 %v3020_v57  ;;  %v3021_v47 = vunpack.i.l.bf16 %v3020_v57  ;;  %v3227_v57 = vld [vmem:[#allocation2 + $0x20] sm:$0xff] }
0x1361   :  { %v1971_v53 = vrot.slane %v1962_v46, 2  ;;  %v1984_v54 = vpack.c.bf16 %v1152_v42, %v1151_v16  ;;  %v3015_v55 = vpop.permute.xlu1 %3014 }
0x1362   :  { %v1963_v2 = vsel %vm1150_vm8, %v1959_v34, %v3022_v45  ;;  %v1153_v3 = vsel %vm1150_vm8, %v1148_v43, %v3021_v47  ;;  %v3017_v4 = vunpack.i.h.bf16 %v3015_v55  ;;  %v3016_v36 = vunpack.i.l.bf16 %v3015_v55  ;;  %v3226_v43 = vld [vmem:[#allocation2 + $0x18] sm:$0xff]  ;;  %v3228_v45 = vld [vmem:[#allocation2 + $0x28] sm:$0xff] }
0x1363   :  { %v1972_v37 = vrot.slane %v1963_v2, 2  ;;  %v1983_v39 = vsel %vm1970_vm9, %v1154_v48, %v1971_v53  ;;  %v3025_v40 = vpop.permute.xlu0 %3024  ;;  %2891 = vmatprep.mubr.msk.bf16.mxu0 %vm65_vm0, %v1984_v54  ;;  %v3229_v34 = vld [vmem:[#allocation2 + $0x38] sm:$0xf]  ;;  %v3230_v54 = vld [vmem:[#allocation2 + $0x30] sm:$0xff] }
0x1364   :  { %v1985_v27 = vpack.c.bf16 %v1983_v39, %v1153_v3  ;;  %v1957_v21 = vsel %vm367_vm2, %v3644_v19, %v3017_v4  ;;  %v1956_v29 = vsel %vm367_vm2, %v3640_v15, %v3016_v36  ;;  %v3027_v30 = vunpack.i.h.bf16 %v3025_v40 }
0x1365   :  { %v3026_v31 = vunpack.i.l.bf16 %v3025_v40  ;;  %v3030_v32 = vpop.permute.xlu1 %3029  ;;  %v1973_v17 = vsel %vm1970_vm9, %v1971_v53, %v1972_v37 }
0x1366   :  { %v1961_v26 = vsel %vm1145_vm7, %v1957_v21, %v3027_v30  ;;  %v3032_v49 = vunpack.i.h.bf16 %v3030_v32  ;;  %v3031_v0 = vunpack.i.l.bf16 %v3030_v32  ;;  %2892 = vmatmul.mubr.msk.bf16.vlgmr.msra.gmra.mrb[32].mxu0 %vm65_vm0, %v1985_v27 }
0x1367   :  { %v1960_v52 = vsel %vm1145_vm7, %v1956_v29, %v3026_v31 }
0x1368   :  { %v1964_v50 = vsel %vm1150_vm8, %v1960_v52, %v3031_v0  ;;  %v1965_v19 = vsel %vm1150_vm8, %v1961_v26, %v3032_v49 }
0x1369   :  { %v1974_v63 = vrot.slane %v1964_v50, 2  ;;  %v1976_v60 = vrot.slane %v1965_v19, 2 }
0x136b   :  { %v1975_v15 = vsel %vm1970_vm9, %v1972_v37, %v1974_v63  ;;  %v1977_v61 = vsel %vm1970_vm9, %v1974_v63, %v1976_v60 }
0x136c   :  { %v1986_v58 = vpack.c.bf16 %v1975_v15, %v1973_v17  ;;  %v1987_v51 = vpack.c.bf16 %v1976_v60, %v1977_v61 }
0x136e   :  { %2895 = vmatprep.mubr.msk.bf16.mxu0 %vm65_vm0, %v1986_v58 }
0x136f   :  { %2896 = vmatmul.mubr.msk.bf16.gmra.mrb[36].mxu0 %vm65_vm0, %v1987_v51 }
0x1439   :  { %v2893_v62 = vpop.f32.mrb[32].mxu0 }
0x143a   :  { %v2052_v5 = vpop.f32.mrb[33].mxu0  ;;  %v2061_v35 = vadd.f32 %v2893_v62, %v2598_v59 }
0x143b   :  { %v2053_v33 = vadd.f32 %v2598_v59, %v2052_v5  ;;  %v2894_v38 = vpop.f32.mrb[34].mxu0 }
0x143c   :  { %v2055_v1 = vpop.f32.mrb[35].mxu0  ;;  %v3832_v7 = vadd.f32 %v3224_v6, %v2061_v35  ;;  %v2064_v8 = vadd.f32 %v2894_v38, %v2598_v59 }
0x143d   :  { %v3830_v28 = vadd.f32 %v3223_v24, %v2053_v33  ;;  %v2056_v18 = vadd.f32 %v2598_v59, %v2055_v1 }
0x143e   :  { %v3840_v14 = vadd.f32 %v3226_v43, %v2064_v8  ;;  %v2097_v23 = vsel %vm65_vm0, %v3832_v7, 0.0 }
0x143f   :  { %v3834_v10 = vadd.f32 %v3225_v9, %v2056_v18  ;;  %v2091_v11 = vsel %vm65_vm0, %v3830_v28, 0.0 }
0x1440   :  { %2092 = vadd.xlane.f32.xlu0 %v2091_v11  ;;  %v2100_v46 = vsel %vm65_vm0, %v3840_v14, 0.0 }
0x1441   :  { %v2094_v12 = vsel %vm65_vm0, %v3834_v10, 0.0 }
0x1442   :  { %2095 = vadd.xlane.f32.xlu1 %v2094_v12  ;;  %v2897_v13 = vpop.f32.mrb[36].mxu0 }
0x1443   :  { %v2068_v22 = vpop.f32.mrb[37].mxu0  ;;  %v2077_v42 = vadd.f32 %v2897_v13, %v2598_v59 }
0x1444   :  { %v2069_v44 = vadd.f32 %v2598_v59, %v2068_v22  ;;  %2098 = vadd.xlane.f32.xlu0 %v2097_v23  ;;  %v2898_v25 = vpop.f32.mrb[38].mxu0  ;;  %v3037_v23 = vld [vmem:[%s4018_s9] sm:$0xff]  }
0x1445   :  { %v2071_v20 = vpop.f32.mrb[39].mxu0  ;;  %v2080_v56 = vadd.f32 %v2898_v25, %v2598_v59  ;;  %v3854_v55 = vadd.f32 %v3230_v54, %v2077_v42  ;;  %2899 = vmatprep.subr.bf16.mxu1 %v3037_v23  ;;  %v3039_v25 = vld [vmem:[%s4019_s11] sm:$0xff]  }
0x1446   :  { %v2072_v41 = vadd.f32 %v2598_v59, %v2071_v20  ;;  %v3844_v16 = vadd.f32 %v3227_v57, %v2069_v44  ;;  %2900 = vmatpush3.bf16.msra.mxu1 %v3037_v23  ;;  %v3038_v44 = vld [vmem:[%s4018_s9 + $0x8] sm:$0xff]   ;;  %2911 = vmatprep.subr.bf16.mxu0 %v3039_v25 }
0x1447   :  { %v3850_v48 = vadd.f32 %v3229_v34, %v2080_v56  ;;  %v2109_v4 = vsel %vm65_vm0, %v3854_v55, 0.0  ;;  %2901 = vmatprep.subr.bf16.mxu1 %v3038_v44  ;;  %v3040_v20 = vld [vmem:[%s4019_s11 + $0x8] sm:$0xff]   ;;  %2912 = vmatpush3.bf16.msra.mxu0 %v3039_v25 }
0x1448   :  { %v3848_v47 = vadd.f32 %v3228_v45, %v2072_v41  ;;  %2101 = vadd.xlane.f32.xlu0 %v2100_v46  ;;  %v2103_v2 = vsel %vm65_vm0, %v3844_v16, 0.0  ;;  %2913 = vmatprep.subr.bf16.mxu0 %v3040_v20 }
0x1449   :  { %v2112_v3 = vsel %vm73_vm1, %v3850_v48, 0.0 }
0x144a   :  { %v2106_v53 = vsel %vm65_vm0, %v3848_v47, 0.0  ;;  %2902 = vmatpush3.bf16.msra.mxu1 %v3038_v44 }
0x144b   :  { %2107 = vadd.xlane.f32.xlu1 %v2106_v53  ;;  %2914 = vmatpush3.bf16.msra.mxu0 %v3040_v20 }
0x144c   :  { %2104 = vadd.xlane.f32.xlu0 %v2103_v2 }
0x144f   :  { %2113 = vadd.xlane.f32.xlu1 %v2112_v3 }
0x1450   :  { %2110 = vadd.xlane.f32.xlu0 %v2109_v4 }
0x14cd   :  { %v2093_v36 = vpop.xlane.xlu0 %2092 }
0x14ce   :  { %v2115_v37 = vmul.f32 0.03125, %v2093_v36 }
0x14cf   :  { %v2096_v39 = vpop.xlane.xlu1 %2095 }
0x14d0   :  { %v3863_v40 = vsub.f32 %v3830_v28, %v2115_v37  ;;  %v2116_v27 = vmul.f32 0.03125, %v2096_v39 }
0x14d1   :  { %v2099_v21 = vpop.xlane.xlu0 %2098 }
0x14d2   :  { %v3866_v29 = vsub.f32 %v3834_v10, %v2116_v27  ;;  %v2117_v30 = vmul.f32 0.03125, %v2099_v21  ;;  %v2131_v31 = vmul.f32 %v3863_v40, %v3863_v40 }
0x14d4   :  { %v3871_v32 = vsub.f32 %v3832_v7, %v2117_v30  ;;  %v2139_v17 = vsel %vm65_vm0, %v2131_v31, 0.0  ;;  %v2132_v26 = vmul.f32 %v3866_v29, %v3866_v29  ;;  %v2605_v30 = vld [vmem:[%s4020_s7] ss:$0 sm:$0xff] }
0x14d5   :  { %v2102_v49 = vpop.xlane.xlu0 %2101  ;;  %2140 = vadd.xlane.f32.xlu0 %v2139_v17 }
0x14d6   :  { %v2118_v0 = vmul.f32 0.03125, %v2102_v49  ;;  %v2142_v52 = vsel %vm65_vm0, %v2132_v26, 0.0  ;;  %v2133_v50 = vmul.f32 %v3871_v32, %v3871_v32 }
0x14d7   :  { %2143 = vadd.xlane.f32.xlu1 %v2142_v52 }
0x14d8   :  { %v3880_v19 = vsub.f32 %v3840_v14, %v2118_v0  ;;  %v2108_v63 = vpop.xlane.xlu1 %2107  ;;  %v2145_v60 = vsel %vm65_vm0, %v2133_v50, 0.0 }
0x14d9   :  { %v2120_v15 = vmul.f32 0.03125, %v2108_v63  ;;  %2146 = vadd.xlane.f32.xlu0 %v2145_v60  ;;  %v2105_v61 = vpop.xlane.xlu0 %2104 }
0x14da   :  { %v2119_v58 = vmul.f32 0.03125, %v2105_v61  ;;  %v2134_v51 = vmul.f32 %v3880_v19, %v3880_v19 }
0x14db   :  { %v3886_v59 = vsub.f32 %v3848_v47, %v2120_v15 }
0x14dc   :  { %v3889_v62 = vsub.f32 %v3844_v16, %v2119_v58  ;;  %v2114_v5 = vpop.xlane.xlu1 %2113  ;;  %v2148_v35 = vsel %vm65_vm0, %v2134_v51, 0.0 }
0x14dd   :  { %v2122_v33 = vmul.f32 0.03125, %v2114_v5  ;;  %2149 = vadd.xlane.f32.xlu1 %v2148_v35  ;;  %v2111_v38 = vpop.xlane.xlu0 %2110  ;;  %v2136_v1 = vmul.f32 %v3886_v59, %v3886_v59  ;;  %v2606_v5 = vld [vmem:[%s4021_s8] ss:$0 sm:$0xff] }
0x14de   :  { %v2121_v24 = vmul.f32 0.03125, %v2111_v38  ;;  %v2135_v18 = vmul.f32 %v3889_v62, %v3889_v62 }
0x14df   :  { %v3897_v6 = vsub.f32 %v3850_v48, %v2122_v33  ;;  %v2154_v8 = vsel %vm65_vm0, %v2136_v1, 0.0 }
0x14e0   :  { %v3901_v9 = vsub.f32 %v3854_v55, %v2121_v24  ;;  %v2151_v11 = vsel %vm65_vm0, %v2135_v18, 0.0 }
0x14e1   :  { %2155 = vadd.xlane.f32.xlu1 %v2154_v8  ;;  %2152 = vadd.xlane.f32.xlu0 %v2151_v11  ;;  %v2138_v12 = vmul.f32 %v3897_v6, %v3897_v6 }
0x14e2   :  { %v2137_v13 = vmul.f32 %v3901_v9, %v3901_v9 }
0x14e3   :  { %v2160_v43 = vsel %vm73_vm1, %v2138_v12, 0.0 }
0x14e4   :  { %v2157_v22 = vsel %vm65_vm0, %v2137_v13, 0.0 }
0x14e5   :  { %2161 = vadd.xlane.f32.xlu1 %v2160_v43  ;;  %2158 = vadd.xlane.f32.xlu0 %v2157_v22 }
0x1562   :  { %v2141_v56 = vpop.xlane.xlu0 %2140 }
0x1563   :  { %v2163_v41 = vmul.f32 0.03125, %v2141_v56 }
0x1564   :  { %v2144_v42 = vpop.xlane.xlu1 %2143 }
0x1565   :  { %v2171_v57 = vadd.f32 1e-05, %v2163_v41  ;;  %v2164_v46 = vmul.f32 0.03125, %v2144_v42 }
0x1566   :  { %v2147_v45 = vpop.xlane.xlu0 %2146 }
0x1567   :  { %3191 = vrsqrt.f32 %v2171_v57  ;;  %v2172_v34 = vadd.f32 1e-05, %v2164_v46  ;;  %v2165_v53 = vmul.f32 0.03125, %v2147_v45 }
0x1569   :  { %3193 = vrsqrt.f32 %v2172_v34  ;;  %v2173_v54 = vadd.f32 1e-05, %v2165_v53 }
0x156a   :  { %v2150_v2 = vpop.xlane.xlu1 %2149 }
0x156b   :  { %3195 = vrsqrt.f32 %v2173_v54  ;;  %v2166_v3 = vmul.f32 0.03125, %v2150_v2  ;;  %v3043_v54 = vld [vmem:[%s4019_s11 + $0x20] sm:$0xff]   ;;  %v3044_v2 = vld [vmem:[%s4019_s11 + $0x28] sm:$0xff]  }
0x156d   :  { %v2174_v4 = vadd.f32 1e-05, %v2166_v3  ;;  %v3045_v3 = vld [vmem:[%s4019_s11 + $0x30] sm:$0xff]  }
0x156e   :  { %v2156_v36 = vpop.xlane.xlu1 %2155  ;;  %v2153_v37 = vpop.xlane.xlu0 %2152 }
0x156f   :  { %3197 = vrsqrt.f32 %v2174_v4  ;;  %v2168_v39 = vmul.f32 0.03125, %v2156_v36  ;;  %v2167_v27 = vmul.f32 0.03125, %v2153_v37  ;;  %v3046_v4 = vld [vmem:[%s4019_s11 + $0x38] sm:$0xff]   ;;  %v2607_v36 = vld [vmem:[%s4022_s10] ss:$0 sm:$0xff] }
0x1571   :  { %v3192_v21 = vpop.eup %3191  ;;  %v2176_v31 = vadd.f32 1e-05, %v2168_v39  ;;  %v2175_v17 = vadd.f32 1e-05, %v2167_v27 }
0x1572   :  { %v2187_v26 = vmul.f32 %v3192_v21, %v3863_v40  ;;  %v2162_v49 = vpop.xlane.xlu1 %2161  ;;  %v2159_v0 = vpop.xlane.xlu0 %2158 }
0x1573   :  { %v3194_v52 = vpop.eup %3193  ;;  %3199 = vrsqrt.f32 %v2176_v31  ;;  %v2170_v50 = vmul.f32 0.03125, %v2162_v49  ;;  %v2169_v63 = vmul.f32 0.03125, %v2159_v0 }
0x1574   :  { %v2188_v60 = vmul.f32 %v3194_v52, %v3866_v29  ;;  %3201 = vrsqrt.f32 %v2175_v17  ;;  %v2201_v15 = vmul.f32 %v2605_v30, %v2187_v26 }
0x1575   :  { %v3196_v61 = vpop.eup %3195  ;;  %v2178_v58 = vadd.f32 1e-05, %v2170_v50  ;;  %v2177_v51 = vadd.f32 1e-05, %v2169_v63 }
0x1576   :  { %v2189_v35 = vmul.f32 %v3196_v61, %v3871_v32  ;;  %v2202_v40 = vmul.f32 %v2605_v30, %v2188_v60  ;;  %v2215_v33 = vadd.f32 %v2606_v5, %v2201_v15 }
0x1577   :  { %3203 = vrsqrt.f32 %v2178_v58 }
0x1578   :  { %3205 = vrsqrt.f32 %v2177_v51  ;;  %v2216_v38 = vadd.f32 %v2606_v5, %v2202_v40  ;;  %v2203_v24 = vmul.f32 %v2605_v30, %v2189_v35 }
0x1579   :  { %v3198_v1 = vpop.eup %3197 }
0x157a   :  { %v2190_v29 = vmul.f32 %v3198_v1, %v3880_v19  ;;  %v2223_v18 = vpack.c.bf16 %v2216_v38, %v2215_v33  ;;  %v2217_v43 = vadd.f32 %v2606_v5, %v2203_v24 }
0x157c   :  { %v2204_v8 = vmul.f32 %v2605_v30, %v2190_v29  ;;  %2903 = vmatprep.mubr.msk.bf16.mxu1 %vm65_vm0, %v2223_v18 }
0x157d   :  { %v3200_v11 = vpop.eup %3199 }
0x157e   :  { %v3202_v12 = vpop.eup %3201  ;;  %v2192_v13 = vmul.f32 %v3200_v11, %v3886_v59  ;;  %v2218_v22 = vadd.f32 %v2606_v5, %v2204_v8 }
0x157f   :  { %v2191_v32 = vmul.f32 %v3202_v12, %v3889_v62 }
0x1580   :  { %v2224_v23 = vpack.c.bf16 %v2218_v22, %v2217_v43  ;;  %v2206_v44 = vmul.f32 %v2605_v30, %v2192_v13 }
0x1581   :  { %v3204_v25 = vpop.eup %3203  ;;  %v2205_v20 = vmul.f32 %v2605_v30, %v2191_v32 }
0x1582   :  { %v3206_v56 = vpop.eup %3205  ;;  %v2194_v41 = vmul.f32 %v3204_v25, %v3897_v6  ;;  %2904 = vmatmul.mubr.msk.bf16.vlgmr.msra.gmra.mrb[40].mxu1 %vm65_vm0, %v2224_v23  ;;  %v2220_v19 = vadd.f32 %v2606_v5, %v2206_v44  ;;  %v3041_v6 = vld [vmem:[%s4019_s11 + $0x10] sm:$0xff]  }
0x1583   :  { %v2193_v42 = vmul.f32 %v3206_v56, %v3901_v9  ;;  %v2219_v57 = vadd.f32 %v2606_v5, %v2205_v20  ;;  %2915 = vmatprep.subr.bf16.mxu0 %v3041_v6  ;;  %v3042_v9 = vld [vmem:[%s4019_s11 + $0x18] sm:$0xff]  }
0x1584   :  { %v2208_v46 = vmul.f32 %v2605_v30, %v2194_v41  ;;  %2916 = vmatpush3.bf16.msra.mxu0 %v3041_v6 }
0x1585   :  { %v2225_v45 = vpack.c.bf16 %v2220_v19, %v2219_v57  ;;  %v2207_v59 = vmul.f32 %v2605_v30, %v2193_v42  ;;  %2917 = vmatprep.subr.bf16.mxu0 %v3042_v9 }
0x1586   :  { %v2222_v34 = vadd.f32 %v2606_v5, %v2208_v46 }
0x1587   :  { %2907 = vmatprep.mubr.msk.bf16.mxu1 %vm65_vm0, %v2225_v45  ;;  %v2221_v62 = vadd.f32 %v2606_v5, %v2207_v59 }
0x1588   :  { %2918 = vmatpush3.bf16.msra.mxu0 %v3042_v9 }
0x1589   :  { %v2226_v53 = vpack.c.bf16 %v2222_v34, %v2221_v62  ;;  %2919 = vmatprep.subr.bf16.mxu0 %v3043_v54 }
0x158b   :  { %2908 = vmatmul.mubr.msk.bf16.gmra.mrb[44].mxu1 %vm65_vm0, %v2226_v53 }
0x158c   :  { %2920 = vmatpush3.bf16.msra.mxu0 %v3043_v54 }
0x158d   :  { %2921 = vmatprep.subr.bf16.mxu0 %v3044_v2 }
0x1590   :  { %2922 = vmatpush3.bf16.msra.mxu0 %v3044_v2 }
0x1591   :  { %2923 = vmatprep.subr.bf16.mxu0 %v3045_v3 }
0x1594   :  { %2924 = vmatpush3.bf16.msra.mxu0 %v3045_v3 }
0x1595   :  { %2925 = vmatprep.subr.bf16.mxu0 %v3046_v4 }
0x1598   :  { %2926 = vmatpush3.bf16.msra.mxu0 %v3046_v4 }
0x1655   :  { %v2905_v37 = vpop.f32.mrb[40].mxu1 }
0x1656   :  { %v2300_v39 = vadd.f32 %v2905_v37, %v2607_v36  ;;  %v2291_v27 = vpop.f32.mrb[41].mxu1 }
0x1657   :  { %v2292_v21 = vadd.f32 %v2607_v36, %v2291_v27  ;;  %v2906_v30 = vpop.f32.mrb[42].mxu1 }
0x1658   :  { %v2332_v31 = vmul.f32 0.70710677, %v2300_v39  ;;  %v2303_v17 = vadd.f32 %v2906_v30, %v2607_v36  ;;  %v2294_v26 = vpop.f32.mrb[43].mxu1  ;;  %v2324_v13 = vmul.f32 0.5, %v2300_v39  ;;  %v2614_v30 = vld [vmem:[%s4023_s12] ss:$0 sm:$0xff] }
0x1659   :  { %v2330_v49 = vmul.f32 0.70710677, %v2292_v21  ;;  %v2295_v0 = vadd.f32 %v2607_v36, %v2294_v26  ;;  %v2322_v32 = vmul.f32 0.5, %v2292_v21 }
0x165a   :  { %3207 = verf.f32 %v2332_v31  ;;  %v2333_v52 = vmul.f32 0.70710677, %v2303_v17  ;;  %v2325_v43 = vmul.f32 0.5, %v2303_v17 }
0x165b   :  { %3209 = verf.f32 %v2330_v49  ;;  %v2331_v50 = vmul.f32 0.70710677, %v2295_v0  ;;  %v2323_v23 = vmul.f32 0.5, %v2295_v0 }
0x165c   :  { %3211 = verf.f32 %v2333_v52 }
0x165d   :  { %3213 = verf.f32 %v2331_v50 }
0x165e   :  { %v2909_v63 = vpop.f32.mrb[44].mxu1 }
0x165f   :  { %v2316_v60 = vadd.f32 %v2909_v63, %v2607_v36  ;;  %v2307_v15 = vpop.f32.mrb[45].mxu1 }
0x1660   :  { %v2308_v61 = vadd.f32 %v2607_v36, %v2307_v15  ;;  %v2910_v58 = vpop.f32.mrb[46].mxu1 }
0x1661   :  { %v2336_v51 = vmul.f32 0.70710677, %v2316_v60  ;;  %v2319_v5 = vadd.f32 %v2910_v58, %v2607_v36  ;;  %v2310_v35 = vpop.f32.mrb[47].mxu1  ;;  %v2328_v53 = vmul.f32 0.5, %v2316_v60 }
0x1662   :  { %v2334_v40 = vmul.f32 0.70710677, %v2308_v61  ;;  %v2311_v33 = vadd.f32 %v2607_v36, %v2310_v35  ;;  %v2326_v54 = vmul.f32 0.5, %v2308_v61 }
0x1663   :  { %3215 = verf.f32 %v2336_v51  ;;  %v2337_v38 = vmul.f32 0.70710677, %v2319_v5  ;;  %v2329_v6 = vmul.f32 0.5, %v2319_v5 }
0x1664   :  { %v3208_v1 = vpop.eup %3207  ;;  %3217 = verf.f32 %v2334_v40  ;;  %v2335_v24 = vmul.f32 0.70710677, %v2311_v33  ;;  %v2327_v2 = vmul.f32 0.5, %v2311_v33 }
0x1665   :  { %v3210_v29 = vpop.eup %3209  ;;  %v2348_v18 = vadd.f32 1.0, %v3208_v1  ;;  %3219 = verf.f32 %v2337_v38 }
0x1666   :  { %v3212_v8 = vpop.eup %3211  ;;  %v2346_v11 = vadd.f32 1.0, %v3210_v29  ;;  %3221 = verf.f32 %v2335_v24 }
0x1667   :  { %v3214_v12 = vpop.eup %3213  ;;  %v2349_v22 = vadd.f32 1.0, %v3212_v8  ;;  %v2356_v25 = vmul.f32 %v2348_v18, %v2324_v13 }
0x1668   :  { %v2347_v44 = vadd.f32 1.0, %v3214_v12  ;;  %v2354_v56 = vmul.f32 %v2346_v11, %v2322_v32 }
0x1669   :  { %v2357_v20 = vmul.f32 %v2349_v22, %v2325_v43 }
0x166a   :  { %v2355_v41 = vmul.f32 %v2347_v44, %v2323_v23 }
0x166b   :  { %v2363_v19 = vpack.c.bf16 %v2357_v20, %v2356_v25 }
0x166c   :  { %v2362_v42 = vpack.c.bf16 %v2355_v41, %v2354_v56 }
0x166d   :  { %v3216_v57 = vpop.eup %3215 }
0x166e   :  { %v3218_v46 = vpop.eup %3217  ;;  %v2352_v45 = vadd.f32 1.0, %v3216_v57  ;;  %2927 = vmatprep.mubr.bf16.mxu0 %v2362_v42 }
0x166f   :  { %v3220_v59 = vpop.eup %3219  ;;  %v2350_v34 = vadd.f32 1.0, %v3218_v46  ;;  %2928 = vmatmul.mubr.bf16.vlgmr.msra.gmra.mrb[40].mxu0 %v2363_v19 }
0x1670   :  { %v3222_v62 = vpop.eup %3221  ;;  %v2353_v9 = vadd.f32 1.0, %v3220_v59  ;;  %v2360_v4 = vmul.f32 %v2352_v45, %v2328_v53 }
0x1671   :  { %v2351_v3 = vadd.f32 1.0, %v3222_v62  ;;  %v2358_v37 = vmul.f32 %v2350_v34, %v2326_v54 }
0x1672   :  { %v2361_v36 = vmul.f32 %v2353_v9, %v2329_v6 }
0x1673   :  { %v2359_v39 = vmul.f32 %v2351_v3, %v2327_v2 }
0x1674   :  { %v2365_v27 = vpack.c.bf16 %v2361_v36, %v2360_v4 }
0x1675   :  { %v2364_v21 = vpack.c.bf16 %v2359_v39, %v2358_v37 }
0x1677   :  { %2931 = vmatprep.mubr.bf16.mxu0 %v2364_v21 }
0x1678   :  { %2932 = vmatmul.mubr.bf16.gmra.mrb[44].mxu0 %v2365_v27 }
0x1742   :  { %v2929_v31 = vpop.f32.mrb[40].mxu0 }
0x1743   :  { %v2463_v17 = vadd.f32 %v2929_v31, %v2614_v30  ;;  %v2454_v26 = vpop.f32.mrb[41].mxu0 }
0x1744   :  { %v2455_v49 = vadd.f32 %v2614_v30, %v2454_v26  ;;  %v2930_v0 = vpop.f32.mrb[42].mxu0 }
0x1745   :  { %v2487_v52 = vadd.f32 %v2463_v17, %v3832_v7  ;;  %v2466_v50 = vadd.f32 %v2930_v0, %v2614_v30  ;;  %v2457_v63 = vpop.f32.mrb[43].mxu0 }
0x1746   :  { %v2485_v60 = vadd.f32 %v2455_v49, %v3830_v28  ;;  %v2458_v15 = vadd.f32 %v2614_v30, %v2457_v63 }
0x1747   :  { %2495 = vst.msk [vmem:[#allocation2 + $0x10] sm:$0xff] %vm65_vm0, %v2487_v52  ;;  %v2488_v61 = vadd.f32 %v2466_v50, %v3840_v14 }
0x1748   :  { %2493 = vst.msk [vmem:[#allocation2] sm:$0xff] %vm65_vm0, %v2485_v60  ;;  %v2486_v58 = vadd.f32 %v2458_v15, %v3834_v10 }
0x1749   :  { %2496 = vst.msk [vmem:[#allocation2 + $0x18] sm:$0xff] %vm65_vm0, %v2488_v61 }
0x174a   :  { %2494 = vst.msk [vmem:[#allocation2 + $0x8] sm:$0xff] %vm65_vm0, %v2486_v58 }
0x174b   :  { %v2933_v51 = vpop.f32.mrb[44].mxu0 }
0x174c   :  { %v2479_v5 = vadd.f32 %v2933_v51, %v2614_v30  ;;  %v2470_v7 = vpop.f32.mrb[45].mxu0 }
0x174d   :  { %v2471_v35 = vadd.f32 %v2614_v30, %v2470_v7  ;;  %v2934_v40 = vpop.f32.mrb[46].mxu0 }
0x174e   :  { %v2506_v33 = vld [vmem:[#allocation2 + $0x10] sm:$0xff]  ;;  %v2491_v28 = vadd.f32 %v2479_v5, %v3854_v55  ;;  %v2482_v38 = vadd.f32 %v2934_v40, %v2614_v30  ;;  %v2473_v1 = vpop.f32.mrb[47].mxu0 }
0x174f   :  { %v2633_v24 = vpack.c.bf16 %v2506_v33, %v2506_v33  ;;  %v2504_v14 = vld [vmem:[#allocation2] sm:$0xff]  ;;  %v2489_v29 = vadd.f32 %v2471_v35, %v3844_v16  ;;  %v2474_v18 = vadd.f32 %v2614_v30, %v2473_v1 }
0x1750   :  { %v2631_v10 = vpack.c.bf16 %v2504_v14, %v2504_v14  ;;  %v2507_v8 = vld [vmem:[#allocation2 + $0x18] sm:$0xff]  ;;  %2499 = vst.msk [vmem:[#allocation2 + $0x30] sm:$0xff] %vm65_vm0, %v2491_v28  ;;  %v2492_v11 = vadd.f32 %v2482_v38, %v3850_v48 }
0x1751   :  { %2546 = vst.msk [vmem:[%s4024_s13 + $0x8] sm:$0xf] %vm73_vm1, %v2633_v24  ;;  %v2634_v12 = vpack.c.bf16 %v2507_v8, %v2507_v8  ;;  %v2505_v55 = vld [vmem:[#allocation2 + $0x8] sm:$0xff]  ;;  %v2490_v13 = vadd.f32 %v2474_v18, %v3848_v47 }
0x1752   :  { %2497 = vst.msk [vmem:[#allocation2 + $0x20] sm:$0xff] %vm65_vm0, %v2489_v29  ;;  %v2632_v16 = vpack.c.bf16 %v2505_v55, %v2505_v55 }
0x1753   :  { %2544 = vst.msk [vmem:[%s4024_s13] sm:$0xf] %vm73_vm1, %v2631_v10  ;;  %2500 = vst.msk [vmem:[#allocation2 + $0x38] sm:$0xf] %vm73_vm1, %v2492_v11 }
0x1754   :  { %2547 = vst.msk [vmem:[%s4024_s13 + $0xc] sm:$0xf] %vm73_vm1, %v2634_v12  ;;  %2545 = vst.msk [vmem:[%s4024_s13 + $0x4] sm:$0xf] %vm73_vm1, %v2632_v16 }
0x1755   :  { %2498 = vst.msk [vmem:[#allocation2 + $0x28] sm:$0xff] %vm65_vm0, %v2490_v13 }
0x1757   :  { %v2510_v47 = vld [vmem:[#allocation2 + $0x30] sm:$0xff] }
0x1758   :  { %v2637_v48 = vpack.c.bf16 %v2510_v47, %v2510_v47 }
0x1759   :  { %v2508_v43 = vld [vmem:[#allocation2 + $0x20] sm:$0xff] }
0x175a   :  { %v2635_v22 = vpack.c.bf16 %v2508_v43, %v2508_v43  ;;  %v2511_v32 = vld [vmem:[#allocation2 + $0x38] sm:$0xf]  ;;  %2550 = vst.msk [vmem:[%s4024_s13 + $0x18] sm:$0xf] %vm73_vm1, %v2637_v48 }
0x175b   :  { %v2638_v23 = vpack.c.bf16 %v2511_v32, %v2511_v32 }
0x175c   :  { %v2509_v44 = vld [vmem:[#allocation2 + $0x28] sm:$0xff]  ;;  %2548 = vst.msk [vmem:[%s4024_s13 + $0x10] sm:$0xf] %vm73_vm1, %v2635_v22 }
0x175d   :  { %v2636_v25 = vpack.c.bf16 %v2509_v44, %v2509_v44  ;;  %2552 = vst.msk [vmem:[%s4024_s13 + $0x1c] sm:$0x3] %vm2551_vm10, %v2638_v23 }
0x175f   :  { %2549 = vst.msk [vmem:[%s4024_s13 + $0x14] sm:$0xf] %vm73_vm1, %v2636_v25 }

</bundles_post_ra>
